<compile_context>
chip_gen: v5e
topology: v5e:2x2
jax: 0.10.0
libtpu: 0.0.40
codegen_flags: <defaults>
</compile_context>

<pallas_src>
import functools

import jax
import jax.numpy as jnp
from jax.experimental import pallas as pl
from jax.experimental.pallas import tpu as pltpu


# ----------------------------- config helpers --------------------------------

def _vmem_limit_bytes():
    """Generation-conditional scoped-VMEM budget (feedback: raise on v5e/v6e,
    keep a smaller budget on v7x's 64 MiB VMEM)."""
    try:
        cap = int(pltpu.get_tpu_info().vmem_capacity_bytes)
    except Exception:  # noqa: BLE001 - fall back to a safe default
        cap = 64 * 1024 * 1024
    return int(max(32 * 1024 * 1024, min(int(0.7 * cap), 96 * 1024 * 1024)))


_VMEM_LIMIT = _vmem_limit_bytes()


def _row_tile(ho, wp):
    """Largest row tile t (exact divisor of ho, giving >=2 tiles) whose
    flattened width t*wp is 128-lane aligned; fall back to the whole image."""
    for t in (32, 16, 8):
        if ho > t and ho % t == 0 and (t * wp) % 128 == 0:
            return t
    return ho


# ----------------------------- Pallas kernels ---------------------------------

def _conv_kernel(x_ref, w_ref, b_ref, *rest, offs, sup_len, n_tiles, relu,
                 has_res):
    """One (batch, row-tile) step of an implicit-GEMM stride-1 convolution.

    x_ref : (Ce, S)      whole padded image, channels-first, spatial flattened
                         (resident across row tiles; HBM<->VMEM handled by the
                         BlockSpec pipeline -> DMA overlapped with compute).
    w_ref : (Cout, K)    folded-BN weights, K = kh*kw*Ce.
    b_ref : (Cout, 1)    f32 bias (BN shift folded in).
    rest  : [r_ref (Cout, tile_p)] o_ref (Cout, tile_p)   lane-dense output.
    """
    if has_res:
        r_ref, o_ref = rest
    else:
        (o_ref,) = rest
        r_ref = None
    tile_p = o_ref.shape[1]
    if n_tiles == 1:
        base = 0                                      # static start
    else:
        base = pl.multiple_of(pl.program_id(1) * tile_p, 128)

    # One halo'd slab load; every tap is a static lane-shifted view of it.
    sup = x_ref[:, pl.ds(base, sup_len)]              # (Ce, sup_len)
    taps = [sup[:, o:o + tile_p] for o in offs]       # kh*kw views (Ce, tile_p)
    # Stack taps along the contraction dim -> ONE MXU matmul (K = kh*kw*Ce).
    lhs = taps[0] if len(taps) == 1 else jnp.concatenate(taps, axis=0)
    y = jnp.dot(w_ref[...], lhs, preferred_element_type=jnp.float32)
    y = y + b_ref[...]                                # BN bias
    if r_ref is not None:
        y = y + r_ref[...].astype(jnp.float32)        # residual add
    if relu:
        y = jnp.maximum(y, 0.0)
    o_ref[...] = y.astype(o_ref.dtype)                # single lane-dense store


def _pool_kernel(x_ref, o_ref, *, c, taps, sup_len, n_tiles):
    """3x3/2 max-pool expressed as stride-1 taps on a space-to-depth grid.

    x_ref : (4*C, S) space-to-depth'd, sentinel-padded image (resident).
    o_ref : (C, tile_p) lane-dense output tile.
    """
    tile_p = o_ref.shape[1]
    if n_tiles == 1:
        base = 0
    else:
        base = pl.multiple_of(pl.program_id(1) * tile_p, 128)
    sup = x_ref[:, pl.ds(base, sup_len)]
    out = None
    for ph, off in taps:
        v = sup[ph * c:(ph + 1) * c, off:off + tile_p]
        out = v if out is None else jnp.maximum(out, v)
    o_ref[...] = out


# ----------------------------- op wrappers -------------------------------------

def _conv_pallas(xg, wmat, bias, offs, ho, wp, residual, relu):
    """xg: (B, Ce, S) bf16; wmat: (Cout, K) bf16; bias: (Cout,1) f32;
    residual: (B, Cout, ho*wp) bf16 or None. Returns (B, Cout, ho*wp) bf16."""
    B, Ce, S = xg.shape
    Cout, K = wmat.shape
    tr = _row_tile(ho, wp)
    n_tiles = ho // tr
    tile_p = tr * wp
    sup_len = tile_p + max(offs)                  # halo rows/cols for all taps
    has_res = residual is not None

    in_specs = [
        pl.BlockSpec((None, Ce, S), lambda b, m: (b, 0, 0)),   # resident image
        pl.BlockSpec((Cout, K), lambda b, m: (0, 0)),          # weights
        pl.BlockSpec((Cout, 1), lambda b, m: (0, 0)),          # bias
    ]
    args = [xg, wmat, bias]
    if has_res:
        in_specs.append(pl.BlockSpec((None, Cout, tile_p),
                                     lambda b, m: (b, 0, m)))  # residual tile
        args.append(residual)

    kernel = functools.partial(_conv_kernel, offs=tuple(offs), sup_len=sup_len,
                               n_tiles=n_tiles, relu=relu, has_res=has_res)
    return pl.pallas_call(
        kernel,
        grid=(B, n_tiles),
        in_specs=in_specs,
        out_specs=pl.BlockSpec((None, Cout, tile_p), lambda b, m: (b, 0, m)),
        out_shape=jax.ShapeDtypeStruct((B, Cout, ho * wp), jnp.bfloat16),
        compiler_params=pltpu.CompilerParams(
            dimension_semantics=("parallel", "parallel"),
            vmem_limit_bytes=_VMEM_LIMIT),
    )(*args)


def _space_to_depth(xp, wt):
    """Turn an NCHW stride-2 conv into a stride-1 conv on a 2x2 s2d grid."""
    B, C, Hp, Wp = xp.shape
    xp = jnp.pad(xp, ((0, 0), (0, 0), (0, Hp % 2), (0, Wp % 2)))
    Hp, Wp = xp.shape[2], xp.shape[3]
    xs = xp.reshape(B, C, Hp // 2, 2, Wp // 2, 2)
    xs = xs.transpose(0, 3, 5, 1, 2, 4).reshape(B, 4 * C, Hp // 2, Wp // 2)

    Cout, Cin, kh, kw = wt.shape
    kh2, kw2 = (kh + 1) // 2, (kw + 1) // 2
    wpad = jnp.zeros((Cout, Cin, 2 * kh2, 2 * kw2), wt.dtype)
    wpad = wpad.at[:, :, :kh, :kw].set(wt)
    w2 = wpad.reshape(Cout, Cin, kh2, 2, kw2, 2).transpose(0, 3, 5, 1, 2, 4)
    w2 = w2.reshape(Cout, 4 * Cin, kh2, kw2)
    return xs, w2


def conv_bn_act(x, cp, *, stride, pad, relu=True, residual=None, eps=1e-5):
    """conv2d + eval-mode BatchNorm (scale/shift folded) (+residual) (+ReLU).
    x: (B, Cin, H, W) bf16 NCHW -> (B, Cout, Ho, Wo) bf16."""
    w = cp["w"].astype(jnp.float32)                  # (Cout, Cin, kh, kw)
    Cout, Cin, kh, kw = w.shape
    B, _, H, W = x.shape
    scale = cp["gamma"] * jax.lax.rsqrt(cp["var"] + eps)
    bias = (cp["beta"] - cp["mean"] * scale).reshape(Cout, 1).astype(jnp.float32)
    wt = w * scale[:, None, None, None]              # fold BN scale in f32

    Ho = (H + 2 * pad - kh) // stride + 1
    Wo = (W + 2 * pad - kw) // stride + 1

    if stride == 1:
        xg = jnp.pad(x, ((0, 0), (0, 0), (pad, pad), (pad, pad)))
        wg = wt
    elif stride == 2 and kh == 1:
        xg = x[:, :, ::2, ::2]                       # 1x1/2 downsample conv
        wg = wt
    elif stride == 2:
        xp = jnp.pad(x, ((0, 0), (0, 0), (pad, pad), (pad, pad)))
        xg, wg = _space_to_depth(xp, wt)             # stride-2 -> stride-1
    else:
        raise NotImplementedError("only stride 1 or 2 supported")

    # Pad channels to a multiple of 16 so the in-kernel tap stacking stays
    # aligned to the bf16 sublane tiling (e.g. conv1's 12 -> 16 channels).
    Ce = xg.shape[1]
    if Ce % 16:
        cpad = 16 - Ce % 16
        xg = jnp.pad(xg, ((0, 0), (0, cpad), (0, 0), (0, 0)))
        wg = jnp.pad(wg, ((0, 0), (0, cpad), (0, 0), (0, 0)))
        Ce += cpad

    kgh, kgw = wg.shape[2], wg.shape[3]
    Hg, Wg = xg.shape[2], xg.shape[3]
    # Over-pad the row width to a multiple of 8 (lane-dense, 128-aligned row
    # tiles) and add junk rows so every tap's contiguous slice stays in bounds.
    wp = -(-Wg // 8) * 8
    rows_needed = Ho + kgh - 1 + (1 if kgw > 1 else 0)
    extra_rows = max(rows_needed - Hg, 0)
    xg = jnp.pad(xg, ((0, 0), (0, 0), (0, extra_rows), (0, wp - Wg)))
    S = xg.shape[2] * wp
    xg = xg.reshape(B, Ce, S).astype(jnp.bfloat16)

    wmat = jnp.transpose(wg, (0, 2, 3, 1)).reshape(Cout, kgh * kgw * Ce)
    wmat = wmat.astype(jnp.bfloat16)
    offs = [i * wp + j for i in range(kgh) for j in range(kgw)]

    res = None
    if residual is not None:
        res = jnp.pad(residual.astype(jnp.bfloat16),
                      ((0, 0), (0, 0), (0, 0), (0, wp - Wo)))
        res = res.reshape(B, Cout, Ho * wp)

    out = _conv_pallas(xg, wmat, bias, offs, Ho, wp, res, relu)
    return out.reshape(B, Cout, Ho, wp)[:, :, :, :Wo]


def maxpool2d_3x3_s2(x):
    """PyTorch MaxPool2d(kernel_size=3, stride=2, padding=1) on NCHW bf16."""
    B, C, H, W = x.shape
    xp = jnp.pad(x, ((0, 0), (0, 0), (1, 1), (1, 1)), constant_values=-1e30)
    Hp, Wp = xp.shape[2], xp.shape[3]
    xp = jnp.pad(xp, ((0, 0), (0, 0), (0, Hp % 2), (0, Wp % 2)),
                 constant_values=-1e30)
    Hp, Wp = xp.shape[2], xp.shape[3]
    Hs, Ws = Hp // 2, Wp // 2
    xs = xp.reshape(B, C, Hs, 2, Ws, 2).transpose(0, 3, 5, 1, 2, 4)
    xs = xs.reshape(B, 4 * C, Hs, Ws)                # space-to-depth phases

    Ho = (H + 2 - 3) // 2 + 1
    Wo = (W + 2 - 3) // 2 + 1
    wp = -(-Ws // 8) * 8
    rows_needed = Ho + 2                             # kgh=2 plus one junk row
    extra_rows = max(rows_needed - Hs, 0)
    xs = jnp.pad(xs, ((0, 0), (0, 0), (0, extra_rows), (0, wp - Ws)))
    S = xs.shape[2] * wp
    xs = xs.reshape(B, 4 * C, S)

    taps = []
    for i2, p in ((0, 0), (0, 1), (1, 0)):           # row offsets 0,1,2
        for j2, q in ((0, 0), (0, 1), (1, 0)):       # col offsets 0,1,2
            taps.append((2 * p + q, i2 * wp + j2))

    tr = _row_tile(Ho, wp)
    n_tiles = Ho // tr
    tile_p = tr * wp
    sup_len = tile_p + wp + 1

    kernel = functools.partial(_pool_kernel, c=C, taps=tuple(taps),
                               sup_len=sup_len, n_tiles=n_tiles)
    out = pl.pallas_call(
        kernel,
        grid=(B, n_tiles),
        in_specs=[pl.BlockSpec((None, 4 * C, S), lambda b, m: (b, 0, 0))],
        out_specs=pl.BlockSpec((None, C, tile_p), lambda b, m: (b, 0, m)),
        out_shape=jax.ShapeDtypeStruct((B, C, Ho * wp), x.dtype),
        compiler_params=pltpu.CompilerParams(
            dimension_semantics=("parallel", "parallel"),
            vmem_limit_bytes=_VMEM_LIMIT),
    )(xs)
    return out.reshape(B, C, Ho, wp)[:, :, :, :Wo]


def basic_block(x, bp, stride):
    out = conv_bn_act(x, bp["conv1"], stride=stride, pad=1, relu=True)
    if "down" in bp:
        identity = conv_bn_act(x, bp["down"], stride=stride, pad=0, relu=False)
    else:
        identity = x
    # second conv: BN + residual add + ReLU fused into the kernel epilogue
    return conv_bn_act(out, bp["conv2"], stride=1, pad=1, relu=True,
                       residual=identity)


def concatenate_layers(layers):
    """Nearest-neighbour resize to layers[0] spatial size, concat on channels
    (matches F.interpolate(mode='nearest') for integer scale factors)."""
    Ht, Wt = layers[0].shape[2:]
    outs = []
    for l in layers:
        fh, fw = Ht // l.shape[2], Wt // l.shape[3]
        if fh > 1 or fw > 1:
            l = jnp.repeat(jnp.repeat(l, fh, axis=2), fw, axis=3)
        outs.append(l)
    return jnp.concatenate(outs, axis=1)


# --------------------------- parameter building --------------------------------

def make_conv_params(key, cin, cout, k):
    kw_, kb = jax.random.split(key)
    w = jax.random.normal(kw_, (cout, cin, k, k), jnp.float32)
    w = w * (2.0 / (cin * k * k)) ** 0.5
    k1, k2, k3, k4 = jax.random.split(kb, 4)
    return dict(
        w=w,
        gamma=1.0 + 0.1 * jax.random.normal(k1, (cout,), jnp.float32),
        beta=0.1 * jax.random.normal(k2, (cout,), jnp.float32),
        mean=0.1 * jax.random.normal(k3, (cout,), jnp.float32),
        var=1.0 + 0.1 * jnp.abs(jax.random.normal(k4, (cout,), jnp.float32)),
    )


def make_block_params(key, cin, cout, has_down):
    k1, k2, k3 = jax.random.split(key, 3)
    p = dict(conv1=make_conv_params(k1, cin, cout, 3),
             conv2=make_conv_params(k2, cout, cout, 3))
    if has_down:
        p["down"] = make_conv_params(k3, cin, cout, 1)
    return p


def build_resnet18_params(key, base_channels=16, in_channels=3):
    nc = base_channels
    keys = jax.random.split(key, 5)
    params = {"conv1": make_conv_params(keys[0], in_channels, nc, 7)}
    cfgs = [(nc, nc, False), (nc, 2 * nc, True),
            (2 * nc, 4 * nc, True), (4 * nc, 8 * nc, True)]
    for li, (cin, cout, has_down) in enumerate(cfgs, start=1):
        bk = jax.random.split(keys[li], 2)
        params[f"layer{li}"] = [make_block_params(bk[0], cin, cout, has_down),
                                make_block_params(bk[1], cout, cout, False)]
    return params


# ------------------------------- forward ----------------------------------------

def forward(params, batch_nchw, channel_indices=None, layer_hook=None,
            layer_indices=None):
    """Mirrors ResnetEmbeddingsExtractor.forward. Returns (emb, width, height)
    with emb of shape (B, H*W, C_total) in float16 (torch .half() device path)."""
    x = batch_nchw.astype(jnp.bfloat16)                              # NCHW
    x = conv_bn_act(x, params["conv1"], stride=2, pad=3, relu=True)  # conv1+bn1+relu
    x = maxpool2d_3x3_s2(x)                                          # maxpool 3x3/2
    layers = []
    for li in range(1, 5):
        blocks = params[f"layer{li}"]
        first_stride = 1 if li == 1 else 2   # static ResNet topology (the fix
        #                                      for the TracerBoolConversionError:
        #                                      strides are not traced values)
        for bi, bp in enumerate(blocks):
            x = basic_block(x, bp, first_stride if bi == 0 else 1)
        layers.append(x)
    if layer_indices is not None:
        layers = [layers[i] for i in layer_indices]
    if layer_hook is not None:
        layers = [layer_hook(l) for l in layers]
    emb = concatenate_layers(layers)                                 # (B,Ctot,H,W)
    if channel_indices is not None:
        emb = jnp.take(emb, channel_indices, axis=1)
    B, C, H, W = emb.shape
    # torch: reshape(B, C, H*W).permute(0, 2, 1)
    emb = jnp.transpose(emb.reshape(B, C, H * W), (0, 2, 1))
    emb = emb.astype(jnp.float16)                                    # .half()
    return emb, H, W


# --------------------------------- main ------------------------------------------

if __name__ == "__main__":
    key = jax.random.PRNGKey(0)
    pkey, xkey = jax.random.split(key)

    base_channels = 16
    params = build_resnet18_params(pkey, base_channels=base_channels)

    # Small NCHW input consistent with an ImageNet-style resnet forward.
    x = jax.random.normal(xkey, (2, 3, 64, 64), jnp.float32)

    fwd = jax.jit(forward)
    emb, h, w = fwd(params, x)
    emb = jax.block_until_ready(emb)
    h, w = int(h), int(w)

    expected_c = base_channels * (1 + 2 + 4 + 8)  # layer1..layer4 channels
    assert emb.shape == (2, h * w, expected_c), emb.shape
    assert emb.dtype == jnp.float16
    assert bool(jnp.all(jnp.isfinite(emb.astype(jnp.float32))))
    print("KERNEL_OK")
</pallas_src>

<mosaic_0001>
module attributes {stable_mosaic.version = 11 : i64} {
  func.func @_conv_kernel(%arg0: i32, %arg1: i32, %arg2: memref<1x16x1440xbf16, #tpu.memory_space<vmem>>, %arg3: memref<16x256xbf16, #tpu.memory_space<vmem>>, %arg4: memref<16x1xf32, #tpu.memory_space<vmem>>, %arg5: memref<1x16x640xbf16, #tpu.memory_space<vmem>>) attributes {dimension_semantics = [#tpu.dimension_semantics<parallel>, #tpu.dimension_semantics<parallel>], iteration_bounds = array<i64: 2, 2>, scalar_prefetch = 0 : i64, scratch_operands = 0 : i64, tpu.core_type = #tpu.core_type<tc>, window_params = [{transform_indices = @transform_0, window_bounds = array<i64: 1, 16, 1440>}, {pipeline_mode = #tpu.pipeline_mode<synchronous>, transform_indices = @transform_1, window_bounds = array<i64: 16, 256>}, {pipeline_mode = #tpu.pipeline_mode<synchronous>, transform_indices = @transform_2, window_bounds = array<i64: 16, 1>}, {transform_indices = @transform_3, window_bounds = array<i64: 1, 16, 640>}]} {
    %c640_i32 = arith.constant 640 : i32
    %0 = arith.muli %arg1, %c640_i32 : i32
    %1 = tpu.assume_multiple %0, 128 : i32
    %c0 = arith.constant 0 : index
    %c0_0 = arith.constant 0 : index
    %2 = arith.index_cast %1 : i32 to index
    %3 = vector.load %arg2[%c0, %c0_0, %2] : memref<1x16x1440xbf16, #tpu.memory_space<vmem>>, vector<1x16x763xbf16>
    %4 = vector.shape_cast %3 : vector<1x16x763xbf16> to vector<16x763xbf16>
    %5 = vector.extract_strided_slice %4 {offsets = [0, 0], sizes = [16, 640], strides = [1, 1]} : vector<16x763xbf16> to vector<16x640xbf16>
    %6 = vector.extract_strided_slice %4 {offsets = [0, 1], sizes = [16, 640], strides = [1, 1]} : vector<16x763xbf16> to vector<16x640xbf16>
    %7 = vector.extract_strided_slice %4 {offsets = [0, 2], sizes = [16, 640], strides = [1, 1]} : vector<16x763xbf16> to vector<16x640xbf16>
    %8 = vector.extract_strided_slice %4 {offsets = [0, 3], sizes = [16, 640], strides = [1, 1]} : vector<16x763xbf16> to vector<16x640xbf16>
    %9 = vector.extract_strided_slice %4 {offsets = [0, 40], sizes = [16, 640], strides = [1, 1]} : vector<16x763xbf16> to vector<16x640xbf16>
    %10 = vector.extract_strided_slice %4 {offsets = [0, 41], sizes = [16, 640], strides = [1, 1]} : vector<16x763xbf16> to vector<16x640xbf16>
    %11 = vector.extract_strided_slice %4 {offsets = [0, 42], sizes = [16, 640], strides = [1, 1]} : vector<16x763xbf16> to vector<16x640xbf16>
    %12 = vector.extract_strided_slice %4 {offsets = [0, 43], sizes = [16, 640], strides = [1, 1]} : vector<16x763xbf16> to vector<16x640xbf16>
    %13 = vector.extract_strided_slice %4 {offsets = [0, 80], sizes = [16, 640], strides = [1, 1]} : vector<16x763xbf16> to vector<16x640xbf16>
    %14 = vector.extract_strided_slice %4 {offsets = [0, 81], sizes = [16, 640], strides = [1, 1]} : vector<16x763xbf16> to vector<16x640xbf16>
    %15 = vector.extract_strided_slice %4 {offsets = [0, 82], sizes = [16, 640], strides = [1, 1]} : vector<16x763xbf16> to vector<16x640xbf16>
    %16 = vector.extract_strided_slice %4 {offsets = [0, 83], sizes = [16, 640], strides = [1, 1]} : vector<16x763xbf16> to vector<16x640xbf16>
    %17 = vector.extract_strided_slice %4 {offsets = [0, 120], sizes = [16, 640], strides = [1, 1]} : vector<16x763xbf16> to vector<16x640xbf16>
    %18 = vector.extract_strided_slice %4 {offsets = [0, 121], sizes = [16, 640], strides = [1, 1]} : vector<16x763xbf16> to vector<16x640xbf16>
    %19 = vector.extract_strided_slice %4 {offsets = [0, 122], sizes = [16, 640], strides = [1, 1]} : vector<16x763xbf16> to vector<16x640xbf16>
    %20 = vector.extract_strided_slice %4 {offsets = [0, 123], sizes = [16, 640], strides = [1, 1]} : vector<16x763xbf16> to vector<16x640xbf16>
    %21 = tpu.concatenate %5, %6, %7, %8, %9, %10, %11, %12, %13, %14, %15, %16, %17, %18, %19, %20 in 0 : vector<16x640xbf16>, vector<16x640xbf16>, vector<16x640xbf16>, vector<16x640xbf16>, vector<16x640xbf16>, vector<16x640xbf16>, vector<16x640xbf16>, vector<16x640xbf16>, vector<16x640xbf16>, vector<16x640xbf16>, vector<16x640xbf16>, vector<16x640xbf16>, vector<16x640xbf16>, vector<16x640xbf16>, vector<16x640xbf16>, vector<16x640xbf16> -> vector<256x640xbf16>
    %c0_1 = arith.constant 0 : index
    %c0_2 = arith.constant 0 : index
    %22 = vector.load %arg3[%c0_1, %c0_2] : memref<16x256xbf16, #tpu.memory_space<vmem>>, vector<16x256xbf16>
    %cst = arith.constant dense<0.000000e+00> : vector<16x640xf32>
    %23 = tpu.matmul %22, %21, %cst {dimension_numbers = #tpu.dot_dimension_numbers<[1], [0], [0], [1], [0, 0, 1, 1], [], []>} : vector<16x256xbf16>, vector<256x640xbf16>, vector<16x640xf32> -> vector<16x640xf32>
    %c0_3 = arith.constant 0 : index
    %c0_4 = arith.constant 0 : index
    %24 = vector.load %arg4[%c0_3, %c0_4] : memref<16x1xf32, #tpu.memory_space<vmem>>, vector<16x1xf32>
    %25 = vector.broadcast %24 : vector<16x1xf32> to vector<16x640xf32>
    %26 = arith.addf %23, %25 : vector<16x640xf32>
    %cst_5 = arith.constant 0.000000e+00 : f32
    %27 = vector.broadcast %cst_5 : f32 to vector<16x640xf32>
    %28 = arith.maximumf %26, %27 : vector<16x640xf32>
    %29 = arith.truncf %28 : vector<16x640xf32> to vector<16x640xbf16>
    %c0_6 = arith.constant 0 : index
    %c0_7 = arith.constant 0 : index
    %c0_8 = arith.constant 0 : index
    %30 = vector.load %arg5[%c0_6, %c0_7, %c0_8] : memref<1x16x640xbf16, #tpu.memory_space<vmem>>, vector<1x16x640xbf16>
    %31 = vector.shape_cast %30 : vector<1x16x640xbf16> to vector<16x640xbf16>
    %32 = vector.shape_cast %29 : vector<16x640xbf16> to vector<1x16x640xbf16>
    tpu.vector_store %arg5[%c0_6, %c0_7, %c0_8], %32 {strides = array<i32>} : memref<1x16x640xbf16, #tpu.memory_space<vmem>>, vector<1x16x640xbf16>,
    return
  }
  func.func @transform_0(%arg0: i32, %arg1: i32) -> (i32, i32, i32) {
    %c0_i32 = arith.constant 0 : i32
    %c0_i32_0 = arith.constant 0 : i32
    %c0_i32_1 = arith.constant 0 : i32
    return %arg0, %c0_i32, %c0_i32_0 : i32, i32, i32
  }
  func.func @transform_1(%arg0: i32, %arg1: i32) -> (i32, i32) {
    %c0_i32 = arith.constant 0 : i32
    %c0_i32_0 = arith.constant 0 : i32
    %c0_i32_1 = arith.constant 0 : i32
    return %c0_i32, %c0_i32_0 : i32, i32
  }
  func.func @transform_2(%arg0: i32, %arg1: i32) -> (i32, i32) {
    %c0_i32 = arith.constant 0 : i32
    %c0_i32_0 = arith.constant 0 : i32
    %c0_i32_1 = arith.constant 0 : i32
    return %c0_i32, %c0_i32_0 : i32, i32
  }
  func.func @transform_3(%arg0: i32, %arg1: i32) -> (i32, i32, i32) {
    %c0_i32 = arith.constant 0 : i32
    %c0_i32_0 = arith.constant 0 : i32
    return %arg0, %c0_i32, %arg1 : i32, i32, i32
  }
}

module attributes {stable_mosaic.version = 11 : i64} {
  func.func @_pool_kernel(%arg0: i32, %arg1: i32, %arg2: memref<1x64x432xbf16, #tpu.memory_space<vmem>>, %arg3: memref<1x16x384xbf16, #tpu.memory_space<vmem>>) attributes {dimension_semantics = [#tpu.dimension_semantics<parallel>, #tpu.dimension_semantics<parallel>], iteration_bounds = array<i64: 2, 1>, scalar_prefetch = 0 : i64, scratch_operands = 0 : i64, tpu.core_type = #tpu.core_type<tc>, window_params = [{transform_indices = @transform_0, window_bounds = array<i64: 1, 64, 432>}, {transform_indices = @transform_1, window_bounds = array<i64: 1, 16, 384>}]} {
    %c0 = arith.constant 0 : index
    %c0_0 = arith.constant 0 : index
    %c0_1 = arith.constant 0 : index
    %0 = vector.load %arg2[%c0, %c0_0, %c0_1] : memref<1x64x432xbf16, #tpu.memory_space<vmem>>, vector<1x64x409xbf16>
    %1 = vector.shape_cast %0 : vector<1x64x409xbf16> to vector<64x409xbf16>
    %2 = vector.extract_strided_slice %1 {offsets = [0, 0], sizes = [16, 384], strides = [1, 1]} : vector<64x409xbf16> to vector<16x384xbf16>
    %3 = vector.extract_strided_slice %1 {offsets = [16, 0], sizes = [16, 384], strides = [1, 1]} : vector<64x409xbf16> to vector<16x384xbf16>
    %4 = arith.maximumf %2, %3 : vector<16x384xbf16>
    %5 = vector.extract_strided_slice %1 {offsets = [0, 1], sizes = [16, 384], strides = [1, 1]} : vector<64x409xbf16> to vector<16x384xbf16>
    %6 = arith.maximumf %4, %5 : vector<16x384xbf16>
    %7 = vector.extract_strided_slice %1 {offsets = [32, 0], sizes = [16, 384], strides = [1, 1]} : vector<64x409xbf16> to vector<16x384xbf16>
    %8 = arith.maximumf %6, %7 : vector<16x384xbf16>
    %9 = vector.extract_strided_slice %1 {offsets = [48, 0], sizes = [16, 384], strides = [1, 1]} : vector<64x409xbf16> to vector<16x384xbf16>
    %10 = arith.maximumf %8, %9 : vector<16x384xbf16>
    %11 = vector.extract_strided_slice %1 {offsets = [32, 1], sizes = [16, 384], strides = [1, 1]} : vector<64x409xbf16> to vector<16x384xbf16>
    %12 = arith.maximumf %10, %11 : vector<16x384xbf16>
    %13 = vector.extract_strided_slice %1 {offsets = [0, 24], sizes = [16, 384], strides = [1, 1]} : vector<64x409xbf16> to vector<16x384xbf16>
    %14 = arith.maximumf %12, %13 : vector<16x384xbf16>
    %15 = vector.extract_strided_slice %1 {offsets = [16, 24], sizes = [16, 384], strides = [1, 1]} : vector<64x409xbf16> to vector<16x384xbf16>
    %16 = arith.maximumf %14, %15 : vector<16x384xbf16>
    %17 = vector.extract_strided_slice %1 {offsets = [0, 25], sizes = [16, 384], strides = [1, 1]} : vector<64x409xbf16> to vector<16x384xbf16>
    %18 = arith.maximumf %16, %17 : vector<16x384xbf16>
    %c0_2 = arith.constant 0 : index
    %c0_3 = arith.constant 0 : index
    %c0_4 = arith.constant 0 : index
    %19 = vector.load %arg3[%c0_2, %c0_3, %c0_4] : memref<1x16x384xbf16, #tpu.memory_space<vmem>>, vector<1x16x384xbf16>
    %20 = vector.shape_cast %19 : vector<1x16x384xbf16> to vector<16x384xbf16>
    %21 = vector.shape_cast %18 : vector<16x384xbf16> to vector<1x16x384xbf16>
    tpu.vector_store %arg3[%c0_2, %c0_3, %c0_4], %21 {strides = array<i32>} : memref<1x16x384xbf16, #tpu.memory_space<vmem>>, vector<1x16x384xbf16>,
    return
  }
  func.func @transform_0(%arg0: i32, %arg1: i32) -> (i32, i32, i32) {
    %c0_i32 = arith.constant 0 : i32
    %c0_i32_0 = arith.constant 0 : i32
    %c0_i32_1 = arith.constant 0 : i32
    return %arg0, %c0_i32, %c0_i32_0 : i32, i32, i32
  }
  func.func @transform_1(%arg0: i32, %arg1: i32) -> (i32, i32, i32) {
    %c0_i32 = arith.constant 0 : i32
    %c0_i32_0 = arith.constant 0 : i32
    return %arg0, %c0_i32, %arg1 : i32, i32, i32
  }
}

module attributes {stable_mosaic.version = 11 : i64} {
  func.func @_conv_kernel(%arg0: i32, %arg1: i32, %arg2: memref<1x16x456xbf16, #tpu.memory_space<vmem>>, %arg3: memref<16x144xbf16, #tpu.memory_space<vmem>>, %arg4: memref<16x1xf32, #tpu.memory_space<vmem>>, %arg5: memref<1x16x384xbf16, #tpu.memory_space<vmem>>) attributes {dimension_semantics = [#tpu.dimension_semantics<parallel>, #tpu.dimension_semantics<parallel>], iteration_bounds = array<i64: 2, 1>, scalar_prefetch = 0 : i64, scratch_operands = 0 : i64, tpu.core_type = #tpu.core_type<tc>, window_params = [{transform_indices = @transform_0, window_bounds = array<i64: 1, 16, 456>}, {pipeline_mode = #tpu.pipeline_mode<synchronous>, transform_indices = @transform_1, window_bounds = array<i64: 16, 144>}, {pipeline_mode = #tpu.pipeline_mode<synchronous>, transform_indices = @transform_2, window_bounds = array<i64: 16, 1>}, {transform_indices = @transform_3, window_bounds = array<i64: 1, 16, 384>}]} {
    %c0 = arith.constant 0 : index
    %c0_0 = arith.constant 0 : index
    %c0_1 = arith.constant 0 : index
    %0 = vector.load %arg2[%c0, %c0_0, %c0_1] : memref<1x16x456xbf16, #tpu.memory_space<vmem>>, vector<1x16x434xbf16>
    %1 = vector.shape_cast %0 : vector<1x16x434xbf16> to vector<16x434xbf16>
    %2 = vector.extract_strided_slice %1 {offsets = [0, 0], sizes = [16, 384], strides = [1, 1]} : vector<16x434xbf16> to vector<16x384xbf16>
    %3 = vector.extract_strided_slice %1 {offsets = [0, 1], sizes = [16, 384], strides = [1, 1]} : vector<16x434xbf16> to vector<16x384xbf16>
    %4 = vector.extract_strided_slice %1 {offsets = [0, 2], sizes = [16, 384], strides = [1, 1]} : vector<16x434xbf16> to vector<16x384xbf16>
    %5 = vector.extract_strided_slice %1 {offsets = [0, 24], sizes = [16, 384], strides = [1, 1]} : vector<16x434xbf16> to vector<16x384xbf16>
    %6 = vector.extract_strided_slice %1 {offsets = [0, 25], sizes = [16, 384], strides = [1, 1]} : vector<16x434xbf16> to vector<16x384xbf16>
    %7 = vector.extract_strided_slice %1 {offsets = [0, 26], sizes = [16, 384], strides = [1, 1]} : vector<16x434xbf16> to vector<16x384xbf16>
    %8 = vector.extract_strided_slice %1 {offsets = [0, 48], sizes = [16, 384], strides = [1, 1]} : vector<16x434xbf16> to vector<16x384xbf16>
    %9 = vector.extract_strided_slice %1 {offsets = [0, 49], sizes = [16, 384], strides = [1, 1]} : vector<16x434xbf16> to vector<16x384xbf16>
    %10 = vector.extract_strided_slice %1 {offsets = [0, 50], sizes = [16, 384], strides = [1, 1]} : vector<16x434xbf16> to vector<16x384xbf16>
    %11 = tpu.concatenate %2, %3, %4, %5, %6, %7, %8, %9, %10 in 0 : vector<16x384xbf16>, vector<16x384xbf16>, vector<16x384xbf16>, vector<16x384xbf16>, vector<16x384xbf16>, vector<16x384xbf16>, vector<16x384xbf16>, vector<16x384xbf16>, vector<16x384xbf16> -> vector<144x384xbf16>
    %c0_2 = arith.constant 0 : index
    %c0_3 = arith.constant 0 : index
    %12 = vector.load %arg3[%c0_2, %c0_3] : memref<16x144xbf16, #tpu.memory_space<vmem>>, vector<16x144xbf16>
    %cst = arith.constant dense<0.000000e+00> : vector<16x384xf32>
    %13 = tpu.matmul %12, %11, %cst {dimension_numbers = #tpu.dot_dimension_numbers<[1], [0], [0], [1], [0, 0, 1, 1], [], []>} : vector<16x144xbf16>, vector<144x384xbf16>, vector<16x384xf32> -> vector<16x384xf32>
    %c0_4 = arith.constant 0 : index
    %c0_5 = arith.constant 0 : index
    %14 = vector.load %arg4[%c0_4, %c0_5] : memref<16x1xf32, #tpu.memory_space<vmem>>, vector<16x1xf32>
    %15 = vector.broadcast %14 : vector<16x1xf32> to vector<16x384xf32>
    %16 = arith.addf %13, %15 : vector<16x384xf32>
    %cst_6 = arith.constant 0.000000e+00 : f32
    %17 = vector.broadcast %cst_6 : f32 to vector<16x384xf32>
    %18 = arith.maximumf %16, %17 : vector<16x384xf32>
    %19 = arith.truncf %18 : vector<16x384xf32> to vector<16x384xbf16>
    %c0_7 = arith.constant 0 : index
    %c0_8 = arith.constant 0 : index
    %c0_9 = arith.constant 0 : index
    %20 = vector.load %arg5[%c0_7, %c0_8, %c0_9] : memref<1x16x384xbf16, #tpu.memory_space<vmem>>, vector<1x16x384xbf16>
    %21 = vector.shape_cast %20 : vector<1x16x384xbf16> to vector<16x384xbf16>
    %22 = vector.shape_cast %19 : vector<16x384xbf16> to vector<1x16x384xbf16>
    tpu.vector_store %arg5[%c0_7, %c0_8, %c0_9], %22 {strides = array<i32>} : memref<1x16x384xbf16, #tpu.memory_space<vmem>>, vector<1x16x384xbf16>,
    return
  }
  func.func @transform_0(%arg0: i32, %arg1: i32) -> (i32, i32, i32) {
    %c0_i32 = arith.constant 0 : i32
    %c0_i32_0 = arith.constant 0 : i32
    %c0_i32_1 = arith.constant 0 : i32
    return %arg0, %c0_i32, %c0_i32_0 : i32, i32, i32
  }
  func.func @transform_1(%arg0: i32, %arg1: i32) -> (i32, i32) {
    %c0_i32 = arith.constant 0 : i32
    %c0_i32_0 = arith.constant 0 : i32
    %c0_i32_1 = arith.constant 0 : i32
    return %c0_i32, %c0_i32_0 : i32, i32
  }
  func.func @transform_2(%arg0: i32, %arg1: i32) -> (i32, i32) {
    %c0_i32 = arith.constant 0 : i32
    %c0_i32_0 = arith.constant 0 : i32
    %c0_i32_1 = arith.constant 0 : i32
    return %c0_i32, %c0_i32_0 : i32, i32
  }
  func.func @transform_3(%arg0: i32, %arg1: i32) -> (i32, i32, i32) {
    %c0_i32 = arith.constant 0 : i32
    %c0_i32_0 = arith.constant 0 : i32
    return %arg0, %c0_i32, %arg1 : i32, i32, i32
  }
}

module attributes {stable_mosaic.version = 11 : i64} {
  func.func @_conv_kernel(%arg0: i32, %arg1: i32, %arg2: memref<1x16x456xbf16, #tpu.memory_space<vmem>>, %arg3: memref<16x144xbf16, #tpu.memory_space<vmem>>, %arg4: memref<16x1xf32, #tpu.memory_space<vmem>>, %arg5: memref<1x16x384xbf16, #tpu.memory_space<vmem>>, %arg6: memref<1x16x384xbf16, #tpu.memory_space<vmem>>) attributes {dimension_semantics = [#tpu.dimension_semantics<parallel>, #tpu.dimension_semantics<parallel>], iteration_bounds = array<i64: 2, 1>, scalar_prefetch = 0 : i64, scratch_operands = 0 : i64, tpu.core_type = #tpu.core_type<tc>, window_params = [{transform_indices = @transform_0, window_bounds = array<i64: 1, 16, 456>}, {pipeline_mode = #tpu.pipeline_mode<synchronous>, transform_indices = @transform_1, window_bounds = array<i64: 16, 144>}, {pipeline_mode = #tpu.pipeline_mode<synchronous>, transform_indices = @transform_2, window_bounds = array<i64: 16, 1>}, {transform_indices = @transform_3, window_bounds = array<i64: 1, 16, 384>}, {transform_indices = @transform_4, window_bounds = array<i64: 1, 16, 384>}]} {
    %c0 = arith.constant 0 : index
    %c0_0 = arith.constant 0 : index
    %c0_1 = arith.constant 0 : index
    %0 = vector.load %arg2[%c0, %c0_0, %c0_1] : memref<1x16x456xbf16, #tpu.memory_space<vmem>>, vector<1x16x434xbf16>
    %1 = vector.shape_cast %0 : vector<1x16x434xbf16> to vector<16x434xbf16>
    %2 = vector.extract_strided_slice %1 {offsets = [0, 0], sizes = [16, 384], strides = [1, 1]} : vector<16x434xbf16> to vector<16x384xbf16>
    %3 = vector.extract_strided_slice %1 {offsets = [0, 1], sizes = [16, 384], strides = [1, 1]} : vector<16x434xbf16> to vector<16x384xbf16>
    %4 = vector.extract_strided_slice %1 {offsets = [0, 2], sizes = [16, 384], strides = [1, 1]} : vector<16x434xbf16> to vector<16x384xbf16>
    %5 = vector.extract_strided_slice %1 {offsets = [0, 24], sizes = [16, 384], strides = [1, 1]} : vector<16x434xbf16> to vector<16x384xbf16>
    %6 = vector.extract_strided_slice %1 {offsets = [0, 25], sizes = [16, 384], strides = [1, 1]} : vector<16x434xbf16> to vector<16x384xbf16>
    %7 = vector.extract_strided_slice %1 {offsets = [0, 26], sizes = [16, 384], strides = [1, 1]} : vector<16x434xbf16> to vector<16x384xbf16>
    %8 = vector.extract_strided_slice %1 {offsets = [0, 48], sizes = [16, 384], strides = [1, 1]} : vector<16x434xbf16> to vector<16x384xbf16>
    %9 = vector.extract_strided_slice %1 {offsets = [0, 49], sizes = [16, 384], strides = [1, 1]} : vector<16x434xbf16> to vector<16x384xbf16>
    %10 = vector.extract_strided_slice %1 {offsets = [0, 50], sizes = [16, 384], strides = [1, 1]} : vector<16x434xbf16> to vector<16x384xbf16>
    %11 = tpu.concatenate %2, %3, %4, %5, %6, %7, %8, %9, %10 in 0 : vector<16x384xbf16>, vector<16x384xbf16>, vector<16x384xbf16>, vector<16x384xbf16>, vector<16x384xbf16>, vector<16x384xbf16>, vector<16x384xbf16>, vector<16x384xbf16>, vector<16x384xbf16> -> vector<144x384xbf16>
    %c0_2 = arith.constant 0 : index
    %c0_3 = arith.constant 0 : index
    %12 = vector.load %arg3[%c0_2, %c0_3] : memref<16x144xbf16, #tpu.memory_space<vmem>>, vector<16x144xbf16>
    %cst = arith.constant dense<0.000000e+00> : vector<16x384xf32>
    %13 = tpu.matmul %12, %11, %cst {dimension_numbers = #tpu.dot_dimension_numbers<[1], [0], [0], [1], [0, 0, 1, 1], [], []>} : vector<16x144xbf16>, vector<144x384xbf16>, vector<16x384xf32> -> vector<16x384xf32>
    %c0_4 = arith.constant 0 : index
    %c0_5 = arith.constant 0 : index
    %14 = vector.load %arg4[%c0_4, %c0_5] : memref<16x1xf32, #tpu.memory_space<vmem>>, vector<16x1xf32>
    %15 = vector.broadcast %14 : vector<16x1xf32> to vector<16x384xf32>
    %16 = arith.addf %13, %15 : vector<16x384xf32>
    %c0_6 = arith.constant 0 : index
    %c0_7 = arith.constant 0 : index
    %c0_8 = arith.constant 0 : index
    %17 = vector.load %arg5[%c0_6, %c0_7, %c0_8] : memref<1x16x384xbf16, #tpu.memory_space<vmem>>, vector<1x16x384xbf16>
    %18 = vector.shape_cast %17 : vector<1x16x384xbf16> to vector<16x384xbf16>
    %19 = arith.extf %18 : vector<16x384xbf16> to vector<16x384xf32>
    %20 = arith.addf %16, %19 : vector<16x384xf32>
    %cst_9 = arith.constant 0.000000e+00 : f32
    %21 = vector.broadcast %cst_9 : f32 to vector<16x384xf32>
    %22 = arith.maximumf %20, %21 : vector<16x384xf32>
    %23 = arith.truncf %22 : vector<16x384xf32> to vector<16x384xbf16>
    %c0_10 = arith.constant 0 : index
    %c0_11 = arith.constant 0 : index
    %c0_12 = arith.constant 0 : index
    %24 = vector.load %arg6[%c0_10, %c0_11, %c0_12] : memref<1x16x384xbf16, #tpu.memory_space<vmem>>, vector<1x16x384xbf16>
    %25 = vector.shape_cast %24 : vector<1x16x384xbf16> to vector<16x384xbf16>
    %26 = vector.shape_cast %23 : vector<16x384xbf16> to vector<1x16x384xbf16>
    tpu.vector_store %arg6[%c0_10, %c0_11, %c0_12], %26 {strides = array<i32>} : memref<1x16x384xbf16, #tpu.memory_space<vmem>>, vector<1x16x384xbf16>,
    return
  }
  func.func @transform_0(%arg0: i32, %arg1: i32) -> (i32, i32, i32) {
    %c0_i32 = arith.constant 0 : i32
    %c0_i32_0 = arith.constant 0 : i32
    %c0_i32_1 = arith.constant 0 : i32
    return %arg0, %c0_i32, %c0_i32_0 : i32, i32, i32
  }
  func.func @transform_1(%arg0: i32, %arg1: i32) -> (i32, i32) {
    %c0_i32 = arith.constant 0 : i32
    %c0_i32_0 = arith.constant 0 : i32
    %c0_i32_1 = arith.constant 0 : i32
    return %c0_i32, %c0_i32_0 : i32, i32
  }
  func.func @transform_2(%arg0: i32, %arg1: i32) -> (i32, i32) {
    %c0_i32 = arith.constant 0 : i32
    %c0_i32_0 = arith.constant 0 : i32
    %c0_i32_1 = arith.constant 0 : i32
    return %c0_i32, %c0_i32_0 : i32, i32
  }
  func.func @transform_3(%arg0: i32, %arg1: i32) -> (i32, i32, i32) {
    %c0_i32 = arith.constant 0 : i32
    %c0_i32_0 = arith.constant 0 : i32
    return %arg0, %c0_i32, %arg1 : i32, i32, i32
  }
  func.func @transform_4(%arg0: i32, %arg1: i32) -> (i32, i32, i32) {
    %c0_i32 = arith.constant 0 : i32
    %c0_i32_0 = arith.constant 0 : i32
    return %arg0, %c0_i32, %arg1 : i32, i32, i32
  }
}

module attributes {stable_mosaic.version = 11 : i64} {
  func.func @_conv_kernel(%arg0: i32, %arg1: i32, %arg2: memref<1x64x160xbf16, #tpu.memory_space<vmem>>, %arg3: memref<32x256xbf16, #tpu.memory_space<vmem>>, %arg4: memref<32x1xf32, #tpu.memory_space<vmem>>, %arg5: memref<1x32x128xbf16, #tpu.memory_space<vmem>>) attributes {dimension_semantics = [#tpu.dimension_semantics<parallel>, #tpu.dimension_semantics<parallel>], iteration_bounds = array<i64: 2, 1>, scalar_prefetch = 0 : i64, scratch_operands = 0 : i64, tpu.core_type = #tpu.core_type<tc>, window_params = [{transform_indices = @transform_0, window_bounds = array<i64: 1, 64, 160>}, {pipeline_mode = #tpu.pipeline_mode<synchronous>, transform_indices = @transform_1, window_bounds = array<i64: 32, 256>}, {pipeline_mode = #tpu.pipeline_mode<synchronous>, transform_indices = @transform_2, window_bounds = array<i64: 32, 1>}, {transform_indices = @transform_3, window_bounds = array<i64: 1, 32, 128>}]} {
    %c0 = arith.constant 0 : index
    %c0_0 = arith.constant 0 : index
    %c0_1 = arith.constant 0 : index
    %0 = vector.load %arg2[%c0, %c0_0, %c0_1] : memref<1x64x160xbf16, #tpu.memory_space<vmem>>, vector<1x64x145xbf16>
    %1 = vector.shape_cast %0 : vector<1x64x145xbf16> to vector<64x145xbf16>
    %2 = vector.extract_strided_slice %1 {offsets = [0, 0], sizes = [64, 128], strides = [1, 1]} : vector<64x145xbf16> to vector<64x128xbf16>
    %3 = vector.extract_strided_slice %1 {offsets = [0, 1], sizes = [64, 128], strides = [1, 1]} : vector<64x145xbf16> to vector<64x128xbf16>
    %4 = vector.extract_strided_slice %1 {offsets = [0, 16], sizes = [64, 128], strides = [1, 1]} : vector<64x145xbf16> to vector<64x128xbf16>
    %5 = vector.extract_strided_slice %1 {offsets = [0, 17], sizes = [64, 128], strides = [1, 1]} : vector<64x145xbf16> to vector<64x128xbf16>
    %6 = tpu.concatenate %2, %3, %4, %5 in 0 : vector<64x128xbf16>, vector<64x128xbf16>, vector<64x128xbf16>, vector<64x128xbf16> -> vector<256x128xbf16>
    %c0_2 = arith.constant 0 : index
    %c0_3 = arith.constant 0 : index
    %7 = vector.load %arg3[%c0_2, %c0_3] : memref<32x256xbf16, #tpu.memory_space<vmem>>, vector<32x256xbf16>
    %cst = arith.constant dense<0.000000e+00> : vector<32x128xf32>
    %8 = tpu.matmul %7, %6, %cst {dimension_numbers = #tpu.dot_dimension_numbers<[1], [0], [0], [1], [0, 0, 1, 1], [], []>} : vector<32x256xbf16>, vector<256x128xbf16>, vector<32x128xf32> -> vector<32x128xf32>
    %c0_4 = arith.constant 0 : index
    %c0_5 = arith.constant 0 : index
    %9 = vector.load %arg4[%c0_4, %c0_5] : memref<32x1xf32, #tpu.memory_space<vmem>>, vector<32x1xf32>
    %10 = vector.broadcast %9 : vector<32x1xf32> to vector<32x128xf32>
    %11 = arith.addf %8, %10 : vector<32x128xf32>
    %cst_6 = arith.constant 0.000000e+00 : f32
    %12 = vector.broadcast %cst_6 : f32 to vector<32x128xf32>
    %13 = arith.maximumf %11, %12 : vector<32x128xf32>
    %14 = arith.truncf %13 : vector<32x128xf32> to vector<32x128xbf16>
    %c0_7 = arith.constant 0 : index
    %c0_8 = arith.constant 0 : index
    %c0_9 = arith.constant 0 : index
    %15 = vector.load %arg5[%c0_7, %c0_8, %c0_9] : memref<1x32x128xbf16, #tpu.memory_space<vmem>>, vector<1x32x128xbf16>
    %16 = vector.shape_cast %15 : vector<1x32x128xbf16> to vector<32x128xbf16>
    %17 = vector.shape_cast %14 : vector<32x128xbf16> to vector<1x32x128xbf16>
    tpu.vector_store %arg5[%c0_7, %c0_8, %c0_9], %17 {strides = array<i32>} : memref<1x32x128xbf16, #tpu.memory_space<vmem>>, vector<1x32x128xbf16>,
    return
  }
  func.func @transform_0(%arg0: i32, %arg1: i32) -> (i32, i32, i32) {
    %c0_i32 = arith.constant 0 : i32
    %c0_i32_0 = arith.constant 0 : i32
    %c0_i32_1 = arith.constant 0 : i32
    return %arg0, %c0_i32, %c0_i32_0 : i32, i32, i32
  }
  func.func @transform_1(%arg0: i32, %arg1: i32) -> (i32, i32) {
    %c0_i32 = arith.constant 0 : i32
    %c0_i32_0 = arith.constant 0 : i32
    %c0_i32_1 = arith.constant 0 : i32
    return %c0_i32, %c0_i32_0 : i32, i32
  }
  func.func @transform_2(%arg0: i32, %arg1: i32) -> (i32, i32) {
    %c0_i32 = arith.constant 0 : i32
    %c0_i32_0 = arith.constant 0 : i32
    %c0_i32_1 = arith.constant 0 : i32
    return %c0_i32, %c0_i32_0 : i32, i32
  }
  func.func @transform_3(%arg0: i32, %arg1: i32) -> (i32, i32, i32) {
    %c0_i32 = arith.constant 0 : i32
    %c0_i32_0 = arith.constant 0 : i32
    return %arg0, %c0_i32, %arg1 : i32, i32, i32
  }
}

module attributes {stable_mosaic.version = 11 : i64} {
  func.func @_conv_kernel(%arg0: i32, %arg1: i32, %arg2: memref<1x16x64xbf16, #tpu.memory_space<vmem>>, %arg3: memref<32x16xbf16, #tpu.memory_space<vmem>>, %arg4: memref<32x1xf32, #tpu.memory_space<vmem>>, %arg5: memref<1x32x64xbf16, #tpu.memory_space<vmem>>) attributes {dimension_semantics = [#tpu.dimension_semantics<parallel>, #tpu.dimension_semantics<parallel>], iteration_bounds = array<i64: 2, 1>, scalar_prefetch = 0 : i64, scratch_operands = 0 : i64, tpu.core_type = #tpu.core_type<tc>, window_params = [{transform_indices = @transform_0, window_bounds = array<i64: 1, 16, 64>}, {pipeline_mode = #tpu.pipeline_mode<synchronous>, transform_indices = @transform_1, window_bounds = array<i64: 32, 16>}, {pipeline_mode = #tpu.pipeline_mode<synchronous>, transform_indices = @transform_2, window_bounds = array<i64: 32, 1>}, {transform_indices = @transform_3, window_bounds = array<i64: 1, 32, 64>}]} {
    %c0 = arith.constant 0 : index
    %c0_0 = arith.constant 0 : index
    %c0_1 = arith.constant 0 : index
    %0 = vector.load %arg2[%c0, %c0_0, %c0_1] : memref<1x16x64xbf16, #tpu.memory_space<vmem>>, vector<1x16x64xbf16>
    %1 = vector.shape_cast %0 : vector<1x16x64xbf16> to vector<16x64xbf16>
    %c0_2 = arith.constant 0 : index
    %c0_3 = arith.constant 0 : index
    %2 = vector.load %arg3[%c0_2, %c0_3] : memref<32x16xbf16, #tpu.memory_space<vmem>>, vector<32x16xbf16>
    %cst = arith.constant dense<0.000000e+00> : vector<32x64xf32>
    %3 = tpu.matmul %2, %1, %cst {dimension_numbers = #tpu.dot_dimension_numbers<[1], [0], [0], [1], [0, 0, 1, 1], [], []>} : vector<32x16xbf16>, vector<16x64xbf16>, vector<32x64xf32> -> vector<32x64xf32>
    %c0_4 = arith.constant 0 : index
    %c0_5 = arith.constant 0 : index
    %4 = vector.load %arg4[%c0_4, %c0_5] : memref<32x1xf32, #tpu.memory_space<vmem>>, vector<32x1xf32>
    %5 = vector.broadcast %4 : vector<32x1xf32> to vector<32x64xf32>
    %6 = arith.addf %3, %5 : vector<32x64xf32>
    %7 = arith.truncf %6 : vector<32x64xf32> to vector<32x64xbf16>
    %c0_6 = arith.constant 0 : index
    %c0_7 = arith.constant 0 : index
    %c0_8 = arith.constant 0 : index
    %8 = vector.load %arg5[%c0_6, %c0_7, %c0_8] : memref<1x32x64xbf16, #tpu.memory_space<vmem>>, vector<1x32x64xbf16>
    %9 = vector.shape_cast %8 : vector<1x32x64xbf16> to vector<32x64xbf16>
    %10 = vector.shape_cast %7 : vector<32x64xbf16> to vector<1x32x64xbf16>
    tpu.vector_store %arg5[%c0_6, %c0_7, %c0_8], %10 {strides = array<i32>} : memref<1x32x64xbf16, #tpu.memory_space<vmem>>, vector<1x32x64xbf16>,
    return
  }
  func.func @transform_0(%arg0: i32, %arg1: i32) -> (i32, i32, i32) {
    %c0_i32 = arith.constant 0 : i32
    %c0_i32_0 = arith.constant 0 : i32
    %c0_i32_1 = arith.constant 0 : i32
    return %arg0, %c0_i32, %c0_i32_0 : i32, i32, i32
  }
  func.func @transform_1(%arg0: i32, %arg1: i32) -> (i32, i32) {
    %c0_i32 = arith.constant 0 : i32
    %c0_i32_0 = arith.constant 0 : i32
    %c0_i32_1 = arith.constant 0 : i32
    return %c0_i32, %c0_i32_0 : i32, i32
  }
  func.func @transform_2(%arg0: i32, %arg1: i32) -> (i32, i32) {
    %c0_i32 = arith.constant 0 : i32
    %c0_i32_0 = arith.constant 0 : i32
    %c0_i32_1 = arith.constant 0 : i32
    return %c0_i32, %c0_i32_0 : i32, i32
  }
  func.func @transform_3(%arg0: i32, %arg1: i32) -> (i32, i32, i32) {
    %c0_i32 = arith.constant 0 : i32
    %c0_i32_0 = arith.constant 0 : i32
    return %arg0, %c0_i32, %arg1 : i32, i32, i32
  }
}

module attributes {stable_mosaic.version = 11 : i64} {
  func.func @_conv_kernel(%arg0: i32, %arg1: i32, %arg2: memref<1x32x176xbf16, #tpu.memory_space<vmem>>, %arg3: memref<32x288xbf16, #tpu.memory_space<vmem>>, %arg4: memref<32x1xf32, #tpu.memory_space<vmem>>, %arg5: memref<1x32x128xbf16, #tpu.memory_space<vmem>>) attributes {dimension_semantics = [#tpu.dimension_semantics<parallel>, #tpu.dimension_semantics<parallel>], iteration_bounds = array<i64: 2, 1>, scalar_prefetch = 0 : i64, scratch_operands = 0 : i64, tpu.core_type = #tpu.core_type<tc>, window_params = [{transform_indices = @transform_0, window_bounds = array<i64: 1, 32, 176>}, {pipeline_mode = #tpu.pipeline_mode<synchronous>, transform_indices = @transform_1, window_bounds = array<i64: 32, 288>}, {pipeline_mode = #tpu.pipeline_mode<synchronous>, transform_indices = @transform_2, window_bounds = array<i64: 32, 1>}, {transform_indices = @transform_3, window_bounds = array<i64: 1, 32, 128>}]} {
    %c0 = arith.constant 0 : index
    %c0_0 = arith.constant 0 : index
    %c0_1 = arith.constant 0 : index
    %0 = vector.load %arg2[%c0, %c0_0, %c0_1] : memref<1x32x176xbf16, #tpu.memory_space<vmem>>, vector<1x32x162xbf16>
    %1 = vector.shape_cast %0 : vector<1x32x162xbf16> to vector<32x162xbf16>
    %2 = vector.extract_strided_slice %1 {offsets = [0, 0], sizes = [32, 128], strides = [1, 1]} : vector<32x162xbf16> to vector<32x128xbf16>
    %3 = vector.extract_strided_slice %1 {offsets = [0, 1], sizes = [32, 128], strides = [1, 1]} : vector<32x162xbf16> to vector<32x128xbf16>
    %4 = vector.extract_strided_slice %1 {offsets = [0, 2], sizes = [32, 128], strides = [1, 1]} : vector<32x162xbf16> to vector<32x128xbf16>
    %5 = vector.extract_strided_slice %1 {offsets = [0, 16], sizes = [32, 128], strides = [1, 1]} : vector<32x162xbf16> to vector<32x128xbf16>
    %6 = vector.extract_strided_slice %1 {offsets = [0, 17], sizes = [32, 128], strides = [1, 1]} : vector<32x162xbf16> to vector<32x128xbf16>
    %7 = vector.extract_strided_slice %1 {offsets = [0, 18], sizes = [32, 128], strides = [1, 1]} : vector<32x162xbf16> to vector<32x128xbf16>
    %8 = vector.extract_strided_slice %1 {offsets = [0, 32], sizes = [32, 128], strides = [1, 1]} : vector<32x162xbf16> to vector<32x128xbf16>
    %9 = vector.extract_strided_slice %1 {offsets = [0, 33], sizes = [32, 128], strides = [1, 1]} : vector<32x162xbf16> to vector<32x128xbf16>
    %10 = vector.extract_strided_slice %1 {offsets = [0, 34], sizes = [32, 128], strides = [1, 1]} : vector<32x162xbf16> to vector<32x128xbf16>
    %11 = tpu.concatenate %2, %3, %4, %5, %6, %7, %8, %9, %10 in 0 : vector<32x128xbf16>, vector<32x128xbf16>, vector<32x128xbf16>, vector<32x128xbf16>, vector<32x128xbf16>, vector<32x128xbf16>, vector<32x128xbf16>, vector<32x128xbf16>, vector<32x128xbf16> -> vector<288x128xbf16>
    %c0_2 = arith.constant 0 : index
    %c0_3 = arith.constant 0 : index
    %12 = vector.load %arg3[%c0_2, %c0_3] : memref<32x288xbf16, #tpu.memory_space<vmem>>, vector<32x288xbf16>
    %cst = arith.constant dense<0.000000e+00> : vector<32x128xf32>
    %13 = tpu.matmul %12, %11, %cst {dimension_numbers = #tpu.dot_dimension_numbers<[1], [0], [0], [1], [0, 0, 1, 1], [], []>} : vector<32x288xbf16>, vector<288x128xbf16>, vector<32x128xf32> -> vector<32x128xf32>
    %c0_4 = arith.constant 0 : index
    %c0_5 = arith.constant 0 : index
    %14 = vector.load %arg4[%c0_4, %c0_5] : memref<32x1xf32, #tpu.memory_space<vmem>>, vector<32x1xf32>
    %15 = vector.broadcast %14 : vector<32x1xf32> to vector<32x128xf32>
    %16 = arith.addf %13, %15 : vector<32x128xf32>
    %cst_6 = arith.constant 0.000000e+00 : f32
    %17 = vector.broadcast %cst_6 : f32 to vector<32x128xf32>
    %18 = arith.maximumf %16, %17 : vector<32x128xf32>
    %19 = arith.truncf %18 : vector<32x128xf32> to vector<32x128xbf16>
    %c0_7 = arith.constant 0 : index
    %c0_8 = arith.constant 0 : index
    %c0_9 = arith.constant 0 : index
    %20 = vector.load %arg5[%c0_7, %c0_8, %c0_9] : memref<1x32x128xbf16, #tpu.memory_space<vmem>>, vector<1x32x128xbf16>
    %21 = vector.shape_cast %20 : vector<1x32x128xbf16> to vector<32x128xbf16>
    %22 = vector.shape_cast %19 : vector<32x128xbf16> to vector<1x32x128xbf16>
    tpu.vector_store %arg5[%c0_7, %c0_8, %c0_9], %22 {strides = array<i32>} : memref<1x32x128xbf16, #tpu.memory_space<vmem>>, vector<1x32x128xbf16>,
    return
  }
  func.func @transform_0(%arg0: i32, %arg1: i32) -> (i32, i32, i32) {
    %c0_i32 = arith.constant 0 : i32
    %c0_i32_0 = arith.constant 0 : i32
    %c0_i32_1 = arith.constant 0 : i32
    return %arg0, %c0_i32, %c0_i32_0 : i32, i32, i32
  }
  func.func @transform_1(%arg0: i32, %arg1: i32) -> (i32, i32) {
    %c0_i32 = arith.constant 0 : i32
    %c0_i32_0 = arith.constant 0 : i32
    %c0_i32_1 = arith.constant 0 : i32
    return %c0_i32, %c0_i32_0 : i32, i32
  }
  func.func @transform_2(%arg0: i32, %arg1: i32) -> (i32, i32) {
    %c0_i32 = arith.constant 0 : i32
    %c0_i32_0 = arith.constant 0 : i32
    %c0_i32_1 = arith.constant 0 : i32
    return %c0_i32, %c0_i32_0 : i32, i32
  }
  func.func @transform_3(%arg0: i32, %arg1: i32) -> (i32, i32, i32) {
    %c0_i32 = arith.constant 0 : i32
    %c0_i32_0 = arith.constant 0 : i32
    return %arg0, %c0_i32, %arg1 : i32, i32, i32
  }
}

module attributes {stable_mosaic.version = 11 : i64} {
  func.func @_conv_kernel(%arg0: i32, %arg1: i32, %arg2: memref<1x32x176xbf16, #tpu.memory_space<vmem>>, %arg3: memref<32x288xbf16, #tpu.memory_space<vmem>>, %arg4: memref<32x1xf32, #tpu.memory_space<vmem>>, %arg5: memref<1x32x128xbf16, #tpu.memory_space<vmem>>, %arg6: memref<1x32x128xbf16, #tpu.memory_space<vmem>>) attributes {dimension_semantics = [#tpu.dimension_semantics<parallel>, #tpu.dimension_semantics<parallel>], iteration_bounds = array<i64: 2, 1>, scalar_prefetch = 0 : i64, scratch_operands = 0 : i64, tpu.core_type = #tpu.core_type<tc>, window_params = [{transform_indices = @transform_0, window_bounds = array<i64: 1, 32, 176>}, {pipeline_mode = #tpu.pipeline_mode<synchronous>, transform_indices = @transform_1, window_bounds = array<i64: 32, 288>}, {pipeline_mode = #tpu.pipeline_mode<synchronous>, transform_indices = @transform_2, window_bounds = array<i64: 32, 1>}, {transform_indices = @transform_3, window_bounds = array<i64: 1, 32, 128>}, {transform_indices = @transform_4, window_bounds = array<i64: 1, 32, 128>}]} {
    %c0 = arith.constant 0 : index
    %c0_0 = arith.constant 0 : index
    %c0_1 = arith.constant 0 : index
    %0 = vector.load %arg2[%c0, %c0_0, %c0_1] : memref<1x32x176xbf16, #tpu.memory_space<vmem>>, vector<1x32x162xbf16>
    %1 = vector.shape_cast %0 : vector<1x32x162xbf16> to vector<32x162xbf16>
    %2 = vector.extract_strided_slice %1 {offsets = [0, 0], sizes = [32, 128], strides = [1, 1]} : vector<32x162xbf16> to vector<32x128xbf16>
    %3 = vector.extract_strided_slice %1 {offsets = [0, 1], sizes = [32, 128], strides = [1, 1]} : vector<32x162xbf16> to vector<32x128xbf16>
    %4 = vector.extract_strided_slice %1 {offsets = [0, 2], sizes = [32, 128], strides = [1, 1]} : vector<32x162xbf16> to vector<32x128xbf16>
    %5 = vector.extract_strided_slice %1 {offsets = [0, 16], sizes = [32, 128], strides = [1, 1]} : vector<32x162xbf16> to vector<32x128xbf16>
    %6 = vector.extract_strided_slice %1 {offsets = [0, 17], sizes = [32, 128], strides = [1, 1]} : vector<32x162xbf16> to vector<32x128xbf16>
    %7 = vector.extract_strided_slice %1 {offsets = [0, 18], sizes = [32, 128], strides = [1, 1]} : vector<32x162xbf16> to vector<32x128xbf16>
    %8 = vector.extract_strided_slice %1 {offsets = [0, 32], sizes = [32, 128], strides = [1, 1]} : vector<32x162xbf16> to vector<32x128xbf16>
    %9 = vector.extract_strided_slice %1 {offsets = [0, 33], sizes = [32, 128], strides = [1, 1]} : vector<32x162xbf16> to vector<32x128xbf16>
    %10 = vector.extract_strided_slice %1 {offsets = [0, 34], sizes = [32, 128], strides = [1, 1]} : vector<32x162xbf16> to vector<32x128xbf16>
    %11 = tpu.concatenate %2, %3, %4, %5, %6, %7, %8, %9, %10 in 0 : vector<32x128xbf16>, vector<32x128xbf16>, vector<32x128xbf16>, vector<32x128xbf16>, vector<32x128xbf16>, vector<32x128xbf16>, vector<32x128xbf16>, vector<32x128xbf16>, vector<32x128xbf16> -> vector<288x128xbf16>
    %c0_2 = arith.constant 0 : index
    %c0_3 = arith.constant 0 : index
    %12 = vector.load %arg3[%c0_2, %c0_3] : memref<32x288xbf16, #tpu.memory_space<vmem>>, vector<32x288xbf16>
    %cst = arith.constant dense<0.000000e+00> : vector<32x128xf32>
    %13 = tpu.matmul %12, %11, %cst {dimension_numbers = #tpu.dot_dimension_numbers<[1], [0], [0], [1], [0, 0, 1, 1], [], []>} : vector<32x288xbf16>, vector<288x128xbf16>, vector<32x128xf32> -> vector<32x128xf32>
    %c0_4 = arith.constant 0 : index
    %c0_5 = arith.constant 0 : index
    %14 = vector.load %arg4[%c0_4, %c0_5] : memref<32x1xf32, #tpu.memory_space<vmem>>, vector<32x1xf32>
    %15 = vector.broadcast %14 : vector<32x1xf32> to vector<32x128xf32>
    %16 = arith.addf %13, %15 : vector<32x128xf32>
    %c0_6 = arith.constant 0 : index
    %c0_7 = arith.constant 0 : index
    %c0_8 = arith.constant 0 : index
    %17 = vector.load %arg5[%c0_6, %c0_7, %c0_8] : memref<1x32x128xbf16, #tpu.memory_space<vmem>>, vector<1x32x128xbf16>
    %18 = vector.shape_cast %17 : vector<1x32x128xbf16> to vector<32x128xbf16>
    %19 = arith.extf %18 : vector<32x128xbf16> to vector<32x128xf32>
    %20 = arith.addf %16, %19 : vector<32x128xf32>
    %cst_9 = arith.constant 0.000000e+00 : f32
    %21 = vector.broadcast %cst_9 : f32 to vector<32x128xf32>
    %22 = arith.maximumf %20, %21 : vector<32x128xf32>
    %23 = arith.truncf %22 : vector<32x128xf32> to vector<32x128xbf16>
    %c0_10 = arith.constant 0 : index
    %c0_11 = arith.constant 0 : index
    %c0_12 = arith.constant 0 : index
    %24 = vector.load %arg6[%c0_10, %c0_11, %c0_12] : memref<1x32x128xbf16, #tpu.memory_space<vmem>>, vector<1x32x128xbf16>
    %25 = vector.shape_cast %24 : vector<1x32x128xbf16> to vector<32x128xbf16>
    %26 = vector.shape_cast %23 : vector<32x128xbf16> to vector<1x32x128xbf16>
    tpu.vector_store %arg6[%c0_10, %c0_11, %c0_12], %26 {strides = array<i32>} : memref<1x32x128xbf16, #tpu.memory_space<vmem>>, vector<1x32x128xbf16>,
    return
  }
  func.func @transform_0(%arg0: i32, %arg1: i32) -> (i32, i32, i32) {
    %c0_i32 = arith.constant 0 : i32
    %c0_i32_0 = arith.constant 0 : i32
    %c0_i32_1 = arith.constant 0 : i32
    return %arg0, %c0_i32, %c0_i32_0 : i32, i32, i32
  }
  func.func @transform_1(%arg0: i32, %arg1: i32) -> (i32, i32) {
    %c0_i32 = arith.constant 0 : i32
    %c0_i32_0 = arith.constant 0 : i32
    %c0_i32_1 = arith.constant 0 : i32
    return %c0_i32, %c0_i32_0 : i32, i32
  }
  func.func @transform_2(%arg0: i32, %arg1: i32) -> (i32, i32) {
    %c0_i32 = arith.constant 0 : i32
    %c0_i32_0 = arith.constant 0 : i32
    %c0_i32_1 = arith.constant 0 : i32
    return %c0_i32, %c0_i32_0 : i32, i32
  }
  func.func @transform_3(%arg0: i32, %arg1: i32) -> (i32, i32, i32) {
    %c0_i32 = arith.constant 0 : i32
    %c0_i32_0 = arith.constant 0 : i32
    return %arg0, %c0_i32, %arg1 : i32, i32, i32
  }
  func.func @transform_4(%arg0: i32, %arg1: i32) -> (i32, i32, i32) {
    %c0_i32 = arith.constant 0 : i32
    %c0_i32_0 = arith.constant 0 : i32
    return %arg0, %c0_i32, %arg1 : i32, i32, i32
  }
}

module attributes {stable_mosaic.version = 11 : i64} {
  func.func @_conv_kernel(%arg0: i32, %arg1: i32, %arg2: memref<1x128x48xbf16, #tpu.memory_space<vmem>>, %arg3: memref<64x512xbf16, #tpu.memory_space<vmem>>, %arg4: memref<64x1xf32, #tpu.memory_space<vmem>>, %arg5: memref<1x64x32xbf16, #tpu.memory_space<vmem>>) attributes {dimension_semantics = [#tpu.dimension_semantics<parallel>, #tpu.dimension_semantics<parallel>], iteration_bounds = array<i64: 2, 1>, scalar_prefetch = 0 : i64, scratch_operands = 0 : i64, tpu.core_type = #tpu.core_type<tc>, window_params = [{transform_indices = @transform_0, window_bounds = array<i64: 1, 128, 48>}, {pipeline_mode = #tpu.pipeline_mode<synchronous>, transform_indices = @transform_1, window_bounds = array<i64: 64, 512>}, {pipeline_mode = #tpu.pipeline_mode<synchronous>, transform_indices = @transform_2, window_bounds = array<i64: 64, 1>}, {transform_indices = @transform_3, window_bounds = array<i64: 1, 64, 32>}]} {
    %c0 = arith.constant 0 : index
    %c0_0 = arith.constant 0 : index
    %c0_1 = arith.constant 0 : index
    %0 = vector.load %arg2[%c0, %c0_0, %c0_1] : memref<1x128x48xbf16, #tpu.memory_space<vmem>>, vector<1x128x41xbf16>
    %1 = vector.shape_cast %0 : vector<1x128x41xbf16> to vector<128x41xbf16>
    %2 = vector.extract_strided_slice %1 {offsets = [0, 0], sizes = [128, 32], strides = [1, 1]} : vector<128x41xbf16> to vector<128x32xbf16>
    %3 = vector.extract_strided_slice %1 {offsets = [0, 1], sizes = [128, 32], strides = [1, 1]} : vector<128x41xbf16> to vector<128x32xbf16>
    %4 = vector.extract_strided_slice %1 {offsets = [0, 8], sizes = [128, 32], strides = [1, 1]} : vector<128x41xbf16> to vector<128x32xbf16>
    %5 = vector.extract_strided_slice %1 {offsets = [0, 9], sizes = [128, 32], strides = [1, 1]} : vector<128x41xbf16> to vector<128x32xbf16>
    %6 = tpu.concatenate %2, %3, %4, %5 in 0 : vector<128x32xbf16>, vector<128x32xbf16>, vector<128x32xbf16>, vector<128x32xbf16> -> vector<512x32xbf16>
    %c0_2 = arith.constant 0 : index
    %c0_3 = arith.constant 0 : index
    %7 = vector.load %arg3[%c0_2, %c0_3] : memref<64x512xbf16, #tpu.memory_space<vmem>>, vector<64x512xbf16>
    %cst = arith.constant dense<0.000000e+00> : vector<64x32xf32>
    %8 = tpu.matmul %7, %6, %cst {dimension_numbers = #tpu.dot_dimension_numbers<[1], [0], [0], [1], [0, 0, 1, 1], [], []>} : vector<64x512xbf16>, vector<512x32xbf16>, vector<64x32xf32> -> vector<64x32xf32>
    %c0_4 = arith.constant 0 : index
    %c0_5 = arith.constant 0 : index
    %9 = vector.load %arg4[%c0_4, %c0_5] : memref<64x1xf32, #tpu.memory_space<vmem>>, vector<64x1xf32>
    %10 = vector.broadcast %9 : vector<64x1xf32> to vector<64x32xf32>
    %11 = arith.addf %8, %10 : vector<64x32xf32>
    %cst_6 = arith.constant 0.000000e+00 : f32
    %12 = vector.broadcast %cst_6 : f32 to vector<64x32xf32>
    %13 = arith.maximumf %11, %12 : vector<64x32xf32>
    %14 = arith.truncf %13 : vector<64x32xf32> to vector<64x32xbf16>
    %c0_7 = arith.constant 0 : index
    %c0_8 = arith.constant 0 : index
    %c0_9 = arith.constant 0 : index
    %15 = vector.load %arg5[%c0_7, %c0_8, %c0_9] : memref<1x64x32xbf16, #tpu.memory_space<vmem>>, vector<1x64x32xbf16>
    %16 = vector.shape_cast %15 : vector<1x64x32xbf16> to vector<64x32xbf16>
    %17 = vector.shape_cast %14 : vector<64x32xbf16> to vector<1x64x32xbf16>
    tpu.vector_store %arg5[%c0_7, %c0_8, %c0_9], %17 {strides = array<i32>} : memref<1x64x32xbf16, #tpu.memory_space<vmem>>, vector<1x64x32xbf16>,
    return
  }
  func.func @transform_0(%arg0: i32, %arg1: i32) -> (i32, i32, i32) {
    %c0_i32 = arith.constant 0 : i32
    %c0_i32_0 = arith.constant 0 : i32
    %c0_i32_1 = arith.constant 0 : i32
    return %arg0, %c0_i32, %c0_i32_0 : i32, i32, i32
  }
  func.func @transform_1(%arg0: i32, %arg1: i32) -> (i32, i32) {
    %c0_i32 = arith.constant 0 : i32
    %c0_i32_0 = arith.constant 0 : i32
    %c0_i32_1 = arith.constant 0 : i32
    return %c0_i32, %c0_i32_0 : i32, i32
  }
  func.func @transform_2(%arg0: i32, %arg1: i32) -> (i32, i32) {
    %c0_i32 = arith.constant 0 : i32
    %c0_i32_0 = arith.constant 0 : i32
    %c0_i32_1 = arith.constant 0 : i32
    return %c0_i32, %c0_i32_0 : i32, i32
  }
  func.func @transform_3(%arg0: i32, %arg1: i32) -> (i32, i32, i32) {
    %c0_i32 = arith.constant 0 : i32
    %c0_i32_0 = arith.constant 0 : i32
    return %arg0, %c0_i32, %arg1 : i32, i32, i32
  }
}

module attributes {stable_mosaic.version = 11 : i64} {
  func.func @_conv_kernel(%arg0: i32, %arg1: i32, %arg2: memref<1x32x32xbf16, #tpu.memory_space<vmem>>, %arg3: memref<64x32xbf16, #tpu.memory_space<vmem>>, %arg4: memref<64x1xf32, #tpu.memory_space<vmem>>, %arg5: memref<1x64x32xbf16, #tpu.memory_space<vmem>>) attributes {dimension_semantics = [#tpu.dimension_semantics<parallel>, #tpu.dimension_semantics<parallel>], iteration_bounds = array<i64: 2, 1>, scalar_prefetch = 0 : i64, scratch_operands = 0 : i64, tpu.core_type = #tpu.core_type<tc>, window_params = [{transform_indices = @transform_0, window_bounds = array<i64: 1, 32, 32>}, {pipeline_mode = #tpu.pipeline_mode<synchronous>, transform_indices = @transform_1, window_bounds = array<i64: 64, 32>}, {pipeline_mode = #tpu.pipeline_mode<synchronous>, transform_indices = @transform_2, window_bounds = array<i64: 64, 1>}, {transform_indices = @transform_3, window_bounds = array<i64: 1, 64, 32>}]} {
    %c0 = arith.constant 0 : index
    %c0_0 = arith.constant 0 : index
    %c0_1 = arith.constant 0 : index
    %0 = vector.load %arg2[%c0, %c0_0, %c0_1] : memref<1x32x32xbf16, #tpu.memory_space<vmem>>, vector<1x32x32xbf16>
    %1 = vector.shape_cast %0 : vector<1x32x32xbf16> to vector<32x32xbf16>
    %c0_2 = arith.constant 0 : index
    %c0_3 = arith.constant 0 : index
    %2 = vector.load %arg3[%c0_2, %c0_3] : memref<64x32xbf16, #tpu.memory_space<vmem>>, vector<64x32xbf16>
    %cst = arith.constant dense<0.000000e+00> : vector<64x32xf32>
    %3 = tpu.matmul %2, %1, %cst {dimension_numbers = #tpu.dot_dimension_numbers<[1], [0], [0], [1], [0, 0, 1, 1], [], []>} : vector<64x32xbf16>, vector<32x32xbf16>, vector<64x32xf32> -> vector<64x32xf32>
    %c0_4 = arith.constant 0 : index
    %c0_5 = arith.constant 0 : index
    %4 = vector.load %arg4[%c0_4, %c0_5] : memref<64x1xf32, #tpu.memory_space<vmem>>, vector<64x1xf32>
    %5 = vector.broadcast %4 : vector<64x1xf32> to vector<64x32xf32>
    %6 = arith.addf %3, %5 : vector<64x32xf32>
    %7 = arith.truncf %6 : vector<64x32xf32> to vector<64x32xbf16>
    %c0_6 = arith.constant 0 : index
    %c0_7 = arith.constant 0 : index
    %c0_8 = arith.constant 0 : index
    %8 = vector.load %arg5[%c0_6, %c0_7, %c0_8] : memref<1x64x32xbf16, #tpu.memory_space<vmem>>, vector<1x64x32xbf16>
    %9 = vector.shape_cast %8 : vector<1x64x32xbf16> to vector<64x32xbf16>
    %10 = vector.shape_cast %7 : vector<64x32xbf16> to vector<1x64x32xbf16>
    tpu.vector_store %arg5[%c0_6, %c0_7, %c0_8], %10 {strides = array<i32>} : memref<1x64x32xbf16, #tpu.memory_space<vmem>>, vector<1x64x32xbf16>,
    return
  }
  func.func @transform_0(%arg0: i32, %arg1: i32) -> (i32, i32, i32) {
    %c0_i32 = arith.constant 0 : i32
    %c0_i32_0 = arith.constant 0 : i32
    %c0_i32_1 = arith.constant 0 : i32
    return %arg0, %c0_i32, %c0_i32_0 : i32, i32, i32
  }
  func.func @transform_1(%arg0: i32, %arg1: i32) -> (i32, i32) {
    %c0_i32 = arith.constant 0 : i32
    %c0_i32_0 = arith.constant 0 : i32
    %c0_i32_1 = arith.constant 0 : i32
    return %c0_i32, %c0_i32_0 : i32, i32
  }
  func.func @transform_2(%arg0: i32, %arg1: i32) -> (i32, i32) {
    %c0_i32 = arith.constant 0 : i32
    %c0_i32_0 = arith.constant 0 : i32
    %c0_i32_1 = arith.constant 0 : i32
    return %c0_i32, %c0_i32_0 : i32, i32
  }
  func.func @transform_3(%arg0: i32, %arg1: i32) -> (i32, i32, i32) {
    %c0_i32 = arith.constant 0 : i32
    %c0_i32_0 = arith.constant 0 : i32
    return %arg0, %c0_i32, %arg1 : i32, i32, i32
  }
}

module attributes {stable_mosaic.version = 11 : i64} {
  func.func @_conv_kernel(%arg0: i32, %arg1: i32, %arg2: memref<1x64x56xbf16, #tpu.memory_space<vmem>>, %arg3: memref<64x576xbf16, #tpu.memory_space<vmem>>, %arg4: memref<64x1xf32, #tpu.memory_space<vmem>>, %arg5: memref<1x64x32xbf16, #tpu.memory_space<vmem>>) attributes {dimension_semantics = [#tpu.dimension_semantics<parallel>, #tpu.dimension_semantics<parallel>], iteration_bounds = array<i64: 2, 1>, scalar_prefetch = 0 : i64, scratch_operands = 0 : i64, tpu.core_type = #tpu.core_type<tc>, window_params = [{transform_indices = @transform_0, window_bounds = array<i64: 1, 64, 56>}, {pipeline_mode = #tpu.pipeline_mode<synchronous>, transform_indices = @transform_1, window_bounds = array<i64: 64, 576>}, {pipeline_mode = #tpu.pipeline_mode<synchronous>, transform_indices = @transform_2, window_bounds = array<i64: 64, 1>}, {transform_indices = @transform_3, window_bounds = array<i64: 1, 64, 32>}]} {
    %c0 = arith.constant 0 : index
    %c0_0 = arith.constant 0 : index
    %c0_1 = arith.constant 0 : index
    %0 = vector.load %arg2[%c0, %c0_0, %c0_1] : memref<1x64x56xbf16, #tpu.memory_space<vmem>>, vector<1x64x50xbf16>
    %1 = vector.shape_cast %0 : vector<1x64x50xbf16> to vector<64x50xbf16>
    %2 = vector.extract_strided_slice %1 {offsets = [0, 0], sizes = [64, 32], strides = [1, 1]} : vector<64x50xbf16> to vector<64x32xbf16>
    %3 = vector.extract_strided_slice %1 {offsets = [0, 1], sizes = [64, 32], strides = [1, 1]} : vector<64x50xbf16> to vector<64x32xbf16>
    %4 = vector.extract_strided_slice %1 {offsets = [0, 2], sizes = [64, 32], strides = [1, 1]} : vector<64x50xbf16> to vector<64x32xbf16>
    %5 = vector.extract_strided_slice %1 {offsets = [0, 8], sizes = [64, 32], strides = [1, 1]} : vector<64x50xbf16> to vector<64x32xbf16>
    %6 = vector.extract_strided_slice %1 {offsets = [0, 9], sizes = [64, 32], strides = [1, 1]} : vector<64x50xbf16> to vector<64x32xbf16>
    %7 = vector.extract_strided_slice %1 {offsets = [0, 10], sizes = [64, 32], strides = [1, 1]} : vector<64x50xbf16> to vector<64x32xbf16>
    %8 = vector.extract_strided_slice %1 {offsets = [0, 16], sizes = [64, 32], strides = [1, 1]} : vector<64x50xbf16> to vector<64x32xbf16>
    %9 = vector.extract_strided_slice %1 {offsets = [0, 17], sizes = [64, 32], strides = [1, 1]} : vector<64x50xbf16> to vector<64x32xbf16>
    %10 = vector.extract_strided_slice %1 {offsets = [0, 18], sizes = [64, 32], strides = [1, 1]} : vector<64x50xbf16> to vector<64x32xbf16>
    %11 = tpu.concatenate %2, %3, %4, %5, %6, %7, %8, %9, %10 in 0 : vector<64x32xbf16>, vector<64x32xbf16>, vector<64x32xbf16>, vector<64x32xbf16>, vector<64x32xbf16>, vector<64x32xbf16>, vector<64x32xbf16>, vector<64x32xbf16>, vector<64x32xbf16> -> vector<576x32xbf16>
    %c0_2 = arith.constant 0 : index
    %c0_3 = arith.constant 0 : index
    %12 = vector.load %arg3[%c0_2, %c0_3] : memref<64x576xbf16, #tpu.memory_space<vmem>>, vector<64x576xbf16>
    %cst = arith.constant dense<0.000000e+00> : vector<64x32xf32>
    %13 = tpu.matmul %12, %11, %cst {dimension_numbers = #tpu.dot_dimension_numbers<[1], [0], [0], [1], [0, 0, 1, 1], [], []>} : vector<64x576xbf16>, vector<576x32xbf16>, vector<64x32xf32> -> vector<64x32xf32>
    %c0_4 = arith.constant 0 : index
    %c0_5 = arith.constant 0 : index
    %14 = vector.load %arg4[%c0_4, %c0_5] : memref<64x1xf32, #tpu.memory_space<vmem>>, vector<64x1xf32>
    %15 = vector.broadcast %14 : vector<64x1xf32> to vector<64x32xf32>
    %16 = arith.addf %13, %15 : vector<64x32xf32>
    %cst_6 = arith.constant 0.000000e+00 : f32
    %17 = vector.broadcast %cst_6 : f32 to vector<64x32xf32>
    %18 = arith.maximumf %16, %17 : vector<64x32xf32>
    %19 = arith.truncf %18 : vector<64x32xf32> to vector<64x32xbf16>
    %c0_7 = arith.constant 0 : index
    %c0_8 = arith.constant 0 : index
    %c0_9 = arith.constant 0 : index
    %20 = vector.load %arg5[%c0_7, %c0_8, %c0_9] : memref<1x64x32xbf16, #tpu.memory_space<vmem>>, vector<1x64x32xbf16>
    %21 = vector.shape_cast %20 : vector<1x64x32xbf16> to vector<64x32xbf16>
    %22 = vector.shape_cast %19 : vector<64x32xbf16> to vector<1x64x32xbf16>
    tpu.vector_store %arg5[%c0_7, %c0_8, %c0_9], %22 {strides = array<i32>} : memref<1x64x32xbf16, #tpu.memory_space<vmem>>, vector<1x64x32xbf16>,
    return
  }
  func.func @transform_0(%arg0: i32, %arg1: i32) -> (i32, i32, i32) {
    %c0_i32 = arith.constant 0 : i32
    %c0_i32_0 = arith.constant 0 : i32
    %c0_i32_1 = arith.constant 0 : i32
    return %arg0, %c0_i32, %c0_i32_0 : i32, i32, i32
  }
  func.func @transform_1(%arg0: i32, %arg1: i32) -> (i32, i32) {
    %c0_i32 = arith.constant 0 : i32
    %c0_i32_0 = arith.constant 0 : i32
    %c0_i32_1 = arith.constant 0 : i32
    return %c0_i32, %c0_i32_0 : i32, i32
  }
  func.func @transform_2(%arg0: i32, %arg1: i32) -> (i32, i32) {
    %c0_i32 = arith.constant 0 : i32
    %c0_i32_0 = arith.constant 0 : i32
    %c0_i32_1 = arith.constant 0 : i32
    return %c0_i32, %c0_i32_0 : i32, i32
  }
  func.func @transform_3(%arg0: i32, %arg1: i32) -> (i32, i32, i32) {
    %c0_i32 = arith.constant 0 : i32
    %c0_i32_0 = arith.constant 0 : i32
    return %arg0, %c0_i32, %arg1 : i32, i32, i32
  }
}

module attributes {stable_mosaic.version = 11 : i64} {
  func.func @_conv_kernel(%arg0: i32, %arg1: i32, %arg2: memref<1x64x56xbf16, #tpu.memory_space<vmem>>, %arg3: memref<64x576xbf16, #tpu.memory_space<vmem>>, %arg4: memref<64x1xf32, #tpu.memory_space<vmem>>, %arg5: memref<1x64x32xbf16, #tpu.memory_space<vmem>>, %arg6: memref<1x64x32xbf16, #tpu.memory_space<vmem>>) attributes {dimension_semantics = [#tpu.dimension_semantics<parallel>, #tpu.dimension_semantics<parallel>], iteration_bounds = array<i64: 2, 1>, scalar_prefetch = 0 : i64, scratch_operands = 0 : i64, tpu.core_type = #tpu.core_type<tc>, window_params = [{transform_indices = @transform_0, window_bounds = array<i64: 1, 64, 56>}, {pipeline_mode = #tpu.pipeline_mode<synchronous>, transform_indices = @transform_1, window_bounds = array<i64: 64, 576>}, {pipeline_mode = #tpu.pipeline_mode<synchronous>, transform_indices = @transform_2, window_bounds = array<i64: 64, 1>}, {transform_indices = @transform_3, window_bounds = array<i64: 1, 64, 32>}, {transform_indices = @transform_4, window_bounds = array<i64: 1, 64, 32>}]} {
    %c0 = arith.constant 0 : index
    %c0_0 = arith.constant 0 : index
    %c0_1 = arith.constant 0 : index
    %0 = vector.load %arg2[%c0, %c0_0, %c0_1] : memref<1x64x56xbf16, #tpu.memory_space<vmem>>, vector<1x64x50xbf16>
    %1 = vector.shape_cast %0 : vector<1x64x50xbf16> to vector<64x50xbf16>
    %2 = vector.extract_strided_slice %1 {offsets = [0, 0], sizes = [64, 32], strides = [1, 1]} : vector<64x50xbf16> to vector<64x32xbf16>
    %3 = vector.extract_strided_slice %1 {offsets = [0, 1], sizes = [64, 32], strides = [1, 1]} : vector<64x50xbf16> to vector<64x32xbf16>
    %4 = vector.extract_strided_slice %1 {offsets = [0, 2], sizes = [64, 32], strides = [1, 1]} : vector<64x50xbf16> to vector<64x32xbf16>
    %5 = vector.extract_strided_slice %1 {offsets = [0, 8], sizes = [64, 32], strides = [1, 1]} : vector<64x50xbf16> to vector<64x32xbf16>
    %6 = vector.extract_strided_slice %1 {offsets = [0, 9], sizes = [64, 32], strides = [1, 1]} : vector<64x50xbf16> to vector<64x32xbf16>
    %7 = vector.extract_strided_slice %1 {offsets = [0, 10], sizes = [64, 32], strides = [1, 1]} : vector<64x50xbf16> to vector<64x32xbf16>
    %8 = vector.extract_strided_slice %1 {offsets = [0, 16], sizes = [64, 32], strides = [1, 1]} : vector<64x50xbf16> to vector<64x32xbf16>
    %9 = vector.extract_strided_slice %1 {offsets = [0, 17], sizes = [64, 32], strides = [1, 1]} : vector<64x50xbf16> to vector<64x32xbf16>
    %10 = vector.extract_strided_slice %1 {offsets = [0, 18], sizes = [64, 32], strides = [1, 1]} : vector<64x50xbf16> to vector<64x32xbf16>
    %11 = tpu.concatenate %2, %3, %4, %5, %6, %7, %8, %9, %10 in 0 : vector<64x32xbf16>, vector<64x32xbf16>, vector<64x32xbf16>, vector<64x32xbf16>, vector<64x32xbf16>, vector<64x32xbf16>, vector<64x32xbf16>, vector<64x32xbf16>, vector<64x32xbf16> -> vector<576x32xbf16>
    %c0_2 = arith.constant 0 : index
    %c0_3 = arith.constant 0 : index
    %12 = vector.load %arg3[%c0_2, %c0_3] : memref<64x576xbf16, #tpu.memory_space<vmem>>, vector<64x576xbf16>
    %cst = arith.constant dense<0.000000e+00> : vector<64x32xf32>
    %13 = tpu.matmul %12, %11, %cst {dimension_numbers = #tpu.dot_dimension_numbers<[1], [0], [0], [1], [0, 0, 1, 1], [], []>} : vector<64x576xbf16>, vector<576x32xbf16>, vector<64x32xf32> -> vector<64x32xf32>
    %c0_4 = arith.constant 0 : index
    %c0_5 = arith.constant 0 : index
    %14 = vector.load %arg4[%c0_4, %c0_5] : memref<64x1xf32, #tpu.memory_space<vmem>>, vector<64x1xf32>
    %15 = vector.broadcast %14 : vector<64x1xf32> to vector<64x32xf32>
    %16 = arith.addf %13, %15 : vector<64x32xf32>
    %c0_6 = arith.constant 0 : index
    %c0_7 = arith.constant 0 : index
    %c0_8 = arith.constant 0 : index
    %17 = vector.load %arg5[%c0_6, %c0_7, %c0_8] : memref<1x64x32xbf16, #tpu.memory_space<vmem>>, vector<1x64x32xbf16>
    %18 = vector.shape_cast %17 : vector<1x64x32xbf16> to vector<64x32xbf16>
    %19 = arith.extf %18 : vector<64x32xbf16> to vector<64x32xf32>
    %20 = arith.addf %16, %19 : vector<64x32xf32>
    %cst_9 = arith.constant 0.000000e+00 : f32
    %21 = vector.broadcast %cst_9 : f32 to vector<64x32xf32>
    %22 = arith.maximumf %20, %21 : vector<64x32xf32>
    %23 = arith.truncf %22 : vector<64x32xf32> to vector<64x32xbf16>
    %c0_10 = arith.constant 0 : index
    %c0_11 = arith.constant 0 : index
    %c0_12 = arith.constant 0 : index
    %24 = vector.load %arg6[%c0_10, %c0_11, %c0_12] : memref<1x64x32xbf16, #tpu.memory_space<vmem>>, vector<1x64x32xbf16>
    %25 = vector.shape_cast %24 : vector<1x64x32xbf16> to vector<64x32xbf16>
    %26 = vector.shape_cast %23 : vector<64x32xbf16> to vector<1x64x32xbf16>
    tpu.vector_store %arg6[%c0_10, %c0_11, %c0_12], %26 {strides = array<i32>} : memref<1x64x32xbf16, #tpu.memory_space<vmem>>, vector<1x64x32xbf16>,
    return
  }
  func.func @transform_0(%arg0: i32, %arg1: i32) -> (i32, i32, i32) {
    %c0_i32 = arith.constant 0 : i32
    %c0_i32_0 = arith.constant 0 : i32
    %c0_i32_1 = arith.constant 0 : i32
    return %arg0, %c0_i32, %c0_i32_0 : i32, i32, i32
  }
  func.func @transform_1(%arg0: i32, %arg1: i32) -> (i32, i32) {
    %c0_i32 = arith.constant 0 : i32
    %c0_i32_0 = arith.constant 0 : i32
    %c0_i32_1 = arith.constant 0 : i32
    return %c0_i32, %c0_i32_0 : i32, i32
  }
  func.func @transform_2(%arg0: i32, %arg1: i32) -> (i32, i32) {
    %c0_i32 = arith.constant 0 : i32
    %c0_i32_0 = arith.constant 0 : i32
    %c0_i32_1 = arith.constant 0 : i32
    return %c0_i32, %c0_i32_0 : i32, i32
  }
  func.func @transform_3(%arg0: i32, %arg1: i32) -> (i32, i32, i32) {
    %c0_i32 = arith.constant 0 : i32
    %c0_i32_0 = arith.constant 0 : i32
    return %arg0, %c0_i32, %arg1 : i32, i32, i32
  }
  func.func @transform_4(%arg0: i32, %arg1: i32) -> (i32, i32, i32) {
    %c0_i32 = arith.constant 0 : i32
    %c0_i32_0 = arith.constant 0 : i32
    return %arg0, %c0_i32, %arg1 : i32, i32, i32
  }
}

module attributes {stable_mosaic.version = 11 : i64} {
  func.func @_conv_kernel(%arg0: i32, %arg1: i32, %arg2: memref<1x256x32xbf16, #tpu.memory_space<vmem>>, %arg3: memref<128x1024xbf16, #tpu.memory_space<vmem>>, %arg4: memref<128x1xf32, #tpu.memory_space<vmem>>, %arg5: memref<1x128x16xbf16, #tpu.memory_space<vmem>>) attributes {dimension_semantics = [#tpu.dimension_semantics<parallel>, #tpu.dimension_semantics<parallel>], iteration_bounds = array<i64: 2, 1>, scalar_prefetch = 0 : i64, scratch_operands = 0 : i64, tpu.core_type = #tpu.core_type<tc>, window_params = [{transform_indices = @transform_0, window_bounds = array<i64: 1, 256, 32>}, {pipeline_mode = #tpu.pipeline_mode<synchronous>, transform_indices = @transform_1, window_bounds = array<i64: 128, 1024>}, {pipeline_mode = #tpu.pipeline_mode<synchronous>, transform_indices = @transform_2, window_bounds = array<i64: 128, 1>}, {transform_indices = @transform_3, window_bounds = array<i64: 1, 128, 16>}]} {
    %c0 = arith.constant 0 : index
    %c0_0 = arith.constant 0 : index
    %c0_1 = arith.constant 0 : index
    %0 = vector.load %arg2[%c0, %c0_0, %c0_1] : memref<1x256x32xbf16, #tpu.memory_space<vmem>>, vector<1x256x25xbf16>
    %1 = vector.shape_cast %0 : vector<1x256x25xbf16> to vector<256x25xbf16>
    %2 = vector.extract_strided_slice %1 {offsets = [0, 0], sizes = [256, 16], strides = [1, 1]} : vector<256x25xbf16> to vector<256x16xbf16>
    %3 = vector.extract_strided_slice %1 {offsets = [0, 1], sizes = [256, 16], strides = [1, 1]} : vector<256x25xbf16> to vector<256x16xbf16>
    %4 = vector.extract_strided_slice %1 {offsets = [0, 8], sizes = [256, 16], strides = [1, 1]} : vector<256x25xbf16> to vector<256x16xbf16>
    %5 = vector.extract_strided_slice %1 {offsets = [0, 9], sizes = [256, 16], strides = [1, 1]} : vector<256x25xbf16> to vector<256x16xbf16>
    %6 = tpu.concatenate %2, %3, %4, %5 in 0 : vector<256x16xbf16>, vector<256x16xbf16>, vector<256x16xbf16>, vector<256x16xbf16> -> vector<1024x16xbf16>
    %c0_2 = arith.constant 0 : index
    %c0_3 = arith.constant 0 : index
    %7 = vector.load %arg3[%c0_2, %c0_3] : memref<128x1024xbf16, #tpu.memory_space<vmem>>, vector<128x1024xbf16>
    %cst = arith.constant dense<0.000000e+00> : vector<128x16xf32>
    %8 = tpu.matmul %7, %6, %cst {dimension_numbers = #tpu.dot_dimension_numbers<[1], [0], [0], [1], [0, 0, 1, 1], [], []>} : vector<128x1024xbf16>, vector<1024x16xbf16>, vector<128x16xf32> -> vector<128x16xf32>
    %c0_4 = arith.constant 0 : index
    %c0_5 = arith.constant 0 : index
    %9 = vector.load %arg4[%c0_4, %c0_5] : memref<128x1xf32, #tpu.memory_space<vmem>>, vector<128x1xf32>
    %10 = vector.broadcast %9 : vector<128x1xf32> to vector<128x16xf32>
    %11 = arith.addf %8, %10 : vector<128x16xf32>
    %cst_6 = arith.constant 0.000000e+00 : f32
    %12 = vector.broadcast %cst_6 : f32 to vector<128x16xf32>
    %13 = arith.maximumf %11, %12 : vector<128x16xf32>
    %14 = arith.truncf %13 : vector<128x16xf32> to vector<128x16xbf16>
    %c0_7 = arith.constant 0 : index
    %c0_8 = arith.constant 0 : index
    %c0_9 = arith.constant 0 : index
    %15 = vector.load %arg5[%c0_7, %c0_8, %c0_9] : memref<1x128x16xbf16, #tpu.memory_space<vmem>>, vector<1x128x16xbf16>
    %16 = vector.shape_cast %15 : vector<1x128x16xbf16> to vector<128x16xbf16>
    %17 = vector.shape_cast %14 : vector<128x16xbf16> to vector<1x128x16xbf16>
    tpu.vector_store %arg5[%c0_7, %c0_8, %c0_9], %17 {strides = array<i32>} : memref<1x128x16xbf16, #tpu.memory_space<vmem>>, vector<1x128x16xbf16>,
    return
  }
  func.func @transform_0(%arg0: i32, %arg1: i32) -> (i32, i32, i32) {
    %c0_i32 = arith.constant 0 : i32
    %c0_i32_0 = arith.constant 0 : i32
    %c0_i32_1 = arith.constant 0 : i32
    return %arg0, %c0_i32, %c0_i32_0 : i32, i32, i32
  }
  func.func @transform_1(%arg0: i32, %arg1: i32) -> (i32, i32) {
    %c0_i32 = arith.constant 0 : i32
    %c0_i32_0 = arith.constant 0 : i32
    %c0_i32_1 = arith.constant 0 : i32
    return %c0_i32, %c0_i32_0 : i32, i32
  }
  func.func @transform_2(%arg0: i32, %arg1: i32) -> (i32, i32) {
    %c0_i32 = arith.constant 0 : i32
    %c0_i32_0 = arith.constant 0 : i32
    %c0_i32_1 = arith.constant 0 : i32
    return %c0_i32, %c0_i32_0 : i32, i32
  }
  func.func @transform_3(%arg0: i32, %arg1: i32) -> (i32, i32, i32) {
    %c0_i32 = arith.constant 0 : i32
    %c0_i32_0 = arith.constant 0 : i32
    return %arg0, %c0_i32, %arg1 : i32, i32, i32
  }
}

module attributes {stable_mosaic.version = 11 : i64} {
  func.func @_conv_kernel(%arg0: i32, %arg1: i32, %arg2: memref<1x64x16xbf16, #tpu.memory_space<vmem>>, %arg3: memref<128x64xbf16, #tpu.memory_space<vmem>>, %arg4: memref<128x1xf32, #tpu.memory_space<vmem>>, %arg5: memref<1x128x16xbf16, #tpu.memory_space<vmem>>) attributes {dimension_semantics = [#tpu.dimension_semantics<parallel>, #tpu.dimension_semantics<parallel>], iteration_bounds = array<i64: 2, 1>, scalar_prefetch = 0 : i64, scratch_operands = 0 : i64, tpu.core_type = #tpu.core_type<tc>, window_params = [{transform_indices = @transform_0, window_bounds = array<i64: 1, 64, 16>}, {pipeline_mode = #tpu.pipeline_mode<synchronous>, transform_indices = @transform_1, window_bounds = array<i64: 128, 64>}, {pipeline_mode = #tpu.pipeline_mode<synchronous>, transform_indices = @transform_2, window_bounds = array<i64: 128, 1>}, {transform_indices = @transform_3, window_bounds = array<i64: 1, 128, 16>}]} {
    %c0 = arith.constant 0 : index
    %c0_0 = arith.constant 0 : index
    %c0_1 = arith.constant 0 : index
    %0 = vector.load %arg2[%c0, %c0_0, %c0_1] : memref<1x64x16xbf16, #tpu.memory_space<vmem>>, vector<1x64x16xbf16>
    %1 = vector.shape_cast %0 : vector<1x64x16xbf16> to vector<64x16xbf16>
    %c0_2 = arith.constant 0 : index
    %c0_3 = arith.constant 0 : index
    %2 = vector.load %arg3[%c0_2, %c0_3] : memref<128x64xbf16, #tpu.memory_space<vmem>>, vector<128x64xbf16>
    %cst = arith.constant dense<0.000000e+00> : vector<128x16xf32>
    %3 = tpu.matmul %2, %1, %cst {dimension_numbers = #tpu.dot_dimension_numbers<[1], [0], [0], [1], [0, 0, 1, 1], [], []>} : vector<128x64xbf16>, vector<64x16xbf16>, vector<128x16xf32> -> vector<128x16xf32>
    %c0_4 = arith.constant 0 : index
    %c0_5 = arith.constant 0 : index
    %4 = vector.load %arg4[%c0_4, %c0_5] : memref<128x1xf32, #tpu.memory_space<vmem>>, vector<128x1xf32>
    %5 = vector.broadcast %4 : vector<128x1xf32> to vector<128x16xf32>
    %6 = arith.addf %3, %5 : vector<128x16xf32>
    %7 = arith.truncf %6 : vector<128x16xf32> to vector<128x16xbf16>
    %c0_6 = arith.constant 0 : index
    %c0_7 = arith.constant 0 : index
    %c0_8 = arith.constant 0 : index
    %8 = vector.load %arg5[%c0_6, %c0_7, %c0_8] : memref<1x128x16xbf16, #tpu.memory_space<vmem>>, vector<1x128x16xbf16>
    %9 = vector.shape_cast %8 : vector<1x128x16xbf16> to vector<128x16xbf16>
    %10 = vector.shape_cast %7 : vector<128x16xbf16> to vector<1x128x16xbf16>
    tpu.vector_store %arg5[%c0_6, %c0_7, %c0_8], %10 {strides = array<i32>} : memref<1x128x16xbf16, #tpu.memory_space<vmem>>, vector<1x128x16xbf16>,
    return
  }
  func.func @transform_0(%arg0: i32, %arg1: i32) -> (i32, i32, i32) {
    %c0_i32 = arith.constant 0 : i32
    %c0_i32_0 = arith.constant 0 : i32
    %c0_i32_1 = arith.constant 0 : i32
    return %arg0, %c0_i32, %c0_i32_0 : i32, i32, i32
  }
  func.func @transform_1(%arg0: i32, %arg1: i32) -> (i32, i32) {
    %c0_i32 = arith.constant 0 : i32
    %c0_i32_0 = arith.constant 0 : i32
    %c0_i32_1 = arith.constant 0 : i32
    return %c0_i32, %c0_i32_0 : i32, i32
  }
  func.func @transform_2(%arg0: i32, %arg1: i32) -> (i32, i32) {
    %c0_i32 = arith.constant 0 : i32
    %c0_i32_0 = arith.constant 0 : i32
    %c0_i32_1 = arith.constant 0 : i32
    return %c0_i32, %c0_i32_0 : i32, i32
  }
  func.func @transform_3(%arg0: i32, %arg1: i32) -> (i32, i32, i32) {
    %c0_i32 = arith.constant 0 : i32
    %c0_i32_0 = arith.constant 0 : i32
    return %arg0, %c0_i32, %arg1 : i32, i32, i32
  }
}

module attributes {stable_mosaic.version = 11 : i64} {
  func.func @_conv_kernel(%arg0: i32, %arg1: i32, %arg2: memref<1x128x40xbf16, #tpu.memory_space<vmem>>, %arg3: memref<128x1152xbf16, #tpu.memory_space<vmem>>, %arg4: memref<128x1xf32, #tpu.memory_space<vmem>>, %arg5: memref<1x128x16xbf16, #tpu.memory_space<vmem>>) attributes {dimension_semantics = [#tpu.dimension_semantics<parallel>, #tpu.dimension_semantics<parallel>], iteration_bounds = array<i64: 2, 1>, scalar_prefetch = 0 : i64, scratch_operands = 0 : i64, tpu.core_type = #tpu.core_type<tc>, window_params = [{transform_indices = @transform_0, window_bounds = array<i64: 1, 128, 40>}, {pipeline_mode = #tpu.pipeline_mode<synchronous>, transform_indices = @transform_1, window_bounds = array<i64: 128, 1152>}, {pipeline_mode = #tpu.pipeline_mode<synchronous>, transform_indices = @transform_2, window_bounds = array<i64: 128, 1>}, {transform_indices = @transform_3, window_bounds = array<i64: 1, 128, 16>}]} {
    %c0 = arith.constant 0 : index
    %c0_0 = arith.constant 0 : index
    %c0_1 = arith.constant 0 : index
    %0 = vector.load %arg2[%c0, %c0_0, %c0_1] : memref<1x128x40xbf16, #tpu.memory_space<vmem>>, vector<1x128x34xbf16>
    %1 = vector.shape_cast %0 : vector<1x128x34xbf16> to vector<128x34xbf16>
    %2 = vector.extract_strided_slice %1 {offsets = [0, 0], sizes = [128, 16], strides = [1, 1]} : vector<128x34xbf16> to vector<128x16xbf16>
    %3 = vector.extract_strided_slice %1 {offsets = [0, 1], sizes = [128, 16], strides = [1, 1]} : vector<128x34xbf16> to vector<128x16xbf16>
    %4 = vector.extract_strided_slice %1 {offsets = [0, 2], sizes = [128, 16], strides = [1, 1]} : vector<128x34xbf16> to vector<128x16xbf16>
    %5 = vector.extract_strided_slice %1 {offsets = [0, 8], sizes = [128, 16], strides = [1, 1]} : vector<128x34xbf16> to vector<128x16xbf16>
    %6 = vector.extract_strided_slice %1 {offsets = [0, 9], sizes = [128, 16], strides = [1, 1]} : vector<128x34xbf16> to vector<128x16xbf16>
    %7 = vector.extract_strided_slice %1 {offsets = [0, 10], sizes = [128, 16], strides = [1, 1]} : vector<128x34xbf16> to vector<128x16xbf16>
    %8 = vector.extract_strided_slice %1 {offsets = [0, 16], sizes = [128, 16], strides = [1, 1]} : vector<128x34xbf16> to vector<128x16xbf16>
    %9 = vector.extract_strided_slice %1 {offsets = [0, 17], sizes = [128, 16], strides = [1, 1]} : vector<128x34xbf16> to vector<128x16xbf16>
    %10 = vector.extract_strided_slice %1 {offsets = [0, 18], sizes = [128, 16], strides = [1, 1]} : vector<128x34xbf16> to vector<128x16xbf16>
    %11 = tpu.concatenate %2, %3, %4, %5, %6, %7, %8, %9, %10 in 0 : vector<128x16xbf16>, vector<128x16xbf16>, vector<128x16xbf16>, vector<128x16xbf16>, vector<128x16xbf16>, vector<128x16xbf16>, vector<128x16xbf16>, vector<128x16xbf16>, vector<128x16xbf16> -> vector<1152x16xbf16>
    %c0_2 = arith.constant 0 : index
    %c0_3 = arith.constant 0 : index
    %12 = vector.load %arg3[%c0_2, %c0_3] : memref<128x1152xbf16, #tpu.memory_space<vmem>>, vector<128x1152xbf16>
    %cst = arith.constant dense<0.000000e+00> : vector<128x16xf32>
    %13 = tpu.matmul %12, %11, %cst {dimension_numbers = #tpu.dot_dimension_numbers<[1], [0], [0], [1], [0, 0, 1, 1], [], []>} : vector<128x1152xbf16>, vector<1152x16xbf16>, vector<128x16xf32> -> vector<128x16xf32>
    %c0_4 = arith.constant 0 : index
    %c0_5 = arith.constant 0 : index
    %14 = vector.load %arg4[%c0_4, %c0_5] : memref<128x1xf32, #tpu.memory_space<vmem>>, vector<128x1xf32>
    %15 = vector.broadcast %14 : vector<128x1xf32> to vector<128x16xf32>
    %16 = arith.addf %13, %15 : vector<128x16xf32>
    %cst_6 = arith.constant 0.000000e+00 : f32
    %17 = vector.broadcast %cst_6 : f32 to vector<128x16xf32>
    %18 = arith.maximumf %16, %17 : vector<128x16xf32>
    %19 = arith.truncf %18 : vector<128x16xf32> to vector<128x16xbf16>
    %c0_7 = arith.constant 0 : index
    %c0_8 = arith.constant 0 : index
    %c0_9 = arith.constant 0 : index
    %20 = vector.load %arg5[%c0_7, %c0_8, %c0_9] : memref<1x128x16xbf16, #tpu.memory_space<vmem>>, vector<1x128x16xbf16>
    %21 = vector.shape_cast %20 : vector<1x128x16xbf16> to vector<128x16xbf16>
    %22 = vector.shape_cast %19 : vector<128x16xbf16> to vector<1x128x16xbf16>
    tpu.vector_store %arg5[%c0_7, %c0_8, %c0_9], %22 {strides = array<i32>} : memref<1x128x16xbf16, #tpu.memory_space<vmem>>, vector<1x128x16xbf16>,
    return
  }
  func.func @transform_0(%arg0: i32, %arg1: i32) -> (i32, i32, i32) {
    %c0_i32 = arith.constant 0 : i32
    %c0_i32_0 = arith.constant 0 : i32
    %c0_i32_1 = arith.constant 0 : i32
    return %arg0, %c0_i32, %c0_i32_0 : i32, i32, i32
  }
  func.func @transform_1(%arg0: i32, %arg1: i32) -> (i32, i32) {
    %c0_i32 = arith.constant 0 : i32
    %c0_i32_0 = arith.constant 0 : i32
    %c0_i32_1 = arith.constant 0 : i32
    return %c0_i32, %c0_i32_0 : i32, i32
  }
  func.func @transform_2(%arg0: i32, %arg1: i32) -> (i32, i32) {
    %c0_i32 = arith.constant 0 : i32
    %c0_i32_0 = arith.constant 0 : i32
    %c0_i32_1 = arith.constant 0 : i32
    return %c0_i32, %c0_i32_0 : i32, i32
  }
  func.func @transform_3(%arg0: i32, %arg1: i32) -> (i32, i32, i32) {
    %c0_i32 = arith.constant 0 : i32
    %c0_i32_0 = arith.constant 0 : i32
    return %arg0, %c0_i32, %arg1 : i32, i32, i32
  }
}

module attributes {stable_mosaic.version = 11 : i64} {
  func.func @_conv_kernel(%arg0: i32, %arg1: i32, %arg2: memref<1x128x40xbf16, #tpu.memory_space<vmem>>, %arg3: memref<128x1152xbf16, #tpu.memory_space<vmem>>, %arg4: memref<128x1xf32, #tpu.memory_space<vmem>>, %arg5: memref<1x128x16xbf16, #tpu.memory_space<vmem>>, %arg6: memref<1x128x16xbf16, #tpu.memory_space<vmem>>) attributes {dimension_semantics = [#tpu.dimension_semantics<parallel>, #tpu.dimension_semantics<parallel>], iteration_bounds = array<i64: 2, 1>, scalar_prefetch = 0 : i64, scratch_operands = 0 : i64, tpu.core_type = #tpu.core_type<tc>, window_params = [{transform_indices = @transform_0, window_bounds = array<i64: 1, 128, 40>}, {pipeline_mode = #tpu.pipeline_mode<synchronous>, transform_indices = @transform_1, window_bounds = array<i64: 128, 1152>}, {pipeline_mode = #tpu.pipeline_mode<synchronous>, transform_indices = @transform_2, window_bounds = array<i64: 128, 1>}, {transform_indices = @transform_3, window_bounds = array<i64: 1, 128, 16>}, {transform_indices = @transform_4, window_bounds = array<i64: 1, 128, 16>}]} {
    %c0 = arith.constant 0 : index
    %c0_0 = arith.constant 0 : index
    %c0_1 = arith.constant 0 : index
    %0 = vector.load %arg2[%c0, %c0_0, %c0_1] : memref<1x128x40xbf16, #tpu.memory_space<vmem>>, vector<1x128x34xbf16>
    %1 = vector.shape_cast %0 : vector<1x128x34xbf16> to vector<128x34xbf16>
    %2 = vector.extract_strided_slice %1 {offsets = [0, 0], sizes = [128, 16], strides = [1, 1]} : vector<128x34xbf16> to vector<128x16xbf16>
    %3 = vector.extract_strided_slice %1 {offsets = [0, 1], sizes = [128, 16], strides = [1, 1]} : vector<128x34xbf16> to vector<128x16xbf16>
    %4 = vector.extract_strided_slice %1 {offsets = [0, 2], sizes = [128, 16], strides = [1, 1]} : vector<128x34xbf16> to vector<128x16xbf16>
    %5 = vector.extract_strided_slice %1 {offsets = [0, 8], sizes = [128, 16], strides = [1, 1]} : vector<128x34xbf16> to vector<128x16xbf16>
    %6 = vector.extract_strided_slice %1 {offsets = [0, 9], sizes = [128, 16], strides = [1, 1]} : vector<128x34xbf16> to vector<128x16xbf16>
    %7 = vector.extract_strided_slice %1 {offsets = [0, 10], sizes = [128, 16], strides = [1, 1]} : vector<128x34xbf16> to vector<128x16xbf16>
    %8 = vector.extract_strided_slice %1 {offsets = [0, 16], sizes = [128, 16], strides = [1, 1]} : vector<128x34xbf16> to vector<128x16xbf16>
    %9 = vector.extract_strided_slice %1 {offsets = [0, 17], sizes = [128, 16], strides = [1, 1]} : vector<128x34xbf16> to vector<128x16xbf16>
    %10 = vector.extract_strided_slice %1 {offsets = [0, 18], sizes = [128, 16], strides = [1, 1]} : vector<128x34xbf16> to vector<128x16xbf16>
    %11 = tpu.concatenate %2, %3, %4, %5, %6, %7, %8, %9, %10 in 0 : vector<128x16xbf16>, vector<128x16xbf16>, vector<128x16xbf16>, vector<128x16xbf16>, vector<128x16xbf16>, vector<128x16xbf16>, vector<128x16xbf16>, vector<128x16xbf16>, vector<128x16xbf16> -> vector<1152x16xbf16>
    %c0_2 = arith.constant 0 : index
    %c0_3 = arith.constant 0 : index
    %12 = vector.load %arg3[%c0_2, %c0_3] : memref<128x1152xbf16, #tpu.memory_space<vmem>>, vector<128x1152xbf16>
    %cst = arith.constant dense<0.000000e+00> : vector<128x16xf32>
    %13 = tpu.matmul %12, %11, %cst {dimension_numbers = #tpu.dot_dimension_numbers<[1], [0], [0], [1], [0, 0, 1, 1], [], []>} : vector<128x1152xbf16>, vector<1152x16xbf16>, vector<128x16xf32> -> vector<128x16xf32>
    %c0_4 = arith.constant 0 : index
    %c0_5 = arith.constant 0 : index
    %14 = vector.load %arg4[%c0_4, %c0_5] : memref<128x1xf32, #tpu.memory_space<vmem>>, vector<128x1xf32>
    %15 = vector.broadcast %14 : vector<128x1xf32> to vector<128x16xf32>
    %16 = arith.addf %13, %15 : vector<128x16xf32>
    %c0_6 = arith.constant 0 : index
    %c0_7 = arith.constant 0 : index
    %c0_8 = arith.constant 0 : index
    %17 = vector.load %arg5[%c0_6, %c0_7, %c0_8] : memref<1x128x16xbf16, #tpu.memory_space<vmem>>, vector<1x128x16xbf16>
    %18 = vector.shape_cast %17 : vector<1x128x16xbf16> to vector<128x16xbf16>
    %19 = arith.extf %18 : vector<128x16xbf16> to vector<128x16xf32>
    %20 = arith.addf %16, %19 : vector<128x16xf32>
    %cst_9 = arith.constant 0.000000e+00 : f32
    %21 = vector.broadcast %cst_9 : f32 to vector<128x16xf32>
    %22 = arith.maximumf %20, %21 : vector<128x16xf32>
    %23 = arith.truncf %22 : vector<128x16xf32> to vector<128x16xbf16>
    %c0_10 = arith.constant 0 : index
    %c0_11 = arith.constant 0 : index
    %c0_12 = arith.constant 0 : index
    %24 = vector.load %arg6[%c0_10, %c0_11, %c0_12] : memref<1x128x16xbf16, #tpu.memory_space<vmem>>, vector<1x128x16xbf16>
    %25 = vector.shape_cast %24 : vector<1x128x16xbf16> to vector<128x16xbf16>
    %26 = vector.shape_cast %23 : vector<128x16xbf16> to vector<1x128x16xbf16>
    tpu.vector_store %arg6[%c0_10, %c0_11, %c0_12], %26 {strides = array<i32>} : memref<1x128x16xbf16, #tpu.memory_space<vmem>>, vector<1x128x16xbf16>,
    return
  }
  func.func @transform_0(%arg0: i32, %arg1: i32) -> (i32, i32, i32) {
    %c0_i32 = arith.constant 0 : i32
    %c0_i32_0 = arith.constant 0 : i32
    %c0_i32_1 = arith.constant 0 : i32
    return %arg0, %c0_i32, %c0_i32_0 : i32, i32, i32
  }
  func.func @transform_1(%arg0: i32, %arg1: i32) -> (i32, i32) {
    %c0_i32 = arith.constant 0 : i32
    %c0_i32_0 = arith.constant 0 : i32
    %c0_i32_1 = arith.constant 0 : i32
    return %c0_i32, %c0_i32_0 : i32, i32
  }
  func.func @transform_2(%arg0: i32, %arg1: i32) -> (i32, i32) {
    %c0_i32 = arith.constant 0 : i32
    %c0_i32_0 = arith.constant 0 : i32
    %c0_i32_1 = arith.constant 0 : i32
    return %c0_i32, %c0_i32_0 : i32, i32
  }
  func.func @transform_3(%arg0: i32, %arg1: i32) -> (i32, i32, i32) {
    %c0_i32 = arith.constant 0 : i32
    %c0_i32_0 = arith.constant 0 : i32
    return %arg0, %c0_i32, %arg1 : i32, i32, i32
  }
  func.func @transform_4(%arg0: i32, %arg1: i32) -> (i32, i32, i32) {
    %c0_i32 = arith.constant 0 : i32
    %c0_i32_0 = arith.constant 0 : i32
    return %arg0, %c0_i32, %arg1 : i32, i32, i32
  }
}

</mosaic_0001>

<bundles_post_ra>
// kernel: forward.21
= control target key start
LH: loop header
LB: loop body
LE: loop exit
PB: predicated region body
PF: predicated region fallthrough
CT: control target
= control target key end

     0   :  { %s1094_s12 = smov 0   ;;  %s1096_s13 = smov 0   ;;  %s1608_s0 = inlined_call_operand.vmem [shape: bf16[2,16,1440], index: 0, kind: input, shape index: {}]   ;;  %s1609_s1 = inlined_call_operand.vmem [shape: bf16[16,256], index: 1, kind: input, shape index: {}]   ;;  %s1610_s2 = inlined_call_operand.vmem [shape: f32[16,1], index: 2, kind: input, shape index: {}]   ;;  %s1611_s3 = inlined_call_operand.vmem [shape: bf16[2,16,1280], index: 3, kind: output, shape index: {}]  }
   0x1   :  { %s1098_s14 = smov 0   ;;  %s1100_s15 = smov 0  }
   0x2   :  { %s1102_s16 = smov 0   ;;  %s1104_s17 = smov 0  }
   0x3   :  { %s1106_s18 = smov 0  }
   0x4 LB: > { %s22_s19 = sadd.s32 1, %s1048_s16  ;;  %s25_s20 = sadd.s32 1, %s1052_s17  ;;  %s1056_s18 = sphi %s1106_s18, %s13_s18   ;;  %s1052_s17 = sphi %s1104_s17, %s1618_s17   ;;  %s1048_s16 = sphi %s1102_s16, %s1617_s16   ;;  %s1044_s15 = sphi %s1100_s15, %s1616_s15   ;;  %s1040_s14 = sphi %s1098_s14, %s1615_s14   ;;  %s1036_s13 = sphi %s1096_s13, %s1614_s13   ;;  %s1032_s12 = sphi %s1094_s12, %s1613_s12  }
   0x5   : > { %p23_p0 = scmp.ge.s32.totalorder %s22_s19, 2  ;;  %s871_s21 = sadd.s32 4294967295, %s1056_s18  }
   0x6   : > { %p112_p1 = scmp.ne.s32.totalorder %s1036_s13, %s1032_s12  ;;  %p113_p2 = scmp.eq.s32.totalorder %s871_s21, 3 }
   0x7   : > { %s1620_s19 = smov (%p23_p0, %s22_s19), 0  ;;  %s1622_s20 = smov (!%p23_p0, %s25_s20), %s1052_s17 }
   0x8   : > { %s98_s22 = ssub.s32 %s1048_s16, %s1620_s19  ;;  %p27_p3 = scmp.ge.s32.totalorder %s1622_s20, 2 }
   0x9   : > { %p875_p4 = scmp.ge.s32.totalorder %s1056_s18, 1  ;;  %p1140_p5 = por %p113_p2, %p112_p1 }
   0xa   : > { %p151_p6 = scmp.lt.s32.totalorder %s1056_s18, 5  ;;  %s1624_s20 = smov (%p27_p3, %s1622_s20), 0 }
   0xb   : > { %s97_s24 = ssub.s32 %s1052_s17, %s1624_s20  ;;  %s102_s26 = sadd.s32 1, %s1036_s13 }
   0xc   : > { %p152_p7 = pnand %p875_p4, %p151_p6  ;;  %s99_s25 = sor.u32 %s98_s22, %s97_s24 }
   0xd   : > { %p100_p8 = scmp.eq.s32.totalorder %s99_s25, 0  ;;  %p174_p9 = scmp.lt.s32.totalorder (!%p152_p7), %s1044_s15, 1 }
   0xe   : > { %155 = sbr.rel (%p152_p7) target bundleno = 535 (0x217), region = 32  ;;  %s1058_s10 = smov (!%p152_p7), 127  }
   0xf   : > { %s1151_s27 = scalar_select %p100_p8, %s1036_s13, %s102_s26  }
  0x10   : > { %s180_s28 = smul.u32 (!%p152_p7), 640, %s1040_s14  ;;  %s1059_s11 = smov (!%p152_p7), 126  }
  0x11   : > { %s1060_s21 = smov (!%p152_p7), 85   ;;  %s1061_s22 = smov (!%p152_p7), 125  }
  0x12   : > { %s181_s30 = sshra.s32 (!%p152_p7), %s180_s28, 7  ;;  %s1062_s24 = smov (!%p152_p7), 86  }
  0x13   : > { %s175_s29 = scalar_select %p174_p9, %s1044_s15, 1  ;;  %vm232_vm0 = vcmask 1039360   ;;  %vm255_vm1 = vcmask 1031168   ;;  %vm370_vm2 = vcmask 695296   ;;  %vm554_vm3 = vcmask 39936  }
  0x14   : > { %s877_s5 = sshll.u32 %s181_s30, 2  ;;  %s1063_s25 = smov 5   ;;  %vm347_vm4 = vcmask 703488   ;;  %vm531_vm5 = vcmask 48128   ;;  %vm324_vm6 = vcmask 711680   ;;  %vm508_vm7 = vcmask 56320  }
  0x15   : > { %s926_s4 = smul.u32 96, %s175_s29  ;;  %s1064_s26 = smov 6   ;;  %vm301_vm8 = vcmask 719872   ;;  %vm278_vm9 = vcmask 1022976   ;;  %vm485_vm10 = vcmask 64512   ;;  %vm462_vm11 = vcmask 367616  }
  0x16   : > { %s1065_s28 = smov 87   ;;  %s1066_s29 = smov 88   ;;  %vm439_vm12 = vcmask 375808   ;;  %vm416_vm13 = vcmask 384000   ;;  %vm393_vm14 = vcmask 392192  }
  0x17   : > { %s178_s8 = scalar_lea.vmem %s1608_s0, %s926_s4  ;;  %s1067_s30 = smov 7  }
  0x18   : > { %s184_s9 = scalar_lea.vmem %s178_s8, %s877_s5  ;;  %s1068_s4 = smov 8  }
  0x19   : > { %v896_v0 = vld [vmem:[%s184_s9 + $0x10] sm:$0xf]  ;;  %v922_v1 = vld [vmem:[%s184_s9 + $0x3c] sm:$0xf0]  ;;  %v888_v2 = vld [vmem:[%s184_s9 + $0x8] sm:$0xf] }
  0x1a   : > { %v1159_v3 = vor.u32 %v922_v1, %v896_v0  ;;  %v921_v4 = vld [vmem:[%s184_s9 + $0x34] sm:$0xf0]  ;;  %v880_v5 = vld [vmem:[%s184_s9] sm:$0xf]  ;;  %v920_v6 = vld [vmem:[%s184_s9 + $0x2c] sm:$0xf0] }
  0x1b   : > { %v1161_v7 = vor.u32 %v921_v4, %v888_v2  ;;  %v1163_v8 = vor.u32 %v920_v6, %v880_v5  ;;  %v919_v9 = vld [vmem:[%s184_s9 + $0x14] sm:$0xf]  ;;  %v898_v10 = vld [vmem:[%s184_s9 + $0x40] sm:$0xf0]  ;;  %v918_v11 = vld [vmem:[%s184_s9 + $0xc] sm:$0xf] }
  0x1c   : > { %228 = vrot.lane.b32.xlu2 %v1159_v3, %s1058_s10  ;;  %v890_v12 = vld [vmem:[%s184_s9 + $0x38] sm:$0xf0]  ;;  %v917_v13 = vld [vmem:[%s184_s9 + $0x4] sm:$0xf]  ;;  %v882_v14 = vld [vmem:[%s184_s9 + $0x30] sm:$0xf0]  ;;  %v1168_v15 = vor.u32 %v919_v9, %v898_v10 }
  0x1d   : > { %224 = vrot.lane.b32.xlu1 %v1161_v7, %s1058_s10  ;;  %220 = vrot.lane.b32.xlu0 %v1163_v8, %s1058_s10  ;;  %v1170_v16 = vor.u32 %v918_v11, %v890_v12  ;;  %v1172_v17 = vor.u32 %v917_v13, %v882_v14  ;;  %s1069_s5 = smov 45   ;;  %s1070_s6 = smov 46  }
  0x1e   : > { %s1071_s7 = smov 47   ;;  %s1072_s8 = smov 48  }
  0x24   : > { %230 = vrot.lane.b32.xlu2 %v1168_v15, %s1058_s10 }
  0x25   : > { %226 = vrot.lane.b32.xlu1 %v1170_v16, %s1058_s10  ;;  %222 = vrot.lane.b32.xlu0 %v1172_v17, %s1058_s10 }
  0x2c   : > { %247 = vrot.lane.b32.xlu2 %v1161_v7, %s1059_s11 }
  0x2d   : > { %245 = vrot.lane.b32.xlu1 %v1172_v17, %s1059_s11  ;;  %243 = vrot.lane.b32.xlu0 %v1163_v8, %s1059_s11 }
  0x34   : > { %253 = vrot.lane.b32.xlu2 %v1168_v15, %s1059_s11 }
  0x35   : > { %251 = vrot.lane.b32.xlu1 %v1159_v3, %s1059_s11  ;;  %249 = vrot.lane.b32.xlu0 %v1170_v16, %s1059_s11 }
  0x3c   : > { %360 = vrot.lane.b32.xlu2 %v1172_v17, %s1060_s21 }
  0x3d   : > { %358 = vrot.lane.b32.xlu1 %v1163_v8, %s1060_s21  ;;  %266 = vrot.lane.b32.xlu0 %v1163_v8, %s1061_s22 }
  0x44   : > { %335 = vrot.lane.b32.xlu2 %v1163_v8, %s1062_s24 }
  0x45   : > { %544 = vrot.lane.b32.xlu1 %v1172_v17, %s1063_s25  ;;  %542 = vrot.lane.b32.xlu0 %v1163_v8, %s1063_s25 }
  0x4c   : > { %521 = vrot.lane.b32.xlu2 %v1172_v17, %s1064_s26 }
  0x4d   : > { %519 = vrot.lane.b32.xlu1 %v1163_v8, %s1064_s26  ;;  %337 = vrot.lane.b32.xlu0 %v1172_v17, %s1062_s24 }
  0x54   : > { %362 = vrot.lane.b32.xlu2 %v1161_v7, %s1060_s21 }
  0x55   : > { %314 = vrot.lane.b32.xlu1 %v1172_v17, %s1065_s28  ;;  %312 = vrot.lane.b32.xlu0 %v1163_v8, %s1065_s28 }
  0x5c   : > { %289 = vrot.lane.b32.xlu2 %v1163_v8, %s1066_s29 }
  0x5d   : > { %498 = vrot.lane.b32.xlu1 %v1172_v17, %s1067_s30  ;;  %496 = vrot.lane.b32.xlu0 %v1163_v8, %s1067_s30 }
  0x64   : > { %339 = vrot.lane.b32.xlu2 %v1161_v7, %s1062_s24 }
  0x65   : > { %546 = vrot.lane.b32.xlu1 %v1161_v7, %s1063_s25  ;;  %291 = vrot.lane.b32.xlu0 %v1172_v17, %s1066_s29 }
  0x6c   : > { %268 = vrot.lane.b32.xlu2 %v1172_v17, %s1061_s22 }
  0x6d   : > { %475 = vrot.lane.b32.xlu1 %v1172_v17, %s1068_s4  ;;  %473 = vrot.lane.b32.xlu0 %v1163_v8, %s1068_s4 }
  0x74   : > { %316 = vrot.lane.b32.xlu2 %v1161_v7, %s1065_s28 }
  0x75   : > { %523 = vrot.lane.b32.xlu1 %v1161_v7, %s1064_s26  ;;  %364 = vrot.lane.b32.xlu0 %v1170_v16, %s1060_s21 }
  0x76   : > { %v229_v18 = vpop.permute.xlu2 %228 }
  0x7c   : > { %548 = vrot.lane.b32.xlu2 %v1170_v16, %s1063_s25 }
  0x7d   : > { %452 = vrot.lane.b32.xlu1 %v1172_v17, %s1069_s5  ;;  %450 = vrot.lane.b32.xlu0 %v1163_v8, %s1069_s5 }
  0x7e   : > { %v231_v19 = vpop.permute.xlu2 %230 }
  0x7f   : > { %v1238_v20 = vsel %vm232_vm0, %v229_v18, %v231_v19 }
  0x84   : > { %293 = vrot.lane.b32.xlu2 %v1161_v7, %s1066_s29 }
  0x85   : > { %500 = vrot.lane.b32.xlu1 %v1161_v7, %s1067_s30  ;;  %341 = vrot.lane.b32.xlu0 %v1170_v16, %s1062_s24 }
  0x86   : > { %v248_v21 = vpop.permute.xlu2 %247 }
  0x8c   : > { %525 = vrot.lane.b32.xlu2 %v1170_v16, %s1064_s26 }
  0x8d   : > { %429 = vrot.lane.b32.xlu1 %v1172_v17, %s1070_s6  ;;  %427 = vrot.lane.b32.xlu0 %v1163_v8, %s1070_s6 }
  0x8e   : > { %v254_v22 = vpop.permute.xlu2 %253 }
  0x8f   : > { %v225_v23 = vpop.permute.xlu1 %224  ;;  %v221_v24 = vpop.permute.xlu0 %220 }
  0x94   : > { %270 = vrot.lane.b32.xlu2 %v1161_v7, %s1061_s22 }
  0x95   : > { %477 = vrot.lane.b32.xlu1 %v1161_v7, %s1068_s4  ;;  %318 = vrot.lane.b32.xlu0 %v1170_v16, %s1065_s28 }
  0x96   : > { %v361_v25 = vpop.permute.xlu2 %360 }
  0x97   : > { %v227_v26 = vpop.permute.xlu1 %226  ;;  %v223_v27 = vpop.permute.xlu0 %222 }
  0x98   : > { %v1259_v28 = vsel %vm232_vm0, %v221_v24, %v223_v27  ;;  %v1262_v29 = vsel %vm232_vm0, %v223_v27, %v225_v23  ;;  %v1265_v30 = vsel %vm232_vm0, %v225_v23, %v227_v26  ;;  %v1268_v31 = vsel %vm232_vm0, %v227_v26, %v229_v18 }
  0x9c   : > { %406 = vrot.lane.b32.xlu2 %v1172_v17, %s1071_s7 }
  0x9d   : > { %404 = vrot.lane.b32.xlu1 %v1163_v8, %s1071_s7  ;;  %366 = vrot.lane.b32.xlu0 %v1159_v3, %s1060_s21 }
  0x9e   : > { %v336_v32 = vpop.permute.xlu2 %335 }
  0x9f   : > { %v246_v33 = vpop.permute.xlu1 %245  ;;  %v244_v34 = vpop.permute.xlu0 %243 }
  0xa0   : > { %v1276_v35 = vsel %vm255_vm1, %v244_v34, %v246_v33  ;;  %v1278_v36 = vsel %vm255_vm1, %v246_v33, %v248_v21 }
  0xa4   : > { %454 = vrot.lane.b32.xlu2 %v1161_v7, %s1069_s5 }
  0xa5   : > { %295 = vrot.lane.b32.xlu1 %v1170_v16, %s1066_s29  ;;  %502 = vrot.lane.b32.xlu0 %v1170_v16, %s1067_s30 }
  0xa6   : > { %v1286_v37 = vpop.permute.xlu2 %521 }
  0xa7   : > { %v252_v38 = vpop.permute.xlu1 %251  ;;  %v250_v39 = vpop.permute.xlu0 %249 }
  0xa8   : > { %v1288_v40 = vsel %vm255_vm1, %v248_v21, %v250_v39  ;;  %v1290_v41 = vsel %vm255_vm1, %v250_v39, %v252_v38  ;;  %v1292_v42 = vsel %vm255_vm1, %v252_v38, %v254_v22 }
  0xac   : > { %381 = vrot.lane.b32.xlu2 %v1163_v8, %s1072_s8 }
  0xad   : > { %343 = vrot.lane.b32.xlu1 %v1159_v3, %s1062_s24  ;;  %550 = vrot.lane.b32.xlu0 %v1159_v3, %s1063_s25 }
  0xae   : > { %v1300_v43 = vpop.permute.xlu2 %362 }
  0xaf   : > { %v359_v44 = vpop.permute.xlu1 %358  ;;  %v1302_v45 = vpop.permute.xlu0 %266  ;;  %v372_v46 = vsel %vm370_vm2, %v361_v25, %v1300_v43 }
  0xb0   : > { %v371_v47 = vsel %vm370_vm2, %v359_v44, %v361_v25  ;;  %617 = vmatpush.bf16.msra.mxu2 %v372_v46 }
  0xb1   : > { %589 = vmatpush.bf16.msra.mxu0 %v371_v47 }
  0xb4   : > { %272 = vrot.lane.b32.xlu2 %v1170_v16, %s1061_s22 }
  0xb5   : > { %479 = vrot.lane.b32.xlu1 %v1170_v16, %s1068_s4  ;;  %383 = vrot.lane.b32.xlu0 %v1172_v17, %s1072_s8 }
  0xb6   : > { %v290_v48 = vpop.permute.xlu2 %289 }
  0xb7   : > { %v545_v49 = vpop.permute.xlu1 %544  ;;  %v543_v50 = vpop.permute.xlu0 %542 }
  0xb8   : > { %v555_v51 = vsel %vm554_vm3, %v543_v50, %v545_v49 }
  0xb9   : > { %603 = vmatpush.bf16.msra.mxu1 %v555_v51  ;;  %v904_v51 = vld [vmem:[%s1609_s1] sm:$0xf] }
  0xbc   : > { %527 = vrot.lane.b32.xlu2 %v1159_v3, %s1064_s26 }
  0xbd   : > { %431 = vrot.lane.b32.xlu1 %v1161_v7, %s1070_s6  ;;  %368 = vrot.lane.b32.xlu0 %v1168_v15, %s1060_s21 }
  0xbe   : > { %v1320_v52 = vpop.permute.xlu2 %339 }
  0xbf   : > { %v520_v53 = vpop.permute.xlu1 %519  ;;  %v338_v54 = vpop.permute.xlu0 %337 }
  0xc0   : > { %v348_v55 = vsel %vm347_vm4, %v336_v32, %v338_v54  ;;  %v349_v56 = vsel %vm347_vm4, %v338_v54, %v1320_v52  ;;  %v532_v57 = vsel %vm531_vm5, %v520_v53, %v1286_v37 }
  0xc1   : > { %590 = vmatpush.bf16.msra.mxu0 %v348_v55  ;;  %618 = vmatpush.bf16.msra.mxu2 %v349_v56 }
  0xc2   : > { %604 = vmatpush.bf16.msra.mxu1 %v532_v57 }
  0xc4   : > { %552 = vrot.lane.b32.xlu2 %v1168_v15, %s1063_s25 }
  0xc5   : > { %456 = vrot.lane.b32.xlu1 %v1170_v16, %s1069_s5  ;;  %320 = vrot.lane.b32.xlu0 %v1159_v3, %s1065_s28 }
  0xc6   : > { %v1333_v58 = vpop.permute.xlu2 %268 }
  0xc7   : > { %v315_v59 = vpop.permute.xlu1 %314  ;;  %v313_v60 = vpop.permute.xlu0 %312  ;;  %v279_v11 = vsel %vm278_vm9, %v1302_v45, %v1333_v58 }
  0xc8   : > { %v325_v61 = vsel %vm324_vm6, %v313_v60, %v315_v59 }
  0xc9   : > { %591 = vmatpush.bf16.msra.mxu0 %v325_v61 }
  0xcc   : > { %504 = vrot.lane.b32.xlu2 %v1159_v3, %s1067_s30 }
  0xcd   : > { %408 = vrot.lane.b32.xlu1 %v1161_v7, %s1071_s7  ;;  %345 = vrot.lane.b32.xlu0 %v1168_v15, %s1062_s24 }
  0xce   : > { %v1342_v62 = vpop.permute.xlu2 %316 }
  0xcf   : > { %v1344_v63 = vpop.permute.xlu1 %498  ;;  %v497_v0 = vpop.permute.xlu0 %496  ;;  %v326_v1 = vsel %vm324_vm6, %v315_v59, %v1342_v62 }
  0xd0   : > { %v509_v2 = vsel %vm508_vm7, %v497_v0, %v1344_v63  ;;  %619 = vmatpush.bf16.msra.mxu2 %v326_v1 }
  0xd1   : > { %605 = vmatpush.bf16.msra.mxu1 %v509_v2 }
  0xd4   : > { %529 = vrot.lane.b32.xlu2 %v1168_v15, %s1064_s26 }
  0xd5   : > { %433 = vrot.lane.b32.xlu1 %v1170_v16, %s1070_s6  ;;  %297 = vrot.lane.b32.xlu0 %v1159_v3, %s1066_s29 }
  0xd6   : > { %v1356_v4 = vpop.permute.xlu2 %548 }
  0xd7   : > { %v1358_v5 = vpop.permute.xlu1 %546  ;;  %v292_v6 = vpop.permute.xlu0 %291 }
  0xd8   : > { %v302_v9 = vsel %vm301_vm8, %v290_v48, %v292_v6  ;;  %v556_v10 = vsel %vm554_vm3, %v545_v49, %v1358_v5 }
  0xd9   : > { %592 = vmatpush.bf16.msra.mxu0 %v302_v9  ;;  %631 = vmatpush.bf16.msra.mxu3 %v556_v10  ;;  %v557_v10 = vsel %vm554_vm3, %v1358_v5, %v1356_v4 }
  0xdc   : > { %481 = vrot.lane.b32.xlu2 %v1159_v3, %s1068_s4 }
  0xdd   : > { %385 = vrot.lane.b32.xlu1 %v1161_v7, %s1072_s8  ;;  %322 = vrot.lane.b32.xlu0 %v1168_v15, %s1065_s28 }
  0xde   : > { %593 = vmatpush.bf16.msra.mxu0 %v279_v11  ;;  %v1372_v12 = vpop.permute.xlu2 %293 }
  0xdf   : > { %v476_v13 = vpop.permute.xlu1 %475  ;;  %v474_v14 = vpop.permute.xlu0 %473  ;;  %v303_v18 = vsel %vm301_vm8, %v292_v6, %v1372_v12 }
  0xe0   : > { %v486_v19 = vsel %vm485_vm10, %v474_v14, %v476_v13  ;;  %620 = vmatpush.bf16.msra.mxu2 %v303_v18  ;;  %v906_v14 = vld [vmem:[%s1609_s1 + $0x8] sm:$0xf0] }
  0xe1   : > { %606 = vmatpush.bf16.msra.mxu1 %v486_v19 }
  0xe2   : > { %594 = vmatpush.bf16.msra.mxu0 %v1276_v35 }
  0xe4   : > { %506 = vrot.lane.b32.xlu2 %v1168_v15, %s1067_s30 }
  0xe5   : > { %410 = vrot.lane.b32.xlu1 %v1170_v16, %s1071_s7  ;;  %274 = vrot.lane.b32.xlu0 %v1159_v3, %s1061_s22 }
  0xe6   : > { %595 = vmatpush.bf16.msra.mxu0 %v1259_v28  ;;  %v1385_v21 = vpop.permute.xlu2 %525 }
  0xe7   : > { %v524_v22 = vpop.permute.xlu1 %523  ;;  %v365_v23 = vpop.permute.xlu0 %364 }
  0xe8   : > { %v533_v24 = vsel %vm531_vm5, %v1286_v37, %v524_v22  ;;  %v373_v25 = vsel %vm370_vm2, %v1300_v43, %v365_v23  ;;  %v1393_v26 = vsel %vm531_vm5, %v524_v22, %v1385_v21 }
  0xe9   : > { %632 = vmatpush.bf16.msra.mxu3 %v533_v24 }
  0xea   : > { %596 = vmatpush.bf16.msra.mxu0 %v1163_v8 }
  0xec   : > { %387 = vrot.lane.b32.xlu2 %v1170_v16, %s1072_s8 }
  0xed   : > { %458 = vrot.lane.b32.xlu1 %v1159_v3, %s1069_s5  ;;  %299 = vrot.lane.b32.xlu0 %v1168_v15, %s1066_s29 }
  0xee   : > { %645 = vmatpush.bf16.msrb.mxu0 %v373_v25  ;;  %v271_v27 = vpop.permute.xlu2 %270 }
  0xef   : > { %v453_v28 = vpop.permute.xlu1 %452  ;;  %v451_v32 = vpop.permute.xlu0 %450  ;;  %v280_v33 = vsel %vm278_vm9, %v1333_v58, %v271_v27 }
  0xf0   : > { %v463_v34 = vsel %vm462_vm11, %v451_v32, %v453_v28  ;;  %621 = vmatpush.bf16.msra.mxu2 %v280_v33 }
  0xf1   : > { %607 = vmatpush.bf16.msra.mxu1 %v463_v34 }
  0xf4   : > { %435 = vrot.lane.b32.xlu2 %v1159_v3, %s1070_s6  ;;  %622 = vmatpush.bf16.msra.mxu2 %v1278_v36 }
  0xf5   : > { %276 = vrot.lane.b32.xlu1 %v1168_v15, %s1061_s22  ;;  %483 = vrot.lane.b32.xlu0 %v1168_v15, %s1068_s4 }
  0xf6   : > { %v1412_v8 = vpop.permute.xlu2 %406 }
  0xf7   : > { %v1414_v35 = vpop.permute.xlu1 %500  ;;  %v342_v37 = vpop.permute.xlu0 %341 }
  0xf8   : > { %623 = vmatpush.bf16.msra.mxu2 %v1262_v29  ;;  %v510_v38 = vsel %vm508_vm7, %v1344_v63, %v1414_v35  ;;  %v350_v36 = vsel %vm347_vm4, %v1320_v52, %v342_v37  ;;  %v924_v52 = vld [vmem:[%s1609_s1 + $0x4] sm:$0xf0] }
  0xf9   : > { %633 = vmatpush.bf16.msra.mxu3 %v510_v38  ;;  %646 = vmatpush.bf16.msrb.mxu0 %v350_v36  ;;  %v1455_v55 = vor.u32 %v924_v52, %v904_v51 }
  0xfb   : > { %597 = vmatmul.bf16.vlgmr.msra.gmra.mxu0 %v1455_v55 }
  0xfc   : > { %624 = vmatpush.bf16.msra.mxu2 %v1172_v17  ;;  %437 = vrot.lane.b32.xlu2 %v1168_v15, %s1070_s6 }
  0xfd   : > { %412 = vrot.lane.b32.xlu1 %v1159_v3, %s1071_s7  ;;  %460 = vrot.lane.b32.xlu0 %v1168_v15, %s1069_s5  ;;  %s171_s5 = sand.u32 1, %s1032_s12   ;;  %s758_s12 = smul.u32 (%p1140_p5), 5, %s1040_s14 }
  0xfe   : > { %v1429_v29 = vpop.permute.xlu2 %454  ;;  %s925_s6 = smul.u32 40, %s171_s5 }
  0xff   : > { %v430_v39 = vpop.permute.xlu1 %429  ;;  %v428_v43 = vpop.permute.xlu0 %427  ;;  %v464_v49 = vsel %vm462_vm11, %v453_v28, %v1429_v29  ;;  %625 = vmatmul.bf16.vlgmr.msra.gmra.mxu2 %v1455_v55 }
 0x100   : > { %v440_v44 = vsel %vm439_vm12, %v428_v43, %v430_v39 }
 0x101   : > { %608 = vmatpush.bf16.msra.mxu1 %v440_v44 }
 0x104   : > { %391 = vrot.lane.b32.xlu2 %v1168_v15, %s1072_s8 }
 0x105   : > { %414 = vrot.lane.b32.xlu1 %v1168_v15, %s1071_s7  ;;  %389 = vrot.lane.b32.xlu0 %v1159_v3, %s1072_s8  ;;  %s1566_s7 = scalar_lea.vmem [#allocation2], %s925_s6  ;;  %s927_s8 = smul.u32 (%p1140_p5), 20, %s1044_s15 }
 0x106   : > { %v382_v46 = vpop.permute.xlu2 %381 }
 0x107   : > { %v478_v17 = vpop.permute.xlu1 %477  ;;  %v1438_v45 = vpop.permute.xlu0 %318  ;;  %s760_s9 = sadd.s32 (%p1140_p5), %s927_s8, %s758_s12 }
 0x108   : > { %v487_v47 = vsel %vm485_vm10, %v476_v13, %v478_v17  ;;  %v327_v48 = vsel %vm324_vm6, %v1342_v62, %v1438_v45  ;;  %s910_s10 = sshll.u32 (%p1140_p5), %s760_s9, 2 }
 0x109   : > { %634 = vmatpush.bf16.msra.mxu3 %v487_v47  ;;  %647 = vmatpush.bf16.msrb.mxu0 %v327_v48  ;;  %s762_s22 = scalar_lea.vmem (%p1140_p5), %s1611_s3, %s910_s10 }
 0x10d   : > { %635 = vmatpush.bf16.msra.mxu3 %v464_v49 }
 0x10e   : > { %v1457_v56 = vpop.permute.xlu2 %272 }
 0x10f   : > { %v405_v15 = vpop.permute.xlu1 %404  ;;  %v367_v50 = vpop.permute.xlu0 %366  ;;  %v281_v61 = vsel %vm278_vm9, %v271_v27, %v1457_v56 }
 0x110   : > { %v374_v53 = vsel %vm370_vm2, %v365_v23, %v367_v50  ;;  %v417_v54 = vsel %vm416_vm13, %v405_v15, %v1412_v8 }
 0x111   : > { %673 = vmatpush.bf16.msrb.mxu2 %v374_v53  ;;  %609 = vmatpush.bf16.msra.mxu1 %v417_v54 }
 0x116   : > { %v1465_v60 = vpop.permute.xlu2 %527 }
 0x117   : > { %v296_v57 = vpop.permute.xlu1 %295  ;;  %v1461_v58 = vpop.permute.xlu0 %502  ;;  %v535_v48 = vsel %vm531_vm5, %v1385_v21, %v1465_v60 }
 0x118   : > { %v304_v59 = vsel %vm301_vm8, %v1372_v12, %v296_v57  ;;  %v511_v5 = vsel %vm508_vm7, %v1414_v35, %v1461_v58 }
 0x119   : > { %648 = vmatpush.bf16.msrb.mxu0 %v304_v59 }
 0x11d   : > { %649 = vmatpush.bf16.msrb.mxu0 %v281_v61 }
 0x11e   : > { %v1474_v1 = vpop.permute.xlu2 %552 }
 0x11f   : > { %v344_v62 = vpop.permute.xlu1 %343  ;;  %v1469_v63 = vpop.permute.xlu0 %550 }
 0x120   : > { %v351_v0 = vsel %vm347_vm4, %v342_v37, %v344_v62  ;;  %v558_v47 = vsel %vm554_vm3, %v1356_v4, %v1469_v63  ;;  %v559_v21 = vsel %vm554_vm3, %v1469_v63, %v1474_v1 }
 0x121   : > { %650 = vmatpush.bf16.msrb.mxu0 %v1288_v40  ;;  %674 = vmatpush.bf16.msrb.mxu2 %v351_v0 }
 0x125   : > { %651 = vmatpush.bf16.msrb.mxu0 %v1265_v30 }
 0x126   : > { %v1485_v11 = vpop.permute.xlu2 %504 }
 0x127   : > { %v1476_v2 = vpop.permute.xlu1 %479  ;;  %v384_v6 = vpop.permute.xlu0 %383  ;;  %v512_v4 = vsel %vm508_vm7, %v1461_v58, %v1485_v11 }
 0x128   : > { %v394_v9 = vsel %vm393_vm14, %v382_v46, %v384_v6  ;;  %v488_v19 = vsel %vm485_vm10, %v478_v17, %v1476_v2 }
 0x129   : > { %610 = vmatpush.bf16.msra.mxu1 %v394_v9  ;;  %652 = vmatpush.bf16.msrb.mxu0 %v1161_v7  ;;  %v923_v7 = vld [vmem:[%s1609_s1 + $0x4] sm:$0xf] }
 0x12a   : > { %v1498_v18 = vor.u32 %v923_v7, %v906_v14 }
 0x12c   : > { %653 = vmatmul.bf16.vlgmr.msrb.gmra.mxu0 %v1455_v55  ;;  %611 = vmatmul.bf16.vlgmr.msra.gmra.mxu1 %v1498_v18 }
 0x12d   : > { %659 = vmatpush.bf16.msrb.mxu1 %v557_v10 }
 0x12f   : > { %v432_v30 = vpop.permute.xlu1 %431  ;;  %v369_v40 = vpop.permute.xlu0 %368 }
 0x130   : > { %v375_v12 = vsel %vm370_vm2, %v367_v50, %v369_v40  ;;  %v441_v13 = vsel %vm439_vm12, %v430_v39, %v432_v30  ;;  %v567_v39 = vld [vmem:[%s1610_s2] sm:$0xff] }
 0x131   : > { %660 = vmatpush.bf16.msrb.mxu1 %v1393_v26  ;;  %636 = vmatpush.bf16.msra.mxu3 %v441_v13  ;;  %v530_v26 = vpop.permute.xlu2 %529 }
 0x132   : > { %701 = vmatpush.bf16.msra.mxu0 %v375_v12  ;;  %v536_v61 = vsel %vm531_vm5, %v1465_v60, %v530_v26 }
 0x135   : > { %661 = vmatpush.bf16.msrb.mxu1 %v511_v5 }
 0x137   : > { %v457_v22 = vpop.permute.xlu1 %456  ;;  %v321_v23 = vpop.permute.xlu0 %320 }
 0x138   : > { %v328_v24 = vsel %vm324_vm6, %v1438_v45, %v321_v23  ;;  %v465_v25 = vsel %vm462_vm11, %v1429_v29, %v457_v22  ;;  %v1073_v29 = vmov 0  }
 0x139   : > { %662 = vmatpush.bf16.msrb.mxu1 %v488_v19  ;;  %675 = vmatpush.bf16.msrb.mxu2 %v328_v24  ;;  %v482_v34 = vpop.permute.xlu2 %481 }
 0x13a   : > { %1001 = vset.pattern.permute.xlu1 %v1073_v29  ;;  %1000 = vset.pattern.permute.xlu0 %v1073_v29  ;;  %v489_v54 = vsel %vm485_vm10, %v1476_v2, %v482_v34 }
 0x13b   : > { %571 = vperm.xlu0 %1000, %v567_v39  }
 0x13d   : > { %663 = vmatpush.bf16.msrb.mxu1 %v465_v25 }
 0x13f   : > { %v409_v27 = vpop.permute.xlu1 %408  ;;  %v346_v28 = vpop.permute.xlu0 %345 }
 0x140   : > { %v418_v32 = vsel %vm416_vm13, %v1412_v8, %v409_v27  ;;  %v352_v33 = vsel %vm347_vm4, %v344_v62, %v346_v28  ;;  %v568_v8 = vld [vmem:[%s1610_s2 + $0x8] sm:$0xff] }
 0x141   : > { %637 = vmatpush.bf16.msra.mxu3 %v418_v32  ;;  %702 = vmatpush.bf16.msra.mxu0 %v352_v33  ;;  %v507_v43 = vpop.permute.xlu2 %506 }
 0x142   : > { %576 = vperm.xlu1 %1001, %v568_v8   ;;  %v513_v63 = vsel %vm508_vm7, %v1485_v11, %v507_v43 }
 0x147   : > { %v434_v35 = vpop.permute.xlu1 %433  ;;  %v298_v37 = vpop.permute.xlu0 %297 }
 0x148   : > { %v442_v38 = vsel %vm439_vm12, %v432_v30, %v434_v35  ;;  %v305_v36 = vsel %vm301_vm8, %v296_v57, %v298_v37 }
 0x149   : > { %664 = vmatpush.bf16.msrb.mxu1 %v442_v38  ;;  %676 = vmatpush.bf16.msrb.mxu2 %v305_v36  ;;  %v388_v50 = vpop.permute.xlu2 %387 }
 0x14f   : > { %v386_v44 = vpop.permute.xlu1 %385  ;;  %v323_v17 = vpop.permute.xlu0 %322 }
 0x150   : > { %v395_v45 = vsel %vm393_vm14, %v384_v6, %v386_v44  ;;  %v329_v46 = vsel %vm324_vm6, %v321_v23, %v323_v17  ;;  %v396_v53 = vsel %vm393_vm14, %v386_v44, %v388_v50 }
 0x151   : > { %638 = vmatpush.bf16.msra.mxu3 %v395_v45  ;;  %703 = vmatpush.bf16.msra.mxu0 %v329_v46 }
 0x154   : > { %639 = vmatmul.bf16.vlgmr.msra.gmra.mxu3 %v1498_v18 }
 0x155   : > { %687 = vmatpush.bf16.msrb.mxu3 %v558_v47 }
 0x157   : > { %v411_v49 = vpop.permute.xlu1 %410  ;;  %v275_v15 = vpop.permute.xlu0 %274 }
 0x158   : > { %v419_v51 = vsel %vm416_vm13, %v409_v27, %v411_v49  ;;  %v282_v52 = vsel %vm278_vm9, %v1457_v56, %v275_v15 }
 0x159   : > { %688 = vmatpush.bf16.msrb.mxu3 %v535_v48  ;;  %665 = vmatpush.bf16.msrb.mxu1 %v419_v51 }
 0x15a   : > { %677 = vmatpush.bf16.msrb.mxu2 %v282_v52 }
 0x15d   : > { %689 = vmatpush.bf16.msrb.mxu3 %v512_v4  ;;  %666 = vmatpush.bf16.msrb.mxu1 %v396_v53 }
 0x15e   : > { %678 = vmatpush.bf16.msrb.mxu2 %v1290_v41  ;;  %v436_v41 = vpop.permute.xlu2 %435 }
 0x15f   : > { %v459_v56 = vpop.permute.xlu1 %458  ;;  %v300_v57 = vpop.permute.xlu0 %299  ;;  %v443_v62 = vsel %vm439_vm12, %v434_v35, %v436_v41 }
 0x160   : > { %v306_v59 = vsel %vm301_vm8, %v298_v37, %v300_v57  ;;  %v466_v58 = vsel %vm462_vm11, %v457_v22, %v459_v56  ;;  %667 = vmatmul.bf16.vlgmr.msrb.gmra.mxu1 %v1498_v18 }
 0x161   : > { %690 = vmatpush.bf16.msrb.mxu3 %v489_v54  ;;  %715 = vmatpush.bf16.msra.mxu1 %v559_v21 }
 0x162   : > { %679 = vmatpush.bf16.msrb.mxu2 %v1268_v31  ;;  %704 = vmatpush.bf16.msra.mxu0 %v306_v59 }
 0x165   : > { %691 = vmatpush.bf16.msrb.mxu3 %v466_v58  ;;  %716 = vmatpush.bf16.msra.mxu1 %v536_v61 }
 0x166   : > { %680 = vmatpush.bf16.msrb.mxu2 %v1170_v16  ;;  %v438_v10 = vpop.permute.xlu2 %437 }
 0x167   : > { %v277_v0 = vpop.permute.xlu1 %276  ;;  %v484_v1 = vpop.permute.xlu0 %483  ;;  %v444_v30 = vsel %vm439_vm12, %v436_v41, %v438_v10 }
 0x168   : > { %v283_v31 = vsel %vm278_vm9, %v275_v15, %v277_v0  ;;  %v490_v2 = vsel %vm485_vm10, %v482_v34, %v484_v1 }
 0x169   : > { %692 = vmatpush.bf16.msrb.mxu3 %v443_v62  ;;  %717 = vmatpush.bf16.msra.mxu1 %v513_v63 }
 0x16a   : > { %681 = vmatmul.bf16.vlgmr.msrb.gmra.mxu2 %v1455_v55  ;;  %705 = vmatpush.bf16.msra.mxu0 %v283_v31 }
 0x16d   : > { %718 = vmatpush.bf16.msra.mxu1 %v490_v2 }
 0x16e   : > { %706 = vmatpush.bf16.msra.mxu0 %v1292_v42  ;;  %v392_v13 = vpop.permute.xlu2 %391 }
 0x16f   : > { %v413_v60 = vpop.permute.xlu1 %412  ;;  %v461_v6 = vpop.permute.xlu0 %460 }
 0x170   : > { %v420_v9 = vsel %vm416_vm13, %v411_v49, %v413_v60  ;;  %v467_v16 = vsel %vm462_vm11, %v459_v56, %v461_v6 }
 0x171   : > { %693 = vmatpush.bf16.msrb.mxu3 %v420_v9  ;;  %719 = vmatpush.bf16.msra.mxu1 %v467_v16 }
 0x172   : > { %707 = vmatpush.bf16.msra.mxu0 %v1238_v20 }
 0x175   : > { %720 = vmatpush.bf16.msra.mxu1 %v444_v30 }
 0x176   : > { %708 = vmatpush.bf16.msra.mxu0 %v1159_v3 }
 0x177   : > { %v415_v40 = vpop.permute.xlu1 %414  ;;  %v390_v11 = vpop.permute.xlu0 %389 }
 0x178   : > { %v397_v42 = vsel %vm393_vm14, %v388_v50, %v390_v11  ;;  %v421_v12 = vsel %vm416_vm13, %v413_v60, %v415_v40  ;;  %v398_v20 = vsel %vm393_vm14, %v390_v11, %v392_v13  ;;  %v598_v3 = vpop.f32.mrf.mxu0 }
 0x179   : > { %709 = vmatmul.bf16.vlgmr.msra.gmra.mxu0 %v1455_v55  ;;  %694 = vmatpush.bf16.msrb.mxu3 %v397_v42 }
 0x17a   : > { %721 = vmatpush.bf16.msra.mxu1 %v421_v12 }
 0x17c   : > { %695 = vmatmul.bf16.vlgmr.msrb.gmra.mxu3 %v1498_v18 }
 0x17e   : > { %722 = vmatpush.bf16.msra.mxu1 %v398_v20 }
 0x180   : > { %v600_v24 = vpop.f32.mrf.mxu0 }
 0x181   : > { %723 = vmatmul.bf16.vlgmr.msra.gmra.mxu1 %v1498_v18 }
 0x182   : > { %v626_v7 = vpop.f32.mrf.mxu2 }
 0x18a   : > { %v628_v32 = vpop.f32.mrf.mxu2 }
 0x1a9   : > { %v612_v14 = vpop.f32.mrf.mxu1  ;;  %v654_v43 = vpop.f32.mrf.mxu0 }
 0x1ad   : > { %v572_v5 = vpop.permute.xlu0 %571 }
 0x1ae   : > { %v599_v19 = vadd.f32 %v598_v3, %v572_v5  ;;  %v627_v22 = vadd.f32 %v626_v7, %v572_v5  ;;  %v655_v48 = vadd.f32 %v654_v43, %v572_v5 }
 0x1b0   : > { %v613_v55 = vadd.f32 %v612_v14, %v599_v19 }
 0x1b1   : > { %v614_v33 = vpop.f32.mrf.mxu1  ;;  %v656_v17 = vpop.f32.mrf.mxu0 }
 0x1b2   : > { %v729_v28 = vmax.f32 %v613_v55, 0.0 }
 0x1b4   : > { %v577_v23 = vpop.permute.xlu1 %576 }
 0x1b5   : > { %v601_v26 = vadd.f32 %v600_v24, %v577_v23  ;;  %v629_v35 = vadd.f32 %v628_v32, %v577_v23  ;;  %v657_v56 = vadd.f32 %v656_v17, %v577_v23 }
 0x1b7   : > { %v615_v37 = vadd.f32 %v614_v33, %v601_v26 }
 0x1b9   : > { %v734_v36 = vmax.f32 %v615_v37, 0.0 }
 0x1d7   : > { %v640_v25 = vpop.f32.mrf.mxu3 }
 0x1d8   : > { %v641_v27 = vadd.f32 %v640_v25, %v627_v22 }
 0x1da   : > { %v730_v34 = vmax.f32 %v641_v27, 0.0 }
 0x1dc   : > { %v739_v18 = vpack.c.bf16 %v730_v34, %v729_v28 }
 0x1dd   : > { %v668_v44 = vpop.f32.mrf.mxu1 }
 0x1de   : > { %745 = vst [vmem:[%s1566_s7] sm:$0xff] %v739_v18  ;;  %v669_v50 = vadd.f32 %v668_v44, %v655_v48 }
 0x1df   : > { %v642_v38 = vpop.f32.mrf.mxu3 }
 0x1e0   : > { %v643_v29 = vadd.f32 %v642_v38, %v629_v35  ;;  %v731_v54 = vmax.f32 %v669_v50, 0.0 }
 0x1e2   : > { %v735_v8 = vmax.f32 %v643_v29, 0.0 }
 0x1e4   : > { %v742_v39 = vpack.c.bf16 %v735_v8, %v734_v36 }
 0x1e5   : > { %v670_v45 = vpop.f32.mrf.mxu1  ;;  %v777_v40 = vld [vmem:[%s1566_s7] sm:$0xff] (%p1140_p5) }
 0x1e6   : > { %748 = vst [vmem:[%s1566_s7 + $0x14] sm:$0xff] %v742_v39  ;;  %v671_v63 = vadd.f32 %v670_v45, %v657_v56 }
 0x1e7   : > { %778 = vst [vmem:[%s762_s22] sm:$0xff] (%p1140_p5), %v777_v40 }
 0x1e8   : > { %v736_v9 = vmax.f32 %v671_v63, 0.0 }
 0x1ed   : > { %v682_v47 = vpop.f32.mrf.mxu2  ;;  %v781_v42 = vld [vmem:[%s1566_s7 + $0x14] sm:$0xff] (%p1140_p5) }
 0x1ee   : > { %v683_v15 = vadd.f32 %v682_v47, %v572_v5  ;;  %782 = vst [vmem:[%s762_s22 + $0x28] sm:$0xff] (%p1140_p5), %v781_v42 }
 0x1f5   : > { %v684_v58 = vpop.f32.mrf.mxu2 }
 0x1f6   : > { %v710_v46 = vpop.f32.mrf.mxu0  ;;  %v685_v0 = vadd.f32 %v684_v58, %v577_v23 }
 0x1f7   : > { %v711_v49 = vadd.f32 %v710_v46, %v572_v5 }
 0x1fe   : > { %v724_v51 = vpop.f32.mrf.mxu1  ;;  %v712_v57 = vpop.f32.mrf.mxu0 }
 0x1ff   : > { %v725_v52 = vadd.f32 %v724_v51, %v711_v49  ;;  %v696_v4 = vpop.f32.mrf.mxu3  ;;  %v713_v62 = vadd.f32 %v712_v57, %v577_v23 }
 0x200   : > { %v697_v53 = vadd.f32 %v696_v4, %v683_v15 }
 0x201   : > { %v733_v21 = vmax.f32 %v725_v52, 0.0 }
 0x202   : > { %v732_v59 = vmax.f32 %v697_v53, 0.0 }
 0x203   : > { %v741_v61 = vpack.c.bf16 %v733_v21, %v733_v21 }
 0x204   : > { %v740_v41 = vpack.c.bf16 %v732_v59, %v731_v54 }
 0x205   : > { %747 = vst [vmem:[%s1566_s7 + $0x10] sm:$0xf] %v741_v61 }
 0x206   : > { %746 = vst [vmem:[%s1566_s7 + $0x8] sm:$0xff] %v740_v41  ;;  %v726_v1 = vpop.f32.mrf.mxu1 }
 0x207   : > { %v727_v31 = vadd.f32 %v726_v1, %v713_v62  ;;  %v698_v2 = vpop.f32.mrf.mxu3 }
 0x208   : > { %v699_v60 = vadd.f32 %v698_v2, %v685_v0 }
 0x209   : > { %v738_v6 = vmax.f32 %v727_v31, 0.0 }
 0x20a   : > { %v737_v16 = vmax.f32 %v699_v60, 0.0  ;;  %757 = sbr.rel (!%p1140_p5) target bundleno = 535 (0x217), region = 36 }
 0x20b   : > { %v744_v10 = vpack.c.bf16 %v738_v6, %v738_v6 }
 0x20c   : > { %v743_v30 = vpack.c.bf16 %v737_v16, %v736_v9  ;;  %v911_v13 = vld [vmem:[%s1566_s7 + $0x10] sm:$0xf] (%p1140_p5) }
 0x20d   : > { %750 = vst [vmem:[%s1566_s7 + $0x24] sm:$0xf] %v744_v10  ;;  %v779_v11 = vld [vmem:[%s1566_s7 + $0x8] sm:$0xff] (%p1140_p5) }
 0x20e   : > { %749 = vst [vmem:[%s1566_s7 + $0x1c] sm:$0xff] %v743_v30 }
 0x20f   : > { %780 = vst [vmem:[%s762_s22 + $0x8] sm:$0xff] %v779_v11 }
 0x210   : > { %912 = vst [vmem:[%s762_s22 + $0x10] sm:$0xf] %v911_v13 }
 0x214   : > { %v913_v20 = vld [vmem:[%s1566_s7 + $0x24] sm:$0xf] }
 0x215   : > { %v783_v12 = vld [vmem:[%s1566_s7 + $0x1c] sm:$0xff]  ;;  %914 = vst [vmem:[%s762_s22 + $0x38] sm:$0xf] %v913_v20 }
 0x216   : > { %784 = vst [vmem:[%s762_s22 + $0x30] sm:$0xff] %v783_v12 }
 0x217 PF: > { %s13_s18 = sadd.s32 1, %s1056_s18   ;;  %s1613_s12 = smov %s1036_s13 }
 0x218   : > { %p10_p10 = scmp.ge.s32.totalorder %s13_s18, 6   ;;  %s1614_s13 = smov %s1151_s27 }
 0x219   : > { %s1615_s14 = smov %s1048_s16  ;;  %s1616_s15 = smov %s1052_s17 }
 0x21a   : > { %s1617_s16 = smov %s1620_s19  ;;  %s1618_s17 = smov %s1624_s20 }
 0x21b   :  { %12 = sbr.rel (!%p10_p10) target bundleno = 4 (0x4), region = 95 }

// kernel: forward.22
= control target key start
LH: loop header
LB: loop body
LE: loop exit
PB: predicated region body
PF: predicated region fallthrough
CT: control target
= control target key end

     0   :  { %s736_s6 = smov 0   ;;  %s738_s7 = smov 0   ;;  %s933_s0 = inlined_call_operand.vmem [shape: bf16[2,64,432], index: 0, kind: input, shape index: {}]   ;;  %s934_s1 = inlined_call_operand.vmem [shape: bf16[2,16,384], index: 1, kind: output, shape index: {}]  }
   0x1   :  { %s740_s8 = smov 0  }
   0x2 LB: > { %s23_s9 = sadd.s32 1, %s717_s7  ;;  %p564_p0 = scmp.ge.s32.totalorder %s721_s8, 1  ;;  %s721_s8 = sphi %s740_s8, %s11_s8   ;;  %s717_s7 = sphi %s738_s7, %s936_s7   ;;  %s713_s6 = sphi %s736_s6, %s935_s6  }
   0x3   : > { %p25_p1 = scmp.ge.s32.totalorder %s23_s9, 2  ;;  %p101_p2 = scmp.lt.s32.totalorder %s721_s8, 3 }
   0x5   : > { %s938_s9 = smov (%p25_p1, %s23_s9), 0  ;;  %p102_p3 = pnand %p564_p0, %p101_p2 }
   0x6   : > { %p125_p4 = scmp.lt.s32.totalorder (!%p102_p3), %s713_s6, 1  ;;  %s723_s14 = smov (!%p102_p3), 127  }
   0x7   : > { %105 = sbr.rel (%p102_p3) target bundleno = 192 (0xc0), region = 24  ;;  %s724_s15 = smov (!%p102_p3), 104  }
   0x8   : > { %s725_s16 = smov (!%p102_p3), 103  }
   0xc   : > { %s940_s6 = smov (!%p125_p4, %s713_s6), 1  ;;  %vm210_vm0 = vcmask 1039360   ;;  %vm353_vm1 = vcmask 850944   ;;  %vm452_vm2 = vcmask 842752  }
   0xd   : > { %s570_s10 = sshll.u32 %s940_s6, 7  ;;  %s571_s17 = smul.u32 24, %s940_s6 }
   0xe   : > { %s760_s13 = scalar_lea.vmem %s933_s0, %s570_s10 }
   0xf   : > { %v142_v0 = vld [vmem:[%s760_s13 + $0x10] sm:$0xff]  ;;  %v140_v1 = vld [vmem:[%s760_s13] sm:$0xff]  ;;  %v143_v6 = vld [vmem:[%s760_s13 + $0x18] sm:$0xff]  ;;  %s904_s20 = scalar_lea.vmem %s934_s1, %s571_s17 }
  0x10   : > { %v159_v2 = vunpack.c.l.bf16 %v142_v0  ;;  %v160_v3 = vunpack.c.h.bf16 %v142_v0  ;;  %v156_v4 = vunpack.c.l.bf16 %v140_v1  ;;  %v157_v5 = vunpack.c.h.bf16 %v140_v1  ;;  %v766_v7 = vld [vmem:[%s760_s13 + $0x40] sm:$0xff]  ;;  %v141_v8 = vld [vmem:[%s760_s13 + $0x8] sm:$0xff]  ;;  %v147_v26 = vld [vmem:[%s760_s13 + $0x38] sm:$0xff] }
  0x11   : > { %v239_v11 = vunpack.c.l.bf16 %v766_v7  ;;  %v240_v12 = vunpack.c.h.bf16 %v766_v7  ;;  %v161_v13 = vunpack.c.l.bf16 %v143_v6  ;;  %v774_v14 = vld [vmem:[%s760_s13 + $0x48] sm:$0xff]  ;;  %v185_v16 = vunpack.c.h.bf16 %v143_v6  ;;  %v144_v20 = vld [vmem:[%s760_s13 + $0x20] sm:$0xff]  ;;  %v790_v29 = vld [vmem:[%s760_s13 + $0x58] sm:$0xff] }
  0x12   : > { %v769_v9 = vpack.i.bf16 %v160_v3, %v159_v2  ;;  %v599_v10 = vpack.i.bf16 %v157_v5, %v156_v4  ;;  %v145_v15 = vld [vmem:[%s760_s13 + $0x28] sm:$0xff]  ;;  %v158_v17 = vunpack.c.l.bf16 %v141_v8  ;;  %v184_v18 = vunpack.c.h.bf16 %v141_v8  ;;  %v795_v31 = vld [vmem:[%s760_s13 + $0x50] sm:$0xff] }
  0x13   : > { %v619_v19 = vpack.i.bf16 %v240_v12, %v239_v11  ;;  %v241_v21 = vunpack.c.l.bf16 %v774_v14  ;;  %v283_v22 = vunpack.c.h.bf16 %v774_v14  ;;  %v164_v23 = vunpack.c.l.bf16 %v145_v15  ;;  %v146_v43 = vld [vmem:[%s760_s13 + $0x30] sm:$0xff] }
  0x14   : > { %610 = vrot.lane.b32.xlu1 %v769_v9, %s723_s14  ;;  %600 = vrot.lane.b32.xlu0 %v599_v10, %s723_s14  ;;  %v162_v24 = vunpack.c.l.bf16 %v144_v20  ;;  %v163_v25 = vunpack.c.h.bf16 %v144_v20  ;;  %v614_v27 = vpack.i.bf16 %v185_v16, %v161_v13  ;;  %v604_v28 = vpack.i.bf16 %v184_v18, %v158_v17  ;;  %v843_v18 = vld [vmem:[%s760_s13 + $0x70] sm:$0xff] }
  0x15   : > { %620 = vrot.lane.b32.xlu2 %v619_v19, %s723_s14  ;;  %v792_v30 = vmax.f32 %v158_v17, %v164_v23  ;;  %v624_v34 = vpack.i.bf16 %v283_v22, %v241_v21  ;;  %v167_v35 = vunpack.c.l.bf16 %v147_v26  ;;  %v244_v36 = vunpack.c.l.bf16 %v790_v29  ;;  %v153_v19 = vld [vmem:[%s760_s13 + $0x68] sm:$0xf] }
  0x16   : > { %v797_v32 = vmax.f32 %v157_v5, %v163_v25  ;;  %v799_v33 = vmax.f32 %v156_v4, %v162_v24  ;;  %v284_v37 = vunpack.c.h.bf16 %v790_v29  ;;  %v242_v38 = vunpack.c.l.bf16 %v795_v31 }
  0x17   : > { %v243_v39 = vunpack.c.h.bf16 %v795_v31  ;;  %v809_v40 = vmax.f32 %v161_v13, %v167_v35  ;;  %v165_v44 = vunpack.c.l.bf16 %v146_v43  ;;  %v166_v45 = vunpack.c.h.bf16 %v146_v43  ;;  %v152_v13 = vld [vmem:[%s760_s13 + $0x60] sm:$0xff] }
  0x18   : > { %v634_v41 = vpack.i.bf16 %v284_v37, %v244_v36  ;;  %v382_v48 = vunpack.c.h.bf16 %v145_v15  ;;  %v659_v50 = vpack.i.bf16 %v163_v25, %v162_v24  ;;  %v383_v52 = vunpack.c.h.bf16 %v147_v26 }
  0x19   : > { %v629_v42 = vpack.i.bf16 %v243_v39, %v242_v38  ;;  %v821_v46 = vmax.f32 %v159_v2, %v165_v44  ;;  %v823_v47 = vmax.f32 %v160_v3, %v166_v45  ;;  %v669_v51 = vpack.i.bf16 %v166_v45, %v165_v44 }
  0x1a   : > { %v664_v49 = vpack.i.bf16 %v382_v48, %v164_v23  ;;  %v674_v53 = vpack.i.bf16 %v383_v52, %v167_v35  ;;  %v261_v22 = vunpack.c.l.bf16 %v152_v13  ;;  %v264_v26 = vunpack.c.l.bf16 %v843_v18 }
  0x1c   : > { %615 = vrot.lane.b32.xlu1 %v614_v27, %s723_s14  ;;  %605 = vrot.lane.b32.xlu0 %v604_v28, %s723_s14 }
  0x1d   : > { %625 = vrot.lane.b32.xlu2 %v624_v34, %s723_s14 }
  0x24   : > { %635 = vrot.lane.b32.xlu1 %v634_v41, %s723_s14  ;;  %630 = vrot.lane.b32.xlu0 %v629_v42, %s723_s14 }
  0x25   : > { %640 = vrot.lane.b32.xlu2 %v599_v10, %s724_s15 }
  0x2c   : > { %650 = vrot.lane.b32.xlu1 %v769_v9, %s724_s15  ;;  %645 = vrot.lane.b32.xlu0 %v604_v28, %s724_s15 }
  0x2d   : > { %655 = vrot.lane.b32.xlu2 %v614_v27, %s724_s15 }
  0x34   : > { %665 = vrot.lane.b32.xlu1 %v664_v49, %s724_s15  ;;  %660 = vrot.lane.b32.xlu0 %v659_v50, %s724_s15  ;;  %v265_v50 = vunpack.c.h.bf16 %v843_v18 }
  0x35   : > { %670 = vrot.lane.b32.xlu2 %v669_v51, %s724_s15 }
  0x3c   : > { %680 = vrot.lane.b32.xlu1 %v599_v10, %s725_s16  ;;  %675 = vrot.lane.b32.xlu0 %v674_v53, %s724_s15 }
  0x3d   : > { %685 = vrot.lane.b32.xlu2 %v604_v28, %s725_s16  ;;  %v263_v28 = vunpack.c.l.bf16 %v153_v19 }
  0x44   : > { %695 = vrot.lane.b32.xlu1 %v614_v27, %s725_s16  ;;  %690 = vrot.lane.b32.xlu0 %v769_v9, %s725_s16 }
  0x6f   : > { %v621_v54 = vpop.permute.xlu2 %620 }
  0x70   : > { %v623_v16 = vunpack.i.h.bf16 %v621_v54  ;;  %v622_v17 = vunpack.i.l.bf16 %v621_v54  ;;  %v262_v54 = vunpack.c.h.bf16 %v152_v13 }
  0x77   : > { %v626_v55 = vpop.permute.xlu2 %625 }
  0x78   : > { %v628_v34 = vunpack.i.h.bf16 %v626_v55  ;;  %v627_v41 = vunpack.i.l.bf16 %v626_v55 }
  0x7a   : > { %v311_v53 = vsel %vm210_vm0, %v627_v41, %v628_v34  ;;  %v310_v55 = vsel %vm210_vm0, %v623_v16, %v627_v41 }
  0x7f   : > { %v827_v56 = vpop.permute.xlu2 %640 }
  0x80   : > { %v642_v44 = vunpack.i.l.bf16 %v827_v56 }
  0x86   : > { %v611_v57 = vpop.permute.xlu1 %610  ;;  %v601_v58 = vpop.permute.xlu0 %600 }
  0x87   : > { %v829_v59 = vpop.permute.xlu2 %655  ;;  %v603_v62 = vunpack.i.h.bf16 %v601_v58  ;;  %v602_v63 = vunpack.i.l.bf16 %v601_v58  ;;  %v613_v9 = vunpack.i.h.bf16 %v611_v57  ;;  %v612_v10 = vunpack.i.l.bf16 %v611_v57 }
  0x88   : > { %v658_v7 = vunpack.i.h.bf16 %v829_v59 }
  0x89   : > { %v211_v2 = vsel %vm210_vm0, %v602_v63, %v603_v62  ;;  %v214_v23 = vsel %vm210_vm0, %v612_v10, %v613_v9 }
  0x8a   : > { %v223_v6 = vmax.f32 %v799_v33, %v211_v2  ;;  %v309_v33 = vsel %vm210_vm0, %v622_v17, %v623_v16  ;;  %v226_v42 = vmax.f32 %v821_v46, %v214_v23 }
  0x8c   : > { %v245_v20 = vmax.f32 %v223_v6, %v239_v11  ;;  %v857_v11 = vld [vmem:[%s760_s13 + $0x78] sm:$0xf] }
  0x8d   : > { %v266_v49 = vunpack.c.l.bf16 %v857_v11 }
  0x8e   : > { %v616_v60 = vpop.permute.xlu1 %615  ;;  %v606_v61 = vpop.permute.xlu0 %605  ;;  %v267_v43 = vmax.f32 %v245_v20, %v261_v22 }
  0x8f   : > { %v608_v0 = vunpack.i.h.bf16 %v606_v61  ;;  %v607_v1 = vunpack.i.l.bf16 %v606_v61  ;;  %v838_v8 = vpop.permute.xlu2 %670  ;;  %v618_v35 = vunpack.i.h.bf16 %v616_v60  ;;  %v617_v37 = vunpack.i.l.bf16 %v616_v60 }
  0x90   : > { %v321_v57 = vmax.f32 %v267_v43, %v309_v33  ;;  %v673_v29 = vunpack.i.h.bf16 %v838_v8 }
  0x91   : > { %v213_v5 = vsel %vm210_vm0, %v607_v1, %v608_v0  ;;  %v212_v24 = vsel %vm210_vm0, %v603_v62, %v607_v1  ;;  %v215_v46 = vsel %vm210_vm0, %v613_v9, %v617_v37 }
  0x92   : > { %v225_v15 = vmax.f32 %v792_v30, %v213_v5  ;;  %v224_v14 = vmax.f32 %v797_v32, %v212_v24  ;;  %v216_v32 = vsel %vm210_vm0, %v617_v37, %v618_v35  ;;  %v227_v0 = vmax.f32 %v823_v47, %v215_v46 }
  0x93   : > { %v228_v1 = vmax.f32 %v809_v40, %v216_v32 }
  0x94   : > { %v247_v25 = vmax.f32 %v225_v15, %v241_v21  ;;  %v643_v21 = vunpack.i.h.bf16 %v827_v56  ;;  %v248_v56 = vmax.f32 %v226_v42, %v242_v38  ;;  %v246_v58 = vmax.f32 %v224_v14, %v240_v12 }
  0x95   : > { %v657_v12 = vunpack.i.l.bf16 %v829_v59  ;;  %v249_v19 = vmax.f32 %v227_v0, %v243_v39  ;;  %v250_v20 = vmax.f32 %v228_v1, %v244_v36  ;;  %v672_v36 = vunpack.i.l.bf16 %v838_v8 }
  0x96   : > { %v832_v3 = vpop.permute.xlu1 %635  ;;  %v834_v4 = vpop.permute.xlu0 %630  ;;  %v269_v51 = vmax.f32 %v247_v25, %v263_v28  ;;  %v354_v60 = vsel %vm353_vm1, %v642_v44, %v643_v21  ;;  %v270_v13 = vmax.f32 %v248_v56, %v264_v26  ;;  %v268_v15 = vmax.f32 %v246_v58, %v262_v54 }
  0x97   : > { %v865_v52 = vpop.permute.xlu2 %685  ;;  %v366_v10 = vmax.f32 %v321_v57, %v354_v60  ;;  %v638_v59 = vunpack.i.h.bf16 %v832_v3  ;;  %v637_v23 = vunpack.i.l.bf16 %v832_v3  ;;  %v633_v24 = vunpack.i.h.bf16 %v834_v4 }
  0x98   : > { %v688_v62 = vunpack.i.h.bf16 %v865_v52  ;;  %v687_v63 = vunpack.i.l.bf16 %v865_v52  ;;  %v323_v2 = vmax.f32 %v269_v51, %v311_v53  ;;  %v632_v25 = vunpack.i.l.bf16 %v834_v4 }
  0x99   : > { %v322_v31 = vmax.f32 %v268_v15, %v310_v55  ;;  %v272_v4 = vmax.f32 %v250_v20, %v266_v49  ;;  %v271_v34 = vmax.f32 %v249_v19, %v265_v50  ;;  %v314_v41 = vsel %vm210_vm0, %v637_v23, %v638_v59 }
  0x9a   : > { %v455_v40 = vsel %vm452_vm2, %v687_v63, %v688_v62  ;;  %v312_v8 = vsel %vm210_vm0, %v632_v25, %v633_v24  ;;  %v313_v14 = vsel %vm210_vm0, %v633_v24, %v637_v23  ;;  %v359_v54 = vsel %vm353_vm1, %v657_v12, %v658_v7 }
  0x9b   : > { %v326_v52 = vmax.f32 %v272_v4, %v314_v41  ;;  %v324_v53 = vmax.f32 %v270_v13, %v312_v8  ;;  %v325_v56 = vmax.f32 %v271_v34, %v313_v14  ;;  %v411_v60 = vsel %vm353_vm1, %v672_v36, %v673_v29 }
  0x9e   : > { %v853_v27 = vpop.permute.xlu1 %650  ;;  %v646_v30 = vpop.permute.xlu0 %645 }
  0x9f   : > { %v648_v45 = vunpack.i.h.bf16 %v646_v30  ;;  %v647_v48 = vunpack.i.l.bf16 %v646_v30  ;;  %v653_v28 = vunpack.i.h.bf16 %v853_v27  ;;  %v652_v30 = vunpack.i.l.bf16 %v853_v27 }
  0xa1   : > { %v356_v61 = vsel %vm353_vm1, %v647_v48, %v648_v45  ;;  %v355_v26 = vsel %vm353_vm1, %v643_v21, %v647_v48  ;;  %v357_v21 = vsel %vm353_vm1, %v652_v30, %v653_v28  ;;  %v358_v55 = vsel %vm353_vm1, %v653_v28, %v657_v12 }
  0xa2   : > { %v368_v16 = vmax.f32 %v323_v2, %v356_v61  ;;  %v367_v35 = vmax.f32 %v322_v31, %v355_v26  ;;  %v369_v57 = vmax.f32 %v324_v53, %v357_v21  ;;  %v370_v0 = vmax.f32 %v325_v56, %v358_v55 }
  0xa6   : > { %v666_v5 = vpop.permute.xlu1 %665  ;;  %v661_v38 = vpop.permute.xlu0 %660 }
  0xa7   : > { %v668_v6 = vunpack.i.h.bf16 %v666_v5  ;;  %v667_v9 = vunpack.i.l.bf16 %v666_v5  ;;  %v663_v47 = vunpack.i.h.bf16 %v661_v38  ;;  %v662_v18 = vunpack.i.l.bf16 %v661_v38 }
  0xa9   : > { %v410_v17 = vsel %vm353_vm1, %v667_v9, %v668_v6  ;;  %v409_v33 = vsel %vm353_vm1, %v663_v47, %v667_v9  ;;  %v408_v3 = vsel %vm353_vm1, %v662_v18, %v663_v47  ;;  %v423_v6 = vmax.f32 %v369_v57, %v411_v60 }
  0xaa   : > { %v422_v22 = vmax.f32 %v368_v16, %v410_v17  ;;  %v420_v44 = vmax.f32 %v366_v10, %v408_v3  ;;  %v421_v45 = vmax.f32 %v367_v35, %v409_v33 }
  0xac   : > { %v467_v39 = vmax.f32 %v422_v22, %v455_v40 }
  0xae   : > { %v472_v27 = vpack.c.bf16 %v467_v39, %v467_v39  ;;  %v681_v37 = vpop.permute.xlu1 %680  ;;  %v676_v11 = vpop.permute.xlu0 %675 }
  0xaf   : > { %v683_v42 = vunpack.i.h.bf16 %v681_v37  ;;  %v682_v43 = vunpack.i.l.bf16 %v681_v37  ;;  %v678_v50 = vunpack.i.h.bf16 %v676_v11  ;;  %v677_v51 = vunpack.i.l.bf16 %v676_v11 }
  0xb0   : > { %476 = vst [vmem:[%s904_s20 + $0x8] sm:$0xf] %v472_v27 }
  0xb1   : > { %v453_v48 = vsel %vm452_vm2, %v682_v43, %v683_v42  ;;  %v454_v49 = vsel %vm452_vm2, %v683_v42, %v687_v63  ;;  %v412_v61 = vsel %vm353_vm1, %v673_v29, %v677_v51  ;;  %v413_v62 = vsel %vm353_vm1, %v677_v51, %v678_v50 }
  0xb2   : > { %v465_v46 = vmax.f32 %v420_v44, %v453_v48  ;;  %v466_v32 = vmax.f32 %v421_v45, %v454_v49  ;;  %v371_v63 = vmax.f32 %v326_v52, %v359_v54  ;;  %v424_v9 = vmax.f32 %v370_v0, %v412_v61 }
  0xb4   : > { %v471_v58 = vpack.c.bf16 %v466_v32, %v465_v46  ;;  %v425_v10 = vmax.f32 %v371_v63, %v413_v62 }
  0xb6   : > { %475 = vst [vmem:[%s904_s20] sm:$0xff] %v471_v58  ;;  %v696_v1 = vpop.permute.xlu1 %695  ;;  %v691_v2 = vpop.permute.xlu0 %690 }
  0xb7   : > { %v698_v5 = vunpack.i.h.bf16 %v696_v1  ;;  %v697_v38 = vunpack.i.l.bf16 %v696_v1  ;;  %v693_v7 = vunpack.i.h.bf16 %v691_v2  ;;  %v692_v12 = vunpack.i.l.bf16 %v691_v2 }
  0xb9   : > { %v458_v13 = vsel %vm452_vm2, %v697_v38, %v698_v5  ;;  %v457_v15 = vsel %vm452_vm2, %v693_v7, %v697_v38  ;;  %v456_v16 = vsel %vm452_vm2, %v692_v12, %v693_v7 }
  0xba   : > { %v470_v17 = vmax.f32 %v425_v10, %v458_v13  ;;  %v468_v47 = vmax.f32 %v423_v6, %v456_v16  ;;  %v469_v18 = vmax.f32 %v424_v9, %v457_v15 }
  0xbc   : > { %v474_v40 = vpack.c.bf16 %v470_v17, %v470_v17  ;;  %v473_v19 = vpack.c.bf16 %v469_v18, %v468_v47 }
  0xbe   : > { %478 = vst [vmem:[%s904_s20 + $0x14] sm:$0xf] %v474_v40 }
  0xbf   : > { %477 = vst [vmem:[%s904_s20 + $0xc] sm:$0xff] %v473_v19 }
  0xc0 PF: > { %s11_s8 = sadd.s32 1, %s721_s8   ;;  %s935_s6 = smov %s717_s7 }
  0xc1   : > { %p8_p5 = scmp.ge.s32.totalorder %s11_s8, 4   ;;  %s936_s7 = smov %s938_s9 }
  0xc3   :  { %10 = sbr.rel (!%p8_p5) target bundleno = 2 (0x2), region = 54 }

// kernel: forward.23
= control target key start
LH: loop header
LB: loop body
LE: loop exit
PB: predicated region body
PF: predicated region fallthrough
CT: control target
= control target key end

     0   :  { %s677_s12 = smov 0   ;;  %s679_s13 = smov 0   ;;  %s801_s0 = inlined_call_operand.vmem [shape: bf16[2,16,456], index: 0, kind: input, shape index: {}]   ;;  %s802_s1 = inlined_call_operand.vmem [shape: bf16[16,144], index: 1, kind: input, shape index: {}]   ;;  %s803_s2 = inlined_call_operand.vmem [shape: f32[16,1], index: 2, kind: input, shape index: {}]   ;;  %s804_s3 = inlined_call_operand.vmem [shape: bf16[2,16,384], index: 3, kind: output, shape index: {}]  }
   0x1   :  { %s681_s14 = smov 0  }
   0x2 LB: > { %s25_s15 = sadd.s32 1, %s642_s13  ;;  %p548_p0 = scmp.ge.s32.totalorder %s646_s14, 1  ;;  %s646_s14 = sphi %s681_s14, %s13_s14   ;;  %s642_s13 = sphi %s679_s13, %s806_s13   ;;  %s638_s12 = sphi %s677_s12, %s805_s12  }
   0x3   : > { %p27_p1 = scmp.ge.s32.totalorder %s25_s15, 2  ;;  %p151_p2 = scmp.lt.s32.totalorder %s646_s14, 3 }
   0x5   : > { %s808_s15 = smov (%p27_p1, %s25_s15), 0  ;;  %p152_p3 = pnand %p548_p0, %p151_p2 }
   0x6   : > { %p179_p4 = scmp.lt.s32.totalorder (!%p152_p3), %s638_s12, 1  ;;  %s648_s20 = smov (!%p152_p3), 79  }
   0x7   : > { %155 = sbr.rel (%p152_p3) target bundleno = 366 (0x16e), region = 32  ;;  %s649_s21 = smov (!%p152_p3), 80  }
   0x8   : > { %s650_s22 = smov (!%p152_p3), 102   ;;  %s651_s23 = smov (!%p152_p3), 103  }
   0x9   : > { %s652_s24 = smov (!%p152_p3), 78   ;;  %s653_s25 = smov (!%p152_p3), 104  }
   0xa   : > { %s654_s26 = smov (!%p152_p3), 126   ;;  %s655_s27 = smov (!%p152_p3), 127  }
   0xc   : > { %s810_s12 = smov (!%p179_p4, %s638_s12), 1  ;;  %vm316_vm0 = vcmask 646144   ;;  %vm301_vm1 = vcmask 654336   ;;  %vm286_vm2 = vcmask 834560   ;;  %vm331_vm3 = vcmask 637952   ;;  %v341_v56 = vld [vmem:[%s803_s2 + $0x8] sm:$0xff] }
   0xd   : > { %s581_s16 = sshll.u32 %s810_s12, 5  ;;  %vm271_vm4 = vcmask 842752   ;;  %v586_v35 = vld [vmem:[%s802_s1 + $0x4] sm:$0xf]  ;;  %v572_v36 = vld [vmem:[%s802_s1 + $0x8] sm:$0xf0] }
   0xe   : > { %s183_s19 = scalar_lea.vmem %s801_s0, %s581_s16  ;;  %v747_v37 = vor.u32 %v586_v35, %v572_v36  ;;  %vm361_vm5 = vcmask 130048   ;;  %vm256_vm6 = vcmask 850944   ;;  %vm241_vm7 = vcmask 1031168   ;;  %v340_v57 = vld [vmem:[%s803_s2] sm:$0xff]  ;;  %s588_s17 = smul.u32 24, %s810_s12 }
   0xf   : > { %v554_v0 = vld [vmem:[%s183_s19] sm:$0xf]  ;;  %v584_v1 = vld [vmem:[%s183_s19 + $0xc] sm:$0xf0]  ;;  %v582_v2 = vld [vmem:[%s183_s19 + $0x4] sm:$0xf] }
  0x10   : > { %v701_v3 = vor.u32 %v584_v1, %v554_v0  ;;  %v556_v4 = vld [vmem:[%s183_s19 + $0x10] sm:$0xf0]  ;;  %v583_v6 = vld [vmem:[%s183_s19 + $0xc] sm:$0xf]  ;;  %v564_v7 = vld [vmem:[%s183_s19 + $0x18] sm:$0xf0] }
  0x11   : > { %v703_v5 = vor.u32 %v582_v2, %v556_v4  ;;  %v562_v8 = vld [vmem:[%s183_s19 + $0x8] sm:$0xf]  ;;  %v585_v9 = vld [vmem:[%s183_s19 + $0x14] sm:$0xf0]  ;;  %v567_v10 = vor.u32 %v583_v6, %v564_v7  ;;  %v656_v58 = vmov 0   ;;  %vm226_vm8 = vcmask 1039360  }
  0x12   : > { %308 = vrot.lane.b32.xlu2 %v701_v3, %s648_s20  ;;  %v708_v11 = vor.u32 %v585_v9, %v562_v8  ;;  %623 = vset.pattern.permute.xlu0 %v656_v58  ;;  %v570_v0 = vld [vmem:[%s802_s1] sm:$0xf]  ;;  %v587_v1 = vld [vmem:[%s802_s1 + $0x4] sm:$0xf0] }
  0x13   : > { %295 = vrot.lane.b32.xlu1 %v703_v5, %s649_s21  ;;  %310 = vrot.lane.b32.xlu0 %v703_v5, %s648_s20  ;;  %v571_v2 = vor.u32 %v587_v1, %v570_v0 }
  0x14   : > { %622 = vset.pattern.permute.xlu2 %v656_v58 }
  0x1a   : > { %314 = vrot.lane.b32.xlu2 %v567_v10, %s648_s20 }
  0x1b   : > { %297 = vrot.lane.b32.xlu1 %v708_v11, %s649_s21  ;;  %312 = vrot.lane.b32.xlu0 %v708_v11, %s648_s20  ;;  %s192_s20 = scalar_lea.vmem %s804_s3, %s588_s17 }
  0x22   : > { %293 = vrot.lane.b32.xlu2 %v701_v3, %s649_s21 }
  0x23   : > { %282 = vrot.lane.b32.xlu1 %v708_v11, %s650_s22  ;;  %280 = vrot.lane.b32.xlu0 %v703_v5, %s650_s22 }
  0x2a   : > { %267 = vrot.lane.b32.xlu2 %v708_v11, %s651_s23 }
  0x2b   : > { %265 = vrot.lane.b32.xlu1 %v703_v5, %s651_s23  ;;  %299 = vrot.lane.b32.xlu0 %v567_v10, %s649_s21 }
  0x32   : > { %325 = vrot.lane.b32.xlu2 %v703_v5, %s652_s24 }
  0x33   : > { %284 = vrot.lane.b32.xlu1 %v567_v10, %s650_s22  ;;  %278 = vrot.lane.b32.xlu0 %v701_v3, %s650_s22 }
  0x3a   : > { %252 = vrot.lane.b32.xlu2 %v708_v11, %s653_s25 }
  0x3b   : > { %250 = vrot.lane.b32.xlu1 %v703_v5, %s653_s25  ;;  %327 = vrot.lane.b32.xlu0 %v708_v11, %s652_s24 }
  0x42   : > { %323 = vrot.lane.b32.xlu2 %v701_v3, %s652_s24 }
  0x43   : > { %269 = vrot.lane.b32.xlu1 %v567_v10, %s651_s23  ;;  %263 = vrot.lane.b32.xlu0 %v701_v3, %s651_s23 }
  0x4a   : > { %248 = vrot.lane.b32.xlu2 %v701_v3, %s653_s25 }
  0x4b   : > { %237 = vrot.lane.b32.xlu1 %v708_v11, %s654_s26  ;;  %235 = vrot.lane.b32.xlu0 %v703_v5, %s654_s26 }
  0x52   : > { %222 = vrot.lane.b32.xlu2 %v708_v11, %s655_s27 }
  0x53   : > { %220 = vrot.lane.b32.xlu1 %v703_v5, %s655_s27  ;;  %254 = vrot.lane.b32.xlu0 %v567_v10, %s653_s25 }
  0x5a   : > { %218 = vrot.lane.b32.xlu2 %v701_v3, %s655_s27 }
  0x5b   : > { %239 = vrot.lane.b32.xlu1 %v567_v10, %s654_s26  ;;  %233 = vrot.lane.b32.xlu0 %v701_v3, %s654_s26 }
  0x62   : > { %344 = vperm.xlu2 %622, %v340_v57  }
  0x63   : > { %329 = vrot.lane.b32.xlu1 %v567_v10, %s652_s24  ;;  %224 = vrot.lane.b32.xlu0 %v567_v10, %s655_s27 }
  0x6b   : > { %349 = vperm.xlu0 %623, %v341_v56  }
  0x6c   : > { %v309_v12 = vpop.permute.xlu2 %308 }
  0x74   : > { %v315_v13 = vpop.permute.xlu2 %314 }
  0x7c   : > { %v294_v14 = vpop.permute.xlu2 %293 }
  0x84   : > { %v268_v15 = vpop.permute.xlu2 %267 }
  0x85   : > { %v296_v16 = vpop.permute.xlu1 %295  ;;  %v311_v17 = vpop.permute.xlu0 %310 }
  0x86   : > { %v317_v18 = vsel %vm316_vm0, %v309_v12, %v311_v17  ;;  %v302_v19 = vsel %vm301_vm1, %v294_v14, %v296_v16 }
  0x87   : > { %365 = vmatpush.bf16.msra.mxu0 %v317_v18 }
  0x8b   : > { %366 = vmatpush.bf16.msra.mxu0 %v302_v19 }
  0x8c   : > { %v326_v20 = vpop.permute.xlu2 %325 }
  0x8d   : > { %v298_v21 = vpop.permute.xlu1 %297  ;;  %v313_v22 = vpop.permute.xlu0 %312 }
  0x8e   : > { %v318_v23 = vsel %vm316_vm0, %v311_v17, %v313_v22  ;;  %v303_v24 = vsel %vm301_vm1, %v296_v16, %v298_v21  ;;  %v319_v34 = vsel %vm316_vm0, %v313_v22, %v315_v13 }
  0x8f   : > { %393 = vmatpush.bf16.msra.mxu2 %v318_v23 }
  0x93   : > { %394 = vmatpush.bf16.msra.mxu2 %v303_v24 }
  0x94   : > { %v735_v25 = vpop.permute.xlu2 %252 }
  0x95   : > { %v283_v26 = vpop.permute.xlu1 %282  ;;  %v281_v27 = vpop.permute.xlu0 %280 }
  0x96   : > { %v288_v28 = vsel %vm286_vm2, %v281_v27, %v283_v26 }
  0x97   : > { %395 = vmatpush.bf16.msra.mxu2 %v288_v28 }
  0x9c   : > { %v324_v29 = vpop.permute.xlu2 %323 }
  0x9d   : > { %v266_v30 = vpop.permute.xlu1 %265  ;;  %v300_v31 = vpop.permute.xlu0 %299  ;;  %v332_v32 = vsel %vm331_vm3, %v324_v29, %v326_v20 }
  0x9e   : > { %386 = vmatpush.bf16.msra.mxu1 %v332_v32  ;;  %v273_v33 = vsel %vm271_vm4, %v266_v30, %v268_v15  ;;  %v304_v38 = vsel %vm301_vm1, %v298_v21, %v300_v31 }
  0x9f   : > { %396 = vmatpush.bf16.msra.mxu2 %v273_v33 }
  0xa1   : > { %576 = vmatmul.msk.bf16.vlgmr.msra.gmra.mxu1 %vm361_vm5, %v747_v37 }
  0xa2   : > { %421 = vmatpush.bf16.msrb.mxu1 %v319_v34 }
  0xa4   : > { %v249_v51 = vpop.permute.xlu2 %248 }
  0xa5   : > { %v285_v39 = vpop.permute.xlu1 %284  ;;  %v279_v40 = vpop.permute.xlu0 %278 }
  0xa6   : > { %422 = vmatpush.bf16.msrb.mxu1 %v304_v38  ;;  %v287_v41 = vsel %vm286_vm2, %v279_v40, %v281_v27  ;;  %v289_v42 = vsel %vm286_vm2, %v283_v26, %v285_v39 }
  0xa7   : > { %367 = vmatpush.bf16.msra.mxu0 %v287_v41 }
  0xaa   : > { %423 = vmatpush.bf16.msrb.mxu1 %v289_v42 }
  0xac   : > { %v223_v59 = vpop.permute.xlu2 %222 }
  0xad   : > { %v251_v43 = vpop.permute.xlu1 %250  ;;  %v328_v44 = vpop.permute.xlu0 %327 }
  0xae   : > { %v258_v45 = vsel %vm256_vm6, %v251_v43, %v735_v25  ;;  %v333_v46 = vsel %vm331_vm3, %v326_v20, %v328_v44  ;;  %v257_v52 = vsel %vm256_vm6, %v249_v51, %v251_v43 }
  0xaf   : > { %397 = vmatpush.bf16.msra.mxu2 %v258_v45  ;;  %414 = vmatpush.bf16.msra.mxu3 %v333_v46 }
  0xb2   : > { %577 = vmatmul.msk.bf16.vlgmr.msra.gmra.mxu3 %vm361_vm5, %v747_v37 }
  0xb4   : > { %v219_v9 = vpop.permute.xlu2 %218 }
  0xb5   : > { %v270_v47 = vpop.permute.xlu1 %269  ;;  %v264_v48 = vpop.permute.xlu0 %263 }
  0xb6   : > { %v272_v49 = vsel %vm271_vm4, %v264_v48, %v266_v30  ;;  %v274_v50 = vsel %vm271_vm4, %v268_v15, %v270_v47 }
  0xb7   : > { %368 = vmatpush.bf16.msra.mxu0 %v272_v49  ;;  %424 = vmatpush.bf16.msrb.mxu1 %v274_v50 }
  0xbb   : > { %369 = vmatpush.bf16.msra.mxu0 %v257_v52 }
  0xbc   : > { %v345_v18 = vpop.permute.xlu2 %344 }
  0xbd   : > { %v238_v53 = vpop.permute.xlu1 %237  ;;  %v236_v54 = vpop.permute.xlu0 %235 }
  0xbe   : > { %v243_v55 = vsel %vm241_vm7, %v236_v54, %v238_v53 }
  0xbf   : > { %398 = vmatpush.bf16.msra.mxu2 %v243_v55 }
  0xc5   : > { %v221_v60 = vpop.permute.xlu1 %220  ;;  %v255_v61 = vpop.permute.xlu0 %254 }
  0xc6   : > { %v228_v62 = vsel %vm226_vm8, %v221_v60, %v223_v59  ;;  %v259_v63 = vsel %vm256_vm6, %v735_v25, %v255_v61  ;;  %v227_v10 = vsel %vm226_vm8, %v219_v9, %v221_v60 }
  0xc7   : > { %399 = vmatpush.bf16.msra.mxu2 %v228_v62  ;;  %425 = vmatpush.bf16.msrb.mxu1 %v259_v63 }
  0xcb   : > { %400 = vmatpush.bf16.msra.mxu2 %v703_v5 }
  0xcd   : > { %v240_v4 = vpop.permute.xlu1 %239  ;;  %v234_v6 = vpop.permute.xlu0 %233 }
  0xce   : > { %401 = vmatmul.bf16.vlgmr.msra.gmra.mxu2 %v571_v2  ;;  %v242_v7 = vsel %vm241_vm7, %v234_v6, %v236_v54  ;;  %v244_v8 = vsel %vm241_vm7, %v238_v53, %v240_v4 }
  0xcf   : > { %370 = vmatpush.bf16.msra.mxu0 %v242_v7  ;;  %426 = vmatpush.bf16.msrb.mxu1 %v244_v8 }
  0xd3   : > { %371 = vmatpush.bf16.msra.mxu0 %v227_v10 }
  0xd5   : > { %v330_v12 = vpop.permute.xlu1 %329  ;;  %v225_v13 = vpop.permute.xlu0 %224 }
  0xd6   : > { %v334_v14 = vsel %vm331_vm3, %v328_v44, %v330_v12  ;;  %v229_v15 = vsel %vm226_vm8, %v223_v59, %v225_v13 }
  0xd7   : > { %372 = vmatpush.bf16.msra.mxu0 %v701_v3  ;;  %442 = vmatpush.bf16.msrb.mxu3 %v334_v14 }
  0xd8   : > { %427 = vmatpush.bf16.msrb.mxu1 %v229_v15 }
  0xda   : > { %373 = vmatmul.bf16.vlgmr.msra.gmra.mxu0 %v571_v2  ;;  %578 = vmatmul.msk.bf16.vlgmr.msrb.gmra.mxu3 %vm361_vm5, %v747_v37 }
  0xdc   : > { %428 = vmatpush.bf16.msrb.mxu1 %v708_v11 }
  0xdd   : > { %v350_v25 = vpop.permute.xlu0 %349 }
  0xdf   : > { %429 = vmatmul.bf16.vlgmr.msrb.gmra.mxu1 %v571_v2 }
 0x11e   : > { %v388_v5 = vpop.f32.mrf.mxu1 }
 0x126   : > { %v390_v20 = vpop.f32.mrf.mxu1 }
 0x135   : > { %v416_v16 = vpop.f32.mrf.mxu3 }
 0x13d   : > { %v418_v21 = vpop.f32.mrf.mxu3 }
 0x151   : > { %v402_v17 = vpop.f32.mrf.mxu2 }
 0x152   : > { %v403_v19 = vadd.f32 %v402_v17, %v345_v18 }
 0x154   : > { %v417_v23 = vadd.f32 %v416_v16, %v403_v19 }
 0x156   : > { %v450_v27 = vmax.f32 %v417_v23, 0.0 }
 0x157   : > { %v374_v22 = vpop.f32.mrf.mxu0 }
 0x158   : > { %v375_v3 = vadd.f32 %v374_v22, %v345_v18 }
 0x159   : > { %v404_v24 = vpop.f32.mrf.mxu2 }
 0x15a   : > { %v389_v26 = vadd.f32 %v388_v5, %v375_v3  ;;  %v405_v29 = vadd.f32 %v404_v24, %v350_v25 }
 0x15c   : > { %v449_v28 = vmax.f32 %v389_v26, 0.0  ;;  %v430_v30 = vpop.f32.mrf.mxu1  ;;  %v419_v35 = vadd.f32 %v418_v21, %v405_v29 }
 0x15d   : > { %v431_v11 = vadd.f32 %v430_v30, %v345_v18  ;;  %v444_v31 = vpop.f32.mrf.mxu3 }
 0x15e   : > { %v455_v32 = vpack.c.bf16 %v450_v27, %v449_v28  ;;  %v453_v40 = vmax.f32 %v419_v35, 0.0 }
 0x15f   : > { %v376_v33 = vpop.f32.mrf.mxu0  ;;  %v445_v34 = vadd.f32 %v444_v31, %v431_v11 }
 0x160   : > { %459 = vst [vmem:[%s192_s20] sm:$0xff] %v455_v32  ;;  %v377_v36 = vadd.f32 %v376_v33, %v350_v25 }
 0x161   : > { %v451_v37 = vmax.f32 %v445_v34, 0.0 }
 0x162   : > { %v391_v38 = vadd.f32 %v390_v20, %v377_v36 }
 0x163   : > { %v456_v39 = vpack.c.bf16 %v451_v37, %v451_v37 }
 0x164   : > { %v452_v41 = vmax.f32 %v391_v38, 0.0  ;;  %v432_v42 = vpop.f32.mrf.mxu1 }
 0x165   : > { %460 = vst [vmem:[%s192_s20 + $0x8] sm:$0xf] %v456_v39  ;;  %v433_v43 = vadd.f32 %v432_v42, %v350_v25  ;;  %v446_v44 = vpop.f32.mrf.mxu3 }
 0x166   : > { %v457_v45 = vpack.c.bf16 %v453_v40, %v452_v41 }
 0x167   : > { %v447_v46 = vadd.f32 %v446_v44, %v433_v43 }
 0x168   : > { %461 = vst [vmem:[%s192_s20 + $0xc] sm:$0xff] %v457_v45 }
 0x169   : > { %v454_v47 = vmax.f32 %v447_v46, 0.0 }
 0x16b   : > { %v458_v48 = vpack.c.bf16 %v454_v47, %v454_v47 }
 0x16d   : > { %462 = vst [vmem:[%s192_s20 + $0x14] sm:$0xf] %v458_v48 }
 0x16e PF: > { %s13_s14 = sadd.s32 1, %s646_s14   ;;  %s805_s12 = smov %s642_s13 }
 0x16f   : > { %p10_p5 = scmp.ge.s32.totalorder %s13_s14, 4   ;;  %s806_s13 = smov %s808_s15 }
 0x171   :  { %12 = sbr.rel (!%p10_p5) target bundleno = 2 (0x2), region = 62 }

// kernel: forward.24
= control target key start
LH: loop header
LB: loop body
LE: loop exit
PB: predicated region body
PF: predicated region fallthrough
CT: control target
= control target key end

     0   :  { %s780_s15 = smov 0   ;;  %s782_s16 = smov 0   ;;  %s917_s0 = inlined_call_operand.vmem [shape: bf16[2,16,456], index: 0, kind: input, shape index: {}]   ;;  %s918_s1 = inlined_call_operand.vmem [shape: bf16[16,144], index: 1, kind: input, shape index: {}]   ;;  %s919_s2 = inlined_call_operand.vmem [shape: f32[16,1], index: 2, kind: input, shape index: {}]   ;;  %s920_s3 = inlined_call_operand.vmem [shape: bf16[2,16,384], index: 3, kind: input, shape index: {}]   ;;  %s921_s4 = inlined_call_operand.vmem [shape: bf16[2,16,384], index: 4, kind: output, shape index: {}]  }
   0x1   :  { %s784_s17 = smov 0  }
   0x2 LB: > { %s26_s18 = sadd.s32 1, %s740_s16  ;;  %p645_p0 = scmp.ge.s32.totalorder %s744_s17, 1  ;;  %s744_s17 = sphi %s784_s17, %s14_s17   ;;  %s740_s16 = sphi %s782_s16, %s923_s16   ;;  %s736_s15 = sphi %s780_s15, %s922_s15  }
   0x3   : > { %p28_p1 = scmp.ge.s32.totalorder %s26_s18, 2  ;;  %p193_p2 = scmp.lt.s32.totalorder %s744_s17, 3 }
   0x5   : > { %s925_s18 = smov (%p28_p1, %s26_s18), 0  ;;  %p194_p3 = pnand %p645_p0, %p193_p2 }
   0x6   : > { %p232_p4 = scmp.lt.s32.totalorder (!%p194_p3), %s736_s15, 1  ;;  %s746_s23 = smov (!%p194_p3), 79  }
   0x7   : > { %197 = sbr.rel (%p194_p3) target bundleno = 368 (0x170), region = 36  ;;  %s747_s24 = smov (!%p194_p3), 80  }
   0x8   : > { %s748_s25 = smov (!%p194_p3), 102   ;;  %s749_s26 = smov (!%p194_p3), 103  }
   0x9   : > { %s750_s27 = smov (!%p194_p3), 78   ;;  %s751_s28 = smov (!%p194_p3), 104  }
   0xa   : > { %s752_s29 = smov (!%p194_p3), 126   ;;  %s753_s30 = smov (!%p194_p3), 127  }
   0xc   : > { %s927_s15 = smov (!%p232_p4, %s736_s15), 1  ;;  %vm379_vm0 = vcmask 646144   ;;  %vm364_vm1 = vcmask 654336   ;;  %vm349_vm2 = vcmask 834560   ;;  %vm394_vm3 = vcmask 637952   ;;  %v404_v56 = vld [vmem:[%s919_s2 + $0x8] sm:$0xff] }
   0xd   : > { %s679_s19 = sshll.u32 %s927_s15, 5  ;;  %vm334_vm4 = vcmask 842752   ;;  %v684_v35 = vld [vmem:[%s918_s1 + $0x4] sm:$0xf]  ;;  %v670_v36 = vld [vmem:[%s918_s1 + $0x8] sm:$0xf0] }
   0xe   : > { %s236_s22 = scalar_lea.vmem %s917_s0, %s679_s19  ;;  %v850_v37 = vor.u32 %v684_v35, %v670_v36  ;;  %vm424_vm5 = vcmask 130048   ;;  %vm319_vm6 = vcmask 850944   ;;  %vm304_vm7 = vcmask 1031168   ;;  %v403_v57 = vld [vmem:[%s919_s2] sm:$0xff]  ;;  %s686_s21 = smul.u32 24, %s927_s15 }
   0xf   : > { %v652_v0 = vld [vmem:[%s236_s22] sm:$0xf]  ;;  %v682_v1 = vld [vmem:[%s236_s22 + $0xc] sm:$0xf0]  ;;  %v680_v2 = vld [vmem:[%s236_s22 + $0x4] sm:$0xf] }
  0x10   : > { %v804_v3 = vor.u32 %v682_v1, %v652_v0  ;;  %v654_v4 = vld [vmem:[%s236_s22 + $0x10] sm:$0xf0]  ;;  %v681_v6 = vld [vmem:[%s236_s22 + $0xc] sm:$0xf]  ;;  %v662_v7 = vld [vmem:[%s236_s22 + $0x18] sm:$0xf0] }
  0x11   : > { %v806_v5 = vor.u32 %v680_v2, %v654_v4  ;;  %v660_v8 = vld [vmem:[%s236_s22 + $0x8] sm:$0xf]  ;;  %v683_v9 = vld [vmem:[%s236_s22 + $0x14] sm:$0xf0]  ;;  %v665_v10 = vor.u32 %v681_v6, %v662_v7  ;;  %v754_v58 = vmov 0   ;;  %vm289_vm8 = vcmask 1039360  }
  0x12   : > { %371 = vrot.lane.b32.xlu2 %v804_v3, %s746_s23  ;;  %v811_v11 = vor.u32 %v683_v9, %v660_v8  ;;  %721 = vset.pattern.permute.xlu0 %v754_v58  ;;  %v668_v0 = vld [vmem:[%s918_s1] sm:$0xf]  ;;  %v685_v1 = vld [vmem:[%s918_s1 + $0x4] sm:$0xf0] }
  0x13   : > { %358 = vrot.lane.b32.xlu1 %v806_v5, %s747_s24  ;;  %373 = vrot.lane.b32.xlu0 %v806_v5, %s746_s23  ;;  %v669_v2 = vor.u32 %v685_v1, %v668_v0 }
  0x14   : > { %720 = vset.pattern.permute.xlu2 %v754_v58 }
  0x1a   : > { %377 = vrot.lane.b32.xlu2 %v665_v10, %s746_s23 }
  0x1b   : > { %360 = vrot.lane.b32.xlu1 %v811_v11, %s747_s24  ;;  %375 = vrot.lane.b32.xlu0 %v811_v11, %s746_s23 }
  0x22   : > { %356 = vrot.lane.b32.xlu2 %v804_v3, %s747_s24 }
  0x23   : > { %345 = vrot.lane.b32.xlu1 %v811_v11, %s748_s25  ;;  %343 = vrot.lane.b32.xlu0 %v806_v5, %s748_s25 }
  0x2a   : > { %330 = vrot.lane.b32.xlu2 %v811_v11, %s749_s26 }
  0x2b   : > { %328 = vrot.lane.b32.xlu1 %v806_v5, %s749_s26  ;;  %362 = vrot.lane.b32.xlu0 %v665_v10, %s747_s24  ;;  %s897_s24 = scalar_lea.vmem %s920_s3, %s686_s21 }
  0x32   : > { %388 = vrot.lane.b32.xlu2 %v806_v5, %s750_s27 }
  0x33   : > { %347 = vrot.lane.b32.xlu1 %v665_v10, %s748_s25  ;;  %341 = vrot.lane.b32.xlu0 %v804_v3, %s748_s25 }
  0x3a   : > { %315 = vrot.lane.b32.xlu2 %v811_v11, %s751_s28 }
  0x3b   : > { %313 = vrot.lane.b32.xlu1 %v806_v5, %s751_s28  ;;  %390 = vrot.lane.b32.xlu0 %v811_v11, %s750_s27 }
  0x42   : > { %386 = vrot.lane.b32.xlu2 %v804_v3, %s750_s27 }
  0x43   : > { %332 = vrot.lane.b32.xlu1 %v665_v10, %s749_s26  ;;  %326 = vrot.lane.b32.xlu0 %v804_v3, %s749_s26 }
  0x4a   : > { %311 = vrot.lane.b32.xlu2 %v804_v3, %s751_s28 }
  0x4b   : > { %300 = vrot.lane.b32.xlu1 %v811_v11, %s752_s29  ;;  %298 = vrot.lane.b32.xlu0 %v806_v5, %s752_s29 }
  0x52   : > { %285 = vrot.lane.b32.xlu2 %v811_v11, %s753_s30 }
  0x53   : > { %283 = vrot.lane.b32.xlu1 %v806_v5, %s753_s30  ;;  %317 = vrot.lane.b32.xlu0 %v665_v10, %s751_s28 }
  0x5a   : > { %281 = vrot.lane.b32.xlu2 %v804_v3, %s753_s30 }
  0x5b   : > { %302 = vrot.lane.b32.xlu1 %v665_v10, %s752_s29  ;;  %296 = vrot.lane.b32.xlu0 %v804_v3, %s752_s29 }
  0x62   : > { %407 = vperm.xlu2 %720, %v403_v57  }
  0x63   : > { %392 = vrot.lane.b32.xlu1 %v665_v10, %s750_s27  ;;  %287 = vrot.lane.b32.xlu0 %v665_v10, %s753_s30  ;;  %s255_s27 = scalar_lea.vmem %s921_s4, %s686_s21 }
  0x6b   : > { %412 = vperm.xlu0 %721, %v404_v56  }
  0x6c   : > { %v372_v12 = vpop.permute.xlu2 %371 }
  0x74   : > { %v378_v13 = vpop.permute.xlu2 %377 }
  0x7c   : > { %v357_v14 = vpop.permute.xlu2 %356 }
  0x84   : > { %v331_v15 = vpop.permute.xlu2 %330 }
  0x85   : > { %v359_v16 = vpop.permute.xlu1 %358  ;;  %v374_v17 = vpop.permute.xlu0 %373 }
  0x86   : > { %v380_v18 = vsel %vm379_vm0, %v372_v12, %v374_v17  ;;  %v365_v19 = vsel %vm364_vm1, %v357_v14, %v359_v16 }
  0x87   : > { %428 = vmatpush.bf16.msra.mxu0 %v380_v18 }
  0x8b   : > { %429 = vmatpush.bf16.msra.mxu0 %v365_v19  ;;  %v512_v19 = vld [vmem:[%s897_s24] sm:$0xff] }
  0x8c   : > { %v389_v20 = vpop.permute.xlu2 %388 }
  0x8d   : > { %v361_v21 = vpop.permute.xlu1 %360  ;;  %v376_v22 = vpop.permute.xlu0 %375 }
  0x8e   : > { %v381_v23 = vsel %vm379_vm0, %v374_v17, %v376_v22  ;;  %v366_v24 = vsel %vm364_vm1, %v359_v16, %v361_v21  ;;  %v382_v34 = vsel %vm379_vm0, %v376_v22, %v378_v13 }
  0x8f   : > { %456 = vmatpush.bf16.msra.mxu2 %v381_v23 }
  0x93   : > { %457 = vmatpush.bf16.msra.mxu2 %v366_v24 }
  0x94   : > { %v838_v25 = vpop.permute.xlu2 %315 }
  0x95   : > { %v346_v26 = vpop.permute.xlu1 %345  ;;  %v344_v27 = vpop.permute.xlu0 %343 }
  0x96   : > { %v351_v28 = vsel %vm349_vm2, %v344_v27, %v346_v26 }
  0x97   : > { %458 = vmatpush.bf16.msra.mxu2 %v351_v28 }
  0x9c   : > { %v387_v29 = vpop.permute.xlu2 %386 }
  0x9d   : > { %v329_v30 = vpop.permute.xlu1 %328  ;;  %v363_v31 = vpop.permute.xlu0 %362  ;;  %v395_v32 = vsel %vm394_vm3, %v387_v29, %v389_v20 }
  0x9e   : > { %449 = vmatpush.bf16.msra.mxu1 %v395_v32  ;;  %v336_v33 = vsel %vm334_vm4, %v329_v30, %v331_v15  ;;  %v367_v38 = vsel %vm364_vm1, %v361_v21, %v363_v31  ;;  %v513_v31 = vld [vmem:[%s897_s24 + $0x8] sm:$0xf]  ;;  %v514_v32 = vld [vmem:[%s897_s24 + $0xc] sm:$0xff] }
  0x9f   : > { %459 = vmatpush.bf16.msra.mxu2 %v336_v33 }
  0xa1   : > { %674 = vmatmul.msk.bf16.vlgmr.msra.gmra.mxu1 %vm424_vm5, %v850_v37 }
  0xa2   : > { %484 = vmatpush.bf16.msrb.mxu1 %v382_v34 }
  0xa4   : > { %v312_v51 = vpop.permute.xlu2 %311 }
  0xa5   : > { %v348_v39 = vpop.permute.xlu1 %347  ;;  %v342_v40 = vpop.permute.xlu0 %341 }
  0xa6   : > { %485 = vmatpush.bf16.msrb.mxu1 %v367_v38  ;;  %v350_v41 = vsel %vm349_vm2, %v342_v40, %v344_v27  ;;  %v352_v42 = vsel %vm349_vm2, %v346_v26, %v348_v39  ;;  %v516_v26 = vunpack.c.l.bf16 %v512_v19 }
  0xa7   : > { %430 = vmatpush.bf16.msra.mxu0 %v350_v41  ;;  %v520_v41 = vunpack.c.h.bf16 %v514_v32 }
  0xaa   : > { %486 = vmatpush.bf16.msrb.mxu1 %v352_v42 }
  0xac   : > { %v286_v59 = vpop.permute.xlu2 %285 }
  0xad   : > { %v314_v43 = vpop.permute.xlu1 %313  ;;  %v391_v44 = vpop.permute.xlu0 %390 }
  0xae   : > { %v321_v45 = vsel %vm319_vm6, %v314_v43, %v838_v25  ;;  %v396_v46 = vsel %vm394_vm3, %v389_v20, %v391_v44  ;;  %v320_v52 = vsel %vm319_vm6, %v312_v51, %v314_v43 }
  0xaf   : > { %460 = vmatpush.bf16.msra.mxu2 %v321_v45  ;;  %477 = vmatpush.bf16.msra.mxu3 %v396_v46  ;;  %v519_v46 = vunpack.c.l.bf16 %v514_v32 }
  0xb2   : > { %675 = vmatmul.msk.bf16.vlgmr.msra.gmra.mxu3 %vm424_vm5, %v850_v37 }
  0xb4   : > { %v282_v9 = vpop.permute.xlu2 %281 }
  0xb5   : > { %v333_v47 = vpop.permute.xlu1 %332  ;;  %v327_v48 = vpop.permute.xlu0 %326 }
  0xb6   : > { %v335_v49 = vsel %vm334_vm4, %v327_v48, %v329_v30  ;;  %v337_v50 = vsel %vm334_vm4, %v331_v15, %v333_v47 }
  0xb7   : > { %431 = vmatpush.bf16.msra.mxu0 %v335_v49  ;;  %487 = vmatpush.bf16.msrb.mxu1 %v337_v50  ;;  %v515_v50 = vld [vmem:[%s897_s24 + $0x14] sm:$0xf] }
  0xb8   : > { %v521_v57 = vunpack.c.l.bf16 %v515_v50 }
  0xbb   : > { %432 = vmatpush.bf16.msra.mxu0 %v320_v52 }
  0xbc   : > { %v408_v17 = vpop.permute.xlu2 %407 }
  0xbd   : > { %v301_v53 = vpop.permute.xlu1 %300  ;;  %v299_v54 = vpop.permute.xlu0 %298 }
  0xbe   : > { %v306_v55 = vsel %vm304_vm7, %v299_v54, %v301_v53 }
  0xbf   : > { %461 = vmatpush.bf16.msra.mxu2 %v306_v55 }
  0xc5   : > { %v284_v60 = vpop.permute.xlu1 %283  ;;  %v318_v61 = vpop.permute.xlu0 %317 }
  0xc6   : > { %v291_v62 = vsel %vm289_vm8, %v284_v60, %v286_v59  ;;  %v322_v63 = vsel %vm319_vm6, %v838_v25, %v318_v61  ;;  %v290_v10 = vsel %vm289_vm8, %v282_v9, %v284_v60 }
  0xc7   : > { %462 = vmatpush.bf16.msra.mxu2 %v291_v62  ;;  %488 = vmatpush.bf16.msrb.mxu1 %v322_v63 }
  0xcb   : > { %463 = vmatpush.bf16.msra.mxu2 %v806_v5 }
  0xcd   : > { %v303_v4 = vpop.permute.xlu1 %302  ;;  %v297_v6 = vpop.permute.xlu0 %296 }
  0xce   : > { %464 = vmatmul.bf16.vlgmr.msra.gmra.mxu2 %v669_v2  ;;  %v305_v7 = vsel %vm304_vm7, %v297_v6, %v299_v54  ;;  %v307_v8 = vsel %vm304_vm7, %v301_v53, %v303_v4 }
  0xcf   : > { %433 = vmatpush.bf16.msra.mxu0 %v305_v7  ;;  %489 = vmatpush.bf16.msrb.mxu1 %v307_v8 }
  0xd3   : > { %434 = vmatpush.bf16.msra.mxu0 %v290_v10 }
  0xd5   : > { %v393_v12 = vpop.permute.xlu1 %392  ;;  %v288_v13 = vpop.permute.xlu0 %287 }
  0xd6   : > { %v397_v14 = vsel %vm394_vm3, %v391_v44, %v393_v12  ;;  %v292_v5 = vsel %vm289_vm8, %v286_v59, %v288_v13 }
  0xd7   : > { %435 = vmatpush.bf16.msra.mxu0 %v804_v3  ;;  %505 = vmatpush.bf16.msrb.mxu3 %v397_v14 }
  0xd8   : > { %490 = vmatpush.bf16.msrb.mxu1 %v292_v5 }
  0xda   : > { %436 = vmatmul.bf16.vlgmr.msra.gmra.mxu0 %v669_v2  ;;  %676 = vmatmul.msk.bf16.vlgmr.msrb.gmra.mxu3 %vm424_vm5, %v850_v37  ;;  %v518_v37 = vunpack.c.l.bf16 %v513_v31 }
  0xdc   : > { %491 = vmatpush.bf16.msrb.mxu1 %v811_v11  ;;  %v517_v11 = vunpack.c.h.bf16 %v512_v19 }
  0xdd   : > { %v413_v24 = vpop.permute.xlu0 %412 }
  0xdf   : > { %492 = vmatmul.bf16.vlgmr.msrb.gmra.mxu1 %v669_v2 }
 0x11e   : > { %v451_v15 = vpop.f32.mrf.mxu1 }
 0x126   : > { %v453_v20 = vpop.f32.mrf.mxu1 }
 0x135   : > { %v479_v16 = vpop.f32.mrf.mxu3 }
 0x13d   : > { %v481_v21 = vpop.f32.mrf.mxu3 }
 0x151   : > { %v465_v3 = vpop.f32.mrf.mxu2 }
 0x152   : > { %v466_v18 = vadd.f32 %v465_v3, %v408_v17 }
 0x154   : > { %v480_v22 = vadd.f32 %v479_v16, %v466_v18 }
 0x156   : > { %v523_v28 = vadd.f32 %v517_v11, %v480_v22 }
 0x157   : > { %v437_v23 = vpop.f32.mrf.mxu0 }
 0x158   : > { %v438_v25 = vadd.f32 %v437_v23, %v408_v17  ;;  %v529_v38 = vmax.f32 %v523_v28, 0.0 }
 0x159   : > { %v467_v27 = vpop.f32.mrf.mxu2 }
 0x15a   : > { %v452_v29 = vadd.f32 %v451_v15, %v438_v25  ;;  %v468_v30 = vadd.f32 %v467_v27, %v413_v24 }
 0x15c   : > { %v522_v33 = vadd.f32 %v516_v26, %v452_v29  ;;  %v493_v34 = vpop.f32.mrf.mxu1  ;;  %v482_v40 = vadd.f32 %v481_v21, %v468_v30 }
 0x15d   : > { %v494_v35 = vadd.f32 %v493_v34, %v408_v17  ;;  %v507_v36 = vpop.f32.mrf.mxu3 }
 0x15e   : > { %v528_v39 = vmax.f32 %v522_v33, 0.0  ;;  %v526_v48 = vadd.f32 %v520_v41, %v482_v40 }
 0x15f   : > { %v439_v42 = vpop.f32.mrf.mxu0  ;;  %v508_v43 = vadd.f32 %v507_v36, %v494_v35 }
 0x160   : > { %v534_v44 = vpack.c.bf16 %v529_v38, %v528_v39  ;;  %v440_v45 = vadd.f32 %v439_v42, %v413_v24  ;;  %v532_v58 = vmax.f32 %v526_v48, 0.0 }
 0x161   : > { %v524_v47 = vadd.f32 %v518_v37, %v508_v43 }
 0x162   : > { %538 = vst [vmem:[%s255_s27] sm:$0xff] %v534_v44  ;;  %v454_v49 = vadd.f32 %v453_v20, %v440_v45 }
 0x163   : > { %v530_v51 = vmax.f32 %v524_v47, 0.0 }
 0x164   : > { %v525_v52 = vadd.f32 %v519_v46, %v454_v49  ;;  %v495_v53 = vpop.f32.mrf.mxu1 }
 0x165   : > { %v535_v54 = vpack.c.bf16 %v530_v51, %v530_v51  ;;  %v496_v55 = vadd.f32 %v495_v53, %v413_v24  ;;  %v509_v56 = vpop.f32.mrf.mxu3 }
 0x166   : > { %v531_v59 = vmax.f32 %v525_v52, 0.0 }
 0x167   : > { %539 = vst [vmem:[%s255_s27 + $0x8] sm:$0xf] %v535_v54  ;;  %v510_v60 = vadd.f32 %v509_v56, %v496_v55 }
 0x168   : > { %v536_v61 = vpack.c.bf16 %v532_v58, %v531_v59 }
 0x169   : > { %v527_v62 = vadd.f32 %v521_v57, %v510_v60 }
 0x16a   : > { %540 = vst [vmem:[%s255_s27 + $0xc] sm:$0xff] %v536_v61 }
 0x16b   : > { %v533_v63 = vmax.f32 %v527_v62, 0.0 }
 0x16d   : > { %v537_v0 = vpack.c.bf16 %v533_v63, %v533_v63 }
 0x16f   : > { %541 = vst [vmem:[%s255_s27 + $0x14] sm:$0xf] %v537_v0 }
 0x170 PF: > { %s14_s17 = sadd.s32 1, %s744_s17   ;;  %s922_s15 = smov %s740_s16 }
 0x171   : > { %p11_p5 = scmp.ge.s32.totalorder %s14_s17, 4   ;;  %s923_s16 = smov %s925_s18 }
 0x173   :  { %13 = sbr.rel (!%p11_p5) target bundleno = 2 (0x2), region = 69 }

// kernel: forward.27
= control target key start
LH: loop header
LB: loop body
LE: loop exit
PB: predicated region body
PF: predicated region fallthrough
CT: control target
= control target key end

     0   :  { %s664_s12 = smov 0   ;;  %s666_s13 = smov 0   ;;  %s811_s0 = inlined_call_operand.vmem [shape: bf16[2,64,160], index: 0, kind: input, shape index: {}]   ;;  %s812_s1 = inlined_call_operand.vmem [shape: bf16[32,256], index: 1, kind: input, shape index: {}]   ;;  %s813_s2 = inlined_call_operand.vmem [shape: f32[32,1], index: 2, kind: input, shape index: {}]   ;;  %s814_s3 = inlined_call_operand.vmem [shape: bf16[2,32,128], index: 3, kind: output, shape index: {}]  }
   0x1   :  { %s668_s14 = smov 0  }
   0x2 LB: > { %s25_s15 = sadd.s32 1, %s634_s13  ;;  %p489_p0 = scmp.ge.s32.totalorder %s638_s14, 1  ;;  %s638_s14 = sphi %s668_s14, %s13_s14   ;;  %s634_s13 = sphi %s666_s13, %s816_s13   ;;  %s630_s12 = sphi %s664_s12, %s815_s12  }
   0x3   : > { %p27_p1 = scmp.ge.s32.totalorder %s25_s15, 2  ;;  %p151_p2 = scmp.lt.s32.totalorder %s638_s14, 3 }
   0x5   : > { %s818_s15 = smov (%p27_p1, %s25_s15), 0  ;;  %p152_p3 = pnand %p489_p0, %p151_p2 }
   0x6   : > { %p178_p4 = scmp.lt.s32.totalorder (!%p152_p3), %s630_s12, 1  ;;  %s640_s20 = smov (!%p152_p3), 111  }
   0x7   : > { %155 = sbr.rel (%p152_p3) target bundleno = 344 (0x158), region = 32  ;;  %s641_s21 = smov (!%p152_p3), 127  }
   0x8   : > { %s642_s22 = smov (!%p152_p3), 112  }
   0xc   : > { %s820_s12 = smov (!%p178_p4, %s630_s12), 1  ;;  %vm301_vm0 = vcmask 908288   ;;  %vm251_vm1 = vcmask 1039360   ;;  %v315_v46 = vld [vmem:[%s813_s2 + $0x8] sm:$0xff]  ;;  %v314_v47 = vld [vmem:[%s813_s2] sm:$0xff]  ;;  %v643_v49 = vmov 0  }
   0xd   : > { %s544_s16 = sshll.u32 %s820_s12, 6  ;;  %614 = vset.pattern.permute.xlu1 %v643_v49  ;;  %613 = vset.pattern.permute.xlu0 %v643_v49  ;;  %v316_v50 = vld [vmem:[%s813_s2 + $0x10] sm:$0xff]  ;;  %vm276_vm2 = vcmask 916480   ;;  %v317_v54 = vld [vmem:[%s813_s2 + $0x18] sm:$0xff]  ;;  %v528_v59 = vld [vmem:[%s812_s1] sm:$0xf] }
   0xe   : > { %s688_s19 = scalar_lea.vmem %s811_s0, %s544_s16  ;;  %615 = vset.pattern.permute.xlu2 %v643_v49  ;;  %v536_v57 = vld [vmem:[%s812_s1 + $0x10] sm:$0xf]  ;;  %v557_v58 = vld [vmem:[%s812_s1 + $0x14] sm:$0xf0]  ;;  %v555_v60 = vld [vmem:[%s812_s1 + $0x4] sm:$0xf0] }
   0xf   : > { %v508_v0 = vld [vmem:[%s688_s19 + $0x30] sm:$0xf]  ;;  %v553_v1 = vld [vmem:[%s688_s19 + $0x34] sm:$0xf0]  ;;  %v504_v3 = vld [vmem:[%s688_s19 + $0x20] sm:$0xf] }
  0x10   : > { %v692_v2 = vor.u32 %v553_v1, %v508_v0  ;;  %v551_v4 = vld [vmem:[%s688_s19 + $0x24] sm:$0xf0]  ;;  %v552_v6 = vld [vmem:[%s688_s19 + $0x34] sm:$0xf]  ;;  %v522_v7 = vld [vmem:[%s688_s19 + $0x38] sm:$0xf0]  ;;  %v537_v0 = vor.u32 %v557_v58, %v536_v57  ;;  %v529_v1 = vor.u32 %v555_v60, %v528_v59 }
  0x11   : > { %v696_v5 = vor.u32 %v551_v4, %v504_v3  ;;  %v525_v8 = vor.u32 %v552_v6, %v522_v7  ;;  %v550_v9 = vld [vmem:[%s688_s19 + $0x24] sm:$0xf]  ;;  %v518_v10 = vld [vmem:[%s688_s19 + $0x28] sm:$0xf0]  ;;  %v500_v12 = vld [vmem:[%s688_s19 + $0x10] sm:$0xf] }
  0x12   : > { %297 = vrot.lane.b32.xlu1 %v692_v2, %s640_s20  ;;  %247 = vrot.lane.b32.xlu0 %v692_v2, %s641_s21  ;;  %v521_v11 = vor.u32 %v550_v9, %v518_v10  ;;  %v549_v13 = vld [vmem:[%s688_s19 + $0x14] sm:$0xf0]  ;;  %v548_v15 = vld [vmem:[%s688_s19 + $0x14] sm:$0xf]  ;;  %s545_s24 = sshll.u32 %s820_s12, 4 }
  0x13   : > { %243 = vrot.lane.b32.xlu2 %v696_v5, %s641_s21  ;;  %v713_v14 = vor.u32 %v549_v13, %v500_v12  ;;  %v514_v16 = vld [vmem:[%s688_s19 + $0x18] sm:$0xf0]  ;;  %v496_v18 = vld [vmem:[%s688_s19] sm:$0xf]  ;;  %v547_v19 = vld [vmem:[%s688_s19 + $0x4] sm:$0xf0]  ;;  %s190_s27 = scalar_lea.vmem %s814_s3, %s545_s24 }
  0x14   : > { %v517_v17 = vor.u32 %v548_v15, %v514_v16  ;;  %v546_v20 = vld [vmem:[%s688_s19 + $0x4] sm:$0xf]  ;;  %v510_v21 = vld [vmem:[%s688_s19 + $0x8] sm:$0xf0]  ;;  %v730_v22 = vor.u32 %v547_v19, %v496_v18  ;;  %v538_v9 = vld [vmem:[%s812_s1 + $0x18] sm:$0xf0] }
  0x15   : > { %v513_v23 = vor.u32 %v546_v20, %v510_v21  ;;  %v554_v6 = vld [vmem:[%s812_s1 + $0x4] sm:$0xf]  ;;  %v530_v7 = vld [vmem:[%s812_s1 + $0x8] sm:$0xf0] }
  0x1a   : > { %299 = vrot.lane.b32.xlu1 %v525_v8, %s640_s20  ;;  %249 = vrot.lane.b32.xlu0 %v525_v8, %s641_s21 }
  0x1b   : > { %245 = vrot.lane.b32.xlu2 %v521_v11, %s641_s21 }
  0x22   : > { %293 = vrot.lane.b32.xlu0 %v696_v5, %s640_s20  ;;  %295 = vrot.lane.b32.xlu1 %v521_v11, %s640_s20 }
  0x23   : > { %239 = vrot.lane.b32.xlu2 %v713_v14, %s641_s21 }
  0x2a   : > { %289 = vrot.lane.b32.xlu1 %v713_v14, %s640_s20  ;;  %241 = vrot.lane.b32.xlu0 %v517_v17, %s641_s21 }
  0x2b   : > { %291 = vrot.lane.b32.xlu2 %v517_v17, %s640_s20 }
  0x32   : > { %235 = vrot.lane.b32.xlu0 %v730_v22, %s641_s21  ;;  %237 = vrot.lane.b32.xlu1 %v513_v23, %s641_s21 }
  0x33   : > { %285 = vrot.lane.b32.xlu2 %v730_v22, %s640_s20 }
  0x3a   : > { %287 = vrot.lane.b32.xlu0 %v513_v23, %s640_s20  ;;  %272 = vrot.lane.b32.xlu1 %v692_v2, %s642_s22 }
  0x3b   : > { %274 = vrot.lane.b32.xlu2 %v525_v8, %s642_s22  ;;  %v556_v8 = vld [vmem:[%s812_s1 + $0x14] sm:$0xf] }
  0x3c   : > { %v541_v12 = vor.u32 %v556_v8, %v538_v9 }
  0x42   : > { %268 = vrot.lane.b32.xlu0 %v696_v5, %s642_s22  ;;  %270 = vrot.lane.b32.xlu1 %v521_v11, %s642_s22  ;;  %v533_v11 = vor.u32 %v554_v6, %v530_v7 }
  0x43   : > { %264 = vrot.lane.b32.xlu2 %v713_v14, %s642_s22 }
  0x4a   : > { %266 = vrot.lane.b32.xlu0 %v517_v17, %s642_s22  ;;  %260 = vrot.lane.b32.xlu1 %v730_v22, %s642_s22 }
  0x4b   : > { %262 = vrot.lane.b32.xlu2 %v513_v23, %s642_s22 }
  0x52   : > { %325 = vperm.xlu1 %614, %v315_v46   ;;  %320 = vperm.xlu0 %613, %v314_v47  }
  0x53   : > { %330 = vperm.xlu2 %615, %v316_v50  }
  0x5a   : > { %335 = vperm.xlu1 %614, %v317_v54  }
  0x6d   : > { %v244_v24 = vpop.permute.xlu2 %243 }
  0x75   : > { %v246_v25 = vpop.permute.xlu2 %245 }
  0x76   : > { %v254_v33 = vsel %vm251_vm1, %v244_v24, %v246_v25 }
  0x7d   : > { %v240_v28 = vpop.permute.xlu2 %239 }
  0x84   : > { %v298_v26 = vpop.permute.xlu1 %297  ;;  %v248_v27 = vpop.permute.xlu0 %247 }
  0x85   : > { %v292_v34 = vpop.permute.xlu2 %291 }
  0x8c   : > { %v300_v29 = vpop.permute.xlu1 %299  ;;  %v250_v30 = vpop.permute.xlu0 %249 }
  0x8d   : > { %v255_v31 = vsel %vm251_vm1, %v248_v27, %v250_v30  ;;  %v305_v32 = vsel %vm301_vm0, %v298_v26, %v300_v29  ;;  %v286_v42 = vpop.permute.xlu2 %285 }
  0x8e   : > { %358 = vmatpush.bf16.msra.mxu0 %v255_v31  ;;  %569 = vmatpush.bf16.msra.mxu2 %v255_v31 }
  0x8f   : > { %377 = vmatpush.bf16.msra.mxu1 %v305_v32  ;;  %577 = vmatpush.bf16.msra.mxu3 %v305_v32 }
  0x92   : > { %359 = vmatpush.bf16.msra.mxu0 %v254_v33  ;;  %570 = vmatpush.bf16.msra.mxu2 %v254_v33 }
  0x94   : > { %v294_v35 = vpop.permute.xlu0 %293  ;;  %v296_v36 = vpop.permute.xlu1 %295 }
  0x95   : > { %v304_v37 = vsel %vm301_vm0, %v294_v35, %v296_v36  ;;  %v275_v48 = vpop.permute.xlu2 %274 }
  0x96   : > { %378 = vmatpush.bf16.msra.mxu1 %v304_v37  ;;  %578 = vmatpush.bf16.msra.mxu3 %v304_v37 }
  0x9c   : > { %v290_v38 = vpop.permute.xlu1 %289  ;;  %v242_v39 = vpop.permute.xlu0 %241 }
  0x9d   : > { %v253_v40 = vsel %vm251_vm1, %v240_v28, %v242_v39  ;;  %v303_v41 = vsel %vm301_vm0, %v290_v38, %v292_v34  ;;  %v265_v56 = vpop.permute.xlu2 %264 }
  0x9e   : > { %360 = vmatpush.bf16.msra.mxu0 %v253_v40  ;;  %571 = vmatpush.bf16.msra.mxu2 %v253_v40 }
  0x9f   : > { %379 = vmatpush.bf16.msra.mxu1 %v303_v41  ;;  %579 = vmatpush.bf16.msra.mxu3 %v303_v41 }
  0xa4   : > { %v236_v43 = vpop.permute.xlu0 %235  ;;  %v238_v44 = vpop.permute.xlu1 %237 }
  0xa5   : > { %v252_v45 = vsel %vm251_vm1, %v236_v43, %v238_v44 }
  0xa6   : > { %361 = vmatpush.bf16.msra.mxu0 %v252_v45  ;;  %572 = vmatpush.bf16.msra.mxu2 %v252_v45 }
  0xaa   : > { %573 = vmatpush.bf16.msra.mxu2 %v692_v2  ;;  %362 = vmatpush.bf16.msra.mxu0 %v692_v2  ;;  %v263_v2 = vpop.permute.xlu2 %262 }
  0xac   : > { %v288_v51 = vpop.permute.xlu0 %287  ;;  %v273_v52 = vpop.permute.xlu1 %272 }
  0xad   : > { %v302_v53 = vsel %vm301_vm0, %v286_v42, %v288_v51  ;;  %v280_v55 = vsel %vm276_vm2, %v273_v52, %v275_v48 }
  0xae   : > { %380 = vmatpush.bf16.msra.mxu1 %v302_v53  ;;  %580 = vmatpush.bf16.msra.mxu3 %v302_v53 }
  0xaf   : > { %574 = vmatpush.bf16.msra.mxu2 %v696_v5  ;;  %363 = vmatpush.bf16.msra.mxu0 %v696_v5 }
  0xb2   : > { %381 = vmatpush.bf16.msra.mxu1 %v280_v55  ;;  %581 = vmatpush.bf16.msra.mxu3 %v280_v55  ;;  %v331_v20 = vpop.permute.xlu2 %330 }
  0xb3   : > { %575 = vmatpush.bf16.msra.mxu2 %v713_v14  ;;  %364 = vmatpush.bf16.msra.mxu0 %v713_v14 }
  0xb4   : > { %v269_v61 = vpop.permute.xlu0 %268  ;;  %v271_v62 = vpop.permute.xlu1 %270 }
  0xb5   : > { %v279_v63 = vsel %vm276_vm2, %v269_v61, %v271_v62 }
  0xb6   : > { %382 = vmatpush.bf16.msra.mxu1 %v279_v63  ;;  %582 = vmatpush.bf16.msra.mxu3 %v279_v63 }
  0xb7   : > { %576 = vmatpush.bf16.msra.mxu2 %v730_v22  ;;  %365 = vmatpush.bf16.msra.mxu0 %v730_v22 }
  0xba   : > { %371 = vmatmul.bf16.vlgmr.msra.gmra.mxu2 %v537_v0  ;;  %366 = vmatmul.bf16.vlgmr.msra.gmra.mxu0 %v529_v1 }
  0xbc   : > { %v267_v3 = vpop.permute.xlu0 %266  ;;  %v261_v4 = vpop.permute.xlu1 %260 }
  0xbd   : > { %v278_v5 = vsel %vm276_vm2, %v265_v56, %v267_v3  ;;  %v277_v10 = vsel %vm276_vm2, %v261_v4, %v263_v2 }
  0xbe   : > { %383 = vmatpush.bf16.msra.mxu1 %v278_v5  ;;  %583 = vmatpush.bf16.msra.mxu3 %v278_v5 }
  0xc2   : > { %384 = vmatpush.bf16.msra.mxu1 %v277_v10  ;;  %584 = vmatpush.bf16.msra.mxu3 %v277_v10 }
  0xc4   : > { %v326_v14 = vpop.permute.xlu1 %325  ;;  %v321_v15 = vpop.permute.xlu0 %320 }
  0xc5   : > { %385 = vmatmul.bf16.vlgmr.msra.gmra.mxu1 %v533_v11  ;;  %390 = vmatmul.bf16.vlgmr.msra.gmra.mxu3 %v541_v12 }
  0xcc   : > { %v336_v28 = vpop.permute.xlu1 %335 }
 0x137   : > { %v367_v13 = vpop.f32.mrf.mxu0 }
 0x138   : > { %v368_v18 = vadd.f32 %v367_v13, %v321_v15 }
 0x13d   : > { %v372_v16 = vpop.f32.mrf.mxu2 }
 0x13e   : > { %v373_v25 = vadd.f32 %v372_v16, %v331_v20 }
 0x13f   : > { %v369_v19 = vpop.f32.mrf.mxu0 }
 0x140   : > { %v370_v23 = vadd.f32 %v369_v19, %v326_v14 }
 0x142   : > { %v386_v17 = vpop.f32.mrf.mxu1 }
 0x143   : > { %v387_v22 = vadd.f32 %v386_v17, %v368_v18 }
 0x145   : > { %v374_v27 = vpop.f32.mrf.mxu2  ;;  %v396_v29 = vmax.f32 %v387_v22, 0.0 }
 0x146   : > { %v375_v31 = vadd.f32 %v374_v27, %v336_v28 }
 0x148   : > { %v391_v21 = vpop.f32.mrf.mxu3 }
 0x149   : > { %v392_v32 = vadd.f32 %v391_v21, %v373_v25 }
 0x14a   : > { %v388_v24 = vpop.f32.mrf.mxu1 }
 0x14b   : > { %v389_v26 = vadd.f32 %v388_v24, %v370_v23  ;;  %v398_v36 = vmax.f32 %v392_v32, 0.0 }
 0x14d   : > { %v397_v30 = vmax.f32 %v389_v26, 0.0 }
 0x14f   : > { %v561_v33 = vpack.c.bf16 %v397_v30, %v396_v29 }
 0x150   : > { %v393_v34 = vpop.f32.mrf.mxu3 }
 0x151   : > { %562 = vst [vmem:[%s190_s27] sm:$0xff] %v561_v33   ;;  %v394_v35 = vadd.f32 %v393_v34, %v375_v31 }
 0x153   : > { %v399_v37 = vmax.f32 %v394_v35, 0.0 }
 0x155   : > { %v566_v38 = vpack.c.bf16 %v399_v37, %v398_v36 }
 0x157   : > { %568 = vst [vmem:[%s190_s27 + $0x8] sm:$0xff] %v566_v38  }
 0x158 PF: > { %s13_s14 = sadd.s32 1, %s638_s14   ;;  %s815_s12 = smov %s634_s13 }
 0x159   : > { %p10_p5 = scmp.ge.s32.totalorder %s13_s14, 4   ;;  %s816_s13 = smov %s818_s15 }
 0x15b   :  { %12 = sbr.rel (!%p10_p5) target bundleno = 2 (0x2), region = 62 }

// kernel: forward.28
= control target key start
LH: loop header
LB: loop body
LE: loop exit
PB: predicated region body
PF: predicated region fallthrough
CT: control target
= control target key end

     0   :  { %s453_s12 = smov 0   ;;  %s455_s13 = smov 0   ;;  %s504_s0 = inlined_call_operand.vmem [shape: bf16[2,16,64], index: 0, kind: input, shape index: {}]   ;;  %s505_s1 = inlined_call_operand.vmem [shape: bf16[32,16], index: 1, kind: input, shape index: {}]   ;;  %s506_s2 = inlined_call_operand.vmem [shape: f32[32,1], index: 2, kind: input, shape index: {}]   ;;  %s507_s3 = inlined_call_operand.vmem [shape: bf16[2,32,64], index: 3, kind: output, shape index: {}]  }
   0x1   :  { %s457_s14 = smov 0  }
   0x2 LB: > { %s25_s15 = sadd.s32 1, %s426_s13  ;;  %p354_p0 = scmp.ge.s32.totalorder %s430_s14, 1  ;;  %s430_s14 = sphi %s457_s14, %s13_s14   ;;  %s426_s13 = sphi %s455_s13, %s509_s13   ;;  %s422_s12 = sphi %s453_s12, %s508_s12  }
   0x3   : > { %p27_p1 = scmp.ge.s32.totalorder %s25_s15, 2  ;;  %p151_p2 = scmp.lt.s32.totalorder %s430_s14, 3 }
   0x5   : > { %s511_s15 = smov (%p27_p1, %s25_s15), 0  ;;  %p152_p3 = pnand %p354_p0, %p151_p2 }
   0x6   : > { %p178_p4 = scmp.lt.s32.totalorder (!%p152_p3), %s422_s12, 1 }
   0x7   : > { %155 = sbr.rel (%p152_p3) target bundleno = 159 (0x9f), region = 32 }
   0xc   : > { %v200_v0 = vld [vmem:[%s506_s2 + $0x10] sm:$0xff]  ;;  %v432_v1 = vmov 0   ;;  %v198_v2 = vld [vmem:[%s506_s2] sm:$0xff]  ;;  %s513_s12 = smov (!%p178_p4, %s422_s12), 1  ;;  %v379_v5 = vld [vmem:[%s505_s1 + $0x8] sm:$0xff]  ;;  %vm238_vm0 = vcmask 130048  }
   0xd   : > { %407 = vset.pattern.permute.xlu1 %v432_v1  ;;  %406 = vset.pattern.permute.xlu0 %v432_v1  ;;  %s375_s20 = sshll.u32 %s513_s12, 3  ;;  %v378_v4 = vld [vmem:[%s505_s1] sm:$0xff]  ;;  %v201_v6 = vld [vmem:[%s506_s2 + $0x18] sm:$0xff]  ;;  %v199_v7 = vld [vmem:[%s506_s2 + $0x8] sm:$0xff]  ;;  %s376_s5 = sshll.u32 %s513_s12, 4  ;;  %vm268_vm1 = vcmask 519168  }
   0xe   : > { %214 = vperm.xlu1 %407, %v200_v0   ;;  %204 = vperm.xlu0 %406, %v198_v2   ;;  %s182_s23 = scalar_lea.vmem %s504_s0, %s375_s20  ;;  %s190_s8 = scalar_lea.vmem %s507_s3, %s376_s5 }
   0xf   : > { %v377_v3 = vld [vmem:[%s182_s23] sm:$0xff] }
  0x10   : > { %252 = vmatpush.bf16.msra.mxu0 %v377_v3  ;;  %380 = vmatpush.bf16.msra.mxu1 %v377_v3 }
  0x13   : > { %371 = vmatmul.msk.bf16.vlgmr.msra.gmra.mxu0 %vm238_vm0, %v378_v4  ;;  %372 = vmatmul.msk.bf16.vlgmr.msra.gmra.mxu1 %vm238_vm0, %v379_v5 }
  0x16   : > { %219 = vperm.xlu1 %407, %v201_v6   ;;  %209 = vperm.xlu0 %406, %v199_v7  }
  0x80   : > { %v215_v8 = vpop.permute.xlu1 %214  ;;  %v205_v9 = vpop.permute.xlu0 %204 }
  0x88   : > { %v220_v16 = vpop.permute.xlu1 %219  ;;  %v210_v17 = vpop.permute.xlu0 %209 }
  0x90   : > { %v254_v10 = vpop.f32.mrf.mxu0  ;;  %v259_v11 = vpop.f32.mrf.mxu1 }
  0x91   : > { %v255_v12 = vadd.f32 %v254_v10, %v205_v9  ;;  %v260_v13 = vadd.f32 %v259_v11, %v215_v8 }
  0x93   : > { %v264_v14 = vpack.c.bf16 %v255_v12, %v255_v12  ;;  %v266_v15 = vpack.c.bf16 %v260_v13, %v260_v13 }
  0x95   : > { %269 = vst.msk [vmem:[%s190_s8] sm:$0xf] %vm268_vm1, %v264_v14 }
  0x96   : > { %271 = vst.msk [vmem:[%s190_s8 + $0x8] sm:$0xf] %vm268_vm1, %v266_v15 }
  0x98   : > { %v256_v18 = vpop.f32.mrf.mxu0  ;;  %v261_v19 = vpop.f32.mrf.mxu1 }
  0x99   : > { %v257_v20 = vadd.f32 %v256_v18, %v210_v17  ;;  %v262_v21 = vadd.f32 %v261_v19, %v220_v16 }
  0x9b   : > { %v265_v22 = vpack.c.bf16 %v257_v20, %v257_v20  ;;  %v267_v23 = vpack.c.bf16 %v262_v21, %v262_v21 }
  0x9d   : > { %270 = vst.msk [vmem:[%s190_s8 + $0x4] sm:$0xf] %vm268_vm1, %v265_v22 }
  0x9e   : > { %272 = vst.msk [vmem:[%s190_s8 + $0xc] sm:$0xf] %vm268_vm1, %v267_v23 }
  0x9f PF: > { %s13_s14 = sadd.s32 1, %s430_s14   ;;  %s508_s12 = smov %s426_s13 }
  0xa0   : > { %p10_p5 = scmp.ge.s32.totalorder %s13_s14, 4   ;;  %s509_s13 = smov %s511_s15 }
  0xa2   :  { %12 = sbr.rel (!%p10_p5) target bundleno = 2 (0x2), region = 62 }

// kernel: forward.30
= control target key start
LH: loop header
LB: loop body
LE: loop exit
PB: predicated region body
PF: predicated region fallthrough
CT: control target
= control target key end

     0   :  { %s706_s12 = smov 0   ;;  %s708_s13 = smov 0   ;;  %s825_s0 = inlined_call_operand.vmem [shape: bf16[2,32,176], index: 0, kind: input, shape index: {}]   ;;  %s826_s1 = inlined_call_operand.vmem [shape: bf16[32,288], index: 1, kind: input, shape index: {}]   ;;  %s827_s2 = inlined_call_operand.vmem [shape: f32[32,1], index: 2, kind: input, shape index: {}]   ;;  %s828_s3 = inlined_call_operand.vmem [shape: bf16[2,32,128], index: 3, kind: output, shape index: {}]  }
   0x1   :  { %s710_s14 = smov 0  }
   0x2 LB: > { %s25_s15 = sadd.s32 1, %s671_s13  ;;  %p537_p0 = scmp.ge.s32.totalorder %s675_s14, 1  ;;  %s675_s14 = sphi %s710_s14, %s13_s14   ;;  %s671_s13 = sphi %s708_s13, %s830_s13   ;;  %s667_s12 = sphi %s706_s12, %s829_s12  }
   0x3   : > { %p27_p1 = scmp.ge.s32.totalorder %s25_s15, 2  ;;  %p151_p2 = scmp.lt.s32.totalorder %s675_s14, 3 }
   0x5   : > { %s832_s15 = smov (%p27_p1, %s25_s15), 0  ;;  %p152_p3 = pnand %p537_p0, %p151_p2 }
   0x6   : > { %p178_p4 = scmp.lt.s32.totalorder (!%p152_p3), %s667_s12, 1  ;;  %s677_s20 = smov (!%p152_p3), 95  }
   0x7   : > { %155 = sbr.rel (%p152_p3) target bundleno = 378 (0x17a), region = 32  ;;  %s678_s21 = smov (!%p152_p3), 112  }
   0x8   : > { %s679_s22 = smov (!%p152_p3), 96   ;;  %s680_s23 = smov (!%p152_p3), 126  }
   0x9   : > { %s681_s24 = smov (!%p152_p3), 110   ;;  %s682_s25 = smov (!%p152_p3), 94  }
   0xa   : > { %s683_s26 = smov (!%p152_p3), 127   ;;  %s684_s27 = smov (!%p152_p3), 111  }
   0xc   : > { %s834_s12 = smov (!%p178_p4, %s667_s12), 1  ;;  %vm248_vm0 = vcmask 916480   ;;  %vm300_vm1 = vcmask 777216   ;;  %vm287_vm2 = vcmask 785408   ;;  %vm235_vm3 = vcmask 1031168   ;;  %v327_v55 = vld [vmem:[%s827_s2 + $0x8] sm:$0xff] }
   0xd   : > { %s586_s16 = sshll.u32 %s834_s12, 5  ;;  %vm274_vm4 = vcmask 900096   ;;  %vm313_vm5 = vcmask 769024   ;;  %vm222_vm6 = vcmask 1039360   ;;  %vm261_vm7 = vcmask 908288   ;;  %v328_v56 = vld [vmem:[%s827_s2 + $0x10] sm:$0xff] }
   0xe   : > { %s182_s19 = scalar_lea.vmem %s825_s0, %s586_s16  ;;  %v568_v52 = vld [vmem:[%s826_s1 + $0x8] sm:$0xf]  ;;  %v594_v53 = vld [vmem:[%s826_s1 + $0x10] sm:$0xf0]  ;;  %v685_v58 = vmov 0   ;;  %v326_v62 = vld [vmem:[%s827_s2] sm:$0xff] }
   0xf   : > { %v548_v0 = vld [vmem:[%s182_s19 + $0x10] sm:$0xf]  ;;  %v591_v1 = vld [vmem:[%s182_s19 + $0x14] sm:$0xf0]  ;;  %v544_v2 = vld [vmem:[%s182_s19] sm:$0xf]  ;;  %651 = vset.pattern.permute.xlu0 %v685_v58  ;;  %652 = vset.pattern.permute.xlu1 %v685_v58  ;;  %v569_v61 = vor.u32 %v594_v53, %v568_v52 }
  0x10   : > { %v730_v3 = vor.u32 %v591_v1, %v548_v0  ;;  %v589_v4 = vld [vmem:[%s182_s19 + $0x4] sm:$0xf0]  ;;  %v590_v6 = vld [vmem:[%s182_s19 + $0x14] sm:$0xf]  ;;  %v554_v7 = vld [vmem:[%s182_s19 + $0x18] sm:$0xf0]  ;;  %650 = vset.pattern.permute.xlu2 %v685_v58 }
  0x11   : > { %v732_v5 = vor.u32 %v589_v4, %v544_v2  ;;  %v588_v8 = vld [vmem:[%s182_s19 + $0x4] sm:$0xf]  ;;  %v550_v9 = vld [vmem:[%s182_s19 + $0x8] sm:$0xf0]  ;;  %v557_v10 = vor.u32 %v590_v6, %v554_v7  ;;  %vm380_vm8 = vcmask 261120   ;;  %s587_s10 = sshll.u32 %s834_s12, 4 }
  0x12   : > { %296 = vrot.lane.b32.xlu0 %v730_v3, %s677_s20  ;;  %244 = vrot.lane.b32.xlu2 %v730_v3, %s678_s21  ;;  %v553_v11 = vor.u32 %v588_v8, %v550_v9  ;;  %v560_v0 = vld [vmem:[%s826_s1] sm:$0xf]  ;;  %v593_v1 = vld [vmem:[%s826_s1 + $0x8] sm:$0xf0]  ;;  %s190_s17 = scalar_lea.vmem %s828_s3, %s587_s10 }
  0x13   : > { %292 = vrot.lane.b32.xlu1 %v732_v5, %s677_s20  ;;  %v572_v2 = vld [vmem:[%s826_s1 + $0x18] sm:$0xf]  ;;  %v596_v4 = vld [vmem:[%s826_s1 + $0x20] sm:$0xf0] }
  0x14   : > { %v592_v7 = vld [vmem:[%s826_s1 + $0x4] sm:$0xf]  ;;  %v329_v9 = vld [vmem:[%s827_s2 + $0x18] sm:$0xff] }
  0x1a   : > { %298 = vrot.lane.b32.xlu0 %v557_v10, %s677_s20  ;;  %246 = vrot.lane.b32.xlu2 %v557_v10, %s678_s21 }
  0x1b   : > { %294 = vrot.lane.b32.xlu1 %v553_v11, %s677_s20 }
  0x22   : > { %283 = vrot.lane.b32.xlu0 %v730_v3, %s679_s22  ;;  %240 = vrot.lane.b32.xlu2 %v732_v5, %s678_s21 }
  0x23   : > { %285 = vrot.lane.b32.xlu1 %v557_v10, %s679_s22 }
  0x2a   : > { %242 = vrot.lane.b32.xlu0 %v553_v11, %s678_s21  ;;  %281 = vrot.lane.b32.xlu2 %v553_v11, %s679_s22 }
  0x2b   : > { %279 = vrot.lane.b32.xlu1 %v732_v5, %s679_s22 }
  0x32   : > { %231 = vrot.lane.b32.xlu0 %v730_v3, %s680_s23  ;;  %270 = vrot.lane.b32.xlu2 %v730_v3, %s681_s24 }
  0x33   : > { %233 = vrot.lane.b32.xlu1 %v557_v10, %s680_s23 }
  0x3a   : > { %272 = vrot.lane.b32.xlu0 %v557_v10, %s681_s24  ;;  %229 = vrot.lane.b32.xlu2 %v553_v11, %s680_s23 }
  0x3b   : > { %227 = vrot.lane.b32.xlu1 %v732_v5, %s680_s23 }
  0x42   : > { %266 = vrot.lane.b32.xlu0 %v732_v5, %s681_s24  ;;  %309 = vrot.lane.b32.xlu2 %v730_v3, %s682_s25 }
  0x43   : > { %268 = vrot.lane.b32.xlu1 %v553_v11, %s681_s24 }
  0x4a   : > { %311 = vrot.lane.b32.xlu0 %v557_v10, %s682_s25  ;;  %220 = vrot.lane.b32.xlu2 %v557_v10, %s683_s26 }
  0x4b   : > { %218 = vrot.lane.b32.xlu1 %v730_v3, %s683_s26 }
  0x52   : > { %257 = vrot.lane.b32.xlu0 %v730_v3, %s684_s27  ;;  %305 = vrot.lane.b32.xlu2 %v732_v5, %s682_s25 }
  0x53   : > { %259 = vrot.lane.b32.xlu1 %v557_v10, %s684_s27 }
  0x5a   : > { %307 = vrot.lane.b32.xlu0 %v553_v11, %s682_s25  ;;  %216 = vrot.lane.b32.xlu2 %v553_v11, %s683_s26 }
  0x5b   : > { %214 = vrot.lane.b32.xlu1 %v732_v5, %s683_s26 }
  0x62   : > { %253 = vrot.lane.b32.xlu0 %v732_v5, %s684_s27  ;;  %332 = vperm.xlu2 %650, %v326_v62  }
  0x63   : > { %255 = vrot.lane.b32.xlu1 %v553_v11, %s684_s27  ;;  %v561_v11 = vor.u32 %v593_v1, %v560_v0 }
  0x6a   : > { %337 = vperm.xlu0 %651, %v327_v55   ;;  %347 = vperm.xlu2 %650, %v329_v9  }
  0x6b   : > { %342 = vperm.xlu1 %652, %v328_v56  }
  0x6c   : > { %v245_v12 = vpop.permute.xlu2 %244 }
  0x74   : > { %v247_v13 = vpop.permute.xlu2 %246 }
  0x75   : > { %v250_v14 = vsel %vm248_vm0, %v245_v12, %v247_v13  ;;  %v573_v12 = vor.u32 %v596_v4, %v572_v2 }
  0x76   : > { %387 = vmatpush.bf16.msra.mxu0 %v250_v14  ;;  %609 = vmatpush.bf16.msra.mxu3 %v250_v14  ;;  %v580_v14 = vld [vmem:[%s826_s1 + $0x20] sm:$0xf] }
  0x7c   : > { %v241_v17 = vpop.permute.xlu2 %240 }
  0x84   : > { %v297_v15 = vpop.permute.xlu0 %296  ;;  %v282_v21 = vpop.permute.xlu2 %281 }
  0x85   : > { %v293_v16 = vpop.permute.xlu1 %292 }
  0x8c   : > { %v299_v18 = vpop.permute.xlu0 %298  ;;  %v271_v26 = vpop.permute.xlu2 %270 }
  0x8d   : > { %v295_v19 = vpop.permute.xlu1 %294  ;;  %v302_v20 = vsel %vm300_vm1, %v297_v15, %v299_v18  ;;  %v597_v15 = vld [vmem:[%s826_s1 + $0x28] sm:$0xf0] }
  0x8e   : > { %406 = vmatpush.bf16.msra.mxu1 %v302_v20  ;;  %v301_v22 = vsel %vm300_vm1, %v293_v16, %v295_v19  ;;  %v581_v16 = vor.u32 %v597_v15, %v580_v14 }
  0x92   : > { %407 = vmatpush.bf16.msra.mxu1 %v301_v22 }
  0x94   : > { %v284_v23 = vpop.permute.xlu0 %283  ;;  %v230_v31 = vpop.permute.xlu2 %229 }
  0x95   : > { %v286_v24 = vpop.permute.xlu1 %285 }
  0x96   : > { %v289_v25 = vsel %vm287_vm2, %v284_v23, %v286_v24 }
  0x97   : > { %408 = vmatpush.bf16.msra.mxu1 %v289_v25 }
  0x9c   : > { %v243_v27 = vpop.permute.xlu0 %242  ;;  %v310_v38 = vpop.permute.xlu2 %309 }
  0x9d   : > { %v280_v28 = vpop.permute.xlu1 %279  ;;  %v249_v29 = vsel %vm248_vm0, %v241_v17, %v243_v27  ;;  %v574_v17 = vld [vmem:[%s826_s1 + $0x24] sm:$0xf0] }
  0x9e   : > { %388 = vmatpush.bf16.msra.mxu0 %v249_v29  ;;  %610 = vmatpush.bf16.msra.mxu3 %v249_v29  ;;  %v288_v30 = vsel %vm287_vm2, %v280_v28, %v282_v21 }
  0x9f   : > { %409 = vmatpush.bf16.msra.mxu1 %v288_v30 }
  0xa4   : > { %v232_v32 = vpop.permute.xlu0 %231  ;;  %v221_v43 = vpop.permute.xlu2 %220 }
  0xa5   : > { %v234_v33 = vpop.permute.xlu1 %233 }
  0xa6   : > { %v237_v34 = vsel %vm235_vm3, %v232_v32, %v234_v33 }
  0xa7   : > { %389 = vmatpush.bf16.msra.mxu0 %v237_v34  ;;  %611 = vmatpush.bf16.msra.mxu3 %v237_v34 }
  0xac   : > { %v273_v35 = vpop.permute.xlu0 %272  ;;  %v306_v48 = vpop.permute.xlu2 %305 }
  0xad   : > { %v228_v36 = vpop.permute.xlu1 %227  ;;  %v276_v37 = vsel %vm274_vm4, %v271_v26, %v273_v35 }
  0xae   : > { %v236_v39 = vsel %vm235_vm3, %v228_v36, %v230_v31  ;;  %410 = vmatpush.bf16.msra.mxu1 %v276_v37 }
  0xaf   : > { %390 = vmatpush.bf16.msra.mxu0 %v236_v39  ;;  %612 = vmatpush.bf16.msra.mxu3 %v236_v39 }
  0xb4   : > { %v267_v40 = vpop.permute.xlu0 %266  ;;  %v217_v54 = vpop.permute.xlu2 %216 }
  0xb5   : > { %v269_v41 = vpop.permute.xlu1 %268 }
  0xb6   : > { %v275_v42 = vsel %vm274_vm4, %v267_v40, %v269_v41 }
  0xb7   : > { %411 = vmatpush.bf16.msra.mxu1 %v275_v42 }
  0xbc   : > { %v312_v44 = vpop.permute.xlu0 %311  ;;  %v333_v20 = vpop.permute.xlu2 %332 }
  0xbd   : > { %v219_v45 = vpop.permute.xlu1 %218  ;;  %v315_v46 = vsel %vm313_vm5, %v310_v38, %v312_v44 }
  0xbe   : > { %v224_v47 = vsel %vm222_vm6, %v219_v45, %v221_v43  ;;  %431 = vmatpush.bf16.msra.mxu2 %v315_v46 }
  0xbf   : > { %391 = vmatpush.bf16.msra.mxu0 %v224_v47  ;;  %613 = vmatpush.bf16.msra.mxu3 %v224_v47 }
  0xc4   : > { %v258_v49 = vpop.permute.xlu0 %257  ;;  %v348_v41 = vpop.permute.xlu2 %347 }
  0xc5   : > { %v260_v50 = vpop.permute.xlu1 %259 }
  0xc6   : > { %v263_v51 = vsel %vm261_vm7, %v258_v49, %v260_v50 }
  0xc7   : > { %412 = vmatpush.bf16.msra.mxu1 %v263_v51 }
  0xcc   : > { %v308_v57 = vpop.permute.xlu0 %307 }
  0xcd   : > { %v215_v59 = vpop.permute.xlu1 %214  ;;  %v314_v60 = vsel %vm313_vm5, %v306_v48, %v308_v57 }
  0xce   : > { %v223_v63 = vsel %vm222_vm6, %v215_v59, %v217_v54  ;;  %432 = vmatpush.bf16.msra.mxu2 %v314_v60 }
  0xcf   : > { %392 = vmatpush.bf16.msra.mxu0 %v223_v63  ;;  %614 = vmatpush.bf16.msra.mxu3 %v223_v63 }
  0xd1   : > { %582 = vmatmul.msk.bf16.vlgmr.msra.gmra.mxu2 %vm380_vm8, %v569_v61 }
  0xd3   : > { %393 = vmatpush.bf16.msra.mxu0 %v730_v3  ;;  %615 = vmatpush.bf16.msra.mxu3 %v730_v3  ;;  %v562_v3 = vld [vmem:[%s826_s1 + $0xc] sm:$0xf0] }
  0xd4   : > { %v254_v6 = vpop.permute.xlu0 %253  ;;  %v565_v13 = vor.u32 %v592_v7, %v562_v3 }
  0xd5   : > { %v256_v8 = vpop.permute.xlu1 %255 }
  0xd6   : > { %v262_v10 = vsel %vm261_vm7, %v254_v6, %v256_v8 }
  0xd7   : > { %394 = vmatpush.bf16.msra.mxu0 %v732_v5  ;;  %616 = vmatpush.bf16.msra.mxu3 %v732_v5  ;;  %v595_v5 = vld [vmem:[%s826_s1 + $0x1c] sm:$0xf] }
  0xd8   : > { %413 = vmatpush.bf16.msra.mxu1 %v262_v10  ;;  %v577_v18 = vor.u32 %v595_v5, %v574_v17 }
  0xda   : > { %395 = vmatmul.bf16.vlgmr.msra.gmra.mxu0 %v561_v11  ;;  %400 = vmatmul.bf16.vlgmr.msra.gmra.mxu3 %v573_v12 }
  0xdb   : > { %414 = vmatmul.bf16.vlgmr.msra.gmra.mxu1 %v565_v13 }
  0xdc   : > { %v338_v24 = vpop.permute.xlu0 %337 }
  0xdd   : > { %v343_v36 = vpop.permute.xlu1 %342 }
  0xe1   : > { %583 = vmatmul.msk.bf16.gmra.mxu2 %vm380_vm8, %v581_v16 }
  0xeb   : > { %419 = vmatmul.bf16.gmra.mxu1 %v577_v18 }
 0x154   : > { %v434_v19 = vpop.f32.mrf.mxu2 }
 0x157   : > { %v396_v21 = vpop.f32.mrf.mxu0 }
 0x158   : > { %v415_v22 = vpop.f32.mrf.mxu1  ;;  %v397_v23 = vadd.f32 %v396_v21, %v333_v20 }
 0x15a   : > { %v416_v25 = vadd.f32 %v415_v22, %v397_v23 }
 0x15c   : > { %v436_v26 = vpop.f32.mrf.mxu2  ;;  %v435_v30 = vadd.f32 %v434_v19, %v416_v25 }
 0x15d   : > { %v401_v31 = vpop.f32.mrf.mxu3 }
 0x15e   : > { %v444_v34 = vmax.f32 %v435_v30, 0.0  ;;  %v402_v40 = vadd.f32 %v401_v31, %v343_v36 }
 0x15f   : > { %v398_v27 = vpop.f32.mrf.mxu0 }
 0x160   : > { %v399_v28 = vadd.f32 %v398_v27, %v338_v24  ;;  %v417_v29 = vpop.f32.mrf.mxu1 }
 0x162   : > { %v418_v32 = vadd.f32 %v417_v29, %v399_v28 }
 0x164   : > { %v437_v33 = vadd.f32 %v436_v26, %v418_v32  ;;  %v439_v38 = vpop.f32.mrf.mxu2 }
 0x165   : > { %v403_v42 = vpop.f32.mrf.mxu3 }
 0x166   : > { %v445_v35 = vmax.f32 %v437_v33, 0.0  ;;  %v404_v44 = vadd.f32 %v403_v42, %v348_v41 }
 0x168   : > { %v601_v37 = vpack.c.bf16 %v445_v35, %v444_v34  ;;  %v420_v39 = vpop.f32.mrf.mxu1 }
 0x169   : > { %v421_v43 = vadd.f32 %v420_v39, %v402_v40 }
 0x16a   : > { %602 = vst [vmem:[%s190_s17] sm:$0xff] %v601_v37  }
 0x16b   : > { %v440_v46 = vadd.f32 %v439_v38, %v421_v43 }
 0x16c   : > { %v441_v48 = vpop.f32.mrf.mxu2 }
 0x16d   : > { %v446_v50 = vmax.f32 %v440_v46, 0.0 }
 0x170   : > { %v422_v45 = vpop.f32.mrf.mxu1 }
 0x171   : > { %v423_v47 = vadd.f32 %v422_v45, %v404_v44 }
 0x173   : > { %v442_v49 = vadd.f32 %v441_v48, %v423_v47 }
 0x175   : > { %v447_v51 = vmax.f32 %v442_v49, 0.0 }
 0x177   : > { %v606_v52 = vpack.c.bf16 %v447_v51, %v446_v50 }
 0x179   : > { %608 = vst [vmem:[%s190_s17 + $0x8] sm:$0xff] %v606_v52  }
 0x17a PF: > { %s13_s14 = sadd.s32 1, %s675_s14   ;;  %s829_s12 = smov %s671_s13 }
 0x17b   : > { %p10_p5 = scmp.ge.s32.totalorder %s13_s14, 4   ;;  %s830_s13 = smov %s832_s15 }
 0x17d   :  { %12 = sbr.rel (!%p10_p5) target bundleno = 2 (0x2), region = 62 }

// kernel: forward.29
= control target key start
LH: loop header
LB: loop body
LE: loop exit
PB: predicated region body
PF: predicated region fallthrough
CT: control target
= control target key end

     0   :  { %s811_s15 = smov 0   ;;  %s813_s16 = smov 0   ;;  %s933_s0 = inlined_call_operand.vmem [shape: bf16[2,32,176], index: 0, kind: input, shape index: {}]   ;;  %s934_s1 = inlined_call_operand.vmem [shape: bf16[32,288], index: 1, kind: input, shape index: {}]   ;;  %s935_s2 = inlined_call_operand.vmem [shape: f32[32,1], index: 2, kind: input, shape index: {}]   ;;  %s936_s3 = inlined_call_operand.vmem [shape: bf16[2,32,128], index: 3, kind: input, shape index: {}]   ;;  %s937_s4 = inlined_call_operand.vmem [shape: bf16[2,32,128], index: 4, kind: output, shape index: {}]  }
   0x1   :  { %s815_s17 = smov 0  }
   0x2 LB: > { %s26_s18 = sadd.s32 1, %s771_s16  ;;  %p625_p0 = scmp.ge.s32.totalorder %s775_s17, 1  ;;  %s775_s17 = sphi %s815_s17, %s14_s17   ;;  %s771_s16 = sphi %s813_s16, %s939_s16   ;;  %s767_s15 = sphi %s811_s15, %s938_s15  }
   0x3   : > { %p28_p1 = scmp.ge.s32.totalorder %s26_s18, 2  ;;  %p191_p2 = scmp.lt.s32.totalorder %s775_s17, 3 }
   0x5   : > { %s941_s18 = smov (%p28_p1, %s26_s18), 0  ;;  %p192_p3 = pnand %p625_p0, %p191_p2 }
   0x6   : > { %p228_p4 = scmp.lt.s32.totalorder (!%p192_p3), %s767_s15, 1  ;;  %s777_s23 = smov (!%p192_p3), 95  }
   0x7   : > { %195 = sbr.rel (%p192_p3) target bundleno = 380 (0x17c), region = 36  ;;  %s778_s24 = smov (!%p192_p3), 112  }
   0x8   : > { %s779_s25 = smov (!%p192_p3), 96   ;;  %s780_s26 = smov (!%p192_p3), 126  }
   0x9   : > { %s781_s27 = smov (!%p192_p3), 110   ;;  %s782_s28 = smov (!%p192_p3), 94  }
   0xa   : > { %s783_s29 = smov (!%p192_p3), 127   ;;  %s784_s30 = smov (!%p192_p3), 111  }
   0xc   : > { %s943_s15 = smov (!%p228_p4, %s767_s15), 1  ;;  %vm306_vm0 = vcmask 916480   ;;  %vm358_vm1 = vcmask 777216   ;;  %vm345_vm2 = vcmask 785408   ;;  %vm293_vm3 = vcmask 1031168   ;;  %v385_v55 = vld [vmem:[%s935_s2 + $0x8] sm:$0xff] }
   0xd   : > { %s676_s19 = sshll.u32 %s943_s15, 5  ;;  %vm332_vm4 = vcmask 900096   ;;  %vm371_vm5 = vcmask 769024   ;;  %vm280_vm6 = vcmask 1039360   ;;  %vm319_vm7 = vcmask 908288   ;;  %v386_v56 = vld [vmem:[%s935_s2 + $0x10] sm:$0xff] }
   0xe   : > { %s232_s22 = scalar_lea.vmem %s933_s0, %s676_s19  ;;  %v658_v52 = vld [vmem:[%s934_s1 + $0x8] sm:$0xf]  ;;  %v685_v53 = vld [vmem:[%s934_s1 + $0x10] sm:$0xf0]  ;;  %v785_v58 = vmov 0   ;;  %v384_v62 = vld [vmem:[%s935_s2] sm:$0xff] }
   0xf   : > { %v638_v0 = vld [vmem:[%s232_s22 + $0x10] sm:$0xf]  ;;  %v682_v1 = vld [vmem:[%s232_s22 + $0x14] sm:$0xf0]  ;;  %v634_v2 = vld [vmem:[%s232_s22] sm:$0xf]  ;;  %751 = vset.pattern.permute.xlu0 %v785_v58  ;;  %752 = vset.pattern.permute.xlu1 %v785_v58  ;;  %v659_v61 = vor.u32 %v685_v53, %v658_v52 }
  0x10   : > { %v835_v3 = vor.u32 %v682_v1, %v638_v0  ;;  %v680_v4 = vld [vmem:[%s232_s22 + $0x4] sm:$0xf0]  ;;  %v681_v6 = vld [vmem:[%s232_s22 + $0x14] sm:$0xf]  ;;  %v644_v7 = vld [vmem:[%s232_s22 + $0x18] sm:$0xf0]  ;;  %750 = vset.pattern.permute.xlu2 %v785_v58 }
  0x11   : > { %v837_v5 = vor.u32 %v680_v4, %v634_v2  ;;  %v679_v8 = vld [vmem:[%s232_s22 + $0x4] sm:$0xf]  ;;  %v640_v9 = vld [vmem:[%s232_s22 + $0x8] sm:$0xf0]  ;;  %v647_v10 = vor.u32 %v681_v6, %v644_v7  ;;  %vm438_vm8 = vcmask 261120   ;;  %s677_s19 = sshll.u32 %s943_s15, 4 }
  0x12   : > { %354 = vrot.lane.b32.xlu0 %v835_v3, %s777_s23  ;;  %302 = vrot.lane.b32.xlu2 %v835_v3, %s778_s24  ;;  %v643_v11 = vor.u32 %v679_v8, %v640_v9  ;;  %v650_v0 = vld [vmem:[%s934_s1] sm:$0xf]  ;;  %v684_v1 = vld [vmem:[%s934_s1 + $0x8] sm:$0xf0]  ;;  %s240_s22 = scalar_lea.vmem %s936_s3, %s677_s19 }
  0x13   : > { %350 = vrot.lane.b32.xlu1 %v837_v5, %s777_s23  ;;  %v662_v2 = vld [vmem:[%s934_s1 + $0x18] sm:$0xf]  ;;  %v687_v4 = vld [vmem:[%s934_s1 + $0x20] sm:$0xf0] }
  0x14   : > { %v683_v7 = vld [vmem:[%s934_s1 + $0x4] sm:$0xf]  ;;  %v387_v9 = vld [vmem:[%s935_s2 + $0x18] sm:$0xff] }
  0x1a   : > { %356 = vrot.lane.b32.xlu0 %v647_v10, %s777_s23  ;;  %304 = vrot.lane.b32.xlu2 %v647_v10, %s778_s24 }
  0x1b   : > { %352 = vrot.lane.b32.xlu1 %v643_v11, %s777_s23 }
  0x22   : > { %341 = vrot.lane.b32.xlu0 %v835_v3, %s779_s25  ;;  %298 = vrot.lane.b32.xlu2 %v837_v5, %s778_s24 }
  0x23   : > { %343 = vrot.lane.b32.xlu1 %v647_v10, %s779_s25 }
  0x2a   : > { %300 = vrot.lane.b32.xlu0 %v643_v11, %s778_s24  ;;  %339 = vrot.lane.b32.xlu2 %v643_v11, %s779_s25  ;;  %s248_s24 = scalar_lea.vmem %s937_s4, %s677_s19 }
  0x2b   : > { %337 = vrot.lane.b32.xlu1 %v837_v5, %s779_s25 }
  0x32   : > { %289 = vrot.lane.b32.xlu0 %v835_v3, %s780_s26  ;;  %328 = vrot.lane.b32.xlu2 %v835_v3, %s781_s27 }
  0x33   : > { %291 = vrot.lane.b32.xlu1 %v647_v10, %s780_s26 }
  0x3a   : > { %330 = vrot.lane.b32.xlu0 %v647_v10, %s781_s27  ;;  %287 = vrot.lane.b32.xlu2 %v643_v11, %s780_s26 }
  0x3b   : > { %285 = vrot.lane.b32.xlu1 %v837_v5, %s780_s26 }
  0x42   : > { %324 = vrot.lane.b32.xlu0 %v837_v5, %s781_s27  ;;  %367 = vrot.lane.b32.xlu2 %v835_v3, %s782_s28 }
  0x43   : > { %326 = vrot.lane.b32.xlu1 %v643_v11, %s781_s27 }
  0x4a   : > { %369 = vrot.lane.b32.xlu0 %v647_v10, %s782_s28  ;;  %278 = vrot.lane.b32.xlu2 %v647_v10, %s783_s29 }
  0x4b   : > { %276 = vrot.lane.b32.xlu1 %v835_v3, %s783_s29 }
  0x52   : > { %315 = vrot.lane.b32.xlu0 %v835_v3, %s784_s30  ;;  %363 = vrot.lane.b32.xlu2 %v837_v5, %s782_s28 }
  0x53   : > { %317 = vrot.lane.b32.xlu1 %v647_v10, %s784_s30 }
  0x5a   : > { %365 = vrot.lane.b32.xlu0 %v643_v11, %s782_s28  ;;  %274 = vrot.lane.b32.xlu2 %v643_v11, %s783_s29 }
  0x5b   : > { %272 = vrot.lane.b32.xlu1 %v837_v5, %s783_s29 }
  0x62   : > { %311 = vrot.lane.b32.xlu0 %v837_v5, %s784_s30  ;;  %390 = vperm.xlu2 %750, %v384_v62  }
  0x63   : > { %313 = vrot.lane.b32.xlu1 %v643_v11, %s784_s30  ;;  %v651_v11 = vor.u32 %v684_v1, %v650_v0 }
  0x6a   : > { %395 = vperm.xlu0 %751, %v385_v55   ;;  %405 = vperm.xlu2 %750, %v387_v9  }
  0x6b   : > { %400 = vperm.xlu1 %752, %v386_v56  }
  0x6c   : > { %v303_v12 = vpop.permute.xlu2 %302 }
  0x74   : > { %v305_v13 = vpop.permute.xlu2 %304 }
  0x75   : > { %v308_v14 = vsel %vm306_vm0, %v303_v12, %v305_v13  ;;  %v663_v12 = vor.u32 %v687_v4, %v662_v2 }
  0x76   : > { %445 = vmatpush.bf16.msra.mxu0 %v308_v14  ;;  %709 = vmatpush.bf16.msra.mxu3 %v308_v14  ;;  %v670_v14 = vld [vmem:[%s934_s1 + $0x20] sm:$0xf] }
  0x7c   : > { %v299_v17 = vpop.permute.xlu2 %298 }
  0x84   : > { %v355_v15 = vpop.permute.xlu0 %354  ;;  %v340_v21 = vpop.permute.xlu2 %339 }
  0x85   : > { %v351_v16 = vpop.permute.xlu1 %350 }
  0x8c   : > { %v357_v18 = vpop.permute.xlu0 %356  ;;  %v329_v26 = vpop.permute.xlu2 %328 }
  0x8d   : > { %v353_v19 = vpop.permute.xlu1 %352  ;;  %v360_v20 = vsel %vm358_vm1, %v355_v15, %v357_v18  ;;  %v688_v15 = vld [vmem:[%s934_s1 + $0x28] sm:$0xf0] }
  0x8e   : > { %464 = vmatpush.bf16.msra.mxu1 %v360_v20  ;;  %v359_v22 = vsel %vm358_vm1, %v351_v16, %v353_v19  ;;  %v671_v16 = vor.u32 %v688_v15, %v670_v14 }
  0x92   : > { %465 = vmatpush.bf16.msra.mxu1 %v359_v22 }
  0x94   : > { %v342_v23 = vpop.permute.xlu0 %341  ;;  %v288_v31 = vpop.permute.xlu2 %287 }
  0x95   : > { %v344_v24 = vpop.permute.xlu1 %343 }
  0x96   : > { %v347_v25 = vsel %vm345_vm2, %v342_v23, %v344_v24 }
  0x97   : > { %466 = vmatpush.bf16.msra.mxu1 %v347_v25  ;;  %v690_v25 = vld [vmem:[%s240_s22] sm:$0xff]  }
  0x9c   : > { %v301_v27 = vpop.permute.xlu0 %300  ;;  %v368_v38 = vpop.permute.xlu2 %367 }
  0x9d   : > { %v338_v28 = vpop.permute.xlu1 %337  ;;  %v307_v29 = vsel %vm306_vm0, %v299_v17, %v301_v27  ;;  %v664_v17 = vld [vmem:[%s934_s1 + $0x24] sm:$0xf0] }
  0x9e   : > { %446 = vmatpush.bf16.msra.mxu0 %v307_v29  ;;  %710 = vmatpush.bf16.msra.mxu3 %v307_v29  ;;  %v346_v30 = vsel %vm345_vm2, %v338_v28, %v340_v21 }
  0x9f   : > { %467 = vmatpush.bf16.msra.mxu1 %v346_v30  ;;  %v691_v30 = vunpack.c.l.bf16 %v690_v25 }
  0xa4   : > { %v290_v32 = vpop.permute.xlu0 %289  ;;  %v279_v43 = vpop.permute.xlu2 %278 }
  0xa5   : > { %v292_v33 = vpop.permute.xlu1 %291 }
  0xa6   : > { %v295_v34 = vsel %vm293_vm3, %v290_v32, %v292_v33 }
  0xa7   : > { %447 = vmatpush.bf16.msra.mxu0 %v295_v34  ;;  %711 = vmatpush.bf16.msra.mxu3 %v295_v34 }
  0xac   : > { %v331_v35 = vpop.permute.xlu0 %330  ;;  %v364_v48 = vpop.permute.xlu2 %363 }
  0xad   : > { %v286_v36 = vpop.permute.xlu1 %285  ;;  %v334_v37 = vsel %vm332_vm4, %v329_v26, %v331_v35  ;;  %v692_v35 = vunpack.c.h.bf16 %v690_v25 }
  0xae   : > { %v294_v39 = vsel %vm293_vm3, %v286_v36, %v288_v31  ;;  %468 = vmatpush.bf16.msra.mxu1 %v334_v37 }
  0xaf   : > { %448 = vmatpush.bf16.msra.mxu0 %v294_v39  ;;  %712 = vmatpush.bf16.msra.mxu3 %v294_v39 }
  0xb4   : > { %v325_v40 = vpop.permute.xlu0 %324  ;;  %v275_v54 = vpop.permute.xlu2 %274 }
  0xb5   : > { %v327_v41 = vpop.permute.xlu1 %326 }
  0xb6   : > { %v333_v42 = vsel %vm332_vm4, %v325_v40, %v327_v41 }
  0xb7   : > { %469 = vmatpush.bf16.msra.mxu1 %v333_v42 }
  0xbc   : > { %v370_v44 = vpop.permute.xlu0 %369  ;;  %v391_v20 = vpop.permute.xlu2 %390 }
  0xbd   : > { %v277_v45 = vpop.permute.xlu1 %276  ;;  %v373_v46 = vsel %vm371_vm5, %v368_v38, %v370_v44 }
  0xbe   : > { %v282_v47 = vsel %vm280_vm6, %v277_v45, %v279_v43  ;;  %489 = vmatpush.bf16.msra.mxu2 %v373_v46 }
  0xbf   : > { %449 = vmatpush.bf16.msra.mxu0 %v282_v47  ;;  %713 = vmatpush.bf16.msra.mxu3 %v282_v47 }
  0xc4   : > { %v316_v49 = vpop.permute.xlu0 %315  ;;  %v406_v47 = vpop.permute.xlu2 %405 }
  0xc5   : > { %v318_v50 = vpop.permute.xlu1 %317 }
  0xc6   : > { %v321_v51 = vsel %vm319_vm7, %v316_v49, %v318_v50  ;;  %v707_v49 = vld [vmem:[%s240_s22 + $0x8] sm:$0xff]  }
  0xc7   : > { %470 = vmatpush.bf16.msra.mxu1 %v321_v51  ;;  %v695_v52 = vunpack.c.l.bf16 %v707_v49  ;;  %v696_v55 = vunpack.c.h.bf16 %v707_v49 }
  0xcc   : > { %v366_v57 = vpop.permute.xlu0 %365 }
  0xcd   : > { %v273_v59 = vpop.permute.xlu1 %272  ;;  %v372_v60 = vsel %vm371_vm5, %v364_v48, %v366_v57 }
  0xce   : > { %v281_v63 = vsel %vm280_vm6, %v273_v59, %v275_v54  ;;  %490 = vmatpush.bf16.msra.mxu2 %v372_v60 }
  0xcf   : > { %450 = vmatpush.bf16.msra.mxu0 %v281_v63  ;;  %714 = vmatpush.bf16.msra.mxu3 %v281_v63 }
  0xd1   : > { %672 = vmatmul.msk.bf16.vlgmr.msra.gmra.mxu2 %vm438_vm8, %v659_v61 }
  0xd3   : > { %451 = vmatpush.bf16.msra.mxu0 %v835_v3  ;;  %715 = vmatpush.bf16.msra.mxu3 %v835_v3  ;;  %v652_v3 = vld [vmem:[%s934_s1 + $0xc] sm:$0xf0] }
  0xd4   : > { %v312_v6 = vpop.permute.xlu0 %311  ;;  %v655_v13 = vor.u32 %v683_v7, %v652_v3 }
  0xd5   : > { %v314_v8 = vpop.permute.xlu1 %313 }
  0xd6   : > { %v320_v10 = vsel %vm319_vm7, %v312_v6, %v314_v8 }
  0xd7   : > { %452 = vmatpush.bf16.msra.mxu0 %v837_v5  ;;  %716 = vmatpush.bf16.msra.mxu3 %v837_v5  ;;  %v686_v5 = vld [vmem:[%s934_s1 + $0x1c] sm:$0xf] }
  0xd8   : > { %471 = vmatpush.bf16.msra.mxu1 %v320_v10  ;;  %v667_v18 = vor.u32 %v686_v5, %v664_v17 }
  0xda   : > { %453 = vmatmul.bf16.vlgmr.msra.gmra.mxu0 %v651_v11  ;;  %458 = vmatmul.bf16.vlgmr.msra.gmra.mxu3 %v663_v12 }
  0xdb   : > { %472 = vmatmul.bf16.vlgmr.msra.gmra.mxu1 %v655_v13 }
  0xdc   : > { %v396_v26 = vpop.permute.xlu0 %395 }
  0xdd   : > { %v401_v38 = vpop.permute.xlu1 %400 }
  0xe1   : > { %673 = vmatmul.msk.bf16.gmra.mxu2 %vm438_vm8, %v671_v16 }
  0xeb   : > { %477 = vmatmul.bf16.gmra.mxu1 %v667_v18 }
 0x154   : > { %v492_v19 = vpop.f32.mrf.mxu2 }
 0x157   : > { %v454_v21 = vpop.f32.mrf.mxu0 }
 0x158   : > { %v455_v22 = vadd.f32 %v454_v21, %v391_v20  ;;  %v473_v23 = vpop.f32.mrf.mxu1 }
 0x15a   : > { %v474_v24 = vadd.f32 %v473_v23, %v455_v22 }
 0x15c   : > { %v494_v27 = vpop.f32.mrf.mxu2  ;;  %v493_v29 = vadd.f32 %v492_v19, %v474_v24 }
 0x15d   : > { %v459_v33 = vpop.f32.mrf.mxu3 }
 0x15e   : > { %v510_v36 = vadd.f32 %v691_v30, %v493_v29  ;;  %v460_v40 = vadd.f32 %v459_v33, %v401_v38 }
 0x15f   : > { %v456_v28 = vpop.f32.mrf.mxu0 }
 0x160   : > { %v457_v31 = vadd.f32 %v456_v28, %v396_v26  ;;  %v475_v32 = vpop.f32.mrf.mxu1  ;;  %v514_v41 = vmax.f32 %v510_v36, 0.0 }
 0x162   : > { %v476_v34 = vadd.f32 %v475_v32, %v457_v31 }
 0x164   : > { %v495_v37 = vadd.f32 %v494_v27, %v476_v34  ;;  %v497_v43 = vpop.f32.mrf.mxu2 }
 0x165   : > { %v461_v48 = vpop.f32.mrf.mxu3 }
 0x166   : > { %v511_v39 = vadd.f32 %v692_v35, %v495_v37  ;;  %v462_v50 = vadd.f32 %v461_v48, %v406_v47 }
 0x168   : > { %v515_v42 = vmax.f32 %v511_v39, 0.0  ;;  %v478_v44 = vpop.f32.mrf.mxu1 }
 0x169   : > { %v479_v46 = vadd.f32 %v478_v44, %v460_v40 }
 0x16a   : > { %v700_v45 = vpack.c.bf16 %v515_v42, %v514_v41 }
 0x16b   : > { %v498_v51 = vadd.f32 %v497_v43, %v479_v46 }
 0x16c   : > { %701 = vst [vmem:[%s248_s24] sm:$0xff] %v700_v45   ;;  %v499_v56 = vpop.f32.mrf.mxu2 }
 0x16d   : > { %v512_v57 = vadd.f32 %v695_v52, %v498_v51 }
 0x16f   : > { %v516_v60 = vmax.f32 %v512_v57, 0.0 }
 0x170   : > { %v480_v53 = vpop.f32.mrf.mxu1 }
 0x171   : > { %v481_v54 = vadd.f32 %v480_v53, %v462_v50 }
 0x173   : > { %v500_v58 = vadd.f32 %v499_v56, %v481_v54 }
 0x175   : > { %v513_v59 = vadd.f32 %v696_v55, %v500_v58 }
 0x177   : > { %v517_v61 = vmax.f32 %v513_v59, 0.0 }
 0x179   : > { %v705_v62 = vpack.c.bf16 %v517_v61, %v516_v60 }
 0x17b   : > { %708 = vst [vmem:[%s248_s24 + $0x8] sm:$0xff] %v705_v62  }
 0x17c PF: > { %s14_s17 = sadd.s32 1, %s775_s17   ;;  %s938_s15 = smov %s771_s16 }
 0x17d   : > { %p11_p5 = scmp.ge.s32.totalorder %s14_s17, 4   ;;  %s939_s16 = smov %s941_s18 }
 0x17f   :  { %13 = sbr.rel (!%p11_p5) target bundleno = 2 (0x2), region = 69 }

// kernel: forward.32
= control target key start
LH: loop header
LB: loop body
LE: loop exit
PB: predicated region body
PF: predicated region fallthrough
CT: control target
= control target key end

     0   :  { %s901_s12 = smov 0   ;;  %s903_s13 = smov 0   ;;  %s1100_s0 = inlined_call_operand.vmem [shape: bf16[2,128,48], index: 0, kind: input, shape index: {}]   ;;  %s1101_s1 = inlined_call_operand.vmem [shape: bf16[64,512], index: 1, kind: input, shape index: {}]   ;;  %s1102_s2 = inlined_call_operand.vmem [shape: f32[64,1], index: 2, kind: input, shape index: {}]   ;;  %s1103_s3 = inlined_call_operand.vmem [shape: bf16[2,64,32], index: 3, kind: output, shape index: {}]  }
   0x1   :  { %s905_s14 = smov 0  }
   0x2 LB: > { %s25_s15 = sadd.s32 1, %s871_s13  ;;  %p693_p0 = scmp.ge.s32.totalorder %s875_s14, 1  ;;  %s875_s14 = sphi %s905_s14, %s13_s14   ;;  %s871_s13 = sphi %s903_s13, %s1105_s13   ;;  %s867_s12 = sphi %s901_s12, %s1104_s12  }
   0x3   : > { %p27_p1 = scmp.ge.s32.totalorder %s25_s15, 2  ;;  %p151_p2 = scmp.lt.s32.totalorder %s875_s14, 3 }
   0x5   : > { %s1107_s15 = smov (%p27_p1, %s25_s15), 0  ;;  %p152_p3 = pnand %p693_p0, %p151_p2 }
   0x6   : > { %p178_p4 = scmp.lt.s32.totalorder (!%p152_p3), %s867_s12, 1  ;;  %s877_s20 = smov (!%p152_p3), 127  }
   0x7   : > { %155 = sbr.rel (%p152_p3) target bundleno = 387 (0x183), region = 32  ;;  %s878_s21 = smov (!%p152_p3), 120  }
   0x8   : > { %s879_s22 = smov (!%p152_p3), 119  }
   0xc   : > { %s1109_s12 = smov (!%p178_p4, %s867_s12), 1  ;;  %v732_v17 = vld [vmem:[%s1101_s1] sm:$0xf]  ;;  %v808_v18 = vld [vmem:[%s1101_s1 + $0xc] sm:$0xf0]  ;;  %v344_v29 = vld [vmem:[%s1102_s2 + $0x8] sm:$0xff] }
   0xd   : > { %s796_s16 = sshll.u32 %s1109_s12, 6  ;;  %v733_v19 = vor.u32 %v808_v18, %v732_v17  ;;  %v748_v26 = vld [vmem:[%s1101_s1 + $0x20] sm:$0xf]  ;;  %v812_v27 = vld [vmem:[%s1101_s1 + $0x2c] sm:$0xf0]  ;;  %v880_v30 = vmov 0  }
   0xe   : > { %s182_s19 = scalar_lea.vmem %s1100_s0, %s796_s16  ;;  %v749_v28 = vor.u32 %v812_v27, %v748_v26  ;;  %851 = vset.pattern.permute.xlu1 %v880_v30  ;;  %850 = vset.pattern.permute.xlu0 %v880_v30  ;;  %v343_v31 = vld [vmem:[%s1102_s2] sm:$0xff]  ;;  %v734_v33 = vld [vmem:[%s1101_s1 + $0x10] sm:$0xf0]  ;;  %v816_v41 = vld [vmem:[%s1101_s1 + $0x4c] sm:$0xf0]  ;;  %s797_s7 = sshll.u32 %s1109_s12, 5 }
   0xf   : > { %v805_v0 = vld [vmem:[%s182_s19 + $0x38] sm:$0xff]  ;;  %v804_v1 = vld [vmem:[%s182_s19 + $0x30] sm:$0xff]  ;;  %v803_v2 = vld [vmem:[%s182_s19 + $0x28] sm:$0xff]  ;;  %852 = vset.pattern.permute.xlu2 %v880_v30  ;;  %s1073_s10 = scalar_lea.vmem %s1103_s3, %s797_s7  ;;  %vm603_vm0 = vcmask 257024  }
  0x10   : > { %269 = vrot.lane.b32.xlu1 %v805_v0, %s877_s20  ;;  %293 = vrot.lane.b32.xlu0 %v805_v0, %s878_s21  ;;  %v802_v3 = vld [vmem:[%s182_s19 + $0x20] sm:$0xff]  ;;  %v801_v4 = vld [vmem:[%s182_s19 + $0x18] sm:$0xff] }
  0x11   : > { %315 = vrot.lane.b32.xlu2 %v804_v1, %s879_s22  ;;  %471 = vmatpush.bf16.msra.mxu0 %v805_v0  ;;  %v800_v5 = vld [vmem:[%s182_s19 + $0x10] sm:$0xff]  ;;  %v799_v6 = vld [vmem:[%s182_s19 + $0x8] sm:$0xff]  ;;  %v798_v7 = vld [vmem:[%s182_s19] sm:$0xff] }
  0x12   : > { %v806_v32 = vld [vmem:[%s1101_s1 + $0x4] sm:$0xf]  ;;  %v764_v40 = vld [vmem:[%s1101_s1 + $0x40] sm:$0xf]  ;;  %v346_v43 = vld [vmem:[%s1102_s2 + $0x18] sm:$0xff] }
  0x13   : > { %v737_v37 = vor.u32 %v806_v32, %v734_v33  ;;  %v765_v42 = vor.u32 %v816_v41, %v764_v40  ;;  %v810_v44 = vld [vmem:[%s1101_s1 + $0x24] sm:$0xf]  ;;  %v750_v45 = vld [vmem:[%s1101_s1 + $0x30] sm:$0xf0]  ;;  %v740_v49 = vld [vmem:[%s1101_s1 + $0x8] sm:$0xf] }
  0x14   : > { %v753_v48 = vor.u32 %v810_v44, %v750_v45  ;;  %v809_v50 = vld [vmem:[%s1101_s1 + $0x14] sm:$0xf0]  ;;  %v807_v51 = vld [vmem:[%s1101_s1 + $0xc] sm:$0xf]  ;;  %v742_v52 = vld [vmem:[%s1101_s1 + $0x18] sm:$0xf0] }
  0x15   : > { %472 = vmatpush.bf16.msra.mxu0 %v804_v1  ;;  %v741_v55 = vor.u32 %v809_v50, %v740_v49  ;;  %v745_v56 = vor.u32 %v807_v51, %v742_v52  ;;  %v780_v57 = vld [vmem:[%s1101_s1 + $0x60] sm:$0xf]  ;;  %v820_v58 = vld [vmem:[%s1101_s1 + $0x6c] sm:$0xf0]  ;;  %v348_v60 = vld [vmem:[%s1102_s2 + $0x28] sm:$0xff] }
  0x16   : > { %v781_v59 = vor.u32 %v820_v58, %v780_v57  ;;  %v814_v61 = vld [vmem:[%s1101_s1 + $0x44] sm:$0xf]  ;;  %v766_v62 = vld [vmem:[%s1101_s1 + $0x50] sm:$0xf0]  ;;  %v350_v18 = vld [vmem:[%s1102_s2 + $0x38] sm:$0xff] }
  0x17   : > { %v769_v63 = vor.u32 %v814_v61, %v766_v62 }
  0x18   : > { %317 = vrot.lane.b32.xlu0 %v805_v0, %s879_s22  ;;  %291 = vrot.lane.b32.xlu1 %v804_v1, %s878_s21  ;;  %v756_v0 = vld [vmem:[%s1101_s1 + $0x28] sm:$0xf] }
  0x19   : > { %267 = vrot.lane.b32.xlu2 %v804_v1, %s877_s20  ;;  %473 = vmatpush.bf16.msra.mxu0 %v803_v2  ;;  %v813_v1 = vld [vmem:[%s1101_s1 + $0x34] sm:$0xf0] }
  0x1d   : > { %474 = vmatpush.bf16.msra.mxu0 %v802_v3 }
  0x20   : > { %313 = vrot.lane.b32.xlu1 %v803_v2, %s879_s22  ;;  %289 = vrot.lane.b32.xlu0 %v803_v2, %s878_s21 }
  0x21   : > { %265 = vrot.lane.b32.xlu2 %v803_v2, %s877_s20  ;;  %475 = vmatpush.bf16.msra.mxu0 %v801_v4  ;;  %v811_v2 = vld [vmem:[%s1101_s1 + $0x2c] sm:$0xf] }
  0x25   : > { %476 = vmatpush.bf16.msra.mxu0 %v800_v5 }
  0x28   : > { %311 = vrot.lane.b32.xlu1 %v802_v3, %s879_s22  ;;  %287 = vrot.lane.b32.xlu0 %v802_v3, %s878_s21 }
  0x29   : > { %263 = vrot.lane.b32.xlu2 %v802_v3, %s877_s20  ;;  %477 = vmatpush.bf16.msra.mxu0 %v799_v6  ;;  %v758_v3 = vld [vmem:[%s1101_s1 + $0x38] sm:$0xf0] }
  0x2d   : > { %478 = vmatpush.bf16.msra.mxu0 %v798_v7 }
  0x30   : > { %309 = vrot.lane.b32.xlu1 %v801_v4, %s879_s22  ;;  %285 = vrot.lane.b32.xlu0 %v801_v4, %s878_s21 }
  0x31   : > { %261 = vrot.lane.b32.xlu2 %v801_v4, %s877_s20  ;;  %479 = vmatmul.bf16.vlgmr.msra.gmra.mxu0 %v733_v19  ;;  %v757_v4 = vor.u32 %v813_v1, %v756_v0  ;;  %v788_v19 = vld [vmem:[%s1101_s1 + $0x68] sm:$0xf] }
  0x38   : > { %307 = vrot.lane.b32.xlu1 %v800_v5, %s879_s22  ;;  %283 = vrot.lane.b32.xlu0 %v800_v5, %s878_s21 }
  0x39   : > { %259 = vrot.lane.b32.xlu2 %v800_v5, %s877_s20  ;;  %v761_v5 = vor.u32 %v811_v2, %v758_v3 }
  0x40   : > { %305 = vrot.lane.b32.xlu1 %v799_v6, %s879_s22  ;;  %281 = vrot.lane.b32.xlu0 %v799_v6, %s878_s21 }
  0x41   : > { %257 = vrot.lane.b32.xlu2 %v799_v6, %s877_s20  ;;  %484 = vmatmul.bf16.gmra.mxu0 %v749_v28  ;;  %v345_v6 = vld [vmem:[%s1102_s2 + $0x10] sm:$0xff] }
  0x48   : > { %303 = vrot.lane.b32.xlu1 %v798_v7, %s879_s22  ;;  %279 = vrot.lane.b32.xlu0 %v798_v7, %s878_s21 }
  0x49   : > { %255 = vrot.lane.b32.xlu2 %v798_v7, %s877_s20  ;;  %v349_v7 = vld [vmem:[%s1102_s2 + $0x30] sm:$0xff] }
  0x50   : > { %358 = vperm.xlu1 %851, %v344_v29   ;;  %353 = vperm.xlu0 %850, %v343_v31  }
  0x51   : > { %489 = vmatmul.bf16.gmra.mxu0 %v765_v42  ;;  %363 = vperm.xlu2 %852, %v345_v6  }
  0x58   : > { %368 = vperm.xlu1 %851, %v346_v43   ;;  %378 = vperm.xlu0 %850, %v348_v60  }
  0x60   : > { %383 = vperm.xlu1 %851, %v349_v7  }
  0x61   : > { %494 = vmatmul.bf16.gmra.mxu0 %v781_v59 }
  0x6b   : > { %v316_v8 = vpop.permute.xlu2 %315 }
  0x73   : > { %v268_v9 = vpop.permute.xlu2 %267 }
  0x7b   : > { %v266_v10 = vpop.permute.xlu2 %265 }
  0x82   : > { %v270_v11 = vpop.permute.xlu1 %269  ;;  %v294_v12 = vpop.permute.xlu0 %293 }
  0x83   : > { %529 = vmatpush.bf16.msra.mxu2 %v294_v12  ;;  %500 = vmatpush.bf16.msra.mxu1 %v270_v11  ;;  %v264_v13 = vpop.permute.xlu2 %263  ;;  %v347_v11 = vld [vmem:[%s1102_s2 + $0x20] sm:$0xff]  ;;  %v772_v12 = vld [vmem:[%s1101_s1 + $0x48] sm:$0xf] }
  0x84   : > { %373 = vperm.xlu2 %852, %v347_v11  }
  0x87   : > { %501 = vmatpush.bf16.msra.mxu1 %v268_v9  ;;  %v782_v9 = vld [vmem:[%s1101_s1 + $0x70] sm:$0xf0] }
  0x8a   : > { %v318_v14 = vpop.permute.xlu0 %317  ;;  %v292_v15 = vpop.permute.xlu1 %291 }
  0x8b   : > { %558 = vmatpush.bf16.msra.mxu3 %v318_v14  ;;  %530 = vmatpush.bf16.msra.mxu2 %v292_v15  ;;  %v262_v16 = vpop.permute.xlu2 %261  ;;  %v815_v14 = vld [vmem:[%s1101_s1 + $0x4c] sm:$0xf]  ;;  %v774_v15 = vld [vmem:[%s1101_s1 + $0x58] sm:$0xf0] }
  0x8c   : > { %502 = vmatpush.bf16.msra.mxu1 %v266_v10  ;;  %v777_v17 = vor.u32 %v815_v14, %v774_v15  ;;  %388 = vperm.xlu2 %852, %v350_v18  }
  0x8f   : > { %559 = vmatpush.bf16.msra.mxu3 %v316_v8  ;;  %v818_v8 = vld [vmem:[%s1101_s1 + $0x64] sm:$0xf] }
  0x90   : > { %503 = vmatpush.bf16.msra.mxu1 %v264_v13  ;;  %v785_v10 = vor.u32 %v818_v8, %v782_v9  ;;  %v817_v13 = vld [vmem:[%s1101_s1 + $0x54] sm:$0xf0] }
  0x92   : > { %v314_v20 = vpop.permute.xlu1 %313  ;;  %v290_v21 = vpop.permute.xlu0 %289 }
  0x93   : > { %531 = vmatpush.bf16.msra.mxu2 %v290_v21  ;;  %560 = vmatpush.bf16.msra.mxu3 %v314_v20  ;;  %v260_v22 = vpop.permute.xlu2 %259  ;;  %v821_v20 = vld [vmem:[%s1101_s1 + $0x74] sm:$0xf0]  ;;  %v819_v21 = vld [vmem:[%s1101_s1 + $0x6c] sm:$0xf] }
  0x94   : > { %504 = vmatpush.bf16.msra.mxu1 %v262_v16  ;;  %v773_v16 = vor.u32 %v817_v13, %v772_v12 }
  0x98   : > { %505 = vmatpush.bf16.msra.mxu1 %v260_v22  ;;  %v790_v22 = vld [vmem:[%s1101_s1 + $0x78] sm:$0xf0] }
  0x9a   : > { %v312_v23 = vpop.permute.xlu1 %311  ;;  %v288_v24 = vpop.permute.xlu0 %287 }
  0x9b   : > { %532 = vmatpush.bf16.msra.mxu2 %v288_v24  ;;  %561 = vmatpush.bf16.msra.mxu3 %v312_v23  ;;  %v258_v25 = vpop.permute.xlu2 %257  ;;  %v789_v23 = vor.u32 %v821_v20, %v788_v19  ;;  %v793_v24 = vor.u32 %v819_v21, %v790_v22 }
  0x9c   : > { %506 = vmatpush.bf16.msra.mxu1 %v258_v25 }
  0xa2   : > { %v310_v34 = vpop.permute.xlu1 %309  ;;  %v286_v35 = vpop.permute.xlu0 %285 }
  0xa3   : > { %533 = vmatpush.bf16.msra.mxu2 %v286_v35  ;;  %562 = vmatpush.bf16.msra.mxu3 %v310_v34  ;;  %v256_v36 = vpop.permute.xlu2 %255 }
  0xa4   : > { %507 = vmatpush.bf16.msra.mxu1 %v256_v36 }
  0xa7   : > { %508 = vmatmul.bf16.vlgmr.msra.gmra.mxu1 %v737_v37 }
  0xaa   : > { %v308_v38 = vpop.permute.xlu1 %307  ;;  %v284_v39 = vpop.permute.xlu0 %283 }
  0xab   : > { %534 = vmatpush.bf16.msra.mxu2 %v284_v39  ;;  %563 = vmatpush.bf16.msra.mxu3 %v308_v38  ;;  %v364_v41 = vpop.permute.xlu2 %363 }
  0xae   : > { %v480_v25 = vpop.f32.mrf.mxu0 }
  0xb2   : > { %v306_v46 = vpop.permute.xlu1 %305  ;;  %v282_v47 = vpop.permute.xlu0 %281 }
  0xb3   : > { %535 = vmatpush.bf16.msra.mxu2 %v282_v47  ;;  %564 = vmatpush.bf16.msra.mxu3 %v306_v46 }
  0xb6   : > { %v482_v27 = vpop.f32.mrf.mxu0 }
  0xb7   : > { %513 = vmatmul.bf16.gmra.mxu1 %v753_v48 }
  0xba   : > { %v304_v53 = vpop.permute.xlu1 %303  ;;  %v280_v54 = vpop.permute.xlu0 %279 }
  0xbb   : > { %536 = vmatpush.bf16.msra.mxu2 %v280_v54  ;;  %565 = vmatpush.bf16.msra.mxu3 %v304_v53 }
  0xbe   : > { %537 = vmatmul.bf16.vlgmr.msra.gmra.mxu2 %v741_v55  ;;  %566 = vmatmul.bf16.vlgmr.msra.gmra.mxu3 %v745_v56  ;;  %v485_v31 = vpop.f32.mrf.mxu0 }
  0xbf   : > { %v486_v48 = vadd.f32 %v485_v31, %v364_v41 }
  0xc2   : > { %v354_v28 = vpop.permute.xlu0 %353  ;;  %v359_v33 = vpop.permute.xlu1 %358 }
  0xc3   : > { %v481_v30 = vadd.f32 %v480_v25, %v354_v28  ;;  %v483_v38 = vadd.f32 %v482_v27, %v359_v33 }
  0xc6   : > { %v487_v43 = vpop.f32.mrf.mxu0 }
  0xc7   : > { %518 = vmatmul.bf16.gmra.mxu1 %v769_v63 }
  0xca   : > { %v369_v54 = vpop.permute.xlu1 %368  ;;  %v379_v12 = vpop.permute.xlu0 %378 }
  0xcb   : > { %v488_v59 = vadd.f32 %v487_v43, %v369_v54 }
  0xce   : > { %542 = vmatmul.bf16.gmra.mxu2 %v757_v4  ;;  %571 = vmatmul.bf16.gmra.mxu3 %v761_v5  ;;  %v490_v57 = vpop.f32.mrf.mxu0 }
  0xd2   : > { %v384_v21 = vpop.permute.xlu1 %383 }
  0xd6   : > { %v492_v6 = vpop.f32.mrf.mxu0 }
  0xd7   : > { %523 = vmatmul.bf16.gmra.mxu1 %v785_v10 }
  0xde   : > { %547 = vmatmul.bf16.gmra.mxu2 %v773_v16  ;;  %576 = vmatmul.bf16.gmra.mxu3 %v777_v17  ;;  %v374_v63 = vpop.permute.xlu2 %373  ;;  %v493_v16 = vadd.f32 %v492_v6, %v379_v12  ;;  %v495_v18 = vpop.f32.mrf.mxu0 }
  0xdf   : > { %v491_v5 = vadd.f32 %v490_v57, %v374_v63  ;;  %v496_v27 = vadd.f32 %v495_v18, %v384_v21 }
  0xe6   : > { %v497_v31 = vpop.f32.mrf.mxu0 }
  0xee   : > { %552 = vmatmul.bf16.gmra.mxu2 %v789_v23  ;;  %581 = vmatmul.bf16.gmra.mxu3 %v793_v24 }
 0x124   : > { %v509_v26 = vpop.f32.mrf.mxu1 }
 0x125   : > { %v510_v32 = vadd.f32 %v509_v26, %v481_v30  ;;  %v389_v30 = vpop.permute.xlu2 %388 }
 0x12c   : > { %v511_v29 = vpop.f32.mrf.mxu1 }
 0x12d   : > { %v512_v44 = vadd.f32 %v511_v29, %v483_v38 }
 0x134   : > { %v514_v36 = vpop.f32.mrf.mxu1 }
 0x135   : > { %v515_v52 = vadd.f32 %v514_v36, %v486_v48 }
 0x13c   : > { %v516_v49 = vpop.f32.mrf.mxu1 }
 0x13d   : > { %v517_v1 = vadd.f32 %v516_v49, %v488_v59 }
 0x141   : > { %v538_v34 = vpop.f32.mrf.mxu2  ;;  %v567_v35 = vpop.f32.mrf.mxu3 }
 0x142   : > { %v539_v37 = vadd.f32 %v538_v34, %v510_v32 }
 0x144   : > { %v568_v39 = vadd.f32 %v567_v35, %v539_v37  ;;  %v519_v61 = vpop.f32.mrf.mxu1  ;;  %v498_v37 = vadd.f32 %v497_v31, %v389_v30 }
 0x145   : > { %v520_v9 = vadd.f32 %v519_v61, %v491_v5 }
 0x146   : > { %v587_v40 = vmax.f32 %v568_v39, 0.0 }
 0x148   : > { %v595_v42 = vpack.c.bf16 %v587_v40, %v587_v40 }
 0x149   : > { %v540_v45 = vpop.f32.mrf.mxu2  ;;  %v569_v46 = vpop.f32.mrf.mxu3 }
 0x14a   : > { %604 = vst.msk [vmem:[%s1073_s10] sm:$0xf] %vm603_vm0, %v595_v42  ;;  %v541_v47 = vadd.f32 %v540_v45, %v512_v44 }
 0x14c   : > { %v570_v50 = vadd.f32 %v569_v46, %v541_v47  ;;  %v521_v10 = vpop.f32.mrf.mxu1 }
 0x14d   : > { %v522_v22 = vadd.f32 %v521_v10, %v493_v16 }
 0x14e   : > { %v588_v51 = vmax.f32 %v570_v50, 0.0 }
 0x150   : > { %v596_v53 = vpack.c.bf16 %v588_v51, %v588_v51 }
 0x151   : > { %v543_v55 = vpop.f32.mrf.mxu2  ;;  %v572_v56 = vpop.f32.mrf.mxu3 }
 0x152   : > { %605 = vst.msk [vmem:[%s1073_s10 + $0x4] sm:$0xf] %vm603_vm0, %v596_v53  ;;  %v544_v58 = vadd.f32 %v543_v55, %v515_v52 }
 0x154   : > { %v573_v60 = vadd.f32 %v572_v56, %v544_v58  ;;  %v524_v26 = vpop.f32.mrf.mxu1 }
 0x155   : > { %v525_v33 = vadd.f32 %v524_v26, %v496_v27 }
 0x156   : > { %v589_v62 = vmax.f32 %v573_v60, 0.0 }
 0x158   : > { %v597_v0 = vpack.c.bf16 %v589_v62, %v589_v62 }
 0x159   : > { %v545_v2 = vpop.f32.mrf.mxu2  ;;  %v574_v3 = vpop.f32.mrf.mxu3 }
 0x15a   : > { %606 = vst.msk [vmem:[%s1073_s10 + $0x8] sm:$0xf] %vm603_vm0, %v597_v0  ;;  %v546_v4 = vadd.f32 %v545_v2, %v517_v1 }
 0x15c   : > { %v575_v7 = vadd.f32 %v574_v3, %v546_v4  ;;  %v526_v39 = vpop.f32.mrf.mxu1 }
 0x15d   : > { %v527_v41 = vadd.f32 %v526_v39, %v498_v37 }
 0x15e   : > { %v590_v8 = vmax.f32 %v575_v7, 0.0 }
 0x160   : > { %v598_v11 = vpack.c.bf16 %v590_v8, %v590_v8 }
 0x161   : > { %v548_v13 = vpop.f32.mrf.mxu2  ;;  %v577_v14 = vpop.f32.mrf.mxu3 }
 0x162   : > { %607 = vst.msk [vmem:[%s1073_s10 + $0xc] sm:$0xf] %vm603_vm0, %v598_v11  ;;  %v549_v15 = vadd.f32 %v548_v13, %v520_v9 }
 0x164   : > { %v578_v17 = vadd.f32 %v577_v14, %v549_v15 }
 0x166   : > { %v591_v19 = vmax.f32 %v578_v17, 0.0 }
 0x168   : > { %v599_v20 = vpack.c.bf16 %v591_v19, %v591_v19 }
 0x169   : > { %v550_v23 = vpop.f32.mrf.mxu2  ;;  %v579_v24 = vpop.f32.mrf.mxu3 }
 0x16a   : > { %608 = vst.msk [vmem:[%s1073_s10 + $0x10] sm:$0xf] %vm603_vm0, %v599_v20  ;;  %v551_v25 = vadd.f32 %v550_v23, %v522_v22 }
 0x16c   : > { %v580_v28 = vadd.f32 %v579_v24, %v551_v25 }
 0x16e   : > { %v592_v29 = vmax.f32 %v580_v28, 0.0 }
 0x170   : > { %v600_v32 = vpack.c.bf16 %v592_v29, %v592_v29 }
 0x171   : > { %v553_v34 = vpop.f32.mrf.mxu2  ;;  %v582_v35 = vpop.f32.mrf.mxu3 }
 0x172   : > { %609 = vst.msk [vmem:[%s1073_s10 + $0x14] sm:$0xf] %vm603_vm0, %v600_v32  ;;  %v554_v36 = vadd.f32 %v553_v34, %v525_v33 }
 0x174   : > { %v583_v38 = vadd.f32 %v582_v35, %v554_v36 }
 0x176   : > { %v593_v40 = vmax.f32 %v583_v38, 0.0 }
 0x178   : > { %v601_v42 = vpack.c.bf16 %v593_v40, %v593_v40 }
 0x179   : > { %v555_v43 = vpop.f32.mrf.mxu2  ;;  %v584_v45 = vpop.f32.mrf.mxu3 }
 0x17a   : > { %610 = vst.msk [vmem:[%s1073_s10 + $0x18] sm:$0xf] %vm603_vm0, %v601_v42  ;;  %v556_v44 = vadd.f32 %v555_v43, %v527_v41 }
 0x17c   : > { %v585_v46 = vadd.f32 %v584_v45, %v556_v44 }
 0x17e   : > { %v594_v47 = vmax.f32 %v585_v46, 0.0 }
 0x180   : > { %v602_v48 = vpack.c.bf16 %v594_v47, %v594_v47 }
 0x182   : > { %611 = vst.msk [vmem:[%s1073_s10 + $0x1c] sm:$0xf] %vm603_vm0, %v602_v48 }
 0x183 PF: > { %s13_s14 = sadd.s32 1, %s875_s14   ;;  %s1104_s12 = smov %s871_s13 }
 0x184   : > { %p10_p5 = scmp.ge.s32.totalorder %s13_s14, 4   ;;  %s1105_s13 = smov %s1107_s15 }
 0x186   :  { %12 = sbr.rel (!%p10_p5) target bundleno = 2 (0x2), region = 62 }

// kernel: forward.33
= control target key start
LH: loop header
LB: loop body
LE: loop exit
PB: predicated region body
PF: predicated region fallthrough
CT: control target
= control target key end

     0   :  { %s546_s12 = smov 0   ;;  %s548_s13 = smov 0   ;;  %s637_s0 = inlined_call_operand.vmem [shape: bf16[2,32,32], index: 0, kind: input, shape index: {}]   ;;  %s638_s1 = inlined_call_operand.vmem [shape: bf16[64,32], index: 1, kind: input, shape index: {}]   ;;  %s639_s2 = inlined_call_operand.vmem [shape: f32[64,1], index: 2, kind: input, shape index: {}]   ;;  %s640_s3 = inlined_call_operand.vmem [shape: bf16[2,64,32], index: 3, kind: output, shape index: {}]  }
   0x1   :  { %s550_s14 = smov 0  }
   0x2 LB: > { %s25_s15 = sadd.s32 1, %s519_s13  ;;  %p424_p0 = scmp.ge.s32.totalorder %s523_s14, 1  ;;  %s523_s14 = sphi %s550_s14, %s13_s14   ;;  %s519_s13 = sphi %s548_s13, %s642_s13   ;;  %s515_s12 = sphi %s546_s12, %s641_s12  }
   0x3   : > { %p27_p1 = scmp.ge.s32.totalorder %s25_s15, 2  ;;  %p151_p2 = scmp.lt.s32.totalorder %s523_s14, 3 }
   0x5   : > { %s644_s15 = smov (%p27_p1, %s25_s15), 0  ;;  %p152_p3 = pnand %p424_p0, %p151_p2 }
   0x6   : > { %p178_p4 = scmp.lt.s32.totalorder (!%p152_p3), %s515_s12, 1 }
   0x7   : > { %155 = sbr.rel (%p152_p3) target bundleno = 171 (0xab), region = 32 }
   0xc   : > { %v206_v0 = vld [vmem:[%s639_s2 + $0x10] sm:$0xff]  ;;  %v204_v1 = vld [vmem:[%s639_s2] sm:$0xff]  ;;  %v525_v2 = vmov 0   ;;  %s646_s12 = smov (!%p178_p4, %s515_s12), 1  ;;  %v207_v5 = vld [vmem:[%s639_s2 + $0x18] sm:$0xff]  ;;  %vm284_vm0 = vcmask 261120  }
   0xd   : > { %499 = vset.pattern.permute.xlu1 %v525_v2  ;;  %498 = vset.pattern.permute.xlu0 %v525_v2  ;;  %v208_v3 = vld [vmem:[%s639_s2 + $0x20] sm:$0xff]  ;;  %s459_s22 = sshll.u32 %s646_s12, 4  ;;  %v205_v6 = vld [vmem:[%s639_s2 + $0x8] sm:$0xff]  ;;  %v465_v11 = vld [vmem:[%s638_s1 + $0x10] sm:$0xff]  ;;  %s460_s21 = sshll.u32 %s646_s12, 5  ;;  %vm334_vm1 = vcmask 257024  }
   0xe   : > { %224 = vperm.xlu1 %499, %v206_v0   ;;  %214 = vperm.xlu0 %498, %v204_v1   ;;  %s182_s25 = scalar_lea.vmem %s637_s0, %s459_s22  ;;  %v463_v8 = vld [vmem:[%s638_s1] sm:$0xff]  ;;  %v464_v9 = vld [vmem:[%s638_s1 + $0x8] sm:$0xff]  ;;  %v466_v12 = vld [vmem:[%s638_s1 + $0x18] sm:$0xff]  ;;  %s610_s24 = scalar_lea.vmem %s640_s3, %s460_s21 }
   0xf   : > { %500 = vset.pattern.permute.xlu2 %v525_v2  ;;  %v462_v4 = vld [vmem:[%s182_s25 + $0x8] sm:$0xff]  ;;  %v461_v7 = vld [vmem:[%s182_s25] sm:$0xff]  ;;  %v211_v13 = vld [vmem:[%s639_s2 + $0x38] sm:$0xff] }
  0x10   : > { %234 = vperm.xlu2 %500, %v208_v3   ;;  %303 = vmatpush.bf16.msra.mxu0 %v462_v4  ;;  %v209_v10 = vld [vmem:[%s639_s2 + $0x28] sm:$0xff]  ;;  %v210_v14 = vld [vmem:[%s639_s2 + $0x30] sm:$0xff] }
  0x11   : > { %467 = vmatpush.bf16.msra.mxu1 %v462_v4  ;;  %468 = vmatpush.bf16.msra.mxu2 %v462_v4 }
  0x12   : > { %469 = vmatpush.bf16.msra.mxu3 %v462_v4 }
  0x14   : > { %304 = vmatpush.bf16.msra.mxu0 %v461_v7 }
  0x15   : > { %470 = vmatpush.bf16.msra.mxu1 %v461_v7  ;;  %471 = vmatpush.bf16.msra.mxu2 %v461_v7 }
  0x16   : > { %229 = vperm.xlu1 %499, %v207_v5   ;;  %219 = vperm.xlu0 %498, %v205_v6  }
  0x17   : > { %472 = vmatpush.bf16.msra.mxu3 %v461_v7  ;;  %453 = vmatmul.msk.bf16.vlgmr.msra.gmra.mxu0 %vm284_vm0, %v463_v8 }
  0x18   : > { %239 = vperm.xlu2 %500, %v209_v10   ;;  %454 = vmatmul.msk.bf16.vlgmr.msra.gmra.mxu1 %vm284_vm0, %v464_v9 }
  0x19   : > { %455 = vmatmul.msk.bf16.vlgmr.msra.gmra.mxu2 %vm284_vm0, %v465_v11 }
  0x1a   : > { %456 = vmatmul.msk.bf16.vlgmr.msra.gmra.mxu3 %vm284_vm0, %v466_v12 }
  0x1e   : > { %249 = vperm.xlu1 %499, %v211_v13   ;;  %244 = vperm.xlu0 %498, %v210_v14  }
  0x6a   : > { %v235_v25 = vpop.permute.xlu2 %234 }
  0x72   : > { %v240_v40 = vpop.permute.xlu2 %239 }
  0x80   : > { %v215_v15 = vpop.permute.xlu0 %214  ;;  %v225_v16 = vpop.permute.xlu1 %224 }
  0x88   : > { %v220_v17 = vpop.permute.xlu0 %219  ;;  %v230_v24 = vpop.permute.xlu1 %229 }
  0x90   : > { %v245_v26 = vpop.permute.xlu0 %244  ;;  %v250_v39 = vpop.permute.xlu1 %249 }
  0x94   : > { %v306_v18 = vpop.f32.mrf.mxu0 }
  0x95   : > { %v311_v19 = vpop.f32.mrf.mxu1  ;;  %v307_v20 = vadd.f32 %v306_v18, %v215_v15 }
  0x96   : > { %v312_v21 = vadd.f32 %v311_v19, %v225_v16 }
  0x97   : > { %v326_v22 = vpack.c.bf16 %v307_v20, %v307_v20 }
  0x98   : > { %v328_v23 = vpack.c.bf16 %v312_v21, %v312_v21 }
  0x99   : > { %335 = vst.msk [vmem:[%s610_s24] sm:$0xf] %vm334_vm1, %v326_v22 }
  0x9a   : > { %337 = vst.msk [vmem:[%s610_s24 + $0x8] sm:$0xf] %vm334_vm1, %v328_v23 }
  0x9c   : > { %v316_v27 = vpop.f32.mrf.mxu2  ;;  %v308_v31 = vpop.f32.mrf.mxu0 }
  0x9d   : > { %v321_v28 = vpop.f32.mrf.mxu3  ;;  %v317_v29 = vadd.f32 %v316_v27, %v235_v25  ;;  %v313_v32 = vpop.f32.mrf.mxu1  ;;  %v309_v33 = vadd.f32 %v308_v31, %v220_v17 }
  0x9e   : > { %v322_v30 = vadd.f32 %v321_v28, %v245_v26  ;;  %v314_v34 = vadd.f32 %v313_v32, %v230_v24 }
  0x9f   : > { %v330_v35 = vpack.c.bf16 %v317_v29, %v317_v29  ;;  %v327_v37 = vpack.c.bf16 %v309_v33, %v309_v33 }
  0xa0   : > { %v332_v36 = vpack.c.bf16 %v322_v30, %v322_v30  ;;  %v329_v38 = vpack.c.bf16 %v314_v34, %v314_v34 }
  0xa1   : > { %339 = vst.msk [vmem:[%s610_s24 + $0x10] sm:$0xf] %vm334_vm1, %v330_v35 }
  0xa2   : > { %341 = vst.msk [vmem:[%s610_s24 + $0x18] sm:$0xf] %vm334_vm1, %v332_v36 }
  0xa3   : > { %336 = vst.msk [vmem:[%s610_s24 + $0x4] sm:$0xf] %vm334_vm1, %v327_v37 }
  0xa4   : > { %338 = vst.msk [vmem:[%s610_s24 + $0xc] sm:$0xf] %vm334_vm1, %v329_v38  ;;  %v318_v41 = vpop.f32.mrf.mxu2 }
  0xa5   : > { %v323_v42 = vpop.f32.mrf.mxu3  ;;  %v319_v43 = vadd.f32 %v318_v41, %v240_v40 }
  0xa6   : > { %v324_v44 = vadd.f32 %v323_v42, %v250_v39 }
  0xa7   : > { %v331_v45 = vpack.c.bf16 %v319_v43, %v319_v43 }
  0xa8   : > { %v333_v46 = vpack.c.bf16 %v324_v44, %v324_v44 }
  0xa9   : > { %340 = vst.msk [vmem:[%s610_s24 + $0x14] sm:$0xf] %vm334_vm1, %v331_v45 }
  0xaa   : > { %342 = vst.msk [vmem:[%s610_s24 + $0x1c] sm:$0xf] %vm334_vm1, %v333_v46 }
  0xab PF: > { %s13_s14 = sadd.s32 1, %s523_s14   ;;  %s641_s12 = smov %s519_s13 }
  0xac   : > { %p10_p5 = scmp.ge.s32.totalorder %s13_s14, 4   ;;  %s642_s13 = smov %s644_s15 }
  0xae   :  { %12 = sbr.rel (!%p10_p5) target bundleno = 2 (0x2), region = 62 }

// kernel: forward.35
= control target key start
LH: loop header
LB: loop body
LE: loop exit
PB: predicated region body
PF: predicated region fallthrough
CT: control target
= control target key end

     0   :  { %s994_s12 = smov 0   ;;  %s996_s13 = smov 0   ;;  %s1264_s0 = inlined_call_operand.vmem [shape: bf16[2,64,56], index: 0, kind: input, shape index: {}]   ;;  %s1265_s1 = inlined_call_operand.vmem [shape: bf16[64,576], index: 1, kind: input, shape index: {}]   ;;  %s1266_s2 = inlined_call_operand.vmem [shape: f32[64,1], index: 2, kind: input, shape index: {}]   ;;  %s1267_s3 = inlined_call_operand.vmem [shape: bf16[2,64,32], index: 3, kind: output, shape index: {}]  }
   0x1   :  { %s998_s14 = smov 0  }
   0x2 LB: > { %s25_s15 = sadd.s32 1, %s959_s13  ;;  %p756_p0 = scmp.ge.s32.totalorder %s963_s14, 1  ;;  %s963_s14 = sphi %s998_s14, %s13_s14   ;;  %s959_s13 = sphi %s996_s13, %s1269_s13   ;;  %s955_s12 = sphi %s994_s12, %s1268_s12  }
   0x3   : > { %p27_p1 = scmp.ge.s32.totalorder %s25_s15, 2  ;;  %p151_p2 = scmp.lt.s32.totalorder %s963_s14, 3 }
   0x5   : > { %s1271_s15 = smov (%p27_p1, %s25_s15), 0  ;;  %p152_p3 = pnand %p756_p0, %p151_p2 }
   0x6   : > { %p178_p4 = scmp.lt.s32.totalorder (!%p152_p3), %s955_s12, 1  ;;  %s965_s20 = smov (!%p152_p3), 127  }
   0x7   : > { %155 = sbr.rel (%p152_p3) target bundleno = 407 (0x197), region = 32  ;;  %s966_s21 = smov (!%p152_p3), 118  }
   0x8   : > { %s967_s22 = smov (!%p152_p3), 111   ;;  %s968_s23 = smov (!%p152_p3), 120  }
   0x9   : > { %s969_s24 = smov (!%p152_p3), 119   ;;  %s970_s25 = smov (!%p152_p3), 112  }
   0xa   : > { %s971_s26 = smov (!%p152_p3), 126   ;;  %s972_s27 = smov (!%p152_p3), 110  }
   0xc   : > { %s1273_s12 = smov (!%p178_p4, %s955_s12), 1  ;;  %v973_v19 = vmov 0   ;;  %v346_v20 = vld [vmem:[%s1266_s2 + $0x10] sm:$0xff]  ;;  %v799_v21 = vld [vmem:[%s1265_s1 + $0x28] sm:$0xf]  ;;  %v348_v34 = vld [vmem:[%s1266_s2 + $0x20] sm:$0xff] }
   0xd   : > { %s863_s16 = sshll.u32 %s1273_s12, 5  ;;  %940 = vset.pattern.permute.xlu1 %v973_v19  ;;  %939 = vset.pattern.permute.xlu0 %v973_v19  ;;  %v876_v22 = vld [vmem:[%s1265_s1 + $0x38] sm:$0xf0]  ;;  %v839_v23 = vld [vmem:[%s1265_s1 + $0x78] sm:$0xf]  ;;  %v345_v33 = vld [vmem:[%s1266_s2 + $0x8] sm:$0xff] }
   0xe   : > { %s182_s19 = scalar_lea.vmem %s1264_s0, %s863_s16  ;;  %938 = vset.pattern.permute.xlu2 %v973_v19  ;;  %v886_v24 = vld [vmem:[%s1265_s1 + $0x88] sm:$0xf0]  ;;  %v779_v25 = vld [vmem:[%s1265_s1] sm:$0xf]  ;;  %v871_v26 = vld [vmem:[%s1265_s1 + $0x10] sm:$0xf0]  ;;  %v800_v29 = vor.u32 %v876_v22, %v799_v21  ;;  %s1234_s11 = scalar_lea.vmem %s1267_s3, %s863_s16 }
   0xf   : > { %v1020_v0 = vld [vmem:[%s182_s19 + $0x18] sm:$0xff]  ;;  %v1022_v1 = vld [vmem:[%s182_s19 + $0x8] sm:$0xff]  ;;  %v1027_v2 = vld [vmem:[%s182_s19 + $0x10] sm:$0xff]  ;;  %v780_v30 = vor.u32 %v871_v26, %v779_v25  ;;  %v840_v31 = vor.u32 %v886_v24, %v839_v23  ;;  %vm492_vm0 = vcmask 523264   ;;  %vm666_vm1 = vcmask 257024  }
  0x10   : > { %230 = vrot.lane.b32.xlu0 %v1020_v0, %s965_s20  ;;  %226 = vrot.lane.b32.xlu1 %v1022_v1, %s965_s20  ;;  %v1029_v3 = vld [vmem:[%s182_s19] sm:$0xff]  ;;  %v350_v38 = vld [vmem:[%s1266_s2 + $0x30] sm:$0xff] }
  0x11   : > { %278 = vrot.lane.b32.xlu2 %v1020_v0, %s966_s21  ;;  %v344_v37 = vld [vmem:[%s1266_s2] sm:$0xff]  ;;  %v819_v39 = vld [vmem:[%s1265_s1 + $0x50] sm:$0xf]  ;;  %v351_v41 = vld [vmem:[%s1266_s2 + $0x38] sm:$0xff] }
  0x12   : > { %v881_v40 = vld [vmem:[%s1265_s1 + $0x60] sm:$0xf0]  ;;  %v347_v45 = vld [vmem:[%s1266_s2 + $0x18] sm:$0xff]  ;;  %v787_v49 = vld [vmem:[%s1265_s1 + $0x8] sm:$0xf] }
  0x13   : > { %v820_v44 = vor.u32 %v881_v40, %v819_v39  ;;  %v872_v50 = vld [vmem:[%s1265_s1 + $0x18] sm:$0xf0]  ;;  %v869_v54 = vld [vmem:[%s1265_s1 + $0x4] sm:$0xf]  ;;  %v781_v55 = vld [vmem:[%s1265_s1 + $0x14] sm:$0xf0] }
  0x14   : > { %v788_v51 = vor.u32 %v872_v50, %v787_v49  ;;  %v349_v57 = vld [vmem:[%s1266_s2 + $0x28] sm:$0xff]  ;;  %v784_v58 = vor.u32 %v869_v54, %v781_v55  ;;  %v789_v60 = vld [vmem:[%s1265_s1 + $0x1c] sm:$0xf0]  ;;  %v815_v19 = vld [vmem:[%s1265_s1 + $0x38] sm:$0xf] }
  0x15   : > { %v870_v59 = vld [vmem:[%s1265_s1 + $0xc] sm:$0xf]  ;;  %v880_v23 = vld [vmem:[%s1265_s1 + $0x5c] sm:$0xf]  ;;  %v829_v24 = vld [vmem:[%s1265_s1 + $0x6c] sm:$0xf0] }
  0x16   : > { %v792_v62 = vor.u32 %v870_v59, %v789_v60  ;;  %v832_v25 = vor.u32 %v880_v23, %v829_v24  ;;  %v847_v26 = vld [vmem:[%s1265_s1 + $0x80] sm:$0xf]  ;;  %v888_v39 = vld [vmem:[%s1265_s1 + $0x98] sm:$0xf0] }
  0x18   : > { %228 = vrot.lane.b32.xlu0 %v1027_v2, %s965_s20  ;;  %224 = vrot.lane.b32.xlu1 %v1029_v3, %s965_s20 }
  0x19   : > { %302 = vrot.lane.b32.xlu2 %v1020_v0, %s967_s22 }
  0x20   : > { %254 = vrot.lane.b32.xlu0 %v1020_v0, %s968_s23  ;;  %276 = vrot.lane.b32.xlu1 %v1027_v2, %s966_s21 }
  0x21   : > { %300 = vrot.lane.b32.xlu2 %v1027_v2, %s967_s22 }
  0x28   : > { %252 = vrot.lane.b32.xlu0 %v1027_v2, %s968_s23  ;;  %274 = vrot.lane.b32.xlu1 %v1022_v1, %s966_s21 }
  0x29   : > { %298 = vrot.lane.b32.xlu2 %v1022_v1, %s967_s22 }
  0x30   : > { %250 = vrot.lane.b32.xlu0 %v1022_v1, %s968_s23  ;;  %272 = vrot.lane.b32.xlu1 %v1029_v3, %s966_s21 }
  0x31   : > { %296 = vrot.lane.b32.xlu2 %v1029_v3, %s967_s22 }
  0x38   : > { %248 = vrot.lane.b32.xlu0 %v1029_v3, %s968_s23  ;;  %266 = vrot.lane.b32.xlu1 %v1020_v0, %s969_s24 }
  0x39   : > { %290 = vrot.lane.b32.xlu2 %v1020_v0, %s970_s25 }
  0x40   : > { %242 = vrot.lane.b32.xlu0 %v1020_v0, %s971_s26  ;;  %264 = vrot.lane.b32.xlu1 %v1027_v2, %s969_s24 }
  0x41   : > { %288 = vrot.lane.b32.xlu2 %v1027_v2, %s970_s25 }
  0x48   : > { %240 = vrot.lane.b32.xlu0 %v1027_v2, %s971_s26  ;;  %262 = vrot.lane.b32.xlu1 %v1022_v1, %s969_s24 }
  0x49   : > { %286 = vrot.lane.b32.xlu2 %v1022_v1, %s970_s25 }
  0x50   : > { %314 = vrot.lane.b32.xlu0 %v1020_v0, %s972_s27  ;;  %238 = vrot.lane.b32.xlu1 %v1022_v1, %s971_s26 }
  0x51   : > { %260 = vrot.lane.b32.xlu2 %v1029_v3, %s969_s24 }
  0x58   : > { %284 = vrot.lane.b32.xlu0 %v1029_v3, %s970_s25  ;;  %312 = vrot.lane.b32.xlu1 %v1027_v2, %s972_s27 }
  0x59   : > { %236 = vrot.lane.b32.xlu2 %v1029_v3, %s971_s26 }
  0x60   : > { %310 = vrot.lane.b32.xlu0 %v1022_v1, %s972_s27  ;;  %308 = vrot.lane.b32.xlu1 %v1029_v3, %s972_s27 }
  0x61   : > { %354 = vperm.xlu2 %938, %v344_v37  }
  0x68   : > { %364 = vperm.xlu1 %940, %v346_v20   ;;  %359 = vperm.xlu0 %939, %v345_v33   ;;  %v878_v20 = vld [vmem:[%s1265_s1 + $0x48] sm:$0xf0] }
  0x69   : > { %369 = vperm.xlu2 %938, %v347_v45   ;;  %v816_v22 = vor.u32 %v878_v20, %v815_v19 }
  0x6b   : > { %v1060_v4 = vpop.permute.xlu2 %278 }
  0x70   : > { %374 = vperm.xlu1 %940, %v348_v34   ;;  %384 = vperm.xlu0 %939, %v350_v38   ;;  %v855_v38 = vld [vmem:[%s1265_s1 + $0x88] sm:$0xf] }
  0x71   : > { %379 = vperm.xlu2 %938, %v349_v57   ;;  %v856_v40 = vor.u32 %v888_v39, %v855_v38 }
  0x73   : > { %v303_v5 = vpop.permute.xlu2 %302 }
  0x74   : > { %592 = vmatpush.bf16.msra.mxu3 %v303_v5  ;;  %v801_v5 = vld [vmem:[%s1265_s1 + $0x3c] sm:$0xf0] }
  0x78   : > { %389 = vperm.xlu1 %940, %v351_v41  }
  0x7b   : > { %v301_v6 = vpop.permute.xlu2 %300 }
  0x7c   : > { %593 = vmatpush.bf16.msra.mxu3 %v301_v6  ;;  %v795_v6 = vld [vmem:[%s1265_s1 + $0x10] sm:$0xf] }
  0x82   : > { %v231_v7 = vpop.permute.xlu0 %230  ;;  %v227_v8 = vpop.permute.xlu1 %226 }
  0x83   : > { %505 = vmatpush.bf16.msra.mxu0 %v231_v7  ;;  %889 = vmatpush.bf16.msra.mxu1 %v231_v7  ;;  %v299_v9 = vpop.permute.xlu2 %298 }
  0x84   : > { %890 = vmatpush.bf16.msra.mxu2 %v231_v7  ;;  %594 = vmatpush.bf16.msra.mxu3 %v299_v9  ;;  %v873_v7 = vld [vmem:[%s1265_s1 + $0x20] sm:$0xf0] }
  0x8a   : > { %v229_v10 = vpop.permute.xlu0 %228  ;;  %v225_v11 = vpop.permute.xlu1 %224 }
  0x8b   : > { %506 = vmatpush.bf16.msra.mxu0 %v229_v10  ;;  %891 = vmatpush.bf16.msra.mxu1 %v229_v10  ;;  %v297_v12 = vpop.permute.xlu2 %296 }
  0x8c   : > { %892 = vmatpush.bf16.msra.mxu2 %v229_v10  ;;  %595 = vmatpush.bf16.msra.mxu3 %v297_v12  ;;  %v796_v10 = vor.u32 %v873_v7, %v795_v6  ;;  %v809_v12 = vld [vmem:[%s1265_s1 + $0x44] sm:$0xf0] }
  0x8f   : > { %507 = vmatpush.bf16.msra.mxu0 %v227_v8  ;;  %893 = vmatpush.bf16.msra.mxu1 %v227_v8 }
  0x90   : > { %894 = vmatpush.bf16.msra.mxu2 %v227_v8 }
  0x92   : > { %v255_v13 = vpop.permute.xlu0 %254  ;;  %v277_v14 = vpop.permute.xlu1 %276 }
  0x93   : > { %508 = vmatpush.bf16.msra.mxu0 %v225_v11  ;;  %895 = vmatpush.bf16.msra.mxu1 %v225_v11  ;;  %v291_v15 = vpop.permute.xlu2 %290 }
  0x94   : > { %896 = vmatpush.bf16.msra.mxu2 %v225_v11  ;;  %596 = vmatpush.bf16.msra.mxu3 %v291_v15  ;;  %v875_v11 = vld [vmem:[%s1265_s1 + $0x34] sm:$0xf]  ;;  %v882_v15 = vld [vmem:[%s1265_s1 + $0x68] sm:$0xf0] }
  0x97   : > { %897 = vmatpush.bf16.msra.mxu1 %v1020_v0  ;;  %509 = vmatpush.bf16.msra.mxu0 %v1020_v0 }
  0x98   : > { %898 = vmatpush.bf16.msra.mxu2 %v1020_v0  ;;  %v807_v0 = vld [vmem:[%s1265_s1 + $0x30] sm:$0xf] }
  0x9a   : > { %v253_v16 = vpop.permute.xlu0 %252  ;;  %v275_v17 = vpop.permute.xlu1 %274 }
  0x9b   : > { %899 = vmatpush.bf16.msra.mxu1 %v1027_v2  ;;  %v289_v18 = vpop.permute.xlu2 %288  ;;  %510 = vmatpush.bf16.msra.mxu0 %v1027_v2 }
  0x9c   : > { %900 = vmatpush.bf16.msra.mxu2 %v1027_v2  ;;  %597 = vmatpush.bf16.msra.mxu3 %v289_v18  ;;  %v821_v18 = vld [vmem:[%s1265_s1 + $0x64] sm:$0xf0] }
  0x9f   : > { %901 = vmatpush.bf16.msra.mxu1 %v1022_v1  ;;  %511 = vmatpush.bf16.msra.mxu0 %v1022_v1 }
  0xa0   : > { %902 = vmatpush.bf16.msra.mxu2 %v1022_v1  ;;  %v877_v1 = vld [vmem:[%s1265_s1 + $0x40] sm:$0xf0] }
  0xa1   : > { %v808_v2 = vor.u32 %v877_v1, %v807_v0 }
  0xa2   : > { %v251_v27 = vpop.permute.xlu0 %250  ;;  %v273_v28 = vpop.permute.xlu1 %272 }
  0xa3   : > { %903 = vmatpush.bf16.msra.mxu1 %v1029_v3  ;;  %512 = vmatpush.bf16.msra.mxu0 %v1029_v3  ;;  %v287_v32 = vpop.permute.xlu2 %286 }
  0xa4   : > { %904 = vmatpush.bf16.msra.mxu2 %v1029_v3  ;;  %598 = vmatpush.bf16.msra.mxu3 %v287_v32  ;;  %v883_v32 = vld [vmem:[%s1265_s1 + $0x70] sm:$0xf0] }
  0xa6   : > { %518 = vmatmul.bf16.vlgmr.msra.gmra.mxu1 %v800_v29  ;;  %513 = vmatmul.bf16.vlgmr.msra.gmra.mxu0 %v780_v30  ;;  %v884_v29 = vld [vmem:[%s1265_s1 + $0x7c] sm:$0xf]  ;;  %v841_v30 = vld [vmem:[%s1265_s1 + $0x8c] sm:$0xf0] }
  0xa7   : > { %534 = vmatpush.bf16.msrb.mxu1 %v255_v13  ;;  %528 = vmatmul.bf16.vlgmr.msra.gmra.mxu2 %v840_v31  ;;  %v812_v13 = vor.u32 %v875_v11, %v809_v12  ;;  %v835_v31 = vld [vmem:[%s1265_s1 + $0x60] sm:$0xf]  ;;  %v844_v33 = vor.u32 %v884_v29, %v841_v30 }
  0xa8   : > { %563 = vmatpush.bf16.msrb.mxu2 %v1060_v4  ;;  %v874_v4 = vld [vmem:[%s1265_s1 + $0x2c] sm:$0xf]  ;;  %v836_v34 = vor.u32 %v883_v32, %v835_v31 }
  0xa9   : > { %v804_v9 = vor.u32 %v874_v4, %v801_v5 }
  0xaa   : > { %v249_v35 = vpop.permute.xlu0 %248  ;;  %v267_v36 = vpop.permute.xlu1 %266 }
  0xab   : > { %535 = vmatpush.bf16.msrb.mxu1 %v253_v16  ;;  %v261_v46 = vpop.permute.xlu2 %260 }
  0xac   : > { %564 = vmatpush.bf16.msrb.mxu2 %v277_v14  ;;  %v827_v14 = vld [vmem:[%s1265_s1 + $0x58] sm:$0xf] }
  0xad   : > { %v828_v16 = vor.u32 %v882_v15, %v827_v14 }
  0xaf   : > { %536 = vmatpush.bf16.msrb.mxu1 %v251_v27  ;;  %v887_v27 = vld [vmem:[%s1265_s1 + $0x90] sm:$0xf0] }
  0xb0   : > { %565 = vmatpush.bf16.msrb.mxu2 %v275_v17  ;;  %v879_v17 = vld [vmem:[%s1265_s1 + $0x54] sm:$0xf] }
  0xb1   : > { %v824_v21 = vor.u32 %v879_v17, %v821_v18 }
  0xb2   : > { %v243_v42 = vpop.permute.xlu0 %242  ;;  %v265_v43 = vpop.permute.xlu1 %264 }
  0xb3   : > { %537 = vmatpush.bf16.msrb.mxu1 %v249_v35  ;;  %v237_v56 = vpop.permute.xlu2 %236  ;;  %v885_v35 = vld [vmem:[%s1265_s1 + $0x84] sm:$0xf] }
  0xb4   : > { %566 = vmatpush.bf16.msrb.mxu2 %v273_v28  ;;  %v848_v28 = vor.u32 %v887_v27, %v847_v26 }
  0xb6   : > { %523 = vmatmul.bf16.gmra.mxu1 %v820_v44 }
  0xb7   : > { %538 = vmatpush.bf16.msrb.mxu1 %v243_v42 }
  0xb8   : > { %567 = vmatpush.bf16.msrb.mxu2 %v267_v36  ;;  %v849_v36 = vld [vmem:[%s1265_s1 + $0x94] sm:$0xf0] }
  0xb9   : > { %v852_v37 = vor.u32 %v885_v35, %v849_v36 }
  0xba   : > { %v241_v47 = vpop.permute.xlu0 %240  ;;  %v263_v48 = vpop.permute.xlu1 %262 }
  0xbb   : > { %539 = vmatpush.bf16.msrb.mxu1 %v241_v47  ;;  %v355_v50 = vpop.permute.xlu2 %354 }
  0xbc   : > { %568 = vmatpush.bf16.msrb.mxu2 %v265_v43 }
  0xc0   : > { %569 = vmatpush.bf16.msrb.mxu2 %v263_v48 }
  0xc2   : > { %v315_v52 = vpop.permute.xlu0 %314  ;;  %v239_v53 = vpop.permute.xlu1 %238 }
  0xc3   : > { %540 = vmatpush.bf16.msrb.mxu1 %v239_v53  ;;  %625 = vmatpush.bf16.msrb.mxu0 %v315_v52 }
  0xc4   : > { %570 = vmatpush.bf16.msrb.mxu2 %v261_v46 }
  0xc7   : > { %571 = vmatmul.bf16.vlgmr.msrb.gmra.mxu2 %v788_v51  ;;  %541 = vmatpush.bf16.msrb.mxu1 %v237_v56 }
  0xca   : > { %v285_v61 = vpop.permute.xlu0 %284  ;;  %542 = vmatmul.bf16.vlgmr.msrb.gmra.mxu1 %v784_v58  ;;  %v313_v63 = vpop.permute.xlu1 %312 }
  0xcb   : > { %599 = vmatpush.bf16.msra.mxu3 %v285_v61  ;;  %626 = vmatpush.bf16.msrb.mxu0 %v313_v63 }
  0xce   : > { %600 = vmatmul.bf16.vlgmr.msra.gmra.mxu3 %v792_v62 }
  0xd2   : > { %v311_v3 = vpop.permute.xlu0 %310  ;;  %v309_v8 = vpop.permute.xlu1 %308 }
  0xd3   : > { %627 = vmatpush.bf16.msrb.mxu0 %v311_v3 }
  0xd7   : > { %576 = vmatmul.bf16.gmra.mxu2 %v808_v2  ;;  %628 = vmatpush.bf16.msrb.mxu0 %v309_v8 }
  0xda   : > { %547 = vmatmul.bf16.gmra.mxu1 %v804_v9  ;;  %857 = vmatmul.msk.bf16.vlgmr.msrb.gmra.mxu0 %vm492_vm0, %v796_v10  ;;  %v360_v58 = vpop.permute.xlu0 %359  ;;  %v365_v4 = vpop.permute.xlu1 %364 }
  0xde   : > { %605 = vmatmul.bf16.gmra.mxu3 %v812_v13 }
  0xe2   : > { %v375_v30 = vpop.permute.xlu1 %374 }
  0xe7   : > { %581 = vmatmul.bf16.gmra.mxu2 %v828_v16  ;;  %v370_v16 = vpop.permute.xlu2 %369 }
  0xea   : > { %552 = vmatmul.bf16.gmra.mxu1 %v824_v21  ;;  %858 = vmatmul.msk.bf16.gmra.mxu0 %vm492_vm0, %v816_v22 }
  0xee   : > { %610 = vmatmul.bf16.gmra.mxu3 %v832_v25 }
  0xef   : > { %v380_v39 = vpop.permute.xlu2 %379 }
  0xf7   : > { %586 = vmatmul.bf16.gmra.mxu2 %v848_v28 }
  0xfa   : > { %557 = vmatmul.bf16.gmra.mxu1 %v844_v33  ;;  %859 = vmatmul.msk.bf16.gmra.mxu0 %vm492_vm0, %v836_v34 }
  0xfe   : > { %615 = vmatmul.bf16.gmra.mxu3 %v852_v37 }
 0x10a   : > { %860 = vmatmul.msk.bf16.gmra.mxu0 %vm492_vm0, %v856_v40 }
 0x123   : > { %v519_v41 = vpop.f32.mrf.mxu1  ;;  %v514_v47 = vpop.f32.mrf.mxu0 }
 0x124   : > { %v515_v51 = vadd.f32 %v514_v47, %v355_v50  ;;  %v520_v7 = vadd.f32 %v519_v41, %v365_v4 }
 0x12a   : > { %v1223_v44 = vpop.f32.mrf.mxu2 }
 0x12b   : > { %v521_v42 = vpop.f32.mrf.mxu1  ;;  %v516_v52 = vpop.f32.mrf.mxu0 }
 0x12c   : > { %v517_v59 = vadd.f32 %v516_v52, %v360_v58  ;;  %v522_v19 = vadd.f32 %v521_v42, %v370_v16 }
 0x132   : > { %v1227_v46 = vpop.f32.mrf.mxu2 }
 0x133   : > { %v524_v43 = vpop.f32.mrf.mxu1 }
 0x134   : > { %v525_v31 = vadd.f32 %v524_v43, %v375_v30 }
 0x13b   : > { %v1225_v45 = vpop.f32.mrf.mxu1 }
 0x13c   : > { %v527_v47 = vadd.f32 %v1225_v45, %v380_v39 }
 0x147   : > { %v543_v48 = vpop.f32.mrf.mxu1 }
 0x148   : > { %v544_v55 = vadd.f32 %v543_v48, %v515_v51 }
 0x14a   : > { %v572_v49 = vpop.f32.mrf.mxu2 }
 0x14b   : > { %v573_v57 = vadd.f32 %v572_v49, %v544_v55 }
 0x14f   : > { %v545_v53 = vpop.f32.mrf.mxu1 }
 0x150   : > { %v546_v63 = vadd.f32 %v545_v53, %v517_v59  ;;  %v385_v53 = vpop.permute.xlu0 %384 }
 0x151   : > { %v601_v56 = vpop.f32.mrf.mxu3 }
 0x152   : > { %v574_v54 = vpop.f32.mrf.mxu2  ;;  %v602_v60 = vadd.f32 %v601_v56, %v573_v57  ;;  %v530_v57 = vadd.f32 %v1223_v44, %v385_v53 }
 0x153   : > { %v575_v5 = vadd.f32 %v574_v54, %v546_v63 }
 0x157   : > { %v548_v61 = vpop.f32.mrf.mxu1  ;;  %v630_v62 = vpop.f32.mrf.mxu0 }
 0x158   : > { %v631_v0 = vadd.f32 %v630_v62, %v602_v60  ;;  %v549_v11 = vadd.f32 %v548_v61, %v520_v7 }
 0x159   : > { %v603_v2 = vpop.f32.mrf.mxu3 }
 0x15a   : > { %v577_v1 = vpop.f32.mrf.mxu2  ;;  %v650_v3 = vmax.f32 %v631_v0, 0.0  ;;  %v604_v8 = vadd.f32 %v603_v2, %v575_v5  ;;  %v390_v0 = vpop.permute.xlu1 %389 }
 0x15b   : > { %v578_v17 = vadd.f32 %v577_v1, %v549_v11  ;;  %v532_v4 = vadd.f32 %v1227_v46, %v390_v0 }
 0x15c   : > { %v658_v6 = vpack.c.bf16 %v650_v3, %v650_v3 }
 0x15e   : > { %667 = vst.msk [vmem:[%s1234_s11] sm:$0xf] %vm666_vm1, %v658_v6 }
 0x15f   : > { %v550_v9 = vpop.f32.mrf.mxu1  ;;  %v632_v10 = vpop.f32.mrf.mxu0 }
 0x160   : > { %v633_v12 = vadd.f32 %v632_v10, %v604_v8  ;;  %v551_v23 = vadd.f32 %v550_v9, %v522_v19 }
 0x161   : > { %v606_v14 = vpop.f32.mrf.mxu3 }
 0x162   : > { %v579_v13 = vpop.f32.mrf.mxu2  ;;  %v651_v15 = vmax.f32 %v633_v12, 0.0  ;;  %v607_v20 = vadd.f32 %v606_v14, %v578_v17 }
 0x163   : > { %v580_v28 = vadd.f32 %v579_v13, %v551_v23 }
 0x164   : > { %v659_v18 = vpack.c.bf16 %v651_v15, %v651_v15 }
 0x166   : > { %668 = vst.msk [vmem:[%s1234_s11 + $0x4] sm:$0xf] %vm666_vm1, %v659_v18 }
 0x167   : > { %v553_v21 = vpop.f32.mrf.mxu1  ;;  %v635_v22 = vpop.f32.mrf.mxu0 }
 0x168   : > { %v636_v24 = vadd.f32 %v635_v22, %v607_v20  ;;  %v554_v34 = vadd.f32 %v553_v21, %v525_v31 }
 0x169   : > { %v608_v25 = vpop.f32.mrf.mxu3 }
 0x16a   : > { %v652_v26 = vmax.f32 %v636_v24, 0.0  ;;  %v582_v27 = vpop.f32.mrf.mxu2  ;;  %v609_v32 = vadd.f32 %v608_v25, %v580_v28 }
 0x16b   : > { %v583_v40 = vadd.f32 %v582_v27, %v554_v34 }
 0x16c   : > { %v660_v29 = vpack.c.bf16 %v652_v26, %v652_v26 }
 0x16e   : > { %669 = vst.msk [vmem:[%s1234_s11 + $0x8] sm:$0xf] %vm666_vm1, %v660_v29 }
 0x16f   : > { %v637_v33 = vpop.f32.mrf.mxu0  ;;  %v555_v36 = vpop.f32.mrf.mxu1 }
 0x170   : > { %v638_v35 = vadd.f32 %v637_v33, %v609_v32  ;;  %v556_v49 = vadd.f32 %v555_v36, %v527_v47 }
 0x171   : > { %v611_v37 = vpop.f32.mrf.mxu3 }
 0x172   : > { %v653_v38 = vmax.f32 %v638_v35, 0.0  ;;  %v584_v42 = vpop.f32.mrf.mxu2  ;;  %v612_v48 = vadd.f32 %v611_v37, %v583_v40 }
 0x173   : > { %v585_v55 = vadd.f32 %v584_v42, %v556_v49 }
 0x174   : > { %v661_v41 = vpack.c.bf16 %v653_v38, %v653_v38 }
 0x176   : > { %670 = vst.msk [vmem:[%s1234_s11 + $0xc] sm:$0xf] %vm666_vm1, %v661_v41 }
 0x177   : > { %v640_v43 = vpop.f32.mrf.mxu0  ;;  %v558_v54 = vpop.f32.mrf.mxu1 }
 0x178   : > { %v641_v50 = vadd.f32 %v640_v43, %v612_v48  ;;  %v559_v60 = vadd.f32 %v558_v54, %v530_v57 }
 0x179   : > { %v613_v51 = vpop.f32.mrf.mxu3 }
 0x17a   : > { %v654_v52 = vmax.f32 %v641_v50, 0.0  ;;  %v614_v58 = vadd.f32 %v613_v51, %v585_v55  ;;  %v587_v59 = vpop.f32.mrf.mxu2 }
 0x17b   : > { %v588_v1 = vadd.f32 %v587_v59, %v559_v60 }
 0x17c   : > { %v662_v56 = vpack.c.bf16 %v654_v52, %v654_v52 }
 0x17e   : > { %671 = vst.msk [vmem:[%s1234_s11 + $0x10] sm:$0xf] %vm666_vm1, %v662_v56 }
 0x17f   : > { %v642_v45 = vpop.f32.mrf.mxu0  ;;  %v560_v3 = vpop.f32.mrf.mxu1 }
 0x180   : > { %v643_v61 = vadd.f32 %v642_v45, %v614_v58  ;;  %v561_v6 = vadd.f32 %v560_v3, %v532_v4 }
 0x181   : > { %v616_v62 = vpop.f32.mrf.mxu3 }
 0x182   : > { %v655_v63 = vmax.f32 %v643_v61, 0.0  ;;  %v617_v44 = vadd.f32 %v616_v62, %v588_v1  ;;  %v589_v8 = vpop.f32.mrf.mxu2 }
 0x183   : > { %v590_v11 = vadd.f32 %v589_v8, %v561_v6 }
 0x184   : > { %v663_v2 = vpack.c.bf16 %v655_v63, %v655_v63 }
 0x186   : > { %672 = vst.msk [vmem:[%s1234_s11 + $0x14] sm:$0xf] %vm666_vm1, %v663_v2 }
 0x187   : > { %v645_v5 = vpop.f32.mrf.mxu0 }
 0x188   : > { %v646_v7 = vadd.f32 %v645_v5, %v617_v44 }
 0x189   : > { %v618_v10 = vpop.f32.mrf.mxu3 }
 0x18a   : > { %v656_v9 = vmax.f32 %v646_v7, 0.0  ;;  %v619_v13 = vadd.f32 %v618_v10, %v590_v11 }
 0x18c   : > { %v664_v12 = vpack.c.bf16 %v656_v9, %v656_v9 }
 0x18e   : > { %673 = vst.msk [vmem:[%s1234_s11 + $0x18] sm:$0xf] %vm666_vm1, %v664_v12 }
 0x18f   : > { %v647_v14 = vpop.f32.mrf.mxu0 }
 0x190   : > { %v648_v15 = vadd.f32 %v647_v14, %v619_v13 }
 0x192   : > { %v657_v16 = vmax.f32 %v648_v15, 0.0 }
 0x194   : > { %v665_v17 = vpack.c.bf16 %v657_v16, %v657_v16 }
 0x196   : > { %674 = vst.msk [vmem:[%s1234_s11 + $0x1c] sm:$0xf] %vm666_vm1, %v665_v17 }
 0x197 PF: > { %s13_s14 = sadd.s32 1, %s963_s14   ;;  %s1268_s12 = smov %s959_s13 }
 0x198   : > { %p10_p5 = scmp.ge.s32.totalorder %s13_s14, 4   ;;  %s1269_s13 = smov %s1271_s15 }
 0x19a   :  { %12 = sbr.rel (!%p10_p5) target bundleno = 2 (0x2), region = 62 }

// kernel: forward.34
= control target key start
LH: loop header
LB: loop body
LE: loop exit
PB: predicated region body
PF: predicated region fallthrough
CT: control target
= control target key end

     0   :  { %s1121_s15 = smov 0   ;;  %s1123_s16 = smov 0   ;;  %s1401_s0 = inlined_call_operand.vmem [shape: bf16[2,64,56], index: 0, kind: input, shape index: {}]   ;;  %s1402_s1 = inlined_call_operand.vmem [shape: bf16[64,576], index: 1, kind: input, shape index: {}]   ;;  %s1403_s2 = inlined_call_operand.vmem [shape: f32[64,1], index: 2, kind: input, shape index: {}]   ;;  %s1404_s3 = inlined_call_operand.vmem [shape: bf16[2,64,32], index: 3, kind: input, shape index: {}]   ;;  %s1405_s4 = inlined_call_operand.vmem [shape: bf16[2,64,32], index: 4, kind: output, shape index: {}]  }
   0x1   :  { %s1125_s17 = smov 0  }
   0x2 LB: > { %s26_s18 = sadd.s32 1, %s1081_s16  ;;  %p856_p0 = scmp.ge.s32.totalorder %s1085_s17, 1  ;;  %s1085_s17 = sphi %s1125_s17, %s14_s17   ;;  %s1081_s16 = sphi %s1123_s16, %s1407_s16   ;;  %s1077_s15 = sphi %s1121_s15, %s1406_s15  }
   0x3   : > { %p28_p1 = scmp.ge.s32.totalorder %s26_s18, 2  ;;  %p191_p2 = scmp.lt.s32.totalorder %s1085_s17, 3 }
   0x5   : > { %s1409_s18 = smov (%p28_p1, %s26_s18), 0  ;;  %p192_p3 = pnand %p856_p0, %p191_p2 }
   0x6   : > { %p228_p4 = scmp.lt.s32.totalorder (!%p192_p3), %s1077_s15, 1  ;;  %s1087_s23 = smov (!%p192_p3), 127  }
   0x7   : > { %195 = sbr.rel (%p192_p3) target bundleno = 409 (0x199), region = 36  ;;  %s1088_s24 = smov (!%p192_p3), 118  }
   0x8   : > { %s1089_s25 = smov (!%p192_p3), 111   ;;  %s1090_s26 = smov (!%p192_p3), 120  }
   0x9   : > { %s1091_s27 = smov (!%p192_p3), 119   ;;  %s1092_s28 = smov (!%p192_p3), 112  }
   0xa   : > { %s1093_s29 = smov (!%p192_p3), 126   ;;  %s1094_s30 = smov (!%p192_p3), 110  }
   0xc   : > { %s1411_s15 = smov (!%p228_p4, %s1077_s15), 1  ;;  %v1095_v19 = vmov 0   ;;  %v404_v20 = vld [vmem:[%s1403_s2 + $0x10] sm:$0xff]  ;;  %v901_v21 = vld [vmem:[%s1402_s1 + $0x28] sm:$0xf]  ;;  %v406_v34 = vld [vmem:[%s1403_s2 + $0x20] sm:$0xff] }
   0xd   : > { %s1139_s19 = sshll.u32 %s1411_s15, 5  ;;  %1062 = vset.pattern.permute.xlu1 %v1095_v19  ;;  %1061 = vset.pattern.permute.xlu0 %v1095_v19  ;;  %v979_v22 = vld [vmem:[%s1402_s1 + $0x38] sm:$0xf0]  ;;  %v941_v23 = vld [vmem:[%s1402_s1 + $0x78] sm:$0xf]  ;;  %v403_v33 = vld [vmem:[%s1403_s2 + $0x8] sm:$0xff] }
   0xe   : > { %s232_s22 = scalar_lea.vmem %s1401_s0, %s1139_s19  ;;  %1060 = vset.pattern.permute.xlu2 %v1095_v19  ;;  %v989_v24 = vld [vmem:[%s1402_s1 + $0x88] sm:$0xf0]  ;;  %v881_v25 = vld [vmem:[%s1402_s1] sm:$0xf]  ;;  %v974_v26 = vld [vmem:[%s1402_s1 + $0x10] sm:$0xf0]  ;;  %v902_v29 = vor.u32 %v979_v22, %v901_v21  ;;  %s1360_s15 = scalar_lea.vmem %s1404_s3, %s1139_s19 }
   0xf   : > { %v1145_v0 = vld [vmem:[%s232_s22 + $0x18] sm:$0xff]  ;;  %v1147_v1 = vld [vmem:[%s232_s22 + $0x8] sm:$0xff]  ;;  %v1152_v2 = vld [vmem:[%s232_s22 + $0x10] sm:$0xff]  ;;  %v882_v30 = vor.u32 %v974_v26, %v881_v25  ;;  %v942_v31 = vor.u32 %v989_v24, %v941_v23  ;;  %vm550_vm0 = vcmask 523264   ;;  %vm748_vm1 = vcmask 257024  }
  0x10   : > { %288 = vrot.lane.b32.xlu0 %v1145_v0, %s1087_s23  ;;  %284 = vrot.lane.b32.xlu1 %v1147_v1, %s1087_s23  ;;  %v1154_v3 = vld [vmem:[%s232_s22] sm:$0xff]  ;;  %v408_v38 = vld [vmem:[%s1403_s2 + $0x30] sm:$0xff]  ;;  %s1367_s22 = scalar_lea.vmem %s1405_s4, %s1139_s19 }
  0x11   : > { %336 = vrot.lane.b32.xlu2 %v1145_v0, %s1088_s24  ;;  %v402_v37 = vld [vmem:[%s1403_s2] sm:$0xff]  ;;  %v921_v39 = vld [vmem:[%s1402_s1 + $0x50] sm:$0xf]  ;;  %v409_v41 = vld [vmem:[%s1403_s2 + $0x38] sm:$0xff] }
  0x12   : > { %v984_v40 = vld [vmem:[%s1402_s1 + $0x60] sm:$0xf0]  ;;  %v405_v45 = vld [vmem:[%s1403_s2 + $0x18] sm:$0xff]  ;;  %v889_v49 = vld [vmem:[%s1402_s1 + $0x8] sm:$0xf] }
  0x13   : > { %v922_v44 = vor.u32 %v984_v40, %v921_v39  ;;  %v975_v50 = vld [vmem:[%s1402_s1 + $0x18] sm:$0xf0]  ;;  %v972_v54 = vld [vmem:[%s1402_s1 + $0x4] sm:$0xf]  ;;  %v883_v55 = vld [vmem:[%s1402_s1 + $0x14] sm:$0xf0] }
  0x14   : > { %v890_v51 = vor.u32 %v975_v50, %v889_v49  ;;  %v407_v57 = vld [vmem:[%s1403_s2 + $0x28] sm:$0xff]  ;;  %v886_v58 = vor.u32 %v972_v54, %v883_v55  ;;  %v891_v60 = vld [vmem:[%s1402_s1 + $0x1c] sm:$0xf0]  ;;  %v917_v19 = vld [vmem:[%s1402_s1 + $0x38] sm:$0xf] }
  0x15   : > { %v973_v59 = vld [vmem:[%s1402_s1 + $0xc] sm:$0xf]  ;;  %v983_v23 = vld [vmem:[%s1402_s1 + $0x5c] sm:$0xf]  ;;  %v931_v24 = vld [vmem:[%s1402_s1 + $0x6c] sm:$0xf0] }
  0x16   : > { %v894_v62 = vor.u32 %v973_v59, %v891_v60  ;;  %v934_v25 = vor.u32 %v983_v23, %v931_v24  ;;  %v949_v26 = vld [vmem:[%s1402_s1 + $0x80] sm:$0xf]  ;;  %v991_v39 = vld [vmem:[%s1402_s1 + $0x98] sm:$0xf0] }
  0x18   : > { %286 = vrot.lane.b32.xlu0 %v1152_v2, %s1087_s23  ;;  %282 = vrot.lane.b32.xlu1 %v1154_v3, %s1087_s23 }
  0x19   : > { %360 = vrot.lane.b32.xlu2 %v1145_v0, %s1089_s25 }
  0x20   : > { %312 = vrot.lane.b32.xlu0 %v1145_v0, %s1090_s26  ;;  %334 = vrot.lane.b32.xlu1 %v1152_v2, %s1088_s24 }
  0x21   : > { %358 = vrot.lane.b32.xlu2 %v1152_v2, %s1089_s25 }
  0x28   : > { %310 = vrot.lane.b32.xlu0 %v1152_v2, %s1090_s26  ;;  %332 = vrot.lane.b32.xlu1 %v1147_v1, %s1088_s24 }
  0x29   : > { %356 = vrot.lane.b32.xlu2 %v1147_v1, %s1089_s25 }
  0x30   : > { %308 = vrot.lane.b32.xlu0 %v1147_v1, %s1090_s26  ;;  %330 = vrot.lane.b32.xlu1 %v1154_v3, %s1088_s24 }
  0x31   : > { %354 = vrot.lane.b32.xlu2 %v1154_v3, %s1089_s25 }
  0x38   : > { %306 = vrot.lane.b32.xlu0 %v1154_v3, %s1090_s26  ;;  %324 = vrot.lane.b32.xlu1 %v1145_v0, %s1091_s27 }
  0x39   : > { %348 = vrot.lane.b32.xlu2 %v1145_v0, %s1092_s28 }
  0x40   : > { %300 = vrot.lane.b32.xlu0 %v1145_v0, %s1093_s29  ;;  %322 = vrot.lane.b32.xlu1 %v1152_v2, %s1091_s27 }
  0x41   : > { %346 = vrot.lane.b32.xlu2 %v1152_v2, %s1092_s28 }
  0x48   : > { %298 = vrot.lane.b32.xlu0 %v1152_v2, %s1093_s29  ;;  %320 = vrot.lane.b32.xlu1 %v1147_v1, %s1091_s27 }
  0x49   : > { %344 = vrot.lane.b32.xlu2 %v1147_v1, %s1092_s28 }
  0x50   : > { %372 = vrot.lane.b32.xlu0 %v1145_v0, %s1094_s30  ;;  %296 = vrot.lane.b32.xlu1 %v1147_v1, %s1093_s29 }
  0x51   : > { %318 = vrot.lane.b32.xlu2 %v1154_v3, %s1091_s27 }
  0x58   : > { %342 = vrot.lane.b32.xlu0 %v1154_v3, %s1092_s28  ;;  %370 = vrot.lane.b32.xlu1 %v1152_v2, %s1094_s30 }
  0x59   : > { %294 = vrot.lane.b32.xlu2 %v1154_v3, %s1093_s29 }
  0x60   : > { %368 = vrot.lane.b32.xlu0 %v1147_v1, %s1094_s30  ;;  %366 = vrot.lane.b32.xlu1 %v1154_v3, %s1094_s30 }
  0x61   : > { %412 = vperm.xlu2 %1060, %v402_v37  }
  0x68   : > { %422 = vperm.xlu1 %1062, %v404_v20   ;;  %417 = vperm.xlu0 %1061, %v403_v33   ;;  %v981_v20 = vld [vmem:[%s1402_s1 + $0x48] sm:$0xf0] }
  0x69   : > { %427 = vperm.xlu2 %1060, %v405_v45   ;;  %v918_v22 = vor.u32 %v981_v20, %v917_v19 }
  0x6b   : > { %v1185_v4 = vpop.permute.xlu2 %336 }
  0x70   : > { %432 = vperm.xlu1 %1062, %v406_v34   ;;  %442 = vperm.xlu0 %1061, %v408_v38   ;;  %v957_v38 = vld [vmem:[%s1402_s1 + $0x88] sm:$0xf] }
  0x71   : > { %437 = vperm.xlu2 %1060, %v407_v57   ;;  %v958_v40 = vor.u32 %v991_v39, %v957_v38  ;;  %v993_v57 = vld [vmem:[%s1360_s15] sm:$0xff]  }
  0x73   : > { %v361_v5 = vpop.permute.xlu2 %360 }
  0x74   : > { %650 = vmatpush.bf16.msra.mxu3 %v361_v5  ;;  %v903_v5 = vld [vmem:[%s1402_s1 + $0x3c] sm:$0xf0] }
  0x78   : > { %447 = vperm.xlu1 %1062, %v409_v41  }
  0x7b   : > { %v359_v6 = vpop.permute.xlu2 %358 }
  0x7c   : > { %651 = vmatpush.bf16.msra.mxu3 %v359_v6  ;;  %v897_v6 = vld [vmem:[%s1402_s1 + $0x10] sm:$0xf] }
  0x82   : > { %v289_v7 = vpop.permute.xlu0 %288  ;;  %v285_v8 = vpop.permute.xlu1 %284 }
  0x83   : > { %563 = vmatpush.bf16.msra.mxu0 %v289_v7  ;;  %1011 = vmatpush.bf16.msra.mxu1 %v289_v7  ;;  %v357_v9 = vpop.permute.xlu2 %356 }
  0x84   : > { %1012 = vmatpush.bf16.msra.mxu2 %v289_v7  ;;  %652 = vmatpush.bf16.msra.mxu3 %v357_v9  ;;  %v976_v7 = vld [vmem:[%s1402_s1 + $0x20] sm:$0xf0] }
  0x8a   : > { %v287_v10 = vpop.permute.xlu0 %286  ;;  %v283_v11 = vpop.permute.xlu1 %282 }
  0x8b   : > { %564 = vmatpush.bf16.msra.mxu0 %v287_v10  ;;  %1013 = vmatpush.bf16.msra.mxu1 %v287_v10  ;;  %v355_v12 = vpop.permute.xlu2 %354 }
  0x8c   : > { %1014 = vmatpush.bf16.msra.mxu2 %v287_v10  ;;  %653 = vmatpush.bf16.msra.mxu3 %v355_v12  ;;  %v898_v10 = vor.u32 %v976_v7, %v897_v6  ;;  %v911_v12 = vld [vmem:[%s1402_s1 + $0x44] sm:$0xf0] }
  0x8f   : > { %565 = vmatpush.bf16.msra.mxu0 %v285_v8  ;;  %1015 = vmatpush.bf16.msra.mxu1 %v285_v8 }
  0x90   : > { %1016 = vmatpush.bf16.msra.mxu2 %v285_v8 }
  0x92   : > { %v313_v13 = vpop.permute.xlu0 %312  ;;  %v335_v14 = vpop.permute.xlu1 %334 }
  0x93   : > { %566 = vmatpush.bf16.msra.mxu0 %v283_v11  ;;  %1017 = vmatpush.bf16.msra.mxu1 %v283_v11  ;;  %v349_v15 = vpop.permute.xlu2 %348 }
  0x94   : > { %1018 = vmatpush.bf16.msra.mxu2 %v283_v11  ;;  %654 = vmatpush.bf16.msra.mxu3 %v349_v15  ;;  %v978_v11 = vld [vmem:[%s1402_s1 + $0x34] sm:$0xf]  ;;  %v985_v15 = vld [vmem:[%s1402_s1 + $0x68] sm:$0xf0] }
  0x97   : > { %1019 = vmatpush.bf16.msra.mxu1 %v1145_v0  ;;  %567 = vmatpush.bf16.msra.mxu0 %v1145_v0 }
  0x98   : > { %1020 = vmatpush.bf16.msra.mxu2 %v1145_v0  ;;  %v909_v0 = vld [vmem:[%s1402_s1 + $0x30] sm:$0xf] }
  0x9a   : > { %v311_v16 = vpop.permute.xlu0 %310  ;;  %v333_v17 = vpop.permute.xlu1 %332 }
  0x9b   : > { %1021 = vmatpush.bf16.msra.mxu1 %v1152_v2  ;;  %v347_v18 = vpop.permute.xlu2 %346  ;;  %568 = vmatpush.bf16.msra.mxu0 %v1152_v2 }
  0x9c   : > { %1022 = vmatpush.bf16.msra.mxu2 %v1152_v2  ;;  %655 = vmatpush.bf16.msra.mxu3 %v347_v18  ;;  %v923_v18 = vld [vmem:[%s1402_s1 + $0x64] sm:$0xf0] }
  0x9f   : > { %1023 = vmatpush.bf16.msra.mxu1 %v1147_v1  ;;  %569 = vmatpush.bf16.msra.mxu0 %v1147_v1 }
  0xa0   : > { %1024 = vmatpush.bf16.msra.mxu2 %v1147_v1  ;;  %v980_v1 = vld [vmem:[%s1402_s1 + $0x40] sm:$0xf0] }
  0xa1   : > { %v910_v2 = vor.u32 %v980_v1, %v909_v0 }
  0xa2   : > { %v309_v27 = vpop.permute.xlu0 %308  ;;  %v331_v28 = vpop.permute.xlu1 %330 }
  0xa3   : > { %1025 = vmatpush.bf16.msra.mxu1 %v1154_v3  ;;  %570 = vmatpush.bf16.msra.mxu0 %v1154_v3  ;;  %v345_v32 = vpop.permute.xlu2 %344 }
  0xa4   : > { %1026 = vmatpush.bf16.msra.mxu2 %v1154_v3  ;;  %656 = vmatpush.bf16.msra.mxu3 %v345_v32  ;;  %v986_v32 = vld [vmem:[%s1402_s1 + $0x70] sm:$0xf0] }
  0xa6   : > { %576 = vmatmul.bf16.vlgmr.msra.gmra.mxu1 %v902_v29  ;;  %571 = vmatmul.bf16.vlgmr.msra.gmra.mxu0 %v882_v30  ;;  %v987_v29 = vld [vmem:[%s1402_s1 + $0x7c] sm:$0xf]  ;;  %v943_v30 = vld [vmem:[%s1402_s1 + $0x8c] sm:$0xf0] }
  0xa7   : > { %592 = vmatpush.bf16.msrb.mxu1 %v313_v13  ;;  %586 = vmatmul.bf16.vlgmr.msra.gmra.mxu2 %v942_v31  ;;  %v914_v13 = vor.u32 %v978_v11, %v911_v12  ;;  %v937_v31 = vld [vmem:[%s1402_s1 + $0x60] sm:$0xf]  ;;  %v946_v33 = vor.u32 %v987_v29, %v943_v30  ;;  %v995_v12 = vunpack.c.h.bf16 %v993_v57 }
  0xa8   : > { %621 = vmatpush.bf16.msrb.mxu2 %v1185_v4  ;;  %v977_v4 = vld [vmem:[%s1402_s1 + $0x2c] sm:$0xf]  ;;  %v938_v34 = vor.u32 %v986_v32, %v937_v31 }
  0xa9   : > { %v906_v9 = vor.u32 %v977_v4, %v903_v5 }
  0xaa   : > { %v307_v35 = vpop.permute.xlu0 %306  ;;  %v325_v36 = vpop.permute.xlu1 %324 }
  0xab   : > { %593 = vmatpush.bf16.msrb.mxu1 %v311_v16  ;;  %v319_v46 = vpop.permute.xlu2 %318 }
  0xac   : > { %622 = vmatpush.bf16.msrb.mxu2 %v335_v14  ;;  %v929_v14 = vld [vmem:[%s1402_s1 + $0x58] sm:$0xf] }
  0xad   : > { %v930_v16 = vor.u32 %v985_v15, %v929_v14 }
  0xaf   : > { %594 = vmatpush.bf16.msrb.mxu1 %v309_v27  ;;  %v990_v27 = vld [vmem:[%s1402_s1 + $0x90] sm:$0xf0] }
  0xb0   : > { %623 = vmatpush.bf16.msrb.mxu2 %v333_v17  ;;  %v982_v17 = vld [vmem:[%s1402_s1 + $0x54] sm:$0xf] }
  0xb1   : > { %v926_v21 = vor.u32 %v982_v17, %v923_v18 }
  0xb2   : > { %v301_v42 = vpop.permute.xlu0 %300  ;;  %v323_v43 = vpop.permute.xlu1 %322 }
  0xb3   : > { %595 = vmatpush.bf16.msrb.mxu1 %v307_v35  ;;  %v295_v56 = vpop.permute.xlu2 %294  ;;  %v988_v35 = vld [vmem:[%s1402_s1 + $0x84] sm:$0xf] }
  0xb4   : > { %624 = vmatpush.bf16.msrb.mxu2 %v331_v28  ;;  %v950_v28 = vor.u32 %v990_v27, %v949_v26 }
  0xb6   : > { %581 = vmatmul.bf16.gmra.mxu1 %v922_v44 }
  0xb7   : > { %596 = vmatpush.bf16.msrb.mxu1 %v301_v42 }
  0xb8   : > { %625 = vmatpush.bf16.msrb.mxu2 %v325_v36  ;;  %v951_v36 = vld [vmem:[%s1402_s1 + $0x94] sm:$0xf0] }
  0xb9   : > { %v954_v37 = vor.u32 %v988_v35, %v951_v36 }
  0xba   : > { %v299_v47 = vpop.permute.xlu0 %298  ;;  %v321_v48 = vpop.permute.xlu1 %320 }
  0xbb   : > { %597 = vmatpush.bf16.msrb.mxu1 %v299_v47  ;;  %v413_v50 = vpop.permute.xlu2 %412 }
  0xbc   : > { %626 = vmatpush.bf16.msrb.mxu2 %v323_v43 }
  0xc0   : > { %627 = vmatpush.bf16.msrb.mxu2 %v321_v48 }
  0xc2   : > { %v373_v52 = vpop.permute.xlu0 %372  ;;  %v297_v53 = vpop.permute.xlu1 %296 }
  0xc3   : > { %598 = vmatpush.bf16.msrb.mxu1 %v297_v53  ;;  %683 = vmatpush.bf16.msrb.mxu0 %v373_v52  ;;  %v428_v20 = vpop.permute.xlu2 %427 }
  0xc4   : > { %628 = vmatpush.bf16.msrb.mxu2 %v319_v46 }
  0xc7   : > { %629 = vmatmul.bf16.vlgmr.msrb.gmra.mxu2 %v890_v51  ;;  %599 = vmatpush.bf16.msrb.mxu1 %v295_v56 }
  0xca   : > { %v343_v61 = vpop.permute.xlu0 %342  ;;  %600 = vmatmul.bf16.vlgmr.msrb.gmra.mxu1 %v886_v58  ;;  %v371_v63 = vpop.permute.xlu1 %370 }
  0xcb   : > { %657 = vmatpush.bf16.msra.mxu3 %v343_v61  ;;  %684 = vmatpush.bf16.msrb.mxu0 %v371_v63 }
  0xce   : > { %658 = vmatmul.bf16.vlgmr.msra.gmra.mxu3 %v894_v62  ;;  %v994_v62 = vunpack.c.l.bf16 %v993_v57 }
  0xd2   : > { %v369_v3 = vpop.permute.xlu0 %368  ;;  %v367_v8 = vpop.permute.xlu1 %366 }
  0xd3   : > { %685 = vmatpush.bf16.msrb.mxu0 %v369_v3 }
  0xd7   : > { %634 = vmatmul.bf16.gmra.mxu2 %v910_v2  ;;  %686 = vmatpush.bf16.msrb.mxu0 %v367_v8 }
  0xda   : > { %605 = vmatmul.bf16.gmra.mxu1 %v906_v9  ;;  %959 = vmatmul.msk.bf16.vlgmr.msrb.gmra.mxu0 %vm550_vm0, %v898_v10  ;;  %v418_v59 = vpop.permute.xlu0 %417  ;;  %v423_v6 = vpop.permute.xlu1 %422 }
  0xde   : > { %663 = vmatmul.bf16.gmra.mxu3 %v914_v13 }
  0xe7   : > { %639 = vmatmul.bf16.gmra.mxu2 %v930_v16 }
  0xea   : > { %610 = vmatmul.bf16.gmra.mxu1 %v926_v21  ;;  %960 = vmatmul.msk.bf16.gmra.mxu0 %vm550_vm0, %v918_v22  ;;  %v1008_v21 = vld [vmem:[%s1360_s15 + $0x8] sm:$0xff]  }
  0xeb   : > { %v998_v27 = vunpack.c.l.bf16 %v1008_v21 }
  0xee   : > { %668 = vmatmul.bf16.gmra.mxu3 %v934_v25 }
  0xf7   : > { %644 = vmatmul.bf16.gmra.mxu2 %v950_v28 }
  0xfa   : > { %615 = vmatmul.bf16.gmra.mxu1 %v946_v33  ;;  %961 = vmatmul.msk.bf16.gmra.mxu0 %vm550_vm0, %v938_v34 }
  0xfe   : > { %673 = vmatmul.bf16.gmra.mxu3 %v954_v37  ;;  %v433_v37 = vpop.permute.xlu1 %432 }
 0x10a   : > { %962 = vmatmul.msk.bf16.gmra.mxu0 %vm550_vm0, %v958_v40 }
 0x123   : > { %v577_v41 = vpop.f32.mrf.mxu1  ;;  %v572_v47 = vpop.f32.mrf.mxu0 }
 0x124   : > { %v573_v51 = vadd.f32 %v572_v47, %v413_v50  ;;  %v578_v9 = vadd.f32 %v577_v41, %v423_v6  ;;  %v999_v41 = vunpack.c.h.bf16 %v1008_v21 }
 0x12a   : > { %v1350_v44 = vpop.f32.mrf.mxu2 }
 0x12b   : > { %v579_v42 = vpop.f32.mrf.mxu1  ;;  %v574_v52 = vpop.f32.mrf.mxu0 }
 0x12c   : > { %v575_v60 = vadd.f32 %v574_v52, %v418_v59  ;;  %v580_v24 = vadd.f32 %v579_v42, %v428_v20  ;;  %v438_v52 = vpop.permute.xlu2 %437 }
 0x132   : > { %v1354_v46 = vpop.f32.mrf.mxu2 }
 0x133   : > { %v1348_v43 = vpop.f32.mrf.mxu1 }
 0x134   : > { %v583_v38 = vadd.f32 %v1348_v43, %v433_v37 }
 0x13b   : > { %v1352_v45 = vpop.f32.mrf.mxu1 }
 0x13c   : > { %v585_v57 = vadd.f32 %v1352_v45, %v438_v52 }
 0x147   : > { %v601_v48 = vpop.f32.mrf.mxu1 }
 0x148   : > { %v602_v55 = vadd.f32 %v601_v48, %v573_v51 }
 0x14a   : > { %v630_v49 = vpop.f32.mrf.mxu2 }
 0x14b   : > { %v631_v58 = vadd.f32 %v630_v49, %v602_v55 }
 0x14f   : > { %v603_v53 = vpop.f32.mrf.mxu1 }
 0x150   : > { %v604_v1 = vadd.f32 %v603_v53, %v575_v60  ;;  %v1009_v53 = vld [vmem:[%s1360_s15 + $0x10] sm:$0xff]  }
 0x151   : > { %v659_v56 = vpop.f32.mrf.mxu3  ;;  %v1002_v59 = vunpack.c.l.bf16 %v1009_v53 }
 0x152   : > { %v632_v54 = vpop.f32.mrf.mxu2  ;;  %v660_v61 = vadd.f32 %v659_v56, %v631_v58 }
 0x153   : > { %v633_v7 = vadd.f32 %v632_v54, %v604_v1  ;;  %v443_v1 = vpop.permute.xlu0 %442 }
 0x157   : > { %v606_v63 = vpop.f32.mrf.mxu1  ;;  %v688_v0 = vpop.f32.mrf.mxu0 }
 0x158   : > { %v689_v2 = vadd.f32 %v688_v0, %v660_v61  ;;  %v607_v15 = vadd.f32 %v606_v63, %v578_v9 }
 0x159   : > { %v661_v4 = vpop.f32.mrf.mxu3 }
 0x15a   : > { %v635_v3 = vpop.f32.mrf.mxu2  ;;  %v724_v5 = vadd.f32 %v994_v62, %v689_v2  ;;  %v662_v11 = vadd.f32 %v661_v4, %v633_v7  ;;  %v1003_v7 = vunpack.c.h.bf16 %v1009_v53 }
 0x15b   : > { %v636_v22 = vadd.f32 %v635_v3, %v607_v15  ;;  %v1010_v15 = vld [vmem:[%s1360_s15 + $0x18] sm:$0xff]  }
 0x15c   : > { %v732_v8 = vmax.f32 %v724_v5, 0.0  ;;  %v588_v5 = vadd.f32 %v1350_v44, %v443_v1  ;;  %v1006_v21 = vunpack.c.l.bf16 %v1010_v15 }
 0x15e   : > { %v740_v10 = vpack.c.bf16 %v732_v8, %v732_v8 }
 0x15f   : > { %v608_v13 = vpop.f32.mrf.mxu1  ;;  %v690_v14 = vpop.f32.mrf.mxu0 }
 0x160   : > { %749 = vst.msk [vmem:[%s1367_s22] sm:$0xf] %vm748_vm1, %v740_v10  ;;  %v691_v16 = vadd.f32 %v690_v14, %v662_v11  ;;  %v609_v30 = vadd.f32 %v608_v13, %v580_v24  ;;  %v448_v14 = vpop.permute.xlu1 %447 }
 0x161   : > { %v664_v18 = vpop.f32.mrf.mxu3 }
 0x162   : > { %v637_v17 = vpop.f32.mrf.mxu2  ;;  %v725_v19 = vadd.f32 %v995_v12, %v691_v16  ;;  %v665_v26 = vadd.f32 %v664_v18, %v636_v22 }
 0x163   : > { %v638_v35 = vadd.f32 %v637_v17, %v609_v30 }
 0x164   : > { %v733_v23 = vmax.f32 %v725_v19, 0.0  ;;  %v590_v19 = vadd.f32 %v1354_v46, %v448_v14 }
 0x166   : > { %v741_v25 = vpack.c.bf16 %v733_v23, %v733_v23 }
 0x167   : > { %v611_v28 = vpop.f32.mrf.mxu1  ;;  %v693_v29 = vpop.f32.mrf.mxu0 }
 0x168   : > { %750 = vst.msk [vmem:[%s1367_s22 + $0x4] sm:$0xf] %vm748_vm1, %v741_v25  ;;  %v694_v31 = vadd.f32 %v693_v29, %v665_v26  ;;  %v612_v47 = vadd.f32 %v611_v28, %v583_v38 }
 0x169   : > { %v666_v32 = vpop.f32.mrf.mxu3 }
 0x16a   : > { %v726_v33 = vadd.f32 %v998_v27, %v694_v31  ;;  %v640_v34 = vpop.f32.mrf.mxu2  ;;  %v667_v40 = vadd.f32 %v666_v32, %v638_v35  ;;  %v1007_v32 = vunpack.c.h.bf16 %v1010_v15 }
 0x16b   : > { %v641_v54 = vadd.f32 %v640_v34, %v612_v47 }
 0x16c   : > { %v734_v36 = vmax.f32 %v726_v33, 0.0 }
 0x16e   : > { %v742_v39 = vpack.c.bf16 %v734_v36, %v734_v36 }
 0x16f   : > { %v695_v42 = vpop.f32.mrf.mxu0  ;;  %v613_v49 = vpop.f32.mrf.mxu1 }
 0x170   : > { %751 = vst.msk [vmem:[%s1367_s22 + $0x8] sm:$0xf] %vm748_vm1, %v742_v39  ;;  %v696_v48 = vadd.f32 %v695_v42, %v667_v40  ;;  %v614_v61 = vadd.f32 %v613_v49, %v585_v57 }
 0x171   : > { %v669_v50 = vpop.f32.mrf.mxu3 }
 0x172   : > { %v727_v51 = vadd.f32 %v999_v41, %v696_v48  ;;  %v642_v56 = vpop.f32.mrf.mxu2  ;;  %v670_v58 = vadd.f32 %v669_v50, %v641_v54 }
 0x173   : > { %v643_v3 = vadd.f32 %v642_v56, %v614_v61 }
 0x174   : > { %v735_v55 = vmax.f32 %v727_v51, 0.0 }
 0x176   : > { %v743_v43 = vpack.c.bf16 %v735_v55, %v735_v55 }
 0x177   : > { %v698_v60 = vpop.f32.mrf.mxu0  ;;  %v616_v2 = vpop.f32.mrf.mxu1 }
 0x178   : > { %752 = vst.msk [vmem:[%s1367_s22 + $0xc] sm:$0xf] %vm748_vm1, %v743_v43  ;;  %v699_v62 = vadd.f32 %v698_v60, %v670_v58  ;;  %v617_v10 = vadd.f32 %v616_v2, %v588_v5 }
 0x179   : > { %v671_v63 = vpop.f32.mrf.mxu3 }
 0x17a   : > { %v728_v0 = vadd.f32 %v1002_v59, %v699_v62  ;;  %v672_v45 = vadd.f32 %v671_v63, %v643_v3  ;;  %v645_v8 = vpop.f32.mrf.mxu2 }
 0x17b   : > { %v646_v16 = vadd.f32 %v645_v8, %v617_v10 }
 0x17c   : > { %v736_v4 = vmax.f32 %v728_v0, 0.0 }
 0x17e   : > { %v744_v6 = vpack.c.bf16 %v736_v4, %v736_v4 }
 0x17f   : > { %v700_v9 = vpop.f32.mrf.mxu0  ;;  %v618_v18 = vpop.f32.mrf.mxu1 }
 0x180   : > { %753 = vst.msk [vmem:[%s1367_s22 + $0x10] sm:$0xf] %vm748_vm1, %v744_v6  ;;  %v701_v11 = vadd.f32 %v700_v9, %v672_v45  ;;  %v619_v23 = vadd.f32 %v618_v18, %v590_v19 }
 0x181   : > { %v674_v12 = vpop.f32.mrf.mxu3 }
 0x182   : > { %v729_v13 = vadd.f32 %v1003_v7, %v701_v11  ;;  %v675_v20 = vadd.f32 %v674_v12, %v646_v16  ;;  %v647_v25 = vpop.f32.mrf.mxu2 }
 0x183   : > { %v648_v28 = vadd.f32 %v647_v25, %v619_v23 }
 0x184   : > { %v737_v17 = vmax.f32 %v729_v13, 0.0 }
 0x186   : > { %v745_v44 = vpack.c.bf16 %v737_v17, %v737_v17 }
 0x187   : > { %v703_v22 = vpop.f32.mrf.mxu0 }
 0x188   : > { %754 = vst.msk [vmem:[%s1367_s22 + $0x14] sm:$0xf] %vm748_vm1, %v745_v44  ;;  %v704_v24 = vadd.f32 %v703_v22, %v675_v20 }
 0x189   : > { %v676_v27 = vpop.f32.mrf.mxu3 }
 0x18a   : > { %v730_v26 = vadd.f32 %v1006_v21, %v704_v24  ;;  %v677_v31 = vadd.f32 %v676_v27, %v648_v28 }
 0x18c   : > { %v738_v29 = vmax.f32 %v730_v26, 0.0 }
 0x18e   : > { %v746_v30 = vpack.c.bf16 %v738_v29, %v738_v29 }
 0x18f   : > { %v705_v33 = vpop.f32.mrf.mxu0 }
 0x190   : > { %755 = vst.msk [vmem:[%s1367_s22 + $0x18] sm:$0xf] %vm748_vm1, %v746_v30  ;;  %v706_v46 = vadd.f32 %v705_v33, %v677_v31 }
 0x192   : > { %v731_v34 = vadd.f32 %v1007_v32, %v706_v46 }
 0x194   : > { %v739_v35 = vmax.f32 %v731_v34, 0.0 }
 0x196   : > { %v747_v36 = vpack.c.bf16 %v739_v35, %v739_v35 }
 0x198   : > { %756 = vst.msk [vmem:[%s1367_s22 + $0x1c] sm:$0xf] %vm748_vm1, %v747_v36 }
 0x199 PF: > { %s14_s17 = sadd.s32 1, %s1085_s17   ;;  %s1406_s15 = smov %s1081_s16 }
 0x19a   : > { %p11_p5 = scmp.ge.s32.totalorder %s14_s17, 4   ;;  %s1407_s16 = smov %s1409_s18 }
 0x19c   :  { %13 = sbr.rel (!%p11_p5) target bundleno = 2 (0x2), region = 69 }

// kernel: forward.37
= control target key start
LH: loop header
LB: loop body
LE: loop exit
PB: predicated region body
PF: predicated region fallthrough
CT: control target
= control target key end

     0   :  { %s1953_s12 = smov 0   ;;  %s1955_s13 = smov 0   ;;  %s2633_s0 = inlined_call_operand.vmem [shape: bf16[2,256,32], index: 0, kind: input, shape index: {}]   ;;  %s2634_s1 = inlined_call_operand.vmem [shape: bf16[128,1024], index: 1, kind: input, shape index: {}]   ;;  %s2635_s2 = inlined_call_operand.vmem [shape: f32[128,1], index: 2, kind: input, shape index: {}]   ;;  %s2636_s3 = inlined_call_operand.vmem [shape: bf16[2,128,16], index: 3, kind: output, shape index: {}]  }
   0x1   :  { %s1957_s14 = smov 0  }
   0x2 LB: > { %s25_s15 = sadd.s32 1, %s1923_s13  ;;  %p1465_p0 = scmp.ge.s32.totalorder %s1927_s14, 1  ;;  %s1927_s14 = sphi %s1957_s14, %s13_s14   ;;  %s1923_s13 = sphi %s1955_s13, %s2638_s13   ;;  %s1919_s12 = sphi %s1953_s12, %s2637_s12  }
   0x3   : > { %p27_p1 = scmp.ge.s32.totalorder %s25_s15, 2  ;;  %p151_p2 = scmp.lt.s32.totalorder %s1927_s14, 3 }
   0x5   : > { %s2640_s15 = smov (%p27_p1, %s25_s15), 0  ;;  %p152_p3 = pnand %p1465_p0, %p151_p2 }
   0x6   : > { %p178_p4 = scmp.lt.s32.totalorder (!%p152_p3), %s1919_s12, 1  ;;  %s1929_s20 = smov (!%p152_p3), 127  }
   0x7   : > { %155 = sbr.rel (%p152_p3) target bundleno = 561 (0x231), region = 32  ;;  %s1930_s21 = smov (!%p152_p3), 119  }
   0x8   : > { %s1931_s22 = smov (!%p152_p3), 120  }
   0xc   : > { %s2642_s12 = smov (!%p178_p4, %s1919_s12), 1  ;;  %v1536_v16 = vld [vmem:[%s2634_s1] sm:$0xf]  ;;  %v1810_v19 = vld [vmem:[%s2634_s1 + $0x4] sm:$0xf]  ;;  %v1932_v52 = vmov 0  }
   0xd   : > { %s1792_s16 = sshll.u32 %s2642_s12, 7  ;;  %v1814_v17 = vld [vmem:[%s2634_s1 + $0x1c] sm:$0xf0]  ;;  %v1538_v20 = vld [vmem:[%s2634_s1 + $0x20] sm:$0xf0]  ;;  %1903 = vset.pattern.permute.xlu1 %v1932_v52  ;;  %1902 = vset.pattern.permute.xlu0 %v1932_v52  ;;  %v528_v53 = vld [vmem:[%s2635_s2 + $0x8] sm:$0xff] }
   0xe   : > { %s1977_s19 = scalar_lea.vmem %s2633_s0, %s1792_s16  ;;  %v1537_v18 = vor.u32 %v1814_v17, %v1536_v16  ;;  %v1541_v21 = vor.u32 %v1810_v19, %v1538_v20  ;;  %v1568_v22 = vld [vmem:[%s2634_s1 + $0x40] sm:$0xf]  ;;  %v1818_v26 = vld [vmem:[%s2634_s1 + $0x44] sm:$0xf]  ;;  %1904 = vset.pattern.permute.xlu2 %v1932_v52  ;;  %s1793_s8 = sshll.u32 %s2642_s12, 6  ;;  %vm1367_vm0 = vcmask 125952  }
   0xf   : > { %v1801_v0 = vld [vmem:[%s1977_s19 + $0x38] sm:$0xff]  ;;  %v1800_v1 = vld [vmem:[%s1977_s19 + $0x30] sm:$0xff]  ;;  %v1799_v3 = vld [vmem:[%s1977_s19 + $0x28] sm:$0xff]  ;;  %s2576_s11 = scalar_lea.vmem %s2636_s3, %s1793_s8 }
  0x10   : > { %v1809_v2 = vld [vmem:[%s1977_s19 + $0x78] sm:$0xff]  ;;  %333 = vrot.lane.b32.xlu0 %v1801_v0, %s1929_s20  ;;  %331 = vrot.lane.b32.xlu1 %v1800_v1, %s1929_s20  ;;  %v1808_v4 = vld [vmem:[%s1977_s19 + $0x70] sm:$0xff] }
  0x11   : > { %943 = vmatpush.bf16.msra.mxu0 %v1801_v0  ;;  %992 = vmatpush.bf16.msra.mxu1 %v1809_v2  ;;  %v1807_v5 = vld [vmem:[%s1977_s19 + $0x68] sm:$0xff]  ;;  %v1798_v6 = vld [vmem:[%s1977_s19 + $0x20] sm:$0xff]  ;;  %v1797_v8 = vld [vmem:[%s1977_s19 + $0x18] sm:$0xff] }
  0x12   : > { %329 = vrot.lane.b32.xlu2 %v1799_v3, %s1929_s20  ;;  %v1806_v7 = vld [vmem:[%s1977_s19 + $0x60] sm:$0xff]  ;;  %v1805_v9 = vld [vmem:[%s1977_s19 + $0x58] sm:$0xff]  ;;  %v1796_v10 = vld [vmem:[%s1977_s19 + $0x10] sm:$0xff] }
  0x13   : > { %v1804_v11 = vld [vmem:[%s1977_s19 + $0x50] sm:$0xff]  ;;  %v1795_v12 = vld [vmem:[%s1977_s19 + $0x8] sm:$0xff]  ;;  %v2009_v14 = vld [vmem:[%s1977_s19 + $0x40] sm:$0xff] }
  0x14   : > { %v2002_v13 = vld [vmem:[%s1977_s19 + $0x48] sm:$0xff]  ;;  %v2012_v15 = vld [vmem:[%s1977_s19] sm:$0xff] }
  0x15   : > { %944 = vmatpush.bf16.msra.mxu0 %v1800_v1  ;;  %993 = vmatpush.bf16.msra.mxu1 %v1808_v4  ;;  %v1822_v23 = vld [vmem:[%s2634_s1 + $0x5c] sm:$0xf0]  ;;  %v1570_v27 = vld [vmem:[%s2634_s1 + $0x60] sm:$0xf0] }
  0x16   : > { %v1569_v25 = vor.u32 %v1822_v23, %v1568_v22  ;;  %v1573_v28 = vor.u32 %v1818_v26, %v1570_v27  ;;  %v1600_v30 = vld [vmem:[%s2634_s1 + $0x80] sm:$0xf]  ;;  %v1826_v32 = vld [vmem:[%s2634_s1 + $0x84] sm:$0xf]  ;;  %v1823_v22 = vld [vmem:[%s2634_s1 + $0x64] sm:$0xf0] }
  0x17   : > { %v1830_v31 = vld [vmem:[%s2634_s1 + $0x9c] sm:$0xf0]  ;;  %v1602_v35 = vld [vmem:[%s2634_s1 + $0xa0] sm:$0xf0]  ;;  %v532_v27 = vld [vmem:[%s2635_s2 + $0x28] sm:$0xff] }
  0x18   : > { %349 = vrot.lane.b32.xlu0 %v1809_v2, %s1929_s20  ;;  %347 = vrot.lane.b32.xlu1 %v1808_v4, %s1929_s20  ;;  %v1601_v34 = vor.u32 %v1830_v31, %v1600_v30  ;;  %v1605_v36 = vor.u32 %v1826_v32, %v1602_v35  ;;  %v1632_v42 = vld [vmem:[%s2634_s1 + $0xc0] sm:$0xf]  ;;  %v1834_v46 = vld [vmem:[%s2634_s1 + $0xc4] sm:$0xf] }
  0x19   : > { %945 = vmatpush.bf16.msra.mxu0 %v1799_v3  ;;  %994 = vmatpush.bf16.msra.mxu1 %v1807_v5  ;;  %v1838_v43 = vld [vmem:[%s2634_s1 + $0xdc] sm:$0xf0]  ;;  %v1634_v47 = vld [vmem:[%s2634_s1 + $0xe0] sm:$0xf0] }
  0x1a   : > { %345 = vrot.lane.b32.xlu2 %v1807_v5, %s1929_s20  ;;  %v1633_v45 = vor.u32 %v1838_v43, %v1632_v42  ;;  %v1637_v48 = vor.u32 %v1834_v46, %v1634_v47  ;;  %v527_v54 = vld [vmem:[%s2635_s2] sm:$0xff]  ;;  %v1831_v42 = vld [vmem:[%s2634_s1 + $0xa4] sm:$0xf0]  ;;  %v533_v46 = vld [vmem:[%s2635_s2 + $0x30] sm:$0xff] }
  0x1b   : > { %v1664_v57 = vld [vmem:[%s2634_s1 + $0x100] sm:$0xf]  ;;  %v1842_v61 = vld [vmem:[%s2634_s1 + $0x104] sm:$0xf] }
  0x1c   : > { %v1846_v58 = vld [vmem:[%s2634_s1 + $0x11c] sm:$0xf0]  ;;  %v1666_v62 = vld [vmem:[%s2634_s1 + $0x120] sm:$0xf0] }
  0x1d   : > { %946 = vmatpush.bf16.msra.mxu0 %v1798_v6  ;;  %995 = vmatpush.bf16.msra.mxu1 %v1806_v7  ;;  %v1665_v60 = vor.u32 %v1846_v58, %v1664_v57  ;;  %v1669_v63 = vor.u32 %v1842_v61, %v1666_v62  ;;  %v1850_v16 = vld [vmem:[%s2634_s1 + $0x144] sm:$0xf]  ;;  %v1728_v31 = vld [vmem:[%s2634_s1 + $0x180] sm:$0xf]  ;;  %v1839_v61 = vld [vmem:[%s2634_s1 + $0xe4] sm:$0xf0] }
  0x1e   : > { %v1698_v17 = vld [vmem:[%s2634_s1 + $0x160] sm:$0xf0]  ;;  %v1862_v32 = vld [vmem:[%s2634_s1 + $0x19c] sm:$0xf0] }
  0x1f   : > { %v1730_v35 = vld [vmem:[%s2634_s1 + $0x1a0] sm:$0xf0] }
  0x20   : > { %327 = vrot.lane.b32.xlu0 %v1798_v6, %s1929_s20  ;;  %343 = vrot.lane.b32.xlu1 %v1806_v7, %s1929_s20  ;;  %v531_v57 = vld [vmem:[%s2635_s2 + $0x20] sm:$0xff] }
  0x21   : > { %947 = vmatpush.bf16.msra.mxu0 %v1797_v8  ;;  %996 = vmatpush.bf16.msra.mxu1 %v1805_v9 }
  0x22   : > { %325 = vrot.lane.b32.xlu2 %v1797_v8, %s1929_s20 }
  0x25   : > { %948 = vmatpush.bf16.msra.mxu0 %v1796_v10  ;;  %997 = vmatpush.bf16.msra.mxu1 %v1804_v11 }
  0x28   : > { %341 = vrot.lane.b32.xlu0 %v1805_v9, %s1929_s20  ;;  %323 = vrot.lane.b32.xlu1 %v1796_v10, %s1929_s20 }
  0x29   : > { %949 = vmatpush.bf16.msra.mxu0 %v1795_v12  ;;  %998 = vmatpush.bf16.msra.mxu1 %v2002_v13 }
  0x2a   : > { %339 = vrot.lane.b32.xlu2 %v1804_v11, %s1929_s20 }
  0x2d   : > { %950 = vmatpush.bf16.msra.mxu0 %v2012_v15  ;;  %999 = vmatpush.bf16.msra.mxu1 %v2009_v14 }
  0x30   : > { %321 = vrot.lane.b32.xlu0 %v1795_v12, %s1929_s20  ;;  %337 = vrot.lane.b32.xlu1 %v2002_v13, %s1929_s20 }
  0x31   : > { %951 = vmatmul.bf16.vlgmr.msra.gmra.mxu0 %v1537_v18  ;;  %1000 = vmatmul.bf16.vlgmr.msra.gmra.mxu1 %v1541_v21  ;;  %v1701_v18 = vor.u32 %v1850_v16, %v1698_v17  ;;  %v1576_v21 = vld [vmem:[%s2634_s1 + $0x48] sm:$0xf]  ;;  %v1674_v16 = vld [vmem:[%s2634_s1 + $0x128] sm:$0xf0] }
  0x32   : > { %319 = vrot.lane.b32.xlu2 %v2012_v15, %s1929_s20  ;;  %v1577_v23 = vor.u32 %v1823_v22, %v1576_v21 }
  0x38   : > { %335 = vrot.lane.b32.xlu0 %v2009_v14, %s1929_s20  ;;  %429 = vrot.lane.b32.xlu1 %v1801_v0, %s1930_s21 }
  0x3a   : > { %381 = vrot.lane.b32.xlu2 %v1801_v0, %s1931_s22 }
  0x40   : > { %445 = vrot.lane.b32.xlu0 %v1809_v2, %s1930_s21  ;;  %397 = vrot.lane.b32.xlu1 %v1809_v2, %s1931_s22  ;;  %v1544_v2 = vld [vmem:[%s2634_s1 + $0x8] sm:$0xf] }
  0x41   : > { %956 = vmatmul.bf16.gmra.mxu0 %v1569_v25  ;;  %1005 = vmatmul.bf16.gmra.mxu1 %v1573_v28  ;;  %v1578_v25 = vld [vmem:[%s2634_s1 + $0x68] sm:$0xf0] }
  0x42   : > { %427 = vrot.lane.b32.xlu2 %v1800_v1, %s1930_s21 }
  0x48   : > { %379 = vrot.lane.b32.xlu0 %v1800_v1, %s1931_s22  ;;  %443 = vrot.lane.b32.xlu1 %v1808_v4, %s1930_s21 }
  0x4a   : > { %395 = vrot.lane.b32.xlu2 %v1808_v4, %s1931_s22 }
  0x50   : > { %425 = vrot.lane.b32.xlu0 %v1799_v3, %s1930_s21  ;;  %377 = vrot.lane.b32.xlu1 %v1799_v3, %s1931_s22  ;;  %v1815_v3 = vld [vmem:[%s2634_s1 + $0x24] sm:$0xf0] }
  0x51   : > { %961 = vmatmul.bf16.gmra.mxu0 %v1601_v34  ;;  %1010 = vmatmul.bf16.gmra.mxu1 %v1605_v36  ;;  %v1858_v34 = vld [vmem:[%s2634_s1 + $0x184] sm:$0xf] }
  0x52   : > { %441 = vrot.lane.b32.xlu2 %v1807_v5, %s1930_s21  ;;  %v1733_v36 = vor.u32 %v1858_v34, %v1730_v35  ;;  %v1706_v35 = vld [vmem:[%s2634_s1 + $0x168] sm:$0xf0] }
  0x58   : > { %393 = vrot.lane.b32.xlu0 %v1807_v5, %s1931_s22  ;;  %423 = vrot.lane.b32.xlu1 %v1798_v6, %s1930_s21  ;;  %v1545_v5 = vor.u32 %v1815_v3, %v1544_v2  ;;  %v536_v2 = vld [vmem:[%s2635_s2 + $0x48] sm:$0xff]  ;;  %v535_v3 = vld [vmem:[%s2635_s2 + $0x40] sm:$0xff] }
  0x5a   : > { %375 = vrot.lane.b32.xlu2 %v1798_v6, %s1931_s22  ;;  %v1811_v6 = vld [vmem:[%s2634_s1 + $0xc] sm:$0xf] }
  0x60   : > { %439 = vrot.lane.b32.xlu0 %v1806_v7, %s1930_s21  ;;  %391 = vrot.lane.b32.xlu1 %v1806_v7, %s1931_s22  ;;  %v1546_v7 = vld [vmem:[%s2634_s1 + $0x28] sm:$0xf0] }
  0x61   : > { %966 = vmatmul.bf16.gmra.mxu0 %v1633_v45  ;;  %1015 = vmatmul.bf16.gmra.mxu1 %v1637_v48  ;;  %v1610_v45 = vld [vmem:[%s2634_s1 + $0xa8] sm:$0xf0] }
  0x62   : > { %421 = vrot.lane.b32.xlu2 %v1797_v8, %s1930_s21 }
  0x68   : > { %373 = vrot.lane.b32.xlu0 %v1797_v8, %s1931_s22  ;;  %437 = vrot.lane.b32.xlu1 %v1805_v9, %s1930_s21  ;;  %v530_v8 = vld [vmem:[%s2635_s2 + $0x18] sm:$0xff] }
  0x6a   : > { %389 = vrot.lane.b32.xlu2 %v1805_v9, %s1931_s22 }
  0x6c   : > { %v330_v24 = vpop.permute.xlu2 %329 }
  0x70   : > { %419 = vrot.lane.b32.xlu0 %v1796_v10, %s1930_s21  ;;  %371 = vrot.lane.b32.xlu1 %v1796_v10, %s1931_s22 }
  0x71   : > { %971 = vmatmul.bf16.gmra.mxu0 %v1665_v60  ;;  %1020 = vmatmul.bf16.gmra.mxu1 %v1669_v63  ;;  %v1640_v60 = vld [vmem:[%s2634_s1 + $0xc8] sm:$0xf] }
  0x72   : > { %435 = vrot.lane.b32.xlu2 %v1804_v11, %s1930_s21  ;;  %v1641_v63 = vor.u32 %v1839_v61, %v1640_v60 }
  0x74   : > { %v346_v29 = vpop.permute.xlu2 %345 }
  0x78   : > { %387 = vrot.lane.b32.xlu0 %v1804_v11, %s1931_s22  ;;  %417 = vrot.lane.b32.xlu1 %v1795_v12, %s1930_s21  ;;  %v1549_v11 = vor.u32 %v1811_v6, %v1546_v7  ;;  %v534_v7 = vld [vmem:[%s2635_s2 + $0x38] sm:$0xff] }
  0x7a   : > { %369 = vrot.lane.b32.xlu2 %v1795_v12, %s1931_s22  ;;  %v1696_v12 = vld [vmem:[%s2634_s1 + $0x140] sm:$0xf] }
  0x7c   : > { %v326_v33 = vpop.permute.xlu2 %325 }
  0x80   : > { %433 = vrot.lane.b32.xlu0 %v2002_v13, %s1930_s21  ;;  %385 = vrot.lane.b32.xlu1 %v2002_v13, %s1931_s22  ;;  %v1854_v13 = vld [vmem:[%s2634_s1 + $0x15c] sm:$0xf0] }
  0x81   : > { %1025 = vmatmul.bf16.gmra.mxu1 %v1701_v18  ;;  %v538_v18 = vld [vmem:[%s2635_s2 + $0x58] sm:$0xff] }
  0x82   : > { %v334_v37 = vpop.permute.xlu0 %333  ;;  %v332_v38 = vpop.permute.xlu1 %331  ;;  %415 = vrot.lane.b32.xlu2 %v2012_v15, %s1930_s21 }
  0x83   : > { %1041 = vmatpush.bf16.msra.mxu2 %v334_v37  ;;  %v529_v37 = vld [vmem:[%s2635_s2 + $0x10] sm:$0xff] }
  0x84   : > { %v340_v39 = vpop.permute.xlu2 %339 }
  0x87   : > { %1042 = vmatpush.bf16.msra.mxu2 %v332_v38 }
  0x88   : > { %367 = vrot.lane.b32.xlu0 %v2012_v15, %s1931_s22  ;;  %431 = vrot.lane.b32.xlu1 %v2009_v14, %s1930_s21 }
  0x8a   : > { %v350_v40 = vpop.permute.xlu0 %349  ;;  %v348_v41 = vpop.permute.xlu1 %347  ;;  %383 = vrot.lane.b32.xlu2 %v2009_v14, %s1931_s22  ;;  %v1697_v14 = vor.u32 %v1854_v13, %v1696_v12  ;;  %v1847_v12 = vld [vmem:[%s2634_s1 + $0x124] sm:$0xf0] }
  0x8b   : > { %1043 = vmatpush.bf16.msra.mxu2 %v330_v24  ;;  %1090 = vmatpush.bf16.msra.mxu3 %v350_v40  ;;  %v1819_v24 = vld [vmem:[%s2634_s1 + $0x4c] sm:$0xf] }
  0x8c   : > { %v320_v44 = vpop.permute.xlu2 %319  ;;  %976 = vmatmul.bf16.gmra.mxu0 %v1697_v14 }
  0x8f   : > { %1091 = vmatpush.bf16.msra.mxu3 %v348_v41  ;;  %v1608_v41 = vld [vmem:[%s2634_s1 + $0x88] sm:$0xf] }
  0x90   : > { %550 = vperm.xlu1 %1903, %v528_v53   ;;  %545 = vperm.xlu0 %1902, %v527_v54   ;;  %v1609_v43 = vor.u32 %v1831_v42, %v1608_v41  ;;  %v1866_v54 = vld [vmem:[%s2634_s1 + $0x1c4] sm:$0xf] }
  0x91   : > { %1030 = vmatmul.bf16.gmra.mxu1 %v1733_v36  ;;  %v1552_v36 = vld [vmem:[%s2634_s1 + $0x10] sm:$0xf] }
  0x92   : > { %v328_v49 = vpop.permute.xlu0 %327  ;;  %v344_v50 = vpop.permute.xlu1 %343  ;;  %555 = vperm.xlu2 %1904, %v529_v37   ;;  %v1816_v37 = vld [vmem:[%s2634_s1 + $0x2c] sm:$0xf0] }
  0x93   : > { %1044 = vmatpush.bf16.msra.mxu2 %v328_v49  ;;  %1092 = vmatpush.bf16.msra.mxu3 %v346_v29  ;;  %v1581_v29 = vor.u32 %v1819_v24, %v1578_v25  ;;  %v1553_v42 = vor.u32 %v1816_v37, %v1552_v36 }
  0x94   : > { %v382_v51 = vpop.permute.xlu2 %381 }
  0x95   : > { %1139 = vmatpush.bf16.msrb.mxu0 %v382_v51  ;;  %v1870_v51 = vld [vmem:[%s2634_s1 + $0x1dc] sm:$0xf0] }
  0x97   : > { %1093 = vmatpush.bf16.msra.mxu3 %v344_v50  ;;  %1045 = vmatpush.bf16.msra.mxu2 %v326_v33  ;;  %v1729_v33 = vor.u32 %v1862_v32, %v1728_v31  ;;  %v1760_v50 = vld [vmem:[%s2634_s1 + $0x1c0] sm:$0xf] }
  0x98   : > { %560 = vperm.xlu1 %1903, %v530_v8   ;;  %570 = vperm.xlu0 %1902, %v532_v27   ;;  %v1761_v53 = vor.u32 %v1870_v51, %v1760_v50  ;;  %v1704_v27 = vld [vmem:[%s2634_s1 + $0x148] sm:$0xf] }
  0x9a   : > { %v342_v55 = vpop.permute.xlu0 %341  ;;  %v324_v56 = vpop.permute.xlu1 %323  ;;  %565 = vperm.xlu2 %1904, %v531_v57   ;;  %v1824_v57 = vld [vmem:[%s2634_s1 + $0x6c] sm:$0xf0] }
  0x9b   : > { %1094 = vmatpush.bf16.msra.mxu3 %v342_v55  ;;  %1046 = vmatpush.bf16.msra.mxu2 %v324_v56  ;;  %v1762_v55 = vld [vmem:[%s2634_s1 + $0x1e0] sm:$0xf0] }
  0x9c   : > { %v428_v59 = vpop.permute.xlu2 %427  ;;  %981 = vmatmul.bf16.gmra.mxu0 %v1729_v33  ;;  %v1765_v56 = vor.u32 %v1866_v54, %v1762_v55  ;;  %v1851_v33 = vld [vmem:[%s2634_s1 + $0x14c] sm:$0xf] }
  0x9d   : > { %v1709_v41 = vor.u32 %v1851_v33, %v1706_v35  ;;  %v1738_v55 = vld [vmem:[%s2634_s1 + $0x1a8] sm:$0xf0]  ;;  %v1813_v33 = vld [vmem:[%s2634_s1 + $0x1c] sm:$0xf] }
  0x9f   : > { %1095 = vmatpush.bf16.msra.mxu3 %v340_v39 }
  0xa0   : > { %575 = vperm.xlu1 %1903, %v533_v46   ;;  %585 = vperm.xlu0 %1902, %v535_v3   ;;  %v1736_v46 = vld [vmem:[%s2634_s1 + $0x188] sm:$0xf] }
  0xa1   : > { %1035 = vmatmul.bf16.gmra.mxu1 %v1765_v56  ;;  %v1584_v56 = vld [vmem:[%s2634_s1 + $0x50] sm:$0xf]  ;;  %v540_v3 = vld [vmem:[%s2635_s2 + $0x68] sm:$0xff] }
  0xa2   : > { %v322_v0 = vpop.permute.xlu0 %321  ;;  %v338_v1 = vpop.permute.xlu1 %337  ;;  %580 = vperm.xlu2 %1904, %v534_v7   ;;  %v1585_v61 = vor.u32 %v1824_v57, %v1584_v56  ;;  %v1618_v7 = vld [vmem:[%s2634_s1 + $0xb0] sm:$0xf0] }
  0xa3   : > { %1047 = vmatpush.bf16.msra.mxu2 %v322_v0  ;;  %1096 = vmatpush.bf16.msra.mxu3 %v338_v1  ;;  %v1835_v0 = vld [vmem:[%s2634_s1 + $0xcc] sm:$0xf] }
  0xa4   : > { %v396_v4 = vpop.permute.xlu2 %395  ;;  %v1642_v1 = vld [vmem:[%s2634_s1 + $0xe8] sm:$0xf0] }
  0xa7   : > { %1048 = vmatpush.bf16.msra.mxu2 %v320_v44  ;;  %v1827_v44 = vld [vmem:[%s2634_s1 + $0x8c] sm:$0xf] }
  0xa8   : > { %v1613_v48 = vor.u32 %v1827_v44, %v1610_v45  ;;  %590 = vperm.xlu1 %1903, %v536_v2   ;;  %600 = vperm.xlu0 %1902, %v538_v18   ;;  %v537_v45 = vld [vmem:[%s2635_s2 + $0x50] sm:$0xff] }
  0xaa   : > { %v336_v9 = vpop.permute.xlu0 %335  ;;  %1049 = vmatmul.bf16.vlgmr.msra.gmra.mxu2 %v1545_v5  ;;  %v430_v10 = vpop.permute.xlu1 %429  ;;  %v1645_v5 = vor.u32 %v1835_v0, %v1642_v1  ;;  %595 = vperm.xlu2 %1904, %v537_v45  }
  0xab   : > { %1097 = vmatpush.bf16.msra.mxu3 %v336_v9  ;;  %1237 = vmatpush.bf16.msrb.mxu2 %v430_v10 }
  0xac   : > { %v442_v15 = vpop.permute.xlu2 %441  ;;  %986 = vmatmul.bf16.gmra.mxu0 %v1761_v53  ;;  %v1859_v53 = vld [vmem:[%s2634_s1 + $0x18c] sm:$0xf] }
  0xad   : > { %v1741_v60 = vor.u32 %v1859_v53, %v1738_v55  ;;  %v1844_v53 = vld [vmem:[%s2634_s1 + $0x114] sm:$0xf] }
  0xae   : > { %1098 = vmatmul.bf16.vlgmr.msra.gmra.mxu3 %v1549_v11  ;;  %v1672_v11 = vld [vmem:[%s2634_s1 + $0x108] sm:$0xf]  ;;  %v2241_v13 = vpop.f32.mrf.mxu0  ;;  %v2249_v17 = vpop.f32.mrf.mxu1 }
  0xaf   : > { %1238 = vmatpush.bf16.msrb.mxu2 %v428_v59  ;;  %v1673_v14 = vor.u32 %v1847_v12, %v1672_v11  ;;  %v1770_v11 = vld [vmem:[%s2634_s1 + $0x1e8] sm:$0xf0]  ;;  %v1616_v12 = vld [vmem:[%s2634_s1 + $0x90] sm:$0xf] }
  0xb2   : > { %v446_v19 = vpop.permute.xlu0 %445  ;;  %v398_v20 = vpop.permute.xlu1 %397  ;;  %610 = vperm.xlu2 %1904, %v540_v3  }
  0xb3   : > { %1286 = vmatpush.bf16.msrb.mxu3 %v446_v19  ;;  %1188 = vmatpush.bf16.msrb.mxu1 %v398_v20 }
  0xb4   : > { %v376_v26 = vpop.permute.xlu2 %375 }
  0xb6   : > { %v2256_v24 = vpop.f32.mrf.mxu1 }
  0xb7   : > { %1189 = vmatpush.bf16.msrb.mxu1 %v396_v4 }
  0xba   : > { %v380_v28 = vpop.permute.xlu0 %379  ;;  %1054 = vmatmul.bf16.gmra.mxu2 %v1577_v23  ;;  %v444_v30 = vpop.permute.xlu1 %443 }
  0xbb   : > { %1140 = vmatpush.bf16.msrb.mxu0 %v380_v28  ;;  %1287 = vmatpush.bf16.msrb.mxu3 %v444_v30  ;;  %v2254_v23 = vpop.f32.mrf.mxu0  ;;  %v1855_v28 = vld [vmem:[%s2634_s1 + $0x164] sm:$0xf0]  ;;  %v1554_v30 = vld [vmem:[%s2634_s1 + $0x30] sm:$0xf0] }
  0xbc   : > { %v422_v38 = vpop.permute.xlu2 %421  ;;  %v1705_v32 = vor.u32 %v1855_v28, %v1704_v27  ;;  %v1836_v27 = vld [vmem:[%s2634_s1 + $0xd4] sm:$0xf] }
  0xbd   : > { %v1650_v28 = vld [vmem:[%s2634_s1 + $0xf0] sm:$0xf0] }
  0xbe   : > { %1103 = vmatmul.bf16.gmra.mxu3 %v1581_v29  ;;  %v1812_v29 = vld [vmem:[%s2634_s1 + $0x14] sm:$0xf] }
  0xbf   : > { %1288 = vmatpush.bf16.msrb.mxu3 %v442_v15  ;;  %v1843_v15 = vld [vmem:[%s2634_s1 + $0x10c] sm:$0xf]  ;;  %v1557_v34 = vor.u32 %v1812_v29, %v1554_v30  ;;  %v1648_v30 = vld [vmem:[%s2634_s1 + $0xd0] sm:$0xf] }
  0xc0   : > { %v1677_v21 = vor.u32 %v1843_v15, %v1674_v16 }
  0xc2   : > { %v426_v39 = vpop.permute.xlu0 %425  ;;  %v378_v40 = vpop.permute.xlu1 %377 }
  0xc3   : > { %1239 = vmatpush.bf16.msrb.mxu2 %v426_v39  ;;  %1141 = vmatpush.bf16.msrb.mxu0 %v378_v40  ;;  %v957_v39 = vpop.f32.mrf.mxu0 }
  0xc4   : > { %v390_v52 = vpop.permute.xlu2 %389 }
  0xc7   : > { %1142 = vmatpush.bf16.msrb.mxu0 %v376_v26 }
  0xca   : > { %v394_v47 = vpop.permute.xlu0 %393  ;;  %1059 = vmatmul.bf16.gmra.mxu2 %v1609_v43  ;;  %v424_v49 = vpop.permute.xlu1 %423 }
  0xcb   : > { %1190 = vmatpush.bf16.msrb.mxu1 %v394_v47  ;;  %1240 = vmatpush.bf16.msrb.mxu2 %v424_v49  ;;  %v1006_v43 = vpop.f32.mrf.mxu1  ;;  %v1863_v47 = vld [vmem:[%s2634_s1 + $0x1a4] sm:$0xf0]  ;;  %v1586_v49 = vld [vmem:[%s2634_s1 + $0x70] sm:$0xf0]  ;;  %v2300_v50 = vpop.f32.mrf.mxu0 }
  0xcc   : > { %v436_v62 = vpop.permute.xlu2 %435 }
  0xce   : > { %1108 = vmatmul.bf16.gmra.mxu3 %v1613_v48  ;;  %v1820_v48 = vld [vmem:[%s2634_s1 + $0x54] sm:$0xf] }
  0xcf   : > { %1241 = vmatpush.bf16.msrb.mxu2 %v422_v38  ;;  %v539_v38 = vld [vmem:[%s2635_s2 + $0x60] sm:$0xff]  ;;  %v1589_v54 = vor.u32 %v1820_v48, %v1586_v49  ;;  %v1592_v48 = vld [vmem:[%s2634_s1 + $0x58] sm:$0xf] }
  0xd0   : > { %605 = vperm.xlu1 %1903, %v539_v38   ;;  %v1825_v49 = vld [vmem:[%s2634_s1 + $0x74] sm:$0xf0] }
  0xd1   : > { %v1593_v57 = vor.u32 %v1825_v49, %v1592_v48 }
  0xd2   : > { %v440_v58 = vpop.permute.xlu0 %439  ;;  %v392_v59 = vpop.permute.xlu1 %391 }
  0xd3   : > { %1289 = vmatpush.bf16.msrb.mxu3 %v440_v58  ;;  %1191 = vmatpush.bf16.msrb.mxu1 %v392_v59  ;;  %v2302_v51 = vpop.f32.mrf.mxu1  ;;  %v542_v58 = vld [vmem:[%s2635_s2 + $0x78] sm:$0xff]  ;;  %v541_v59 = vld [vmem:[%s2635_s2 + $0x70] sm:$0xff] }
  0xd4   : > { %v370_v8 = vpop.permute.xlu2 %369  ;;  %615 = vperm.xlu0 %1902, %v541_v59  }
  0xd7   : > { %1192 = vmatpush.bf16.msrb.mxu1 %v390_v52  ;;  %v1737_v52 = vor.u32 %v1863_v47, %v1736_v46 }
  0xd8   : > { %620 = vperm.xlu1 %1903, %v542_v58   ;;  %v1680_v58 = vld [vmem:[%s2634_s1 + $0x110] sm:$0xf] }
  0xda   : > { %v374_v4 = vpop.permute.xlu0 %373  ;;  %1064 = vmatmul.bf16.gmra.mxu2 %v1641_v63  ;;  %v438_v6 = vpop.permute.xlu1 %437 }
  0xdb   : > { %1143 = vmatpush.bf16.msrb.mxu0 %v374_v4  ;;  %1290 = vmatpush.bf16.msrb.mxu3 %v438_v6  ;;  %v962_v63 = vpop.f32.mrf.mxu0  ;;  %v1011_v1 = vpop.f32.mrf.mxu1  ;;  %v1768_v4 = vld [vmem:[%s2634_s1 + $0x1c8] sm:$0xf]  ;;  %v1828_v6 = vld [vmem:[%s2634_s1 + $0x94] sm:$0xf] }
  0xdc   : > { %v416_v19 = vpop.permute.xlu2 %415 }
  0xde   : > { %1113 = vmatmul.bf16.gmra.mxu3 %v1645_v5  ;;  %v1871_v5 = vld [vmem:[%s2634_s1 + $0x1e4] sm:$0xf0] }
  0xdf   : > { %1291 = vmatpush.bf16.msrb.mxu3 %v436_v62 }
  0xe2   : > { %v420_v9 = vpop.permute.xlu0 %419  ;;  %v372_v10 = vpop.permute.xlu1 %371 }
  0xe3   : > { %1144 = vmatpush.bf16.msrb.mxu0 %v372_v10  ;;  %1242 = vmatpush.bf16.msrb.mxu2 %v420_v9  ;;  %v1867_v9 = vld [vmem:[%s2634_s1 + $0x1cc] sm:$0xf]  ;;  %v1621_v10 = vor.u32 %v1828_v6, %v1618_v7  ;;  %v2353_v15 = vpop.f32.mrf.mxu1 }
  0xe4   : > { %v384_v31 = vpop.permute.xlu2 %383  ;;  %v1773_v16 = vor.u32 %v1867_v9, %v1770_v11 }
  0xe7   : > { %1145 = vmatpush.bf16.msrb.mxu0 %v370_v8  ;;  %v1769_v8 = vor.u32 %v1871_v5, %v1768_v4 }
  0xea   : > { %v388_v20 = vpop.permute.xlu0 %387  ;;  %1069 = vmatmul.bf16.gmra.mxu2 %v1673_v14  ;;  %v418_v22 = vpop.permute.xlu1 %417 }
  0xeb   : > { %1193 = vmatpush.bf16.msrb.mxu1 %v388_v20  ;;  %1243 = vmatpush.bf16.msrb.mxu2 %v418_v22  ;;  %v2351_v14 = vpop.f32.mrf.mxu0  ;;  %v1560_v22 = vld [vmem:[%s2634_s1 + $0x18] sm:$0xf] }
  0xec   : > { %v556_v18 = vpop.permute.xlu2 %555 }
  0xee   : > { %1118 = vmatmul.bf16.gmra.mxu3 %v1677_v21 }
  0xef   : > { %1244 = vmatpush.bf16.msrb.mxu2 %v416_v19  ;;  %v958_v19 = vadd.f32 %v957_v39, %v556_v18  ;;  %v1852_v18 = vld [vmem:[%s2634_s1 + $0x154] sm:$0xf] }
  0xf1   : > { %v1007_v20 = vadd.f32 %v1006_v43, %v958_v19  ;;  %v1714_v19 = vld [vmem:[%s2634_s1 + $0x170] sm:$0xf0] }
  0xf2   : > { %v434_v25 = vpop.permute.xlu0 %433  ;;  %v386_v26 = vpop.permute.xlu1 %385 }
  0xf3   : > { %1194 = vmatpush.bf16.msrb.mxu1 %v386_v26  ;;  %1292 = vmatpush.bf16.msrb.mxu3 %v434_v25  ;;  %v967_v21 = vpop.f32.mrf.mxu0  ;;  %v1817_v25 = vld [vmem:[%s2634_s1 + $0x34] sm:$0xf0]  ;;  %v1016_v26 = vpop.f32.mrf.mxu1 }
  0xf4   : > { %v1561_v29 = vor.u32 %v1817_v25, %v1560_v22  ;;  %v566_v39 = vpop.permute.xlu2 %565  ;;  %v1712_v25 = vld [vmem:[%s2634_s1 + $0x150] sm:$0xf] }
  0xf7   : > { %1195 = vmatpush.bf16.msrb.mxu1 %v384_v31  ;;  %v1653_v31 = vor.u32 %v1836_v27, %v1650_v28  ;;  %v1856_v27 = vld [vmem:[%s2634_s1 + $0x16c] sm:$0xf0]  ;;  %v1829_v28 = vld [vmem:[%s2634_s1 + $0x9c] sm:$0xf] }
  0xfa   : > { %v368_v40 = vpop.permute.xlu0 %367  ;;  %1074 = vmatmul.bf16.gmra.mxu2 %v1705_v32  ;;  %1196 = vmatmul.bf16.vlgmr.msrb.gmra.mxu1 %v1557_v34  ;;  %v432_v44 = vpop.permute.xlu1 %431  ;;  %v1840_v32 = vld [vmem:[%s2634_s1 + $0xec] sm:$0xf0]  ;;  %v1562_v34 = vld [vmem:[%s2634_s1 + $0x38] sm:$0xf0] }
  0xfb   : > { %1146 = vmatpush.bf16.msrb.mxu0 %v368_v40  ;;  %1293 = vmatpush.bf16.msrb.mxu3 %v432_v44  ;;  %v1649_v35 = vor.u32 %v1840_v32, %v1648_v30  ;;  %v1565_v36 = vor.u32 %v1813_v33, %v1562_v34  ;;  %v2379_v38 = vpop.f32.mrf.mxu0  ;;  %v1713_v33 = vor.u32 %v1856_v27, %v1712_v25  ;;  %v1778_v25 = vld [vmem:[%s2634_s1 + $0x1f0] sm:$0xf0] }
  0xfe   : > { %1123 = vmatmul.bf16.gmra.mxu3 %v1709_v41  ;;  %1147 = vmatmul.bf16.vlgmr.msrb.gmra.mxu0 %v1553_v42  ;;  %v2381_v41 = vpop.f32.mrf.mxu1  ;;  %v963_v42 = vadd.f32 %v962_v63, %v566_v39  ;;  %v1594_v63 = vld [vmem:[%s2634_s1 + $0x78] sm:$0xf0] }
 0x100   : > { %v2383_v44 = vadd.f32 %v1011_v1, %v963_v42 }
 0x102   : > { %v546_v62 = vpop.permute.xlu0 %545  ;;  %v551_v37 = vpop.permute.xlu1 %550 }
 0x103   : > { %v953_v0 = vadd.f32 %v2241_v13, %v546_v62  ;;  %v1832_v13 = vld [vmem:[%s2634_s1 + $0xac] sm:$0xf0]  ;;  %v955_v46 = vadd.f32 %v2254_v23, %v551_v37  ;;  %v972_v55 = vpop.f32.mrf.mxu0  ;;  %v1821_v62 = vld [vmem:[%s2634_s1 + $0x5c] sm:$0xf] }
 0x104   : > { %v1597_v3 = vor.u32 %v1821_v62, %v1594_v63  ;;  %v1864_v62 = vld [vmem:[%s2634_s1 + $0x1ac] sm:$0xf0]  ;;  %v1837_v63 = vld [vmem:[%s2634_s1 + $0xdc] sm:$0xf] }
 0x105   : > { %v1002_v2 = vadd.f32 %v2249_v17, %v953_v0  ;;  %v1617_v17 = vor.u32 %v1832_v13, %v1616_v12  ;;  %v1004_v56 = vadd.f32 %v2256_v24, %v955_v46 }
 0x10a   : > { %1079 = vmatmul.bf16.gmra.mxu2 %v1737_v52  ;;  %1201 = vmatmul.bf16.gmra.mxu1 %v1589_v54  ;;  %v561_v52 = vpop.permute.xlu1 %560  ;;  %v1682_v54 = vld [vmem:[%s2634_s1 + $0x130] sm:$0xf0] }
 0x10b   : > { %v1685_v59 = vor.u32 %v1844_v53, %v1682_v54  ;;  %v974_v9 = vpop.f32.mrf.mxu0  ;;  %v960_v12 = vadd.f32 %v2300_v50, %v561_v52  ;;  %v1656_v53 = vld [vmem:[%s2634_s1 + $0xd8] sm:$0xf] }
 0x10e   : > { %1128 = vmatmul.bf16.gmra.mxu3 %v1741_v60  ;;  %1152 = vmatmul.bf16.gmra.mxu0 %v1585_v61  ;;  %v1021_v60 = vpop.f32.mrf.mxu1  ;;  %v1848_v61 = vld [vmem:[%s2634_s1 + $0x12c] sm:$0xf0] }
 0x112   : > { %v576_v4 = vpop.permute.xlu1 %575 }
 0x113   : > { %v968_v5 = vadd.f32 %v967_v21, %v576_v4  ;;  %v1009_v21 = vadd.f32 %v2302_v51, %v960_v12 }
 0x116   : > { %v1023_v11 = vpop.f32.mrf.mxu1 }
 0x11a   : > { %1084 = vmatmul.bf16.gmra.mxu2 %v1769_v8  ;;  %1206 = vmatmul.bf16.gmra.mxu1 %v1621_v10  ;;  %v2415_v8 = vadd.f32 %v1016_v26, %v968_v5  ;;  %v1717_v26 = vor.u32 %v1852_v18, %v1714_v19 }
 0x11e   : > { %1133 = vmatmul.bf16.gmra.mxu3 %v1773_v16  ;;  %1157 = vmatmul.bf16.gmra.mxu0 %v1617_v17  ;;  %v1624_v16 = vld [vmem:[%s2634_s1 + $0x98] sm:$0xf] }
 0x11f   : > { %v1833_v17 = vld [vmem:[%s2634_s1 + $0xb4] sm:$0xf0] }
 0x120   : > { %v1625_v22 = vor.u32 %v1833_v17, %v1624_v16 }
 0x12a   : > { %1245 = vmatmul.bf16.vlgmr.msrb.gmra.mxu2 %v1561_v29  ;;  %1211 = vmatmul.bf16.gmra.mxu1 %v1653_v31  ;;  %v1626_v29 = vld [vmem:[%s2634_s1 + $0xb8] sm:$0xf0]  ;;  %v977_v31 = vpop.f32.mrf.mxu0 }
 0x12b   : > { %v1629_v34 = vor.u32 %v1829_v28, %v1626_v29  ;;  %v1776_v28 = vld [vmem:[%s2634_s1 + $0x1d0] sm:$0xf] }
 0x12d   : > { %v1050_v40 = vpop.f32.mrf.mxu2 }
 0x12e   : > { %1162 = vmatmul.bf16.gmra.mxu0 %v1649_v35  ;;  %1294 = vmatmul.bf16.vlgmr.msrb.gmra.mxu3 %v1565_v36  ;;  %v1051_v43 = vadd.f32 %v1050_v40, %v1002_v2  ;;  %v1681_v2 = vor.u32 %v1848_v61, %v1680_v58  ;;  %v1026_v35 = vpop.f32.mrf.mxu1  ;;  %v591_v36 = vpop.permute.xlu1 %590 }
 0x12f   : > { %v975_v37 = vadd.f32 %v974_v9, %v591_v36 }
 0x131   : > { %v1099_v45 = vpop.f32.mrf.mxu3 }
 0x132   : > { %v2386_v47 = vadd.f32 %v1099_v45, %v1051_v43  ;;  %v2448_v45 = vadd.f32 %v1023_v11, %v975_v37  ;;  %v979_v54 = vpop.f32.mrf.mxu0 }
 0x135   : > { %v1052_v23 = vpop.f32.mrf.mxu2 }
 0x136   : > { %v1053_v24 = vadd.f32 %v1052_v23, %v1004_v56  ;;  %v1841_v23 = vld [vmem:[%s2634_s1 + $0xf4] sm:$0xf0]  ;;  %v1028_v56 = vpop.f32.mrf.mxu1 }
 0x139   : > { %v1101_v0 = vpop.f32.mrf.mxu3 }
 0x13a   : > { %v2413_v1 = vadd.f32 %v1101_v0, %v1053_v24  ;;  %1250 = vmatmul.bf16.gmra.mxu2 %v1593_v57  ;;  %1216 = vmatmul.bf16.gmra.mxu1 %v1685_v59  ;;  %v1657_v59 = vor.u32 %v1841_v23, %v1656_v53  ;;  %v1658_v24 = vld [vmem:[%s2634_s1 + $0xf8] sm:$0xf0] }
 0x13b   : > { %v1661_v4 = vor.u32 %v1837_v63, %v1658_v24 }
 0x13d   : > { %v1055_v6 = vpop.f32.mrf.mxu2 }
 0x13e   : > { %1167 = vmatmul.bf16.gmra.mxu0 %v1681_v2  ;;  %1299 = vmatmul.bf16.gmra.mxu3 %v1597_v3  ;;  %v1056_v7 = vadd.f32 %v1055_v6, %v1007_v20  ;;  %v571_v20 = vpop.permute.xlu0 %570  ;;  %v1031_v18 = vpop.f32.mrf.mxu1 }
 0x13f   : > { %v965_v49 = vadd.f32 %v2351_v14, %v571_v20  ;;  %v581_v14 = vpop.permute.xlu2 %580 }
 0x140   : > { %v970_v20 = vadd.f32 %v2379_v38, %v581_v14 }
 0x141   : > { %v1104_v10 = vpop.f32.mrf.mxu3  ;;  %v1014_v58 = vadd.f32 %v2353_v15, %v965_v49 }
 0x142   : > { %v2418_v13 = vadd.f32 %v1104_v10, %v1056_v7  ;;  %v982_v10 = vpop.f32.mrf.mxu0  ;;  %v1019_v38 = vadd.f32 %v2381_v41, %v970_v20  ;;  %v1865_v20 = vld [vmem:[%s2634_s1 + $0x1b4] sm:$0xf0] }
 0x145   : > { %v1057_v50 = vpop.f32.mrf.mxu2 }
 0x146   : > { %v1058_v30 = vadd.f32 %v1057_v50, %v1009_v21  ;;  %v586_v39 = vpop.permute.xlu0 %585  ;;  %v1688_v21 = vld [vmem:[%s2634_s1 + $0x118] sm:$0xf] }
 0x147   : > { %v973_v42 = vadd.f32 %v972_v55, %v586_v39  ;;  %v1746_v55 = vld [vmem:[%s2634_s1 + $0x1b0] sm:$0xf0]  ;;  %v596_v6 = vpop.permute.xlu2 %595 }
 0x148   : > { %v978_v9 = vadd.f32 %v977_v31, %v596_v6  ;;  %v1845_v31 = vld [vmem:[%s2634_s1 + $0x11c] sm:$0xf] }
 0x149   : > { %v1106_v51 = vpop.f32.mrf.mxu3  ;;  %v2450_v46 = vadd.f32 %v1021_v60, %v973_v42  ;;  %v1744_v60 = vld [vmem:[%s2634_s1 + $0x190] sm:$0xf] }
 0x14a   : > { %v2445_v32 = vadd.f32 %v1106_v51, %v1058_v30  ;;  %1255 = vmatmul.bf16.gmra.mxu2 %v1625_v22  ;;  %1221 = vmatmul.bf16.gmra.mxu1 %v1717_v26  ;;  %v1745_v3 = vor.u32 %v1864_v62, %v1744_v60  ;;  %v1027_v16 = vadd.f32 %v1026_v35, %v978_v9  ;;  %v1849_v22 = vld [vmem:[%s2634_s1 + $0x134] sm:$0xf0]  ;;  %v984_v30 = vpop.f32.mrf.mxu0  ;;  %v1872_v51 = vld [vmem:[%s2634_s1 + $0x1ec] sm:$0xf0]  ;;  %v1722_v62 = vld [vmem:[%s2634_s1 + $0x178] sm:$0xf0] }
 0x14b   : > { %v1689_v27 = vor.u32 %v1849_v22, %v1688_v21  ;;  %v1777_v37 = vor.u32 %v1872_v51, %v1776_v28 }
 0x14d   : > { %v1060_v40 = vpop.f32.mrf.mxu2 }
 0x14e   : > { %1172 = vmatmul.bf16.gmra.mxu0 %v1713_v33  ;;  %1304 = vmatmul.bf16.gmra.mxu3 %v1629_v34  ;;  %v1061_v43 = vadd.f32 %v1060_v40, %v2383_v44  ;;  %v1860_v44 = vld [vmem:[%s2634_s1 + $0x194] sm:$0xf]  ;;  %v601_v5 = vpop.permute.xlu0 %600  ;;  %v1690_v33 = vld [vmem:[%s2634_s1 + $0x138] sm:$0xf0]  ;;  %v1033_v34 = vpop.f32.mrf.mxu1 }
 0x14f   : > { %v1749_v61 = vor.u32 %v1860_v44, %v1746_v55  ;;  %v980_v7 = vadd.f32 %v979_v54, %v601_v5  ;;  %v1693_v39 = vor.u32 %v1845_v31, %v1690_v33  ;;  %v606_v40 = vpop.permute.xlu1 %605  ;;  %v611_v42 = vpop.permute.xlu2 %610 }
 0x151   : > { %v1109_v48 = vpop.f32.mrf.mxu3  ;;  %v2483_v17 = vadd.f32 %v1028_v56, %v980_v7 }
 0x152   : > { %v2453_v52 = vadd.f32 %v1109_v48, %v1061_v43  ;;  %v983_v43 = vadd.f32 %v982_v10, %v606_v40  ;;  %v985_v48 = vadd.f32 %v984_v30, %v611_v42  ;;  %v987_v44 = vpop.f32.mrf.mxu0  ;;  %v1869_v42 = vld [vmem:[%s2634_s1 + $0x1dc] sm:$0xf] }
 0x154   : > { %v1032_v54 = vadd.f32 %v1031_v18, %v983_v43  ;;  %v1034_v23 = vadd.f32 %v1033_v34, %v985_v48  ;;  %v1873_v34 = vld [vmem:[%s2634_s1 + $0x1f4] sm:$0xf0]  ;;  %v1786_v43 = vld [vmem:[%s2634_s1 + $0x1f8] sm:$0xf0] }
 0x155   : > { %v1062_v57 = vpop.f32.mrf.mxu2 }
 0x156   : > { %v1063_v0 = vadd.f32 %v1062_v57, %v1014_v58  ;;  %v1036_v56 = vpop.f32.mrf.mxu1  ;;  %v1720_v57 = vld [vmem:[%s2634_s1 + $0x158] sm:$0xf]  ;;  %v616_v5 = vpop.permute.xlu0 %615 }
 0x157   : > { %v1857_v58 = vld [vmem:[%s2634_s1 + $0x174] sm:$0xf0]  ;;  %v988_v7 = vadd.f32 %v987_v44, %v616_v5 }
 0x159   : > { %v1111_v15 = vpop.f32.mrf.mxu3 }
 0x15a   : > { %v2480_v2 = vadd.f32 %v1111_v15, %v1063_v0  ;;  %1260 = vmatmul.bf16.gmra.mxu2 %v1657_v59  ;;  %1226 = vmatmul.bf16.gmra.mxu1 %v1749_v61  ;;  %v1721_v61 = vor.u32 %v1857_v58, %v1720_v57  ;;  %v989_v15 = vpop.f32.mrf.mxu0 }
 0x15d   : > { %v1065_v11 = vpop.f32.mrf.mxu2 }
 0x15e   : > { %1177 = vmatmul.bf16.gmra.mxu0 %v1745_v3  ;;  %1309 = vmatmul.bf16.gmra.mxu3 %v1661_v4  ;;  %v1066_v12 = vadd.f32 %v1065_v11, %v2415_v8  ;;  %v1868_v8 = vld [vmem:[%s2634_s1 + $0x1d4] sm:$0xf]  ;;  %v621_v3 = vpop.permute.xlu1 %620  ;;  %v1038_v6 = vpop.f32.mrf.mxu1  ;;  %v1037_v11 = vadd.f32 %v1036_v56, %v988_v7 }
 0x15f   : > { %v1781_v29 = vor.u32 %v1868_v8, %v1778_v25  ;;  %v990_v4 = vadd.f32 %v989_v15, %v621_v3  ;;  %v1754_v25 = vld [vmem:[%s2634_s1 + $0x1b8] sm:$0xf0] }
 0x161   : > { %v1114_v19 = vpop.f32.mrf.mxu3  ;;  %v1039_v10 = vadd.f32 %v1038_v6, %v990_v4 }
 0x162   : > { %v2486_v50 = vadd.f32 %v1114_v19, %v1066_v12  ;;  %v1752_v19 = vld [vmem:[%s2634_s1 + $0x198] sm:$0xf] }
 0x163   : > { %v1753_v8 = vor.u32 %v1865_v20, %v1752_v19 }
 0x165   : > { %v1067_v26 = vpop.f32.mrf.mxu2 }
 0x166   : > { %v1068_v41 = vadd.f32 %v1067_v26, %v1019_v38 }
 0x169   : > { %v1116_v35 = vpop.f32.mrf.mxu3 }
 0x16a   : > { %v2513_v36 = vadd.f32 %v1116_v35, %v1068_v41  ;;  %1265 = vmatmul.bf16.gmra.mxu2 %v1689_v27  ;;  %1231 = vmatmul.bf16.gmra.mxu1 %v1781_v29  ;;  %v1784_v41 = vld [vmem:[%s2634_s1 + $0x1d8] sm:$0xf] }
 0x16d   : > { %v1070_v49 = vpop.f32.mrf.mxu2 }
 0x16e   : > { %1182 = vmatmul.bf16.gmra.mxu0 %v1777_v37  ;;  %1314 = vmatmul.bf16.gmra.mxu3 %v1693_v39  ;;  %v1071_v53 = vadd.f32 %v1070_v49, %v2450_v46  ;;  %v1853_v46 = vld [vmem:[%s2634_s1 + $0x15c] sm:$0xf]  ;;  %v1785_v39 = vor.u32 %v1873_v34, %v1784_v41 }
 0x16f   : > { %v1725_v0 = vor.u32 %v1853_v46, %v1722_v62 }
 0x171   : > { %v1119_v55 = vpop.f32.mrf.mxu3 }
 0x172   : > { %v2516_v14 = vadd.f32 %v1119_v55, %v1071_v53  ;;  %v1789_v53 = vor.u32 %v1869_v42, %v1786_v43 }
 0x175   : > { %v1072_v59 = vpop.f32.mrf.mxu2 }
 0x176   : > { %v1073_v60 = vadd.f32 %v1072_v59, %v2448_v45 }
 0x177   : > { %v1197_v29 = vpop.f32.mrf.mxu1 }
 0x179   : > { %v1121_v63 = vpop.f32.mrf.mxu3 }
 0x17a   : > { %v2531_v24 = vadd.f32 %v1121_v63, %v1073_v60  ;;  %1270 = vmatmul.bf16.gmra.mxu2 %v1721_v61 }
 0x17b   : > { %v1148_v26 = vpop.f32.mrf.mxu0 }
 0x17c   : > { %v1149_v46 = vadd.f32 %v1148_v26, %v2386_v47 }
 0x17d   : > { %v1075_v45 = vpop.f32.mrf.mxu2 }
 0x17e   : > { %1319 = vmatmul.bf16.gmra.mxu3 %v1725_v0  ;;  %v1076_v9 = vadd.f32 %v1075_v45, %v1027_v16  ;;  %v1861_v16 = vld [vmem:[%s2634_s1 + $0x19c] sm:$0xf]  ;;  %v1198_v15 = vadd.f32 %v1197_v29, %v1149_v46 }
 0x17f   : > { %v1757_v28 = vor.u32 %v1861_v16, %v1754_v25  ;;  %v1199_v40 = vpop.f32.mrf.mxu1 }
 0x181   : > { %v1124_v12 = vpop.f32.mrf.mxu3 }
 0x182   : > { %v2533_v18 = vadd.f32 %v1124_v12, %v1076_v9 }
 0x183   : > { %v1150_v33 = vpop.f32.mrf.mxu0 }
 0x184   : > { %v1151_v6 = vadd.f32 %v1150_v33, %v2413_v1 }
 0x185   : > { %v1077_v21 = vpop.f32.mrf.mxu2 }
 0x186   : > { %v1078_v22 = vadd.f32 %v1077_v21, %v2483_v17 }
 0x189   : > { %v1126_v38 = vpop.f32.mrf.mxu3 }
 0x18a   : > { %v2548_v27 = vadd.f32 %v1126_v38, %v1078_v22  ;;  %1275 = vmatmul.bf16.gmra.mxu2 %v1753_v8 }
 0x18d   : > { %v1080_v30 = vpop.f32.mrf.mxu2 }
 0x18e   : > { %1324 = vmatmul.bf16.gmra.mxu3 %v1757_v28  ;;  %v1081_v51 = vadd.f32 %v1080_v30, %v1032_v54  ;;  %v1153_v54 = vpop.f32.mrf.mxu0 }
 0x18f   : > { %v1154_v1 = vadd.f32 %v1153_v54, %v2418_v13 }
 0x191   : > { %v1129_v17 = vpop.f32.mrf.mxu3 }
 0x192   : > { %v2550_v31 = vadd.f32 %v1129_v17, %v1081_v51 }
 0x195   : > { %v1082_v35 = vpop.f32.mrf.mxu2 }
 0x196   : > { %v1083_v37 = vadd.f32 %v1082_v35, %v1034_v23  ;;  %v1202_v23 = vpop.f32.mrf.mxu1  ;;  %v1155_v60 = vpop.f32.mrf.mxu0 }
 0x197   : > { %v1203_v16 = vadd.f32 %v1202_v23, %v1154_v1  ;;  %v1156_v29 = vadd.f32 %v1155_v60, %v2445_v32 }
 0x199   : > { %v1131_v48 = vpop.f32.mrf.mxu3 }
 0x19a   : > { %v2564_v49 = vadd.f32 %v1131_v48, %v1083_v37  ;;  %1280 = vmatmul.bf16.gmra.mxu2 %v1785_v39 }
 0x19d   : > { %v1085_v44 = vpop.f32.mrf.mxu2 }
 0x19e   : > { %1329 = vmatmul.bf16.gmra.mxu3 %v1789_v53  ;;  %v1086_v55 = vadd.f32 %v1085_v44, %v1037_v11  ;;  %v1204_v63 = vpop.f32.mrf.mxu1  ;;  %v1158_v4 = vpop.f32.mrf.mxu0 }
 0x19f   : > { %v1205_v13 = vadd.f32 %v1204_v63, %v1156_v29  ;;  %v1159_v39 = vadd.f32 %v1158_v4, %v2453_v52 }
 0x1a1   : > { %v1134_v56 = vpop.f32.mrf.mxu3 }
 0x1a2   : > { %v2566_v57 = vadd.f32 %v1134_v56, %v1086_v55 }
 0x1a5   : > { %v1087_v58 = vpop.f32.mrf.mxu2 }
 0x1a6   : > { %v1088_v59 = vadd.f32 %v1087_v58, %v1039_v10  ;;  %v1207_v9 = vpop.f32.mrf.mxu1  ;;  %v1200_v10 = vadd.f32 %v1199_v40, %v1151_v6  ;;  %v1160_v21 = vpop.f32.mrf.mxu0 }
 0x1a7   : > { %v1208_v48 = vadd.f32 %v1207_v9, %v1159_v39  ;;  %v1161_v55 = vadd.f32 %v1160_v21, %v2480_v2 }
 0x1a9   : > { %v1136_v61 = vpop.f32.mrf.mxu3 }
 0x1aa   : > { %v2569_v62 = vadd.f32 %v1136_v61, %v1088_v59 }
 0x1ad   : > { %v1246_v0 = vpop.f32.mrf.mxu2 }
 0x1ae   : > { %v1247_v3 = vadd.f32 %v1246_v0, %v1198_v15  ;;  %v1209_v26 = vpop.f32.mrf.mxu1  ;;  %v1163_v17 = vpop.f32.mrf.mxu0 }
 0x1af   : > { %v1210_v60 = vadd.f32 %v1209_v26, %v1161_v55  ;;  %v1164_v0 = vadd.f32 %v1163_v17, %v2486_v50 }
 0x1b1   : > { %v1295_v5 = vpop.f32.mrf.mxu3 }
 0x1b2   : > { %v1296_v45 = vadd.f32 %v1295_v5, %v1247_v3 }
 0x1b4   : > { %v1335_v7 = vmax.f32 %v1296_v45, 0.0 }
 0x1b5   : > { %v1248_v47 = vpop.f32.mrf.mxu2 }
 0x1b6   : > { %v1351_v11 = vpack.c.bf16 %v1335_v7, %v1335_v7  ;;  %v1249_v12 = vadd.f32 %v1248_v47, %v1200_v10  ;;  %v1212_v35 = vpop.f32.mrf.mxu1  ;;  %v1165_v53 = vpop.f32.mrf.mxu0 }
 0x1b7   : > { %v1213_v2 = vadd.f32 %v1212_v35, %v1164_v0  ;;  %v1166_v9 = vadd.f32 %v1165_v53, %v2513_v36 }
 0x1b8   : > { %1368 = vst.msk [vmem:[%s2576_s11] sm:$0xf] %vm1367_vm0, %v1351_v11 }
 0x1b9   : > { %v1297_v19 = vpop.f32.mrf.mxu3 }
 0x1ba   : > { %v1298_v20 = vadd.f32 %v1297_v19, %v1249_v12 }
 0x1bc   : > { %v1336_v22 = vmax.f32 %v1298_v20, 0.0 }
 0x1bd   : > { %v1251_v8 = vpop.f32.mrf.mxu2 }
 0x1be   : > { %v1352_v25 = vpack.c.bf16 %v1336_v22, %v1336_v22  ;;  %v1252_v38 = vadd.f32 %v1251_v8, %v1203_v16  ;;  %v1214_v56 = vpop.f32.mrf.mxu1  ;;  %v1168_v46 = vpop.f32.mrf.mxu0 }
 0x1bf   : > { %v1215_v19 = vadd.f32 %v1214_v56, %v1166_v9  ;;  %v1169_v22 = vadd.f32 %v1168_v46, %v2516_v14 }
 0x1c0   : > { %1369 = vst.msk [vmem:[%s2576_s11 + $0x4] sm:$0xf] %vm1367_vm0, %v1352_v25 }
 0x1c1   : > { %v1300_v28 = vpop.f32.mrf.mxu3 }
 0x1c2   : > { %v1301_v30 = vadd.f32 %v1300_v28, %v1252_v38 }
 0x1c4   : > { %v1337_v51 = vmax.f32 %v1301_v30, 0.0 }
 0x1c5   : > { %v1253_v33 = vpop.f32.mrf.mxu2 }
 0x1c6   : > { %v1353_v41 = vpack.c.bf16 %v1337_v51, %v1337_v51  ;;  %v1254_v34 = vadd.f32 %v1253_v33, %v1205_v13  ;;  %v1217_v4 = vpop.f32.mrf.mxu1  ;;  %v1170_v10 = vpop.f32.mrf.mxu0 }
 0x1c7   : > { %v1218_v36 = vadd.f32 %v1217_v4, %v1169_v22  ;;  %v1171_v51 = vadd.f32 %v1170_v10, %v2531_v24 }
 0x1c8   : > { %1370 = vst.msk [vmem:[%s2576_s11 + $0x8] sm:$0xf] %vm1367_vm0, %v1353_v41 }
 0x1c9   : > { %v1302_v37 = vpop.f32.mrf.mxu3 }
 0x1ca   : > { %v1303_v40 = vadd.f32 %v1302_v37, %v1254_v34 }
 0x1cc   : > { %v1338_v42 = vmax.f32 %v1303_v40, 0.0 }
 0x1cd   : > { %v1256_v43 = vpop.f32.mrf.mxu2 }
 0x1ce   : > { %v1354_v32 = vpack.c.bf16 %v1338_v42, %v1338_v42  ;;  %v1257_v54 = vadd.f32 %v1256_v43, %v1208_v48  ;;  %v1219_v1 = vpop.f32.mrf.mxu1  ;;  %v1173_v25 = vpop.f32.mrf.mxu0 }
 0x1cf   : > { %v1220_v41 = vadd.f32 %v1219_v1, %v1171_v51  ;;  %v1174_v39 = vadd.f32 %v1173_v25, %v2533_v18 }
 0x1d0   : > { %1371 = vst.msk [vmem:[%s2576_s11 + $0xc] sm:$0xf] %vm1367_vm0, %v1354_v32 }
 0x1d1   : > { %v1305_v44 = vpop.f32.mrf.mxu3 }
 0x1d2   : > { %v1306_v23 = vadd.f32 %v1305_v44, %v1257_v54 }
 0x1d4   : > { %v1339_v58 = vmax.f32 %v1306_v23, 0.0 }
 0x1d5   : > { %v1258_v59 = vpop.f32.mrf.mxu2 }
 0x1d6   : > { %v1355_v52 = vpack.c.bf16 %v1339_v58, %v1339_v58  ;;  %v1259_v61 = vadd.f32 %v1258_v59, %v1210_v60  ;;  %v1222_v29 = vpop.f32.mrf.mxu1  ;;  %v1175_v34 = vpop.f32.mrf.mxu0 }
 0x1d7   : > { %v1223_v32 = vadd.f32 %v1222_v29, %v1174_v39  ;;  %v1176_v55 = vadd.f32 %v1175_v34, %v2548_v27 }
 0x1d8   : > { %1372 = vst.msk [vmem:[%s2576_s11 + $0x10] sm:$0xf] %vm1367_vm0, %v1355_v52 }
 0x1d9   : > { %v1307_v63 = vpop.f32.mrf.mxu3 }
 0x1da   : > { %v1308_v15 = vadd.f32 %v1307_v63, %v1259_v61 }
 0x1dc   : > { %v1340_v3 = vmax.f32 %v1308_v15, 0.0 }
 0x1dd   : > { %v1261_v5 = vpop.f32.mrf.mxu2 }
 0x1de   : > { %v1356_v6 = vpack.c.bf16 %v1340_v3, %v1340_v3  ;;  %v1262_v45 = vadd.f32 %v1261_v5, %v1213_v2  ;;  %v1224_v42 = vpop.f32.mrf.mxu1  ;;  %v1178_v54 = vpop.f32.mrf.mxu0 }
 0x1df   : > { %v1225_v18 = vadd.f32 %v1224_v42, %v1176_v55  ;;  %v1179_v46 = vadd.f32 %v1178_v54, %v2550_v31 }
 0x1e0   : > { %1373 = vst.msk [vmem:[%s2576_s11 + $0x14] sm:$0xf] %vm1367_vm0, %v1356_v6 }
 0x1e1   : > { %v1310_v7 = vpop.f32.mrf.mxu3 }
 0x1e2   : > { %v1311_v47 = vadd.f32 %v1310_v7, %v1262_v45 }
 0x1e4   : > { %v1341_v11 = vmax.f32 %v1311_v47, 0.0 }
 0x1e5   : > { %v1263_v12 = vpop.f32.mrf.mxu2 }
 0x1e6   : > { %v1357_v50 = vpack.c.bf16 %v1341_v11, %v1341_v11  ;;  %v1264_v20 = vadd.f32 %v1263_v12, %v1215_v19  ;;  %v1227_v58 = vpop.f32.mrf.mxu1  ;;  %v1180_v0 = vpop.f32.mrf.mxu0 }
 0x1e7   : > { %v1228_v4 = vadd.f32 %v1227_v58, %v1179_v46  ;;  %v1181_v45 = vadd.f32 %v1180_v0, %v2564_v49 }
 0x1e8   : > { %1374 = vst.msk [vmem:[%s2576_s11 + $0x18] sm:$0xf] %vm1367_vm0, %v1357_v50 }
 0x1e9   : > { %v1312_v21 = vpop.f32.mrf.mxu3 }
 0x1ea   : > { %v1313_v8 = vadd.f32 %v1312_v21, %v1264_v20 }
 0x1ec   : > { %v1342_v16 = vmax.f32 %v1313_v8, 0.0 }
 0x1ed   : > { %v1266_v26 = vpop.f32.mrf.mxu2 }
 0x1ee   : > { %v1358_v38 = vpack.c.bf16 %v1342_v16, %v1342_v16  ;;  %v1267_v28 = vadd.f32 %v1266_v26, %v1218_v36  ;;  %v1229_v5 = vpop.f32.mrf.mxu1  ;;  %v1183_v47 = vpop.f32.mrf.mxu0 }
 0x1ef   : > { %v1230_v31 = vadd.f32 %v1229_v5, %v1181_v45  ;;  %v1184_v1 = vadd.f32 %v1183_v47, %v2566_v57 }
 0x1f0   : > { %1375 = vst.msk [vmem:[%s2576_s11 + $0x1c] sm:$0xf] %vm1367_vm0, %v1358_v38 }
 0x1f1   : > { %v1315_v30 = vpop.f32.mrf.mxu3 }
 0x1f2   : > { %v1316_v17 = vadd.f32 %v1315_v30, %v1267_v28 }
 0x1f4   : > { %v1343_v33 = vmax.f32 %v1316_v17, 0.0 }
 0x1f5   : > { %v1268_v13 = vpop.f32.mrf.mxu2 }
 0x1f6   : > { %v1359_v14 = vpack.c.bf16 %v1343_v33, %v1343_v33  ;;  %v1269_v35 = vadd.f32 %v1268_v13, %v1220_v41  ;;  %v1232_v19 = vpop.f32.mrf.mxu1  ;;  %v1185_v16 = vpop.f32.mrf.mxu0 }
 0x1f7   : > { %v1233_v8 = vadd.f32 %v1232_v19, %v1184_v1  ;;  %v1186_v36 = vadd.f32 %v1185_v16, %v2569_v62 }
 0x1f8   : > { %1376 = vst.msk [vmem:[%s2576_s11 + $0x20] sm:$0xf] %vm1367_vm0, %v1359_v14 }
 0x1f9   : > { %v1317_v37 = vpop.f32.mrf.mxu3 }
 0x1fa   : > { %v1318_v40 = vadd.f32 %v1317_v37, %v1269_v35 }
 0x1fc   : > { %v1344_v43 = vmax.f32 %v1318_v40, 0.0 }
 0x1fd   : > { %v1271_v48 = vpop.f32.mrf.mxu2 }
 0x1fe   : > { %v1360_v24 = vpack.c.bf16 %v1344_v43, %v1344_v43  ;;  %v1272_v53 = vadd.f32 %v1271_v48, %v1223_v32  ;;  %v1234_v28 = vpop.f32.mrf.mxu1 }
 0x1ff   : > { %v1235_v51 = vadd.f32 %v1234_v28, %v1186_v36 }
 0x200   : > { %1377 = vst.msk [vmem:[%s2576_s11 + $0x24] sm:$0xf] %vm1367_vm0, %v1360_v24 }
 0x201   : > { %v1320_v44 = vpop.f32.mrf.mxu3 }
 0x202   : > { %v1321_v23 = vadd.f32 %v1320_v44, %v1272_v53 }
 0x204   : > { %v1345_v56 = vmax.f32 %v1321_v23, 0.0 }
 0x205   : > { %v1273_v59 = vpop.f32.mrf.mxu2 }
 0x206   : > { %v1361_v60 = vpack.c.bf16 %v1345_v56, %v1345_v56  ;;  %v1274_v52 = vadd.f32 %v1273_v59, %v1225_v18 }
 0x208   : > { %1378 = vst.msk [vmem:[%s2576_s11 + $0x28] sm:$0xf] %vm1367_vm0, %v1361_v60 }
 0x209   : > { %v1322_v61 = vpop.f32.mrf.mxu3 }
 0x20a   : > { %v1323_v63 = vadd.f32 %v1322_v61, %v1274_v52 }
 0x20c   : > { %v1346_v15 = vmax.f32 %v1323_v63, 0.0 }
 0x20d   : > { %v1276_v3 = vpop.f32.mrf.mxu2 }
 0x20e   : > { %v1362_v27 = vpack.c.bf16 %v1346_v15, %v1346_v15  ;;  %v1277_v2 = vadd.f32 %v1276_v3, %v1228_v4 }
 0x210   : > { %1379 = vst.msk [vmem:[%s2576_s11 + $0x2c] sm:$0xf] %vm1367_vm0, %v1362_v27 }
 0x211   : > { %v1325_v6 = vpop.f32.mrf.mxu3 }
 0x212   : > { %v1326_v7 = vadd.f32 %v1325_v6, %v1277_v2 }
 0x214   : > { %v1347_v9 = vmax.f32 %v1326_v7, 0.0 }
 0x215   : > { %v1278_v10 = vpop.f32.mrf.mxu2 }
 0x216   : > { %v1363_v11 = vpack.c.bf16 %v1347_v9, %v1347_v9  ;;  %v1279_v12 = vadd.f32 %v1278_v10, %v1230_v31 }
 0x218   : > { %1380 = vst.msk [vmem:[%s2576_s11 + $0x30] sm:$0xf] %vm1367_vm0, %v1363_v11 }
 0x219   : > { %v1327_v50 = vpop.f32.mrf.mxu3 }
 0x21a   : > { %v1328_v20 = vadd.f32 %v1327_v50, %v1279_v12 }
 0x21c   : > { %v1348_v21 = vmax.f32 %v1328_v20, 0.0 }
 0x21d   : > { %v1281_v22 = vpop.f32.mrf.mxu2 }
 0x21e   : > { %v1364_v49 = vpack.c.bf16 %v1348_v21, %v1348_v21  ;;  %v1282_v25 = vadd.f32 %v1281_v22, %v1233_v8 }
 0x220   : > { %1381 = vst.msk [vmem:[%s2576_s11 + $0x34] sm:$0xf] %vm1367_vm0, %v1364_v49 }
 0x221   : > { %v1330_v26 = vpop.f32.mrf.mxu3 }
 0x222   : > { %v1331_v38 = vadd.f32 %v1330_v26, %v1282_v25 }
 0x224   : > { %v1349_v29 = vmax.f32 %v1331_v38, 0.0 }
 0x225   : > { %v1283_v30 = vpop.f32.mrf.mxu2 }
 0x226   : > { %v1365_v57 = vpack.c.bf16 %v1349_v29, %v1349_v29  ;;  %v1284_v17 = vadd.f32 %v1283_v30, %v1235_v51 }
 0x228   : > { %1382 = vst.msk [vmem:[%s2576_s11 + $0x38] sm:$0xf] %vm1367_vm0, %v1365_v57 }
 0x229   : > { %v1332_v33 = vpop.f32.mrf.mxu3 }
 0x22a   : > { %v1333_v13 = vadd.f32 %v1332_v33, %v1284_v17 }
 0x22c   : > { %v1350_v41 = vmax.f32 %v1333_v13, 0.0 }
 0x22e   : > { %v1366_v14 = vpack.c.bf16 %v1350_v41, %v1350_v41 }
 0x230   : > { %1383 = vst.msk [vmem:[%s2576_s11 + $0x3c] sm:$0xf] %vm1367_vm0, %v1366_v14 }
 0x231 PF: > { %s13_s14 = sadd.s32 1, %s1927_s14   ;;  %s2637_s12 = smov %s1923_s13 }
 0x232   : > { %p10_p5 = scmp.ge.s32.totalorder %s13_s14, 4   ;;  %s2638_s13 = smov %s2640_s15 }
 0x234   :  { %12 = sbr.rel (!%p10_p5) target bundleno = 2 (0x2), region = 62 }

// kernel: forward.38
= control target key start
LH: loop header
LB: loop body
LE: loop exit
PB: predicated region body
PF: predicated region fallthrough
CT: control target
= control target key end

     0   :  { %s726_s12 = smov 0   ;;  %s728_s13 = smov 0   ;;  %s877_s0 = inlined_call_operand.vmem [shape: bf16[2,64,16], index: 0, kind: input, shape index: {}]   ;;  %s878_s1 = inlined_call_operand.vmem [shape: bf16[128,64], index: 1, kind: input, shape index: {}]   ;;  %s879_s2 = inlined_call_operand.vmem [shape: f32[128,1], index: 2, kind: input, shape index: {}]   ;;  %s880_s3 = inlined_call_operand.vmem [shape: bf16[2,128,16], index: 3, kind: output, shape index: {}]  }
   0x1   :  { %s730_s14 = smov 0  }
   0x2 LB: > { %s25_s15 = sadd.s32 1, %s699_s13  ;;  %p564_p0 = scmp.ge.s32.totalorder %s703_s14, 1  ;;  %s703_s14 = sphi %s730_s14, %s13_s14   ;;  %s699_s13 = sphi %s728_s13, %s882_s13   ;;  %s695_s12 = sphi %s726_s12, %s881_s12  }
   0x3   : > { %p27_p1 = scmp.ge.s32.totalorder %s25_s15, 2  ;;  %p151_p2 = scmp.lt.s32.totalorder %s703_s14, 3 }
   0x5   : > { %s884_s15 = smov (%p27_p1, %s25_s15), 0  ;;  %p152_p3 = pnand %p564_p0, %p151_p2 }
   0x6   : > { %p178_p4 = scmp.lt.s32.totalorder (!%p152_p3), %s695_s12, 1 }
   0x7   : > { %155 = sbr.rel (%p152_p3) target bundleno = 195 (0xc3), region = 32 }
   0xc   : > { %v218_v0 = vld [vmem:[%s879_s2 + $0x10] sm:$0xff]  ;;  %v216_v1 = vld [vmem:[%s879_s2] sm:$0xff]  ;;  %v705_v2 = vmov 0   ;;  %s886_s12 = smov (!%p178_p4, %s695_s12), 1  ;;  %v219_v5 = vld [vmem:[%s879_s2 + $0x18] sm:$0xff]  ;;  %vm376_vm0 = vcmask 523264  }
   0xd   : > { %679 = vset.pattern.permute.xlu1 %v705_v2  ;;  %678 = vset.pattern.permute.xlu0 %v705_v2  ;;  %v220_v3 = vld [vmem:[%s879_s2 + $0x20] sm:$0xff]  ;;  %s627_s22 = sshll.u32 %s886_s12, 5  ;;  %v217_v6 = vld [vmem:[%s879_s2 + $0x8] sm:$0xff]  ;;  %v223_v10 = vld [vmem:[%s879_s2 + $0x38] sm:$0xff]  ;;  %vm466_vm1 = vcmask 125952  }
   0xe   : > { %244 = vperm.xlu1 %679, %v218_v0   ;;  %234 = vperm.xlu0 %678, %v216_v1   ;;  %s182_s25 = scalar_lea.vmem %s877_s0, %s627_s22  ;;  %v221_v8 = vld [vmem:[%s879_s2 + $0x28] sm:$0xff]  ;;  %v222_v11 = vld [vmem:[%s879_s2 + $0x30] sm:$0xff]  ;;  %v633_v13 = vld [vmem:[%s878_s1] sm:$0xff]  ;;  %s628_s22 = sshll.u32 %s886_s12, 6 }
   0xf   : > { %680 = vset.pattern.permute.xlu2 %v705_v2  ;;  %v632_v4 = vld [vmem:[%s182_s25 + $0x18] sm:$0xff]  ;;  %v631_v7 = vld [vmem:[%s182_s25 + $0x10] sm:$0xff]  ;;  %v630_v9 = vld [vmem:[%s182_s25 + $0x8] sm:$0xff] }
  0x10   : > { %254 = vperm.xlu2 %680, %v220_v3   ;;  %405 = vmatpush.bf16.msra.mxu0 %v632_v4  ;;  %v629_v12 = vld [vmem:[%s182_s25] sm:$0xff]  ;;  %v635_v14 = vld [vmem:[%s878_s1 + $0x10] sm:$0xff]  ;;  %v225_v19 = vld [vmem:[%s879_s2 + $0x48] sm:$0xff]  ;;  %s834_s25 = scalar_lea.vmem %s880_s3, %s628_s22 }
  0x11   : > { %641 = vmatpush.bf16.msra.mxu1 %v632_v4  ;;  %642 = vmatpush.bf16.msra.mxu2 %v632_v4  ;;  %v224_v15 = vld [vmem:[%s879_s2 + $0x40] sm:$0xff]  ;;  %v639_v17 = vld [vmem:[%s878_s1 + $0x30] sm:$0xff]  ;;  %v227_v20 = vld [vmem:[%s879_s2 + $0x58] sm:$0xff] }
  0x12   : > { %643 = vmatpush.bf16.msra.mxu3 %v632_v4  ;;  %v637_v16 = vld [vmem:[%s878_s1 + $0x20] sm:$0xff]  ;;  %v226_v18 = vld [vmem:[%s879_s2 + $0x50] sm:$0xff]  ;;  %v229_v21 = vld [vmem:[%s879_s2 + $0x68] sm:$0xff] }
  0x13   : > { %v228_v22 = vld [vmem:[%s879_s2 + $0x60] sm:$0xff]  ;;  %v634_v23 = vld [vmem:[%s878_s1 + $0x8] sm:$0xff]  ;;  %v636_v24 = vld [vmem:[%s878_s1 + $0x18] sm:$0xff] }
  0x14   : > { %406 = vmatpush.bf16.msra.mxu0 %v631_v7  ;;  %v230_v25 = vld [vmem:[%s879_s2 + $0x70] sm:$0xff]  ;;  %v638_v26 = vld [vmem:[%s878_s1 + $0x28] sm:$0xff]  ;;  %v640_v27 = vld [vmem:[%s878_s1 + $0x38] sm:$0xff] }
  0x15   : > { %644 = vmatpush.bf16.msra.mxu1 %v631_v7  ;;  %645 = vmatpush.bf16.msra.mxu2 %v631_v7  ;;  %v231_v28 = vld [vmem:[%s879_s2 + $0x78] sm:$0xff] }
  0x16   : > { %249 = vperm.xlu1 %679, %v219_v5   ;;  %239 = vperm.xlu0 %678, %v217_v6  }
  0x17   : > { %646 = vmatpush.bf16.msra.mxu3 %v631_v7 }
  0x18   : > { %259 = vperm.xlu2 %680, %v221_v8   ;;  %407 = vmatpush.bf16.msra.mxu0 %v630_v9 }
  0x19   : > { %647 = vmatpush.bf16.msra.mxu1 %v630_v9  ;;  %648 = vmatpush.bf16.msra.mxu2 %v630_v9 }
  0x1b   : > { %649 = vmatpush.bf16.msra.mxu3 %v630_v9 }
  0x1c   : > { %408 = vmatpush.bf16.msra.mxu0 %v629_v12 }
  0x1d   : > { %650 = vmatpush.bf16.msra.mxu1 %v629_v12  ;;  %651 = vmatpush.bf16.msra.mxu2 %v629_v12 }
  0x1e   : > { %269 = vperm.xlu1 %679, %v223_v10   ;;  %264 = vperm.xlu0 %678, %v222_v11  }
  0x1f   : > { %652 = vmatpush.bf16.msra.mxu3 %v629_v12  ;;  %617 = vmatmul.msk.bf16.vlgmr.msra.gmra.mxu0 %vm376_vm0, %v633_v13 }
  0x20   : > { %274 = vperm.xlu2 %680, %v224_v15   ;;  %619 = vmatmul.msk.bf16.vlgmr.msra.gmra.mxu1 %vm376_vm0, %v635_v14 }
  0x21   : > { %621 = vmatmul.msk.bf16.vlgmr.msra.gmra.mxu2 %vm376_vm0, %v637_v16 }
  0x22   : > { %623 = vmatmul.msk.bf16.vlgmr.msra.gmra.mxu3 %vm376_vm0, %v639_v17 }
  0x26   : > { %284 = vperm.xlu1 %679, %v226_v18   ;;  %279 = vperm.xlu0 %678, %v225_v19  }
  0x28   : > { %289 = vperm.xlu2 %680, %v227_v20  }
  0x2e   : > { %299 = vperm.xlu1 %679, %v229_v21   ;;  %294 = vperm.xlu0 %678, %v228_v22  }
  0x2f   : > { %618 = vmatmul.msk.bf16.gmra.mxu0 %vm376_vm0, %v634_v23 }
  0x30   : > { %304 = vperm.xlu2 %680, %v230_v25   ;;  %620 = vmatmul.msk.bf16.gmra.mxu1 %vm376_vm0, %v636_v24 }
  0x31   : > { %622 = vmatmul.msk.bf16.gmra.mxu2 %vm376_vm0, %v638_v26 }
  0x32   : > { %624 = vmatmul.msk.bf16.gmra.mxu3 %vm376_vm0, %v640_v27 }
  0x36   : > { %309 = vperm.xlu0 %678, %v231_v28  }
  0x6a   : > { %v255_v32 = vpop.permute.xlu2 %254 }
  0x72   : > { %v260_v35 = vpop.permute.xlu2 %259 }
  0x7a   : > { %v275_v40 = vpop.permute.xlu2 %274 }
  0x80   : > { %v235_v29 = vpop.permute.xlu0 %234  ;;  %v245_v30 = vpop.permute.xlu1 %244 }
  0x82   : > { %v290_v57 = vpop.permute.xlu2 %289 }
  0x88   : > { %v240_v31 = vpop.permute.xlu0 %239  ;;  %v250_v33 = vpop.permute.xlu1 %249 }
  0x8a   : > { %v305_v9 = vpop.permute.xlu2 %304 }
  0x90   : > { %v265_v34 = vpop.permute.xlu0 %264  ;;  %v270_v36 = vpop.permute.xlu1 %269 }
  0x98   : > { %v280_v37 = vpop.permute.xlu0 %279  ;;  %v285_v43 = vpop.permute.xlu1 %284 }
  0x9c   : > { %v410_v38 = vpop.f32.mrf.mxu0 }
  0x9d   : > { %v420_v39 = vpop.f32.mrf.mxu1  ;;  %v411_v41 = vadd.f32 %v410_v38, %v235_v29 }
  0x9e   : > { %v421_v42 = vadd.f32 %v420_v39, %v255_v32 }
  0x9f   : > { %v450_v44 = vpack.c.bf16 %v411_v41, %v411_v41 }
  0xa0   : > { %v454_v45 = vpack.c.bf16 %v421_v42, %v421_v42  ;;  %v295_v46 = vpop.permute.xlu0 %294  ;;  %v300_v60 = vpop.permute.xlu1 %299 }
  0xa1   : > { %467 = vst.msk [vmem:[%s834_s25] sm:$0xf] %vm466_vm1, %v450_v44 }
  0xa2   : > { %471 = vst.msk [vmem:[%s834_s25 + $0x10] sm:$0xf] %vm466_vm1, %v454_v45 }
  0xa4   : > { %v430_v47 = vpop.f32.mrf.mxu2  ;;  %v412_v51 = vpop.f32.mrf.mxu0 }
  0xa5   : > { %v440_v48 = vpop.f32.mrf.mxu3  ;;  %v431_v49 = vadd.f32 %v430_v47, %v275_v40  ;;  %v422_v52 = vpop.f32.mrf.mxu1  ;;  %v413_v55 = vadd.f32 %v412_v51, %v240_v31 }
  0xa6   : > { %v441_v50 = vadd.f32 %v440_v48, %v295_v46  ;;  %v423_v56 = vadd.f32 %v422_v52, %v260_v35 }
  0xa7   : > { %v458_v53 = vpack.c.bf16 %v431_v49, %v431_v49  ;;  %v451_v58 = vpack.c.bf16 %v413_v55, %v413_v55 }
  0xa8   : > { %v462_v54 = vpack.c.bf16 %v441_v50, %v441_v50  ;;  %v455_v59 = vpack.c.bf16 %v423_v56, %v423_v56  ;;  %v310_v22 = vpop.permute.xlu0 %309 }
  0xa9   : > { %475 = vst.msk [vmem:[%s834_s25 + $0x20] sm:$0xf] %vm466_vm1, %v458_v53 }
  0xaa   : > { %479 = vst.msk [vmem:[%s834_s25 + $0x30] sm:$0xf] %vm466_vm1, %v462_v54 }
  0xab   : > { %468 = vst.msk [vmem:[%s834_s25 + $0x4] sm:$0xf] %vm466_vm1, %v451_v58 }
  0xac   : > { %472 = vst.msk [vmem:[%s834_s25 + $0x14] sm:$0xf] %vm466_vm1, %v455_v59  ;;  %v432_v61 = vpop.f32.mrf.mxu2  ;;  %v415_v1 = vpop.f32.mrf.mxu0 }
  0xad   : > { %v442_v62 = vpop.f32.mrf.mxu3  ;;  %v433_v63 = vadd.f32 %v432_v61, %v280_v37  ;;  %v425_v2 = vpop.f32.mrf.mxu1  ;;  %v416_v5 = vadd.f32 %v415_v1, %v245_v30 }
  0xae   : > { %v443_v0 = vadd.f32 %v442_v62, %v300_v60  ;;  %v426_v6 = vadd.f32 %v425_v2, %v265_v34 }
  0xaf   : > { %v459_v3 = vpack.c.bf16 %v433_v63, %v433_v63  ;;  %v452_v7 = vpack.c.bf16 %v416_v5, %v416_v5 }
  0xb0   : > { %v463_v4 = vpack.c.bf16 %v443_v0, %v443_v0  ;;  %v456_v8 = vpack.c.bf16 %v426_v6, %v426_v6 }
  0xb1   : > { %476 = vst.msk [vmem:[%s834_s25 + $0x24] sm:$0xf] %vm466_vm1, %v459_v3 }
  0xb2   : > { %480 = vst.msk [vmem:[%s834_s25 + $0x34] sm:$0xf] %vm466_vm1, %v463_v4 }
  0xb3   : > { %469 = vst.msk [vmem:[%s834_s25 + $0x8] sm:$0xf] %vm466_vm1, %v452_v7 }
  0xb4   : > { %473 = vst.msk [vmem:[%s834_s25 + $0x18] sm:$0xf] %vm466_vm1, %v456_v8  ;;  %v435_v10 = vpop.f32.mrf.mxu2  ;;  %v417_v14 = vpop.f32.mrf.mxu0 }
  0xb5   : > { %v445_v11 = vpop.f32.mrf.mxu3  ;;  %v436_v12 = vadd.f32 %v435_v10, %v285_v43  ;;  %v427_v15 = vpop.f32.mrf.mxu1  ;;  %v418_v18 = vadd.f32 %v417_v14, %v250_v33 }
  0xb6   : > { %v446_v13 = vadd.f32 %v445_v11, %v305_v9  ;;  %v428_v19 = vadd.f32 %v427_v15, %v270_v36 }
  0xb7   : > { %v460_v16 = vpack.c.bf16 %v436_v12, %v436_v12  ;;  %v453_v20 = vpack.c.bf16 %v418_v18, %v418_v18 }
  0xb8   : > { %v464_v17 = vpack.c.bf16 %v446_v13, %v446_v13  ;;  %v457_v21 = vpack.c.bf16 %v428_v19, %v428_v19 }
  0xb9   : > { %477 = vst.msk [vmem:[%s834_s25 + $0x28] sm:$0xf] %vm466_vm1, %v460_v16 }
  0xba   : > { %481 = vst.msk [vmem:[%s834_s25 + $0x38] sm:$0xf] %vm466_vm1, %v464_v17 }
  0xbb   : > { %470 = vst.msk [vmem:[%s834_s25 + $0xc] sm:$0xf] %vm466_vm1, %v453_v20 }
  0xbc   : > { %474 = vst.msk [vmem:[%s834_s25 + $0x1c] sm:$0xf] %vm466_vm1, %v457_v21  ;;  %v437_v23 = vpop.f32.mrf.mxu2 }
  0xbd   : > { %v447_v24 = vpop.f32.mrf.mxu3  ;;  %v438_v25 = vadd.f32 %v437_v23, %v290_v57 }
  0xbe   : > { %v448_v26 = vadd.f32 %v447_v24, %v310_v22 }
  0xbf   : > { %v461_v27 = vpack.c.bf16 %v438_v25, %v438_v25 }
  0xc0   : > { %v465_v28 = vpack.c.bf16 %v448_v26, %v448_v26 }
  0xc1   : > { %478 = vst.msk [vmem:[%s834_s25 + $0x2c] sm:$0xf] %vm466_vm1, %v461_v27 }
  0xc2   : > { %482 = vst.msk [vmem:[%s834_s25 + $0x3c] sm:$0xf] %vm466_vm1, %v465_v28 }
  0xc3 PF: > { %s13_s14 = sadd.s32 1, %s703_s14   ;;  %s881_s12 = smov %s699_s13 }
  0xc4   : > { %p10_p5 = scmp.ge.s32.totalorder %s13_s14, 4   ;;  %s882_s13 = smov %s884_s15 }
  0xc6   :  { %12 = sbr.rel (!%p10_p5) target bundleno = 2 (0x2), region = 62 }

// kernel: forward.40
= control target key start
LH: loop header
LB: loop body
LE: loop exit
PB: predicated region body
PF: predicated region fallthrough
CT: control target
= control target key end

     0   :  { %s2084_s12 = smov 0   ;;  %s2086_s13 = smov 0   ;;  %s2908_s0 = inlined_call_operand.vmem [shape: bf16[2,128,40], index: 0, kind: input, shape index: {}]   ;;  %s2909_s1 = inlined_call_operand.vmem [shape: bf16[128,1152], index: 1, kind: input, shape index: {}]   ;;  %s2910_s2 = inlined_call_operand.vmem [shape: f32[128,1], index: 2, kind: input, shape index: {}]   ;;  %s2911_s3 = inlined_call_operand.vmem [shape: bf16[2,128,16], index: 3, kind: output, shape index: {}]  }
   0x1   :  { %s2088_s14 = smov 0  }
   0x2 LB: > { %s25_s15 = sadd.s32 1, %s2049_s13  ;;  %p1562_p0 = scmp.ge.s32.totalorder %s2053_s14, 1  ;;  %s2053_s14 = sphi %s2088_s14, %s13_s14   ;;  %s2049_s13 = sphi %s2086_s13, %s2913_s13   ;;  %s2045_s12 = sphi %s2084_s12, %s2912_s12  }
   0x3   : > { %p27_p1 = scmp.ge.s32.totalorder %s25_s15, 2  ;;  %p151_p2 = scmp.lt.s32.totalorder %s2053_s14, 3 }
   0x5   : > { %s2915_s15 = smov (%p27_p1, %s25_s15), 0  ;;  %p152_p3 = pnand %p1562_p0, %p151_p2 }
   0x6   : > { %p178_p4 = scmp.lt.s32.totalorder (!%p152_p3), %s2045_s12, 1  ;;  %s2055_s20 = smov (!%p152_p3), 127  }
   0x7   : > { %155 = sbr.rel (%p152_p3) target bundleno = 599 (0x257), region = 32  ;;  %s2056_s21 = smov (!%p152_p3), 126  }
   0x8   : > { %s2057_s22 = smov (!%p152_p3), 120   ;;  %s2058_s23 = smov (!%p152_p3), 119  }
   0x9   : > { %s2059_s24 = smov (!%p152_p3), 112   ;;  %s2060_s25 = smov (!%p152_p3), 118  }
   0xa   : > { %s2061_s26 = smov (!%p152_p3), 111   ;;  %s2062_s27 = smov (!%p152_p3), 110  }
   0xc   : > { %s2917_s12 = smov (!%p178_p4, %s2045_s12), 1  ;;  %v1745_v14 = vld [vmem:[%s2909_s1 + $0x120] sm:$0xf]  ;;  %v1939_v15 = vld [vmem:[%s2909_s1 + $0x140] sm:$0xf0]  ;;  %v2063_v35 = vmov 0  }
   0xd   : > { %s1889_s16 = sshll.u32 %s2917_s12, 6  ;;  %v1746_v16 = vor.u32 %v1939_v15, %v1745_v14  ;;  %v1673_v17 = vld [vmem:[%s2909_s1 + $0x90] sm:$0xf]  ;;  %v1921_v18 = vld [vmem:[%s2909_s1 + $0xb0] sm:$0xf0]  ;;  %2028 = vset.pattern.permute.xlu1 %v2063_v35  ;;  %2030 = vset.pattern.permute.xlu0 %v2063_v35  ;;  %v527_v57 = vld [vmem:[%s2910_s2] sm:$0xff] }
   0xe   : > { %s2110_s19 = scalar_lea.vmem %s2908_s0, %s1889_s16  ;;  %v1817_v19 = vld [vmem:[%s2909_s1 + $0x1b0] sm:$0xf]  ;;  %v1674_v20 = vor.u32 %v1921_v18, %v1673_v17  ;;  %v1957_v21 = vld [vmem:[%s2909_s1 + $0x1d0] sm:$0xf0]  ;;  %v1601_v26 = vld [vmem:[%s2909_s1] sm:$0xf]  ;;  %2029 = vset.pattern.permute.xlu2 %v2063_v35 }
   0xf   : > { %v2113_v0 = vld [vmem:[%s2110_s19 + $0x38] sm:$0xff]  ;;  %v2116_v1 = vld [vmem:[%s2110_s19 + $0x30] sm:$0xff]  ;;  %v2132_v2 = vld [vmem:[%s2110_s19 + $0x28] sm:$0xff]  ;;  %v1818_v22 = vor.u32 %v1957_v21, %v1817_v19  ;;  %vm1464_vm0 = vcmask 125952  }
  0x10   : > { %269 = vrot.lane.b32.xlu1 %v2113_v0, %s2055_s20  ;;  %293 = vrot.lane.b32.xlu0 %v2113_v0, %s2056_s21  ;;  %v2145_v3 = vld [vmem:[%s2110_s19 + $0x20] sm:$0xff]  ;;  %v2152_v4 = vld [vmem:[%s2110_s19 + $0x18] sm:$0xff] }
  0x11   : > { %315 = vrot.lane.b32.xlu2 %v2116_v1, %s2057_s22  ;;  %1971 = vmatpush.bf16.msra.mxu1 %v2113_v0  ;;  %v2165_v5 = vld [vmem:[%s2110_s19 + $0x10] sm:$0xff]  ;;  %v2172_v6 = vld [vmem:[%s2110_s19 + $0x8] sm:$0xff]  ;;  %v2192_v7 = vld [vmem:[%s2110_s19] sm:$0xff] }
  0x12   : > { %1972 = vmatpush.bf16.msra.mxu2 %v2113_v0  ;;  %1973 = vmatpush.bf16.msra.mxu3 %v2113_v0  ;;  %v1903_v27 = vld [vmem:[%s2909_s1 + $0x20] sm:$0xf0]  ;;  %v1781_v32 = vld [vmem:[%s2909_s1 + $0x168] sm:$0xf]  ;;  %v1948_v33 = vld [vmem:[%s2909_s1 + $0x188] sm:$0xf0] }
  0x13   : > { %991 = vmatpush.bf16.msra.mxu0 %v2113_v0  ;;  %v1602_v28 = vor.u32 %v1903_v27, %v1601_v26  ;;  %v1782_v34 = vor.u32 %v1948_v33, %v1781_v32  ;;  %v1709_v36 = vld [vmem:[%s2909_s1 + $0xd8] sm:$0xf]  ;;  %v1930_v37 = vld [vmem:[%s2909_s1 + $0xf8] sm:$0xf0]  ;;  %v1637_v45 = vld [vmem:[%s2909_s1 + $0x48] sm:$0xf] }
  0x14   : > { %v1710_v38 = vor.u32 %v1930_v37, %v1709_v36  ;;  %v1853_v39 = vld [vmem:[%s2909_s1 + $0x1f8] sm:$0xf]  ;;  %v1966_v40 = vld [vmem:[%s2909_s1 + $0x218] sm:$0xf0]  ;;  %v1912_v46 = vld [vmem:[%s2909_s1 + $0x68] sm:$0xf0] }
  0x15   : > { %1974 = vmatpush.bf16.msra.mxu1 %v2116_v1  ;;  %v1854_v41 = vor.u32 %v1966_v40, %v1853_v39  ;;  %v1638_v47 = vor.u32 %v1912_v46, %v1637_v45  ;;  %v528_v58 = vld [vmem:[%s2910_s2 + $0x8] sm:$0xff]  ;;  %v1611_v14 = vld [vmem:[%s2909_s1 + $0x2c] sm:$0xf0]  ;;  %v1913_v19 = vld [vmem:[%s2909_s1 + $0x70] sm:$0xf0] }
  0x16   : > { %1975 = vmatpush.bf16.msra.mxu2 %v2116_v1  ;;  %1976 = vmatpush.bf16.msra.mxu3 %v2116_v1  ;;  %v1609_v61 = vld [vmem:[%s2909_s1 + $0x8] sm:$0xf]  ;;  %v1904_v62 = vld [vmem:[%s2909_s1 + $0x28] sm:$0xf0]  ;;  %v1645_v18 = vld [vmem:[%s2909_s1 + $0x50] sm:$0xf] }
  0x17   : > { %992 = vmatpush.bf16.msra.mxu0 %v2116_v1  ;;  %v537_v21 = vld [vmem:[%s2910_s2 + $0x50] sm:$0xff]  ;;  %v1908_v27 = vld [vmem:[%s2909_s1 + $0x4c] sm:$0xf]  ;;  %v538_v32 = vld [vmem:[%s2910_s2 + $0x58] sm:$0xff] }
  0x18   : > { %317 = vrot.lane.b32.xlu0 %v2113_v0, %s2057_s22  ;;  %291 = vrot.lane.b32.xlu1 %v2116_v1, %s2056_s21  ;;  %v539_v35 = vld [vmem:[%s2910_s2 + $0x60] sm:$0xff]  ;;  %v1909_v36 = vld [vmem:[%s2909_s1 + $0x54] sm:$0xf] }
  0x19   : > { %267 = vrot.lane.b32.xlu2 %v2116_v1, %s2055_s20  ;;  %1977 = vmatpush.bf16.msra.mxu1 %v2132_v2  ;;  %v1647_v37 = vld [vmem:[%s2909_s1 + $0x74] sm:$0xf0] }
  0x1a   : > { %1978 = vmatpush.bf16.msra.mxu2 %v2132_v2  ;;  %1979 = vmatpush.bf16.msra.mxu3 %v2132_v2  ;;  %v542_v46 = vld [vmem:[%s2910_s2 + $0x78] sm:$0xff] }
  0x1b   : > { %993 = vmatpush.bf16.msra.mxu0 %v2132_v2 }
  0x1d   : > { %1980 = vmatpush.bf16.msra.mxu1 %v2145_v3 }
  0x1e   : > { %1981 = vmatpush.bf16.msra.mxu2 %v2145_v3  ;;  %1982 = vmatpush.bf16.msra.mxu3 %v2145_v3 }
  0x1f   : > { %994 = vmatpush.bf16.msra.mxu0 %v2145_v3 }
  0x20   : > { %313 = vrot.lane.b32.xlu1 %v2132_v2, %s2057_s22  ;;  %289 = vrot.lane.b32.xlu0 %v2132_v2, %s2056_s21 }
  0x21   : > { %341 = vrot.lane.b32.xlu2 %v2113_v0, %s2058_s23  ;;  %1983 = vmatpush.bf16.msra.mxu1 %v2152_v4 }
  0x22   : > { %1984 = vmatpush.bf16.msra.mxu2 %v2152_v4  ;;  %1985 = vmatpush.bf16.msra.mxu3 %v2152_v4 }
  0x23   : > { %995 = vmatpush.bf16.msra.mxu0 %v2152_v4 }
  0x25   : > { %1986 = vmatpush.bf16.msra.mxu1 %v2165_v5 }
  0x26   : > { %1987 = vmatpush.bf16.msra.mxu2 %v2165_v5  ;;  %1988 = vmatpush.bf16.msra.mxu3 %v2165_v5 }
  0x27   : > { %996 = vmatpush.bf16.msra.mxu0 %v2165_v5 }
  0x28   : > { %265 = vrot.lane.b32.xlu0 %v2132_v2, %s2055_s20  ;;  %287 = vrot.lane.b32.xlu1 %v2145_v3, %s2056_s21 }
  0x29   : > { %311 = vrot.lane.b32.xlu2 %v2145_v3, %s2057_s22  ;;  %1989 = vmatpush.bf16.msra.mxu1 %v2172_v6 }
  0x2a   : > { %1990 = vmatpush.bf16.msra.mxu2 %v2172_v6  ;;  %1991 = vmatpush.bf16.msra.mxu3 %v2172_v6 }
  0x2b   : > { %997 = vmatpush.bf16.msra.mxu0 %v2172_v6 }
  0x2d   : > { %1992 = vmatpush.bf16.msra.mxu1 %v2192_v7 }
  0x2e   : > { %1993 = vmatpush.bf16.msra.mxu2 %v2192_v7  ;;  %1994 = vmatpush.bf16.msra.mxu3 %v2192_v7 }
  0x2f   : > { %998 = vmatpush.bf16.msra.mxu0 %v2192_v7 }
  0x30   : > { %339 = vrot.lane.b32.xlu0 %v2116_v1, %s2058_s23  ;;  %263 = vrot.lane.b32.xlu1 %v2145_v3, %s2055_s20 }
  0x31   : > { %285 = vrot.lane.b32.xlu2 %v2152_v4, %s2056_s21  ;;  %1019 = vmatmul.bf16.vlgmr.msra.gmra.mxu2 %v1746_v16 }
  0x32   : > { %1009 = vmatmul.bf16.vlgmr.msra.gmra.mxu1 %v1674_v20  ;;  %1029 = vmatmul.bf16.vlgmr.msra.gmra.mxu3 %v1818_v22  ;;  %v535_v22 = vld [vmem:[%s2910_s2 + $0x40] sm:$0xff] }
  0x33   : > { %999 = vmatmul.bf16.vlgmr.msra.gmra.mxu0 %v1602_v28  ;;  %v1639_v28 = vld [vmem:[%s2909_s1 + $0x6c] sm:$0xf0] }
  0x34   : > { %v1642_v33 = vor.u32 %v1908_v27, %v1639_v28  ;;  %v1936_v27 = vld [vmem:[%s2909_s1 + $0x12c] sm:$0xf]  ;;  %v1755_v28 = vld [vmem:[%s2909_s1 + $0x14c] sm:$0xf0] }
  0x38   : > { %337 = vrot.lane.b32.xlu1 %v2132_v2, %s2058_s23  ;;  %309 = vrot.lane.b32.xlu0 %v2152_v4, %s2057_s22 }
  0x39   : > { %261 = vrot.lane.b32.xlu2 %v2152_v4, %s2055_s20 }
  0x40   : > { %307 = vrot.lane.b32.xlu1 %v2165_v5, %s2057_s22  ;;  %283 = vrot.lane.b32.xlu0 %v2165_v5, %s2056_s21 }
  0x41   : > { %335 = vrot.lane.b32.xlu2 %v2145_v3, %s2058_s23  ;;  %1024 = vmatmul.bf16.gmra.mxu2 %v1782_v34 }
  0x42   : > { %1014 = vmatmul.bf16.gmra.mxu1 %v1710_v38  ;;  %1034 = vmatmul.bf16.gmra.mxu3 %v1854_v41  ;;  %v1650_v41 = vor.u32 %v1909_v36, %v1647_v37 }
  0x43   : > { %1004 = vmatmul.bf16.gmra.mxu0 %v1638_v47 }
  0x48   : > { %259 = vrot.lane.b32.xlu0 %v2165_v5, %s2055_s20  ;;  %281 = vrot.lane.b32.xlu1 %v2172_v6, %s2056_s21 }
  0x49   : > { %305 = vrot.lane.b32.xlu2 %v2172_v6, %s2057_s22 }
  0x50   : > { %333 = vrot.lane.b32.xlu0 %v2152_v4, %s2058_s23  ;;  %257 = vrot.lane.b32.xlu1 %v2172_v6, %s2055_s20 }
  0x51   : > { %279 = vrot.lane.b32.xlu2 %v2192_v7, %s2056_s21 }
  0x58   : > { %331 = vrot.lane.b32.xlu1 %v2165_v5, %s2058_s23  ;;  %303 = vrot.lane.b32.xlu0 %v2192_v7, %s2057_s22 }
  0x59   : > { %255 = vrot.lane.b32.xlu2 %v2192_v7, %s2055_s20 }
  0x60   : > { %327 = vrot.lane.b32.xlu1 %v2192_v7, %s2058_s23  ;;  %329 = vrot.lane.b32.xlu0 %v2172_v6, %s2058_s23 }
  0x61   : > { %389 = vrot.lane.b32.xlu2 %v2113_v0, %s2059_s24 }
  0x68   : > { %365 = vrot.lane.b32.xlu1 %v2113_v0, %s2060_s25  ;;  %413 = vrot.lane.b32.xlu0 %v2113_v0, %s2061_s26 }
  0x69   : > { %387 = vrot.lane.b32.xlu2 %v2116_v1, %s2059_s24 }
  0x6b   : > { %v316_v8 = vpop.permute.xlu2 %315 }
  0x70   : > { %363 = vrot.lane.b32.xlu1 %v2116_v1, %s2060_s25  ;;  %411 = vrot.lane.b32.xlu0 %v2116_v1, %s2061_s26 }
  0x71   : > { %385 = vrot.lane.b32.xlu2 %v2132_v2, %s2059_s24 }
  0x73   : > { %v268_v9 = vpop.permute.xlu2 %267 }
  0x78   : > { %437 = vrot.lane.b32.xlu1 %v2113_v0, %s2062_s27  ;;  %409 = vrot.lane.b32.xlu0 %v2132_v2, %s2061_s26  ;;  %v529_v0 = vld [vmem:[%s2910_s2 + $0x10] sm:$0xff] }
  0x79   : > { %361 = vrot.lane.b32.xlu2 %v2132_v2, %s2060_s25 }
  0x7b   : > { %v342_v10 = vpop.permute.xlu2 %341 }
  0x7c   : > { %1187 = vmatpush.bf16.msrb.mxu0 %v342_v10  ;;  %v532_v10 = vld [vmem:[%s2910_s2 + $0x28] sm:$0xff] }
  0x80   : > { %383 = vrot.lane.b32.xlu0 %v2145_v3, %s2059_s24  ;;  %407 = vrot.lane.b32.xlu1 %v2145_v3, %s2061_s26 }
  0x81   : > { %435 = vrot.lane.b32.xlu2 %v2116_v1, %s2062_s27  ;;  %v530_v1 = vld [vmem:[%s2910_s2 + $0x18] sm:$0xff] }
  0x82   : > { %v270_v11 = vpop.permute.xlu1 %269  ;;  %v294_v12 = vpop.permute.xlu0 %293 }
  0x83   : > { %1040 = vmatpush.bf16.msrb.mxu1 %v270_v11  ;;  %1089 = vmatpush.bf16.msrb.mxu2 %v294_v12  ;;  %v312_v13 = vpop.permute.xlu2 %311  ;;  %v533_v12 = vld [vmem:[%s2910_s2 + $0x30] sm:$0xff] }
  0x87   : > { %1041 = vmatpush.bf16.msrb.mxu1 %v268_v9  ;;  %v534_v9 = vld [vmem:[%s2910_s2 + $0x38] sm:$0xff] }
  0x88   : > { %359 = vrot.lane.b32.xlu0 %v2145_v3, %s2060_s25  ;;  %381 = vrot.lane.b32.xlu1 %v2152_v4, %s2059_s24 }
  0x89   : > { %405 = vrot.lane.b32.xlu2 %v2152_v4, %s2061_s26 }
  0x8a   : > { %v318_v23 = vpop.permute.xlu0 %317  ;;  %v292_v24 = vpop.permute.xlu1 %291 }
  0x8b   : > { %1090 = vmatpush.bf16.msrb.mxu2 %v292_v24  ;;  %1138 = vmatpush.bf16.msrb.mxu3 %v318_v23  ;;  %v286_v25 = vpop.permute.xlu2 %285  ;;  %v1646_v23 = vor.u32 %v1913_v19, %v1645_v18  ;;  %v536_v24 = vld [vmem:[%s2910_s2 + $0x48] sm:$0xff] }
  0x8f   : > { %1139 = vmatpush.bf16.msrb.mxu3 %v316_v8 }
  0x90   : > { %433 = vrot.lane.b32.xlu0 %v2132_v2, %s2062_s27  ;;  %357 = vrot.lane.b32.xlu1 %v2152_v4, %s2060_s25  ;;  %v1610_v2 = vor.u32 %v1904_v62, %v1609_v61  ;;  %v1717_v61 = vld [vmem:[%s2909_s1 + $0xe0] sm:$0xf]  ;;  %v1931_v62 = vld [vmem:[%s2909_s1 + $0x100] sm:$0xf0] }
  0x91   : > { %379 = vrot.lane.b32.xlu2 %v2165_v5, %s2059_s24 }
  0x92   : > { %v314_v29 = vpop.permute.xlu1 %313  ;;  %v290_v30 = vpop.permute.xlu0 %289 }
  0x93   : > { %1140 = vmatpush.bf16.msrb.mxu3 %v314_v29  ;;  %1091 = vmatpush.bf16.msrb.mxu2 %v290_v30  ;;  %v262_v31 = vpop.permute.xlu2 %261  ;;  %v1617_v29 = vld [vmem:[%s2909_s1 + $0x10] sm:$0xf]  ;;  %v1905_v30 = vld [vmem:[%s2909_s1 + $0x30] sm:$0xf0] }
  0x94   : > { %v1618_v34 = vor.u32 %v1905_v30, %v1617_v29 }
  0x97   : > { %1141 = vmatpush.bf16.msrb.mxu3 %v312_v13  ;;  %v1900_v13 = vld [vmem:[%s2909_s1 + $0xc] sm:$0xf] }
  0x98   : > { %403 = vrot.lane.b32.xlu0 %v2165_v5, %s2061_s26  ;;  %431 = vrot.lane.b32.xlu1 %v2145_v3, %s2062_s27  ;;  %v531_v3 = vld [vmem:[%s2910_s2 + $0x20] sm:$0xff]  ;;  %v1614_v17 = vor.u32 %v1900_v13, %v1611_v14 }
  0x99   : > { %355 = vrot.lane.b32.xlu2 %v2165_v5, %s2060_s25 }
  0x9a   : > { %v266_v42 = vpop.permute.xlu0 %265  ;;  %v288_v43 = vpop.permute.xlu1 %287 }
  0x9b   : > { %1092 = vmatpush.bf16.msrb.mxu2 %v288_v43  ;;  %1042 = vmatpush.bf16.msrb.mxu1 %v266_v42  ;;  %v336_v44 = vpop.permute.xlu2 %335  ;;  %v1681_v42 = vld [vmem:[%s2909_s1 + $0x98] sm:$0xf]  ;;  %v1922_v43 = vld [vmem:[%s2909_s1 + $0xb8] sm:$0xf0] }
  0x9c   : > { %v1682_v45 = vor.u32 %v1922_v43, %v1681_v42 }
  0x9f   : > { %1093 = vmatpush.bf16.msrb.mxu2 %v286_v25 }
  0xa0   : > { %377 = vrot.lane.b32.xlu0 %v2172_v6, %s2059_s24  ;;  %401 = vrot.lane.b32.xlu1 %v2172_v6, %s2061_s26 }
  0xa1   : > { %429 = vrot.lane.b32.xlu2 %v2152_v4, %s2062_s27 }
  0xa2   : > { %v340_v48 = vpop.permute.xlu0 %339  ;;  %v264_v49 = vpop.permute.xlu1 %263 }
  0xa3   : > { %1043 = vmatpush.bf16.msrb.mxu1 %v264_v49  ;;  %1188 = vmatpush.bf16.msrb.mxu0 %v340_v48  ;;  %v306_v50 = vpop.permute.xlu2 %305  ;;  %v1917_v49 = vld [vmem:[%s2909_s1 + $0x94] sm:$0xf] }
  0xa7   : > { %1044 = vmatpush.bf16.msrb.mxu1 %v262_v31  ;;  %v540_v31 = vld [vmem:[%s2910_s2 + $0x68] sm:$0xff] }
  0xa8   : > { %353 = vrot.lane.b32.xlu0 %v2172_v6, %s2060_s25  ;;  %375 = vrot.lane.b32.xlu1 %v2192_v7, %s2059_s24 }
  0xa9   : > { %399 = vrot.lane.b32.xlu2 %v2192_v7, %s2061_s26 }
  0xaa   : > { %v338_v51 = vpop.permute.xlu1 %337  ;;  %v310_v52 = vpop.permute.xlu0 %309 }
  0xab   : > { %1189 = vmatpush.bf16.msrb.mxu0 %v338_v51  ;;  %1142 = vmatpush.bf16.msrb.mxu3 %v310_v52  ;;  %v280_v53 = vpop.permute.xlu2 %279  ;;  %v1653_v51 = vld [vmem:[%s2909_s1 + $0x58] sm:$0xf]  ;;  %v1914_v52 = vld [vmem:[%s2909_s1 + $0x78] sm:$0xf0] }
  0xaf   : > { %1190 = vmatpush.bf16.msrb.mxu0 %v336_v44  ;;  %v541_v44 = vld [vmem:[%s2910_s2 + $0x70] sm:$0xff] }
  0xb0   : > { %427 = vrot.lane.b32.xlu0 %v2165_v5, %s2062_s27  ;;  %351 = vrot.lane.b32.xlu1 %v2192_v7, %s2060_s25  ;;  %s2851_s25 = scalar_lea.vmem %s2911_s3, %s1889_s16 }
  0xb1   : > { %425 = vrot.lane.b32.xlu2 %v2172_v6, %s2062_s27  ;;  %v1899_v6 = vld [vmem:[%s2909_s1 + $0x4] sm:$0xf] }
  0xb2   : > { %v308_v54 = vpop.permute.xlu1 %307  ;;  %v284_v55 = vpop.permute.xlu0 %283 }
  0xb3   : > { %1143 = vmatpush.bf16.msrb.mxu3 %v308_v54  ;;  %1094 = vmatpush.bf16.msrb.mxu2 %v284_v55  ;;  %v256_v56 = vpop.permute.xlu2 %255  ;;  %v1654_v55 = vor.u32 %v1914_v52, %v1653_v51  ;;  %v1958_v51 = vld [vmem:[%s2909_s1 + $0x1d8] sm:$0xf0] }
  0xb4   : > { %v2536_v52 = vpop.f32.mrf.mxu2 }
  0xb7   : > { %1144 = vmatpush.bf16.msrb.mxu3 %v306_v50  ;;  %v1675_v50 = vld [vmem:[%s2909_s1 + $0xb4] sm:$0xf0] }
  0xb8   : > { %423 = vrot.lane.b32.xlu0 %v2192_v7, %s2062_s27  ;;  %545 = vperm.xlu1 %2028, %v527_v57   ;;  %v1603_v7 = vld [vmem:[%s2909_s1 + $0x24] sm:$0xf0]  ;;  %v1678_v54 = vor.u32 %v1917_v49, %v1675_v50  ;;  %v1683_v57 = vld [vmem:[%s2909_s1 + $0xbc] sm:$0xf0]  ;;  %v1825_v50 = vld [vmem:[%s2909_s1 + $0x1b8] sm:$0xf] }
  0xb9   : > { %550 = vperm.xlu2 %2029, %v528_v58   ;;  %v1606_v11 = vor.u32 %v1899_v6, %v1603_v7  ;;  %v1923_v6 = vld [vmem:[%s2909_s1 + $0xc0] sm:$0xf0] }
  0xba   : > { %v260_v59 = vpop.permute.xlu0 %259  ;;  %v282_v60 = vpop.permute.xlu1 %281 }
  0xbb   : > { %1095 = vmatpush.bf16.msrb.mxu2 %v282_v60  ;;  %1045 = vmatpush.bf16.msrb.mxu1 %v260_v59  ;;  %v390_v63 = vpop.permute.xlu2 %389 }
  0xbf   : > { %1096 = vmatpush.bf16.msrb.mxu2 %v280_v53 }
  0xc0   : > { %555 = vperm.xlu0 %2030, %v529_v0   ;;  %560 = vperm.xlu1 %2028, %v530_v1   ;;  %v1718_v0 = vor.u32 %v1931_v62, %v1717_v61 }
  0xc1   : > { %565 = vperm.xlu2 %2029, %v531_v3   ;;  %v1926_v3 = vld [vmem:[%s2909_s1 + $0xdc] sm:$0xf] }
  0xc2   : > { %v334_v4 = vpop.permute.xlu0 %333  ;;  %v258_v5 = vpop.permute.xlu1 %257  ;;  %1097 = vmatmul.bf16.vlgmr.msrb.gmra.mxu2 %v1610_v2 }
  0xc3   : > { %1285 = vmatpush.bf16.msra.mxu2 %v390_v63  ;;  %1046 = vmatpush.bf16.msrb.mxu1 %v258_v5  ;;  %v388_v8 = vpop.permute.xlu2 %387  ;;  %v1689_v5 = vld [vmem:[%s2909_s1 + $0xa0] sm:$0xf] }
  0xc4   : > { %1191 = vmatpush.bf16.msrb.mxu0 %v334_v4  ;;  %v1711_v4 = vld [vmem:[%s2909_s1 + $0xfc] sm:$0xf0] }
  0xc5   : > { %v1714_v7 = vor.u32 %v1926_v3, %v1711_v4 }
  0xc7   : > { %1286 = vmatpush.bf16.msra.mxu2 %v388_v8  ;;  %1047 = vmatpush.bf16.msrb.mxu1 %v256_v56  ;;  %v1918_v56 = vld [vmem:[%s2909_s1 + $0x9c] sm:$0xf]  ;;  %v1690_v8 = vor.u32 %v1923_v6, %v1689_v5  ;;  %v2562_v6 = vpop.f32.mrf.mxu3 }
  0xc8   : > { %580 = vperm.xlu0 %2030, %v534_v9   ;;  %570 = vperm.xlu1 %2028, %v532_v10   ;;  %v1686_v60 = vor.u32 %v1918_v56, %v1683_v57  ;;  %v1927_v10 = vld [vmem:[%s2909_s1 + $0xe4] sm:$0xf]  ;;  %v1953_v57 = vld [vmem:[%s2909_s1 + $0x1b4] sm:$0xf] }
  0xc9   : > { %575 = vperm.xlu2 %2029, %v533_v12  }
  0xca   : > { %v332_v15 = vpop.permute.xlu1 %331  ;;  %v304_v16 = vpop.permute.xlu0 %303  ;;  %1048 = vmatmul.bf16.vlgmr.msrb.gmra.mxu1 %v1606_v11  ;;  %v1719_v11 = vld [vmem:[%s2909_s1 + $0x104] sm:$0xf0] }
  0xcb   : > { %1145 = vmatpush.bf16.msrb.mxu3 %v304_v16  ;;  %1192 = vmatpush.bf16.msrb.mxu0 %v332_v15  ;;  %v386_v20 = vpop.permute.xlu2 %385  ;;  %v1722_v14 = vor.u32 %v1927_v10, %v1719_v11  ;;  %v1753_v15 = vld [vmem:[%s2909_s1 + $0x128] sm:$0xf]  ;;  %v1940_v16 = vld [vmem:[%s2909_s1 + $0x148] sm:$0xf0]  ;;  %v1000_v10 = vpop.f32.mrf.mxu0 }
  0xcc   : > { %1287 = vmatpush.bf16.msra.mxu2 %v386_v20 }
  0xce   : > { %1146 = vmatmul.bf16.vlgmr.msrb.gmra.mxu3 %v1614_v17  ;;  %v1754_v17 = vor.u32 %v1940_v16, %v1753_v15  ;;  %v1833_v15 = vld [vmem:[%s2909_s1 + $0x1c0] sm:$0xf]  ;;  %v1959_v16 = vld [vmem:[%s2909_s1 + $0x1e0] sm:$0xf0] }
  0xd0   : > { %595 = vperm.xlu0 %2030, %v537_v21   ;;  %585 = vperm.xlu1 %2028, %v535_v22   ;;  %v1935_v21 = vld [vmem:[%s2909_s1 + $0x124] sm:$0xf]  ;;  %v1747_v22 = vld [vmem:[%s2909_s1 + $0x144] sm:$0xf0] }
  0xd1   : > { %590 = vperm.xlu2 %2029, %v536_v24   ;;  %v1932_v24 = vld [vmem:[%s2909_s1 + $0x108] sm:$0xf0] }
  0xd2   : > { %v328_v25 = vpop.permute.xlu1 %327  ;;  %v330_v26 = vpop.permute.xlu0 %329  ;;  %1102 = vmatmul.bf16.gmra.mxu2 %v1646_v23  ;;  %v1725_v23 = vld [vmem:[%s2909_s1 + $0xe8] sm:$0xf] }
  0xd3   : > { %1193 = vmatpush.bf16.msrb.mxu0 %v330_v26  ;;  %v362_v38 = vpop.permute.xlu2 %361  ;;  %v1726_v26 = vor.u32 %v1932_v24, %v1725_v23  ;;  %v1002_v23 = vpop.f32.mrf.mxu0 }
  0xd7   : > { %1194 = vmatpush.bf16.msrb.mxu0 %v328_v25  ;;  %v1750_v25 = vor.u32 %v1935_v21, %v1747_v22  ;;  %v1863_v21 = vld [vmem:[%s2909_s1 + $0x224] sm:$0xf0] }
  0xd8   : > { %610 = vperm.xlu0 %2030, %v540_v31   ;;  %600 = vperm.xlu1 %2028, %v538_v32   ;;  %v1758_v31 = vor.u32 %v1936_v27, %v1755_v28  ;;  %v1789_v32 = vld [vmem:[%s2909_s1 + $0x170] sm:$0xf] }
  0xd9   : > { %605 = vperm.xlu2 %2029, %v539_v35  }
  0xda   : > { %v366_v39 = vpop.permute.xlu1 %365  ;;  %v414_v40 = vpop.permute.xlu0 %413  ;;  %1053 = vmatmul.bf16.gmra.mxu1 %v1642_v33  ;;  %1195 = vmatmul.bf16.vlgmr.msrb.gmra.mxu0 %v1618_v34  ;;  %v1949_v33 = vld [vmem:[%s2909_s1 + $0x190] sm:$0xf0] }
  0xdb   : > { %1236 = vmatpush.bf16.msra.mxu1 %v366_v39  ;;  %1334 = vmatpush.bf16.msra.mxu3 %v414_v40  ;;  %v436_v53 = vpop.permute.xlu2 %435  ;;  %v1790_v35 = vor.u32 %v1949_v33, %v1789_v32  ;;  %v1783_v39 = vld [vmem:[%s2909_s1 + $0x18c] sm:$0xf0]  ;;  %v1901_v32 = vld [vmem:[%s2909_s1 + $0x14] sm:$0xf]  ;;  %v1619_v33 = vld [vmem:[%s2909_s1 + $0x34] sm:$0xf0] }
  0xdc   : > { %v1761_v40 = vld [vmem:[%s2909_s1 + $0x130] sm:$0xf] }
  0xde   : > { %1151 = vmatmul.bf16.gmra.mxu3 %v1650_v41  ;;  %v1941_v41 = vld [vmem:[%s2909_s1 + $0x150] sm:$0xf0] }
  0xe0   : > { %615 = vperm.xlu1 %2028, %v541_v44   ;;  %v1762_v44 = vor.u32 %v1941_v41, %v1761_v40  ;;  %v1902_v41 = vld [vmem:[%s2909_s1 + $0x1c] sm:$0xf] }
  0xe1   : > { %620 = vperm.xlu2 %2029, %v542_v46   ;;  %v1791_v46 = vld [vmem:[%s2909_s1 + $0x194] sm:$0xf0] }
  0xe2   : > { %v364_v47 = vpop.permute.xlu1 %363  ;;  %v412_v48 = vpop.permute.xlu0 %411  ;;  %1107 = vmatmul.bf16.gmra.mxu2 %v1682_v45  ;;  %v1945_v45 = vld [vmem:[%s2909_s1 + $0x174] sm:$0xf] }
  0xe3   : > { %1237 = vmatpush.bf16.msra.mxu1 %v364_v47  ;;  %1335 = vmatpush.bf16.msra.mxu3 %v412_v48  ;;  %v406_v63 = vpop.permute.xlu2 %405  ;;  %v1794_v49 = vor.u32 %v1945_v45, %v1791_v46 }
  0xe7   : > { %1238 = vmatpush.bf16.msra.mxu1 %v362_v38  ;;  %v1944_v38 = vld [vmem:[%s2909_s1 + $0x16c] sm:$0xf] }
  0xe8   : > { %v1786_v43 = vor.u32 %v1944_v38, %v1783_v39  ;;  %v1622_v39 = vor.u32 %v1901_v32, %v1619_v33 }
  0xea   : > { %v438_v58 = vpop.permute.xlu1 %437  ;;  %v410_v59 = vpop.permute.xlu0 %409  ;;  %1058 = vmatmul.bf16.gmra.mxu1 %v1678_v54  ;;  %1200 = vmatmul.bf16.gmra.mxu0 %v1654_v55 }
  0xeb   : > { %1383 = vmatpush.bf16.msra.mxu0 %v438_v58  ;;  %1336 = vmatpush.bf16.msra.mxu3 %v410_v59  ;;  %v380_v9 = vpop.permute.xlu2 %379  ;;  %v2538_v54 = vpop.f32.mrf.mxu1  ;;  %v1819_v58 = vld [vmem:[%s2909_s1 + $0x1d4] sm:$0xf0] }
  0xec   : > { %v1797_v59 = vld [vmem:[%s2909_s1 + $0x178] sm:$0xf]  ;;  %v1822_v62 = vor.u32 %v1953_v57, %v1819_v58 }
  0xee   : > { %1156 = vmatmul.bf16.gmra.mxu3 %v1686_v60  ;;  %v1950_v60 = vld [vmem:[%s2909_s1 + $0x198] sm:$0xf0] }
  0xef   : > { %1384 = vmatpush.bf16.msra.mxu0 %v436_v53  ;;  %v1826_v53 = vor.u32 %v1958_v51, %v1825_v50 }
  0xf2   : > { %v384_v1 = vpop.permute.xlu0 %383  ;;  %v408_v2 = vpop.permute.xlu1 %407  ;;  %1112 = vmatmul.bf16.gmra.mxu2 %v1718_v0  ;;  %v1954_v0 = vld [vmem:[%s2909_s1 + $0x1bc] sm:$0xf] }
  0xf3   : > { %1288 = vmatpush.bf16.msra.mxu2 %v384_v1  ;;  %1337 = vmatpush.bf16.msra.mxu3 %v408_v2  ;;  %v356_v18 = vpop.permute.xlu2 %355  ;;  %v1827_v1 = vld [vmem:[%s2909_s1 + $0x1dc] sm:$0xf0]  ;;  %v2558_v2 = vpop.f32.mrf.mxu2 }
  0xf4   : > { %v2560_v3 = vpop.f32.mrf.mxu1  ;;  %v1830_v5 = vor.u32 %v1954_v0, %v1827_v1  ;;  %v1907_v0 = vld [vmem:[%s2909_s1 + $0x40] sm:$0xf0] }
  0xf7   : > { %1338 = vmatpush.bf16.msra.mxu3 %v406_v63  ;;  %v1798_v63 = vor.u32 %v1950_v60, %v1797_v59 }
  0xfa   : > { %v360_v12 = vpop.permute.xlu0 %359  ;;  %1063 = vmatmul.bf16.gmra.mxu1 %v1714_v7  ;;  %1205 = vmatmul.bf16.gmra.mxu0 %v1690_v8  ;;  %v382_v13 = vpop.permute.xlu1 %381  ;;  %v1861_v7 = vld [vmem:[%s2909_s1 + $0x200] sm:$0xf]  ;;  %v1967_v8 = vld [vmem:[%s2909_s1 + $0x220] sm:$0xf0] }
  0xfb   : > { %1239 = vmatpush.bf16.msra.mxu1 %v360_v12  ;;  %1289 = vmatpush.bf16.msra.mxu2 %v382_v13  ;;  %v430_v34 = vpop.permute.xlu2 %429  ;;  %v2570_v11 = vpop.f32.mrf.mxu2  ;;  %v1962_v12 = vld [vmem:[%s2909_s1 + $0x1fc] sm:$0xf] }
  0xfc   : > { %v2575_v13 = vpop.f32.mrf.mxu1 }
  0xfe   : > { %1161 = vmatmul.bf16.gmra.mxu3 %v1722_v14  ;;  %v1855_v14 = vld [vmem:[%s2909_s1 + $0x21c] sm:$0xf0] }
  0xff   : > { %1290 = vmatpush.bf16.msra.mxu2 %v380_v9  ;;  %v1862_v9 = vor.u32 %v1967_v8, %v1861_v7 }
 0x102   : > { %v434_v19 = vpop.permute.xlu0 %433  ;;  %v358_v20 = vpop.permute.xlu1 %357  ;;  %1117 = vmatmul.bf16.gmra.mxu2 %v1754_v17 }
 0x103   : > { %1385 = vmatpush.bf16.msra.mxu0 %v434_v19  ;;  %1240 = vmatpush.bf16.msra.mxu1 %v358_v20  ;;  %v400_v42 = vpop.permute.xlu2 %399  ;;  %v2586_v17 = vpop.f32.mrf.mxu3  ;;  %v1834_v19 = vor.u32 %v1959_v16, %v1833_v15  ;;  %v1963_v20 = vld [vmem:[%s2909_s1 + $0x204] sm:$0xf] }
 0x104   : > { %v1866_v22 = vor.u32 %v1963_v20, %v1863_v21  ;;  %v2594_v24 = vpop.f32.mrf.mxu2  ;;  %v2602_v27 = vpop.f32.mrf.mxu1 }
 0x107   : > { %1241 = vmatpush.bf16.msra.mxu1 %v356_v18  ;;  %v1858_v18 = vor.u32 %v1962_v12, %v1855_v14  ;;  %v1911_v12 = vld [vmem:[%s2909_s1 + $0x64] sm:$0xf]  ;;  %v1663_v14 = vld [vmem:[%s2909_s1 + $0x84] sm:$0xf0] }
 0x108   : > { %v1666_v21 = vor.u32 %v1911_v12, %v1663_v14  ;;  %v1928_v12 = vld [vmem:[%s2909_s1 + $0xec] sm:$0xf]  ;;  %v1727_v14 = vld [vmem:[%s2909_s1 + $0x10c] sm:$0xf0] }
 0x10a   : > { %v404_v29 = vpop.permute.xlu0 %403  ;;  %1068 = vmatmul.bf16.gmra.mxu1 %v1750_v25  ;;  %1210 = vmatmul.bf16.gmra.mxu0 %v1726_v26  ;;  %v432_v30 = vpop.permute.xlu1 %431  ;;  %v1625_v25 = vld [vmem:[%s2909_s1 + $0x18] sm:$0xf]  ;;  %v1906_v26 = vld [vmem:[%s2909_s1 + $0x38] sm:$0xf0] }
 0x10b   : > { %1386 = vmatpush.bf16.msra.mxu0 %v432_v30  ;;  %1339 = vmatpush.bf16.msra.mxu3 %v404_v29  ;;  %v426_v61 = vpop.permute.xlu2 %425  ;;  %v1626_v28 = vor.u32 %v1906_v26, %v1625_v25  ;;  %v2604_v29 = vpop.f32.mrf.mxu3  ;;  %v1869_v30 = vld [vmem:[%s2909_s1 + $0x208] sm:$0xf] }
 0x10e   : > { %1166 = vmatmul.bf16.gmra.mxu3 %v1758_v31  ;;  %v1968_v31 = vld [vmem:[%s2909_s1 + $0x228] sm:$0xf0] }
 0x10f   : > { %1387 = vmatpush.bf16.msra.mxu0 %v430_v34  ;;  %v1005_v34 = vpop.f32.mrf.mxu0  ;;  %v1870_v38 = vor.u32 %v1968_v31, %v1869_v30 }
 0x112   : > { %v378_v36 = vpop.permute.xlu0 %377  ;;  %v402_v37 = vpop.permute.xlu1 %401  ;;  %1122 = vmatmul.bf16.gmra.mxu2 %v1790_v35 }
 0x113   : > { %1291 = vmatpush.bf16.msra.mxu2 %v378_v36  ;;  %1340 = vmatpush.bf16.msra.mxu3 %v402_v37 }
 0x117   : > { %1341 = vmatpush.bf16.msra.mxu3 %v400_v42  ;;  %v1627_v42 = vld [vmem:[%s2909_s1 + $0x3c] sm:$0xf0] }
 0x118   : > { %v1630_v46 = vor.u32 %v1902_v41, %v1627_v42  ;;  %v1916_v41 = vld [vmem:[%s2909_s1 + $0x88] sm:$0xf0] }
 0x11a   : > { %v354_v47 = vpop.permute.xlu0 %353  ;;  %1073 = vmatmul.bf16.gmra.mxu1 %v1786_v43  ;;  %1215 = vmatmul.bf16.gmra.mxu0 %v1762_v44  ;;  %v376_v48 = vpop.permute.xlu1 %375 }
 0x11b   : > { %1242 = vmatpush.bf16.msra.mxu1 %v354_v47  ;;  %1292 = vmatpush.bf16.msra.mxu2 %v376_v48  ;;  %v2624_v44 = vpop.f32.mrf.mxu3  ;;  %v1661_v47 = vld [vmem:[%s2909_s1 + $0x60] sm:$0xf]  ;;  %v1915_v48 = vld [vmem:[%s2909_s1 + $0x80] sm:$0xf0] }
 0x11e   : > { %1171 = vmatmul.bf16.gmra.mxu3 %v1794_v49  ;;  %v551_v49 = vpop.permute.xlu2 %550 }
 0x11f   : > { %v1003_v51 = vadd.f32 %v1002_v23, %v551_v49  ;;  %v1924_v23 = vld [vmem:[%s2909_s1 + $0xc8] sm:$0xf0] }
 0x122   : > { %v428_v55 = vpop.permute.xlu0 %427  ;;  %v352_v56 = vpop.permute.xlu1 %351  ;;  %1127 = vmatmul.bf16.gmra.mxu2 %v1826_v53  ;;  %v1662_v53 = vor.u32 %v1915_v48, %v1661_v47 }
 0x123   : > { %1388 = vmatpush.bf16.msra.mxu0 %v428_v55  ;;  %1243 = vmatpush.bf16.msra.mxu1 %v352_v56  ;;  %v1007_v55 = vpop.f32.mrf.mxu0 }
 0x126   : > { %v566_v42 = vpop.permute.xlu2 %565 }
 0x127   : > { %1389 = vmatpush.bf16.msra.mxu0 %v426_v61  ;;  %v1910_v61 = vld [vmem:[%s2909_s1 + $0x5c] sm:$0xf] }
 0x12a   : > { %v424_v4 = vpop.permute.xlu0 %423  ;;  %1078 = vmatmul.bf16.gmra.mxu1 %v1822_v62  ;;  %1220 = vmatmul.bf16.gmra.mxu0 %v1798_v63  ;;  %v546_v35 = vpop.permute.xlu1 %545  ;;  %v1655_v62 = vld [vmem:[%s2909_s1 + $0x7c] sm:$0xf0] }
 0x12b   : > { %1390 = vmatpush.bf16.msra.mxu0 %v424_v4  ;;  %v1001_v37 = vadd.f32 %v1000_v10, %v546_v35  ;;  %v1633_v63 = vld [vmem:[%s2909_s1 + $0x20] sm:$0xf]  ;;  %v1658_v7 = vor.u32 %v1910_v61, %v1655_v62  ;;  %v1933_v61 = vld [vmem:[%s2909_s1 + $0x110] sm:$0xf0] }
 0x12c   : > { %v1634_v8 = vor.u32 %v1907_v0, %v1633_v63 }
 0x12e   : > { %1176 = vmatmul.bf16.gmra.mxu3 %v1830_v5 }
 0x132   : > { %1132 = vmatmul.bf16.gmra.mxu2 %v1862_v9  ;;  %v556_v1 = vpop.permute.xlu0 %555  ;;  %v561_v25 = vpop.permute.xlu1 %560 }
 0x133   : > { %v1006_v5 = vadd.f32 %v1005_v34, %v556_v1 }
 0x13a   : > { %1083 = vmatmul.bf16.gmra.mxu1 %v1858_v18  ;;  %1225 = vmatmul.bf16.gmra.mxu0 %v1834_v19 }
 0x13e   : > { %1181 = vmatmul.bf16.gmra.mxu3 %v1866_v22  ;;  %v1697_v22 = vld [vmem:[%s2909_s1 + $0xa8] sm:$0xf] }
 0x13f   : > { %v1698_v30 = vor.u32 %v1924_v23, %v1697_v22 }
 0x142   : > { %1293 = vmatmul.bf16.vlgmr.msra.gmra.mxu2 %v1626_v28  ;;  %v1008_v28 = vadd.f32 %v1007_v55, %v561_v25 }
 0x145   : > { %v1098_v36 = vpop.f32.mrf.mxu2 }
 0x147   : > { %v1049_v40 = vpop.f32.mrf.mxu1 }
 0x148   : > { %v1050_v43 = vadd.f32 %v1049_v40, %v1001_v37  ;;  %v1669_v40 = vld [vmem:[%s2909_s1 + $0x68] sm:$0xf] }
 0x149   : > { %v1670_v47 = vor.u32 %v1916_v41, %v1669_v40 }
 0x14a   : > { %v1099_v45 = vadd.f32 %v1098_v36, %v1050_v43  ;;  %1230 = vmatmul.bf16.gmra.mxu0 %v1870_v38  ;;  %1244 = vmatmul.bf16.vlgmr.msra.gmra.mxu1 %v1622_v39  ;;  %v1919_v38 = vld [vmem:[%s2909_s1 + $0xa4] sm:$0xf]  ;;  %v1691_v39 = vld [vmem:[%s2909_s1 + $0xc4] sm:$0xf0] }
 0x14d   : > { %v1100_v50 = vpop.f32.mrf.mxu2 }
 0x14e   : > { %1342 = vmatmul.bf16.vlgmr.msra.gmra.mxu3 %v1630_v46  ;;  %v1694_v46 = vor.u32 %v1919_v38, %v1691_v39  ;;  %v581_v38 = vpop.permute.xlu0 %580 }
 0x14f   : > { %v1051_v56 = vpop.f32.mrf.mxu1  ;;  %v1018_v40 = vadd.f32 %v2602_v27, %v581_v38  ;;  %v1763_v27 = vld [vmem:[%s2909_s1 + $0x154] sm:$0xf0] }
 0x150   : > { %v1052_v57 = vadd.f32 %v1051_v56, %v1003_v51  ;;  %v1699_v51 = vld [vmem:[%s2909_s1 + $0xcc] sm:$0xf0] }
 0x151   : > { %v1147_v58 = vpop.f32.mrf.mxu3 }
 0x152   : > { %v1101_v59 = vadd.f32 %v1100_v50, %v1052_v57  ;;  %v1148_v60 = vadd.f32 %v1147_v58, %v1099_v45  ;;  %1298 = vmatmul.bf16.gmra.mxu2 %v1662_v53  ;;  %v1011_v45 = vadd.f32 %v2538_v54, %v566_v42  ;;  %v1920_v50 = vld [vmem:[%s2909_s1 + $0xac] sm:$0xf] }
 0x153   : > { %v1702_v54 = vor.u32 %v1920_v50, %v1699_v51  ;;  %v1937_v50 = vld [vmem:[%s2909_s1 + $0x134] sm:$0xf] }
 0x155   : > { %v1103_v4 = vpop.f32.mrf.mxu2 }
 0x157   : > { %v1054_v9 = vpop.f32.mrf.mxu1  ;;  %v1196_v10 = vpop.f32.mrf.mxu0 }
 0x158   : > { %v1055_v15 = vadd.f32 %v1054_v9, %v1006_v5  ;;  %v2650_v16 = vadd.f32 %v1196_v10, %v1148_v60  ;;  %v1733_v60 = vld [vmem:[%s2909_s1 + $0xf0] sm:$0xf] }
 0x159   : > { %v1149_v18 = vpop.f32.mrf.mxu3  ;;  %v1734_v0 = vor.u32 %v1933_v61, %v1733_v60 }
 0x15a   : > { %v1104_v19 = vadd.f32 %v1103_v4, %v1055_v15  ;;  %v1150_v20 = vadd.f32 %v1149_v18, %v1101_v59  ;;  %1249 = vmatmul.bf16.gmra.mxu1 %v1658_v7  ;;  %1391 = vmatmul.bf16.vlgmr.msra.gmra.mxu0 %v1634_v8  ;;  %v571_v59 = vpop.permute.xlu1 %570  ;;  %v1925_v15 = vld [vmem:[%s2909_s1 + $0xd0] sm:$0xf0]  ;;  %v576_v18 = vpop.permute.xlu2 %575 }
 0x15b   : > { %v1013_v63 = vadd.f32 %v2560_v3, %v571_v59  ;;  %v1705_v3 = vld [vmem:[%s2909_s1 + $0xb0] sm:$0xf] }
 0x15c   : > { %v1706_v22 = vor.u32 %v1925_v15, %v1705_v3 }
 0x15d   : > { %v1105_v26 = vpop.f32.mrf.mxu2 }
 0x15e   : > { %1347 = vmatmul.bf16.gmra.mxu3 %v1666_v21  ;;  %v1730_v21 = vor.u32 %v1928_v12, %v1727_v14 }
 0x15f   : > { %v1056_v31 = vpop.f32.mrf.mxu1  ;;  %v1198_v32 = vpop.f32.mrf.mxu0 }
 0x160   : > { %v1057_v33 = vadd.f32 %v1056_v31, %v1008_v28  ;;  %v2658_v34 = vadd.f32 %v1198_v32, %v1150_v20  ;;  %v1016_v20 = vadd.f32 %v2575_v13, %v576_v18  ;;  %v1735_v28 = vld [vmem:[%s2909_s1 + $0x114] sm:$0xf0] }
 0x161   : > { %v1152_v35 = vpop.f32.mrf.mxu3 }
 0x162   : > { %v1106_v36 = vadd.f32 %v1105_v26, %v1057_v33  ;;  %v1153_v37 = vadd.f32 %v1152_v35, %v1104_v19  ;;  %1303 = vmatmul.bf16.gmra.mxu2 %v1698_v30  ;;  %v1929_v26 = vld [vmem:[%s2909_s1 + $0xf4] sm:$0xf]  ;;  %v586_v51 = vpop.permute.xlu1 %585  ;;  %v591_v12 = vpop.permute.xlu2 %590 }
 0x163   : > { %v1738_v13 = vor.u32 %v1929_v26, %v1735_v28  ;;  %v1023_v3 = vadd.f32 %v2558_v2, %v591_v12  ;;  %v1946_v26 = vld [vmem:[%s2909_s1 + $0x17c] sm:$0xf]  ;;  %v596_v28 = vpop.permute.xlu0 %595  ;;  %v1799_v2 = vld [vmem:[%s2909_s1 + $0x19c] sm:$0xf0] }
 0x165   : > { %v1108_v43 = vpop.f32.mrf.mxu2 }
 0x167   : > { %v1059_v48 = vpop.f32.mrf.mxu1  ;;  %v1201_v49 = vpop.f32.mrf.mxu0 }
 0x168   : > { %v1060_v53 = vadd.f32 %v1059_v48, %v1011_v45  ;;  %v2679_v55 = vadd.f32 %v1201_v49, %v1153_v37  ;;  %v1942_v37 = vld [vmem:[%s2909_s1 + $0x158] sm:$0xf0] }
 0x169   : > { %v1154_v56 = vpop.f32.mrf.mxu3 }
 0x16a   : > { %v1109_v57 = vadd.f32 %v1108_v43, %v1060_v53  ;;  %v1155_v58 = vadd.f32 %v1154_v56, %v1106_v36  ;;  %1254 = vmatmul.bf16.gmra.mxu1 %v1694_v46  ;;  %1396 = vmatmul.bf16.gmra.mxu0 %v1670_v47  ;;  %v1769_v36 = vld [vmem:[%s2909_s1 + $0x138] sm:$0xf]  ;;  %v1934_v56 = vld [vmem:[%s2909_s1 + $0x118] sm:$0xf0] }
 0x16b   : > { %v1770_v41 = vor.u32 %v1942_v37, %v1769_v36  ;;  %v1741_v53 = vld [vmem:[%s2909_s1 + $0xf8] sm:$0xf] }
 0x16c   : > { %v1742_v59 = vor.u32 %v1934_v56, %v1741_v53 }
 0x16d   : > { %v1110_v62 = vpop.f32.mrf.mxu2 }
 0x16e   : > { %1352 = vmatmul.bf16.gmra.mxu3 %v1702_v54  ;;  %v1766_v54 = vor.u32 %v1937_v50, %v1763_v27  ;;  %v1960_v50 = vld [vmem:[%s2909_s1 + $0x1e8] sm:$0xf0] }
 0x16f   : > { %v1061_v1 = vpop.f32.mrf.mxu1  ;;  %v1203_v4 = vpop.f32.mrf.mxu0 }
 0x170   : > { %v1062_v5 = vadd.f32 %v1061_v1, %v1013_v63  ;;  %v2688_v7 = vadd.f32 %v1203_v4, %v1155_v58  ;;  %v1021_v58 = vadd.f32 %v2536_v52, %v586_v51  ;;  %v1771_v63 = vld [vmem:[%s2909_s1 + $0x15c] sm:$0xf0] }
 0x171   : > { %v1157_v8 = vpop.f32.mrf.mxu3 }
 0x172   : > { %v1111_v9 = vadd.f32 %v1110_v62, %v1062_v5  ;;  %v1158_v10 = vadd.f32 %v1157_v8, %v1109_v57  ;;  %1308 = vmatmul.bf16.gmra.mxu2 %v1734_v0  ;;  %v1938_v62 = vld [vmem:[%s2909_s1 + $0x13c] sm:$0xf] }
 0x173   : > { %v1774_v52 = vor.u32 %v1938_v62, %v1771_v63  ;;  %v1955_v62 = vld [vmem:[%s2909_s1 + $0x1c4] sm:$0xf]  ;;  %v606_v63 = vpop.permute.xlu2 %605 }
 0x175   : > { %v1113_v19 = vpop.f32.mrf.mxu2 }
 0x177   : > { %v1064_v23 = vpop.f32.mrf.mxu1  ;;  %v1206_v25 = vpop.f32.mrf.mxu0 }
 0x178   : > { %v1065_v30 = vadd.f32 %v1064_v23, %v1016_v20  ;;  %v2709_v31 = vadd.f32 %v1206_v25, %v1158_v10  ;;  %v1951_v10 = vld [vmem:[%s2909_s1 + $0x1a0] sm:$0xf0] }
 0x179   : > { %v1159_v32 = vpop.f32.mrf.mxu3 }
 0x17a   : > { %v1114_v33 = vadd.f32 %v1113_v19, %v1065_v30  ;;  %v1160_v35 = vadd.f32 %v1159_v32, %v1111_v9  ;;  %1259 = vmatmul.bf16.gmra.mxu1 %v1730_v21  ;;  %1401 = vmatmul.bf16.gmra.mxu0 %v1706_v22  ;;  %v1805_v9 = vld [vmem:[%s2909_s1 + $0x180] sm:$0xf]  ;;  %v1943_v32 = vld [vmem:[%s2909_s1 + $0x160] sm:$0xf0] }
 0x17b   : > { %v1806_v15 = vor.u32 %v1951_v10, %v1805_v9  ;;  %v1777_v30 = vld [vmem:[%s2909_s1 + $0x140] sm:$0xf] }
 0x17c   : > { %v1778_v36 = vor.u32 %v1943_v32, %v1777_v30 }
 0x17d   : > { %v1115_v39 = vpop.f32.mrf.mxu2 }
 0x17e   : > { %1357 = vmatmul.bf16.gmra.mxu3 %v1738_v13  ;;  %v1802_v13 = vor.u32 %v1946_v26, %v1799_v2  ;;  %v1969_v26 = vld [vmem:[%s2909_s1 + $0x230] sm:$0xf0] }
 0x17f   : > { %v1066_v42 = vpop.f32.mrf.mxu1  ;;  %v1208_v43 = vpop.f32.mrf.mxu0 }
 0x180   : > { %v1067_v45 = vadd.f32 %v1066_v42, %v1018_v40  ;;  %v2718_v46 = vadd.f32 %v1208_v43, %v1160_v35  ;;  %v1026_v35 = vadd.f32 %v2570_v11, %v596_v28  ;;  %v1807_v40 = vld [vmem:[%s2909_s1 + $0x1a4] sm:$0xf0] }
 0x181   : > { %v1162_v47 = vpop.f32.mrf.mxu3 }
 0x182   : > { %v1116_v48 = vadd.f32 %v1115_v39, %v1067_v45  ;;  %v1163_v49 = vadd.f32 %v1162_v47, %v1114_v33  ;;  %1313 = vmatmul.bf16.gmra.mxu2 %v1770_v41  ;;  %v1947_v39 = vld [vmem:[%s2909_s1 + $0x184] sm:$0xf] }
 0x183   : > { %v1810_v11 = vor.u32 %v1947_v39, %v1807_v40  ;;  %v1964_v39 = vld [vmem:[%s2909_s1 + $0x20c] sm:$0xf] }
 0x185   : > { %v1118_v57 = vpop.f32.mrf.mxu2 }
 0x187   : > { %v1069_v60 = vpop.f32.mrf.mxu1  ;;  %v1211_v61 = vpop.f32.mrf.mxu0 }
 0x188   : > { %v1070_v0 = vadd.f32 %v1069_v60, %v1021_v58  ;;  %v2739_v1 = vadd.f32 %v1211_v61, %v1163_v49  ;;  %v1841_v49 = vld [vmem:[%s2909_s1 + $0x1c8] sm:$0xf] }
 0x189   : > { %v1164_v4 = vpop.f32.mrf.mxu3  ;;  %v1842_v53 = vor.u32 %v1960_v50, %v1841_v49 }
 0x18a   : > { %v1119_v5 = vadd.f32 %v1118_v57, %v1070_v0  ;;  %v1165_v8 = vadd.f32 %v1164_v4, %v1116_v48  ;;  %1264 = vmatmul.bf16.gmra.mxu1 %v1766_v54  ;;  %1406 = vmatmul.bf16.gmra.mxu0 %v1742_v59  ;;  %v601_v48 = vpop.permute.xlu1 %600  ;;  %v1813_v0 = vld [vmem:[%s2909_s1 + $0x188] sm:$0xf]  ;;  %v1952_v4 = vld [vmem:[%s2909_s1 + $0x1a8] sm:$0xf0] }
 0x18b   : > { %v1028_v27 = vadd.f32 %v2594_v24, %v601_v48  ;;  %v1835_v24 = vld [vmem:[%s2909_s1 + $0x1e4] sm:$0xf0]  ;;  %v1814_v9 = vor.u32 %v1952_v4, %v1813_v0 }
 0x18d   : > { %v1120_v14 = vpop.f32.mrf.mxu2 }
 0x18e   : > { %1362 = vmatmul.bf16.gmra.mxu3 %v1774_v52  ;;  %v1838_v52 = vor.u32 %v1955_v62, %v1835_v24 }
 0x18f   : > { %v1071_v18 = vpop.f32.mrf.mxu1  ;;  %v1213_v19 = vpop.f32.mrf.mxu0 }
 0x190   : > { %v1072_v20 = vadd.f32 %v1071_v18, %v1023_v3  ;;  %v2748_v21 = vadd.f32 %v1213_v19, %v1165_v8  ;;  %v1031_v8 = vadd.f32 %v2562_v6, %v606_v63  ;;  %v1843_v3 = vld [vmem:[%s2909_s1 + $0x1ec] sm:$0xf0] }
 0x191   : > { %v1167_v22 = vpop.f32.mrf.mxu3 }
 0x192   : > { %v1121_v23 = vadd.f32 %v1120_v14, %v1072_v20  ;;  %v1168_v25 = vadd.f32 %v1167_v22, %v1119_v5  ;;  %1318 = vmatmul.bf16.gmra.mxu2 %v1806_v15  ;;  %v1956_v14 = vld [vmem:[%s2909_s1 + $0x1cc] sm:$0xf]  ;;  %v616_v40 = vpop.permute.xlu1 %615 }
 0x193   : > { %v1846_v6 = vor.u32 %v1956_v14, %v1843_v3 }
 0x195   : > { %v1123_v33 = vpop.f32.mrf.mxu2 }
 0x197   : > { %v1074_v37 = vpop.f32.mrf.mxu1  ;;  %v1216_v38 = vpop.f32.mrf.mxu0 }
 0x198   : > { %v1075_v41 = vadd.f32 %v1074_v37, %v1026_v35  ;;  %v2769_v42 = vadd.f32 %v1216_v38, %v1168_v25  ;;  %v1877_v25 = vld [vmem:[%s2909_s1 + $0x210] sm:$0xf] }
 0x199   : > { %v1169_v43 = vpop.f32.mrf.mxu3  ;;  %v1878_v30 = vor.u32 %v1969_v26, %v1877_v25 }
 0x19a   : > { %v1124_v45 = vadd.f32 %v1123_v33, %v1075_v41  ;;  %v1170_v47 = vadd.f32 %v1169_v43, %v1121_v23  ;;  %1269 = vmatmul.bf16.gmra.mxu1 %v1802_v13  ;;  %1411 = vmatmul.bf16.gmra.mxu0 %v1778_v36  ;;  %v611_v23 = vpop.permute.xlu0 %610  ;;  %v1849_v41 = vld [vmem:[%s2909_s1 + $0x1d0] sm:$0xf]  ;;  %v1961_v43 = vld [vmem:[%s2909_s1 + $0x1f0] sm:$0xf0] }
 0x19b   : > { %v1033_v2 = vadd.f32 %v2586_v17, %v611_v23  ;;  %v1871_v17 = vld [vmem:[%s2909_s1 + $0x22c] sm:$0xf0]  ;;  %v1850_v48 = vor.u32 %v1961_v43, %v1849_v41 }
 0x19d   : > { %v1125_v51 = vpop.f32.mrf.mxu2 }
 0x19e   : > { %1367 = vmatmul.bf16.gmra.mxu3 %v1810_v11  ;;  %v1874_v11 = vor.u32 %v1964_v39, %v1871_v17 }
 0x19f   : > { %v1076_v56 = vpop.f32.mrf.mxu1  ;;  %v1218_v57 = vpop.f32.mrf.mxu0 }
 0x1a0   : > { %v1077_v58 = vadd.f32 %v1076_v56, %v1028_v27  ;;  %v2778_v54 = vadd.f32 %v1218_v57, %v1170_v47  ;;  %v1036_v47 = vadd.f32 %v2604_v29, %v616_v40  ;;  %v1879_v27 = vld [vmem:[%s2909_s1 + $0x234] sm:$0xf0] }
 0x1a1   : > { %v1172_v59 = vpop.f32.mrf.mxu3 }
 0x1a2   : > { %v1126_v60 = vadd.f32 %v1125_v51, %v1077_v58  ;;  %v1173_v61 = vadd.f32 %v1172_v59, %v1124_v45  ;;  %1323 = vmatmul.bf16.gmra.mxu2 %v1842_v53  ;;  %v1965_v51 = vld [vmem:[%s2909_s1 + $0x214] sm:$0xf] }
 0x1a3   : > { %v1882_v29 = vor.u32 %v1965_v51, %v1879_v27 }
 0x1a5   : > { %v1128_v5 = vpop.f32.mrf.mxu2 }
 0x1a7   : > { %v1079_v10 = vpop.f32.mrf.mxu1  ;;  %v1221_v12 = vpop.f32.mrf.mxu0 }
 0x1a8   : > { %v1080_v15 = vadd.f32 %v1079_v10, %v1031_v8  ;;  %v2799_v18 = vadd.f32 %v1221_v12, %v1173_v61  ;;  %v1970_v10 = vld [vmem:[%s2909_s1 + $0x238] sm:$0xf0] }
 0x1a9   : > { %v1174_v19 = vpop.f32.mrf.mxu3 }
 0x1aa   : > { %v1129_v20 = vadd.f32 %v1128_v5, %v1080_v15  ;;  %v1175_v22 = vadd.f32 %v1174_v19, %v1126_v60  ;;  %1274 = vmatmul.bf16.gmra.mxu1 %v1838_v52  ;;  %1416 = vmatmul.bf16.gmra.mxu0 %v1814_v9  ;;  %v621_v60 = vpop.permute.xlu2 %620  ;;  %v1885_v9 = vld [vmem:[%s2909_s1 + $0x218] sm:$0xf] }
 0x1ab   : > { %v1038_v62 = vadd.f32 %v2624_v44, %v621_v60  ;;  %v1886_v14 = vor.u32 %v1970_v10, %v1885_v9 }
 0x1ad   : > { %v1130_v28 = vpop.f32.mrf.mxu2 }
 0x1ae   : > { %1372 = vmatmul.bf16.gmra.mxu3 %v1846_v6 }
 0x1af   : > { %v1081_v32 = vpop.f32.mrf.mxu1  ;;  %v1223_v33 = vpop.f32.mrf.mxu0 }
 0x1b0   : > { %v1082_v35 = vadd.f32 %v1081_v32, %v1033_v2  ;;  %v2808_v13 = vadd.f32 %v1223_v33, %v1175_v22 }
 0x1b1   : > { %v1177_v36 = vpop.f32.mrf.mxu3 }
 0x1b2   : > { %v1131_v37 = vadd.f32 %v1130_v28, %v1082_v35  ;;  %v1178_v38 = vadd.f32 %v1177_v36, %v1129_v20  ;;  %1328 = vmatmul.bf16.gmra.mxu2 %v1878_v30 }
 0x1b5   : > { %v1133_v45 = vpop.f32.mrf.mxu2 }
 0x1b7   : > { %v1084_v49 = vpop.f32.mrf.mxu1  ;;  %v1226_v50 = vpop.f32.mrf.mxu0 }
 0x1b8   : > { %v1085_v53 = vadd.f32 %v1084_v49, %v1036_v47  ;;  %v2829_v56 = vadd.f32 %v1226_v50, %v1178_v38 }
 0x1b9   : > { %v1179_v57 = vpop.f32.mrf.mxu3 }
 0x1ba   : > { %v1134_v58 = vadd.f32 %v1133_v45, %v1085_v53  ;;  %v1180_v59 = vadd.f32 %v1179_v57, %v1131_v37  ;;  %1279 = vmatmul.bf16.gmra.mxu1 %v1874_v11  ;;  %1421 = vmatmul.bf16.gmra.mxu0 %v1850_v48 }
 0x1bd   : > { %v1135_v61 = vpop.f32.mrf.mxu2 }
 0x1be   : > { %1377 = vmatmul.bf16.gmra.mxu3 %v1882_v29 }
 0x1bf   : > { %v1086_v63 = vpop.f32.mrf.mxu1  ;;  %v1228_v24 = vpop.f32.mrf.mxu0 }
 0x1c0   : > { %v1087_v0 = vadd.f32 %v1086_v63, %v1038_v62  ;;  %v2832_v4 = vadd.f32 %v1228_v24, %v1180_v59 }
 0x1c1   : > { %v1182_v5 = vpop.f32.mrf.mxu3 }
 0x1c2   : > { %v1136_v8 = vadd.f32 %v1135_v61, %v1087_v0  ;;  %v1183_v52 = vadd.f32 %v1182_v5, %v1134_v58 }
 0x1c5   : > { %v1294_v12 = vpop.f32.mrf.mxu2 }
 0x1c7   : > { %v1231_v44 = vpop.f32.mrf.mxu0  ;;  %v1245_v3 = vpop.f32.mrf.mxu1 }
 0x1c8   : > { %v2840_v15 = vadd.f32 %v1231_v44, %v1183_v52  ;;  %v1246_v25 = vadd.f32 %v1245_v3, %v2650_v16 }
 0x1c9   : > { %v1184_v19 = vpop.f32.mrf.mxu3 }
 0x1ca   : > { %v1185_v20 = vadd.f32 %v1184_v19, %v1136_v8  ;;  %1426 = vmatmul.bf16.gmra.mxu0 %v1886_v14  ;;  %v1295_v2 = vadd.f32 %v1294_v12, %v1246_v25 }
 0x1cd   : > { %v1296_v22 = vpop.f32.mrf.mxu2 }
 0x1cf   : > { %v1233_v6 = vpop.f32.mrf.mxu0  ;;  %v1247_v23 = vpop.f32.mrf.mxu1 }
 0x1d0   : > { %v2843_v26 = vadd.f32 %v1233_v6, %v1185_v20  ;;  %v1248_v36 = vadd.f32 %v1247_v23, %v2658_v34 }
 0x1d1   : > { %v1343_v28 = vpop.f32.mrf.mxu3 }
 0x1d2   : > { %v1344_v32 = vadd.f32 %v1343_v28, %v1295_v2  ;;  %v1297_v16 = vadd.f32 %v1296_v22, %v1248_v36 }
 0x1d5   : > { %v1299_v30 = vpop.f32.mrf.mxu2 }
 0x1d7   : > { %v1250_v33 = vpop.f32.mrf.mxu1  ;;  %v1392_v35 = vpop.f32.mrf.mxu0 }
 0x1d8   : > { %v1393_v37 = vadd.f32 %v1392_v35, %v1344_v32  ;;  %v1251_v45 = vadd.f32 %v1250_v33, %v2679_v55 }
 0x1d9   : > { %v1345_v38 = vpop.f32.mrf.mxu3 }
 0x1da   : > { %v1432_v39 = vmax.f32 %v1393_v37, 0.0  ;;  %v1346_v41 = vadd.f32 %v1345_v38, %v1297_v16  ;;  %v1300_v49 = vadd.f32 %v1299_v30, %v1251_v45 }
 0x1dc   : > { %v1448_v40 = vpack.c.bf16 %v1432_v39, %v1432_v39 }
 0x1dd   : > { %v1301_v17 = vpop.f32.mrf.mxu2 }
 0x1de   : > { %1465 = vst.msk [vmem:[%s2851_s25] sm:$0xf] %vm1464_vm0, %v1448_v40 }
 0x1df   : > { %v1252_v43 = vpop.f32.mrf.mxu1  ;;  %v1394_v34 = vpop.f32.mrf.mxu0 }
 0x1e0   : > { %v1395_v47 = vadd.f32 %v1394_v34, %v1346_v41  ;;  %v1253_v58 = vadd.f32 %v1252_v43, %v2688_v7 }
 0x1e1   : > { %v1348_v11 = vpop.f32.mrf.mxu3 }
 0x1e2   : > { %v1433_v48 = vmax.f32 %v1395_v47, 0.0  ;;  %v1349_v27 = vadd.f32 %v1348_v11, %v1300_v49  ;;  %v1302_v61 = vadd.f32 %v1301_v17, %v1253_v58 }
 0x1e4   : > { %v1449_v50 = vpack.c.bf16 %v1433_v48, %v1433_v48 }
 0x1e5   : > { %v1304_v51 = vpop.f32.mrf.mxu2 }
 0x1e6   : > { %1466 = vst.msk [vmem:[%s2851_s25 + $0x4] sm:$0xf] %vm1464_vm0, %v1449_v50 }
 0x1e7   : > { %v1255_v53 = vpop.f32.mrf.mxu1  ;;  %v1397_v57 = vpop.f32.mrf.mxu0 }
 0x1e8   : > { %v1398_v59 = vadd.f32 %v1397_v57, %v1349_v27  ;;  %v1256_v5 = vadd.f32 %v1255_v53, %v2709_v31 }
 0x1e9   : > { %v1350_v29 = vpop.f32.mrf.mxu3 }
 0x1ea   : > { %v1434_v60 = vmax.f32 %v1398_v59, 0.0  ;;  %v1351_v63 = vadd.f32 %v1350_v29, %v1302_v61  ;;  %v1305_v10 = vadd.f32 %v1304_v51, %v1256_v5 }
 0x1ec   : > { %v1450_v55 = vpack.c.bf16 %v1434_v60, %v1434_v60 }
 0x1ed   : > { %v1306_v62 = vpop.f32.mrf.mxu2 }
 0x1ee   : > { %1467 = vst.msk [vmem:[%s2851_s25 + $0x8] sm:$0xf] %vm1464_vm0, %v1450_v55 }
 0x1ef   : > { %v1257_v24 = vpop.f32.mrf.mxu1  ;;  %v1399_v0 = vpop.f32.mrf.mxu0 }
 0x1f0   : > { %v1400_v8 = vadd.f32 %v1399_v0, %v1351_v63  ;;  %v1258_v19 = vadd.f32 %v1257_v24, %v2718_v46 }
 0x1f1   : > { %v1353_v52 = vpop.f32.mrf.mxu3 }
 0x1f2   : > { %v1435_v9 = vmax.f32 %v1400_v8, 0.0  ;;  %v1354_v14 = vadd.f32 %v1353_v52, %v1305_v10  ;;  %v1307_v23 = vadd.f32 %v1306_v62, %v1258_v19 }
 0x1f4   : > { %v1451_v7 = vpack.c.bf16 %v1435_v9, %v1435_v9 }
 0x1f5   : > { %v1309_v12 = vpop.f32.mrf.mxu2 }
 0x1f6   : > { %1468 = vst.msk [vmem:[%s2851_s25 + $0xc] sm:$0xf] %vm1464_vm0, %v1451_v7 }
 0x1f7   : > { %v1260_v44 = vpop.f32.mrf.mxu1  ;;  %v1402_v3 = vpop.f32.mrf.mxu0 }
 0x1f8   : > { %v1403_v20 = vadd.f32 %v1402_v3, %v1354_v14  ;;  %v1261_v32 = vadd.f32 %v1260_v44, %v2739_v1 }
 0x1f9   : > { %v1355_v22 = vpop.f32.mrf.mxu3 }
 0x1fa   : > { %v1436_v6 = vmax.f32 %v1403_v20, 0.0  ;;  %v1356_v28 = vadd.f32 %v1355_v22, %v1307_v23  ;;  %v1310_v37 = vadd.f32 %v1309_v12, %v1261_v32 }
 0x1fc   : > { %v1452_v31 = vpack.c.bf16 %v1436_v6, %v1436_v6 }
 0x1fd   : > { %v1311_v25 = vpop.f32.mrf.mxu2 }
 0x1fe   : > { %1469 = vst.msk [vmem:[%s2851_s25 + $0x10] sm:$0xf] %vm1464_vm0, %v1452_v31 }
 0x1ff   : > { %v1262_v2 = vpop.f32.mrf.mxu1  ;;  %v1404_v30 = vpop.f32.mrf.mxu0 }
 0x200   : > { %v1405_v33 = vadd.f32 %v1404_v30, %v1356_v28  ;;  %v1263_v17 = vadd.f32 %v1262_v2, %v2748_v21 }
 0x201   : > { %v1358_v35 = vpop.f32.mrf.mxu3 }
 0x202   : > { %v1437_v36 = vmax.f32 %v1405_v33, 0.0  ;;  %v1359_v39 = vadd.f32 %v1358_v35, %v1310_v37  ;;  %v1312_v45 = vadd.f32 %v1311_v25, %v1263_v17 }
 0x204   : > { %v1453_v46 = vpack.c.bf16 %v1437_v36, %v1437_v36 }
 0x205   : > { %v1314_v38 = vpop.f32.mrf.mxu2 }
 0x206   : > { %1470 = vst.msk [vmem:[%s2851_s25 + $0x14] sm:$0xf] %vm1464_vm0, %v1453_v46 }
 0x207   : > { %v1265_v16 = vpop.f32.mrf.mxu1  ;;  %v1407_v40 = vpop.f32.mrf.mxu0 }
 0x208   : > { %v1408_v41 = vadd.f32 %v1407_v40, %v1359_v39  ;;  %v1266_v50 = vadd.f32 %v1265_v16, %v2769_v42 }
 0x209   : > { %v1360_v43 = vpop.f32.mrf.mxu3 }
 0x20a   : > { %v1438_v34 = vmax.f32 %v1408_v41, 0.0  ;;  %v1361_v11 = vadd.f32 %v1360_v43, %v1312_v45  ;;  %v1315_v57 = vadd.f32 %v1314_v38, %v1266_v50 }
 0x20c   : > { %v1454_v1 = vpack.c.bf16 %v1438_v34, %v1438_v34 }
 0x20d   : > { %v1316_v47 = vpop.f32.mrf.mxu2 }
 0x20e   : > { %1471 = vst.msk [vmem:[%s2851_s25 + $0x18] sm:$0xf] %vm1464_vm0, %v1454_v1 }
 0x20f   : > { %v1267_v48 = vpop.f32.mrf.mxu1  ;;  %v1409_v49 = vpop.f32.mrf.mxu0 }
 0x210   : > { %v1410_v51 = vadd.f32 %v1409_v49, %v1361_v11  ;;  %v1268_v61 = vadd.f32 %v1267_v48, %v2778_v54 }
 0x211   : > { %v1363_v27 = vpop.f32.mrf.mxu3 }
 0x212   : > { %v1439_v53 = vmax.f32 %v1410_v51, 0.0  ;;  %v1364_v58 = vadd.f32 %v1363_v27, %v1315_v57  ;;  %v1317_v24 = vadd.f32 %v1316_v47, %v1268_v61 }
 0x214   : > { %v1455_v21 = vpack.c.bf16 %v1439_v53, %v1439_v53 }
 0x215   : > { %v1319_v59 = vpop.f32.mrf.mxu2 }
 0x216   : > { %1472 = vst.msk [vmem:[%s2851_s25 + $0x1c] sm:$0xf] %vm1464_vm0, %v1455_v21 }
 0x217   : > { %v1270_v29 = vpop.f32.mrf.mxu1  ;;  %v1412_v60 = vpop.f32.mrf.mxu0 }
 0x218   : > { %v1413_v55 = vadd.f32 %v1412_v60, %v1364_v58  ;;  %v1271_v52 = vadd.f32 %v1270_v29, %v2799_v18 }
 0x219   : > { %v1365_v62 = vpop.f32.mrf.mxu3 }
 0x21a   : > { %v1440_v63 = vmax.f32 %v1413_v55, 0.0  ;;  %v1366_v0 = vadd.f32 %v1365_v62, %v1317_v24  ;;  %v1320_v14 = vadd.f32 %v1319_v59, %v1271_v52 }
 0x21c   : > { %v1456_v42 = vpack.c.bf16 %v1440_v63, %v1440_v63 }
 0x21d   : > { %v1321_v10 = vpop.f32.mrf.mxu2 }
 0x21e   : > { %1473 = vst.msk [vmem:[%s2851_s25 + $0x20] sm:$0xf] %vm1464_vm0, %v1456_v42 }
 0x21f   : > { %v1272_v5 = vpop.f32.mrf.mxu1  ;;  %v1414_v8 = vpop.f32.mrf.mxu0 }
 0x220   : > { %v1415_v9 = vadd.f32 %v1414_v8, %v1366_v0  ;;  %v1273_v20 = vadd.f32 %v1272_v5, %v2808_v13 }
 0x221   : > { %v1368_v7 = vpop.f32.mrf.mxu3 }
 0x222   : > { %v1441_v12 = vmax.f32 %v1415_v9, 0.0  ;;  %v1369_v44 = vadd.f32 %v1368_v7, %v1320_v14  ;;  %v1322_v18 = vadd.f32 %v1321_v10, %v1273_v20 }
 0x224   : > { %v1457_v54 = vpack.c.bf16 %v1441_v12, %v1441_v12 }
 0x225   : > { %v1324_v31 = vpop.f32.mrf.mxu2 }
 0x226   : > { %1474 = vst.msk [vmem:[%s2851_s25 + $0x24] sm:$0xf] %vm1464_vm0, %v1457_v54 }
 0x227   : > { %v1275_v3 = vpop.f32.mrf.mxu1  ;;  %v1417_v19 = vpop.f32.mrf.mxu0 }
 0x228   : > { %v1418_v22 = vadd.f32 %v1417_v19, %v1369_v44  ;;  %v1276_v30 = vadd.f32 %v1275_v3, %v2829_v56 }
 0x229   : > { %v1370_v6 = vpop.f32.mrf.mxu3 }
 0x22a   : > { %v1442_v23 = vmax.f32 %v1418_v22, 0.0  ;;  %v1371_v28 = vadd.f32 %v1370_v6, %v1322_v18  ;;  %v1325_v37 = vadd.f32 %v1324_v31, %v1276_v30 }
 0x22c   : > { %v1458_v25 = vpack.c.bf16 %v1442_v23, %v1442_v23 }
 0x22d   : > { %v1326_v46 = vpop.f32.mrf.mxu2 }
 0x22e   : > { %1475 = vst.msk [vmem:[%s2851_s25 + $0x28] sm:$0xf] %vm1464_vm0, %v1458_v25 }
 0x22f   : > { %v1419_v2 = vpop.f32.mrf.mxu0  ;;  %v1277_v33 = vpop.f32.mrf.mxu1 }
 0x230   : > { %v1420_v32 = vadd.f32 %v1419_v2, %v1371_v28  ;;  %v1278_v16 = vadd.f32 %v1277_v33, %v2832_v4 }
 0x231   : > { %v1373_v35 = vpop.f32.mrf.mxu3 }
 0x232   : > { %v1443_v36 = vmax.f32 %v1420_v32, 0.0  ;;  %v1374_v38 = vadd.f32 %v1373_v35, %v1325_v37  ;;  %v1327_v56 = vadd.f32 %v1326_v46, %v1278_v16 }
 0x234   : > { %v1459_v13 = vpack.c.bf16 %v1443_v36, %v1443_v36 }
 0x235   : > { %v1329_v1 = vpop.f32.mrf.mxu2 }
 0x236   : > { %1476 = vst.msk [vmem:[%s2851_s25 + $0x2c] sm:$0xf] %vm1464_vm0, %v1459_v13 }
 0x237   : > { %v1422_v39 = vpop.f32.mrf.mxu0  ;;  %v1280_v43 = vpop.f32.mrf.mxu1 }
 0x238   : > { %v1423_v40 = vadd.f32 %v1422_v39, %v1374_v38  ;;  %v1281_v11 = vadd.f32 %v1280_v43, %v2840_v15 }
 0x239   : > { %v1375_v17 = vpop.f32.mrf.mxu3 }
 0x23a   : > { %v1444_v41 = vmax.f32 %v1423_v40, 0.0  ;;  %v1376_v45 = vadd.f32 %v1375_v17, %v1327_v56  ;;  %v1330_v51 = vadd.f32 %v1329_v1, %v1281_v11 }
 0x23c   : > { %v1460_v34 = vpack.c.bf16 %v1444_v41, %v1444_v41 }
 0x23d   : > { %v1331_v59 = vpop.f32.mrf.mxu2 }
 0x23e   : > { %1477 = vst.msk [vmem:[%s2851_s25 + $0x30] sm:$0xf] %vm1464_vm0, %v1460_v34 }
 0x23f   : > { %v1424_v47 = vpop.f32.mrf.mxu0  ;;  %v1282_v27 = vpop.f32.mrf.mxu1 }
 0x240   : > { %v1425_v48 = vadd.f32 %v1424_v47, %v1376_v45  ;;  %v1283_v21 = vadd.f32 %v1282_v27, %v2843_v26 }
 0x241   : > { %v1378_v49 = vpop.f32.mrf.mxu3 }
 0x242   : > { %v1445_v50 = vmax.f32 %v1425_v48, 0.0  ;;  %v1379_v53 = vadd.f32 %v1378_v49, %v1330_v51  ;;  %v1332_v61 = vadd.f32 %v1331_v59, %v1283_v21 }
 0x244   : > { %v1461_v4 = vpack.c.bf16 %v1445_v50, %v1445_v50 }
 0x246   : > { %1478 = vst.msk [vmem:[%s2851_s25 + $0x34] sm:$0xf] %vm1464_vm0, %v1461_v4 }
 0x247   : > { %v1427_v57 = vpop.f32.mrf.mxu0 }
 0x248   : > { %v1428_v58 = vadd.f32 %v1427_v57, %v1379_v53 }
 0x249   : > { %v1380_v60 = vpop.f32.mrf.mxu3 }
 0x24a   : > { %v1446_v29 = vmax.f32 %v1428_v58, 0.0  ;;  %v1381_v55 = vadd.f32 %v1380_v60, %v1332_v61 }
 0x24c   : > { %v1462_v15 = vpack.c.bf16 %v1446_v29, %v1446_v29 }
 0x24e   : > { %1479 = vst.msk [vmem:[%s2851_s25 + $0x38] sm:$0xf] %vm1464_vm0, %v1462_v15 }
 0x24f   : > { %v1429_v62 = vpop.f32.mrf.mxu0 }
 0x250   : > { %v1430_v63 = vadd.f32 %v1429_v62, %v1381_v55 }
 0x252   : > { %v1447_v24 = vmax.f32 %v1430_v63, 0.0 }
 0x254   : > { %v1463_v42 = vpack.c.bf16 %v1447_v24, %v1447_v24 }
 0x256   : > { %1480 = vst.msk [vmem:[%s2851_s25 + $0x3c] sm:$0xf] %vm1464_vm0, %v1463_v42 }
 0x257 PF: > { %s13_s14 = sadd.s32 1, %s2053_s14   ;;  %s2912_s12 = smov %s2049_s13 }
 0x258   : > { %p10_p5 = scmp.ge.s32.totalorder %s13_s14, 4   ;;  %s2913_s13 = smov %s2915_s15 }
 0x25a   :  { %12 = sbr.rel (!%p10_p5) target bundleno = 2 (0x2), region = 62 }

// kernel: forward.39
= control target key start
LH: loop header
LB: loop body
LE: loop exit
PB: predicated region body
PF: predicated region fallthrough
CT: control target
= control target key end

     0   :  { %s2255_s15 = smov 0   ;;  %s2257_s16 = smov 0   ;;  %s3090_s0 = inlined_call_operand.vmem [shape: bf16[2,128,40], index: 0, kind: input, shape index: {}]   ;;  %s3091_s1 = inlined_call_operand.vmem [shape: bf16[128,1152], index: 1, kind: input, shape index: {}]   ;;  %s3092_s2 = inlined_call_operand.vmem [shape: f32[128,1], index: 2, kind: input, shape index: {}]   ;;  %s3093_s3 = inlined_call_operand.vmem [shape: bf16[2,128,16], index: 3, kind: input, shape index: {}]   ;;  %s3094_s4 = inlined_call_operand.vmem [shape: bf16[2,128,16], index: 4, kind: output, shape index: {}]  }
   0x1   :  { %s2259_s17 = smov 0  }
   0x2 LB: > { %s26_s18 = sadd.s32 1, %s2215_s16  ;;  %p1686_p0 = scmp.ge.s32.totalorder %s2219_s17, 1  ;;  %s2219_s17 = sphi %s2259_s17, %s14_s17   ;;  %s2215_s16 = sphi %s2257_s16, %s3096_s16   ;;  %s2211_s15 = sphi %s2255_s15, %s3095_s15  }
   0x3   : > { %p28_p1 = scmp.ge.s32.totalorder %s26_s18, 2  ;;  %p191_p2 = scmp.lt.s32.totalorder %s2219_s17, 3 }
   0x5   : > { %s3098_s18 = smov (%p28_p1, %s26_s18), 0  ;;  %p192_p3 = pnand %p1686_p0, %p191_p2 }
   0x6   : > { %p228_p4 = scmp.lt.s32.totalorder (!%p192_p3), %s2211_s15, 1  ;;  %s2221_s23 = smov (!%p192_p3), 127  }
   0x7   : > { %195 = sbr.rel (%p192_p3) target bundleno = 601 (0x259), region = 36  ;;  %s2222_s24 = smov (!%p192_p3), 126  }
   0x8   : > { %s2223_s25 = smov (!%p192_p3), 120   ;;  %s2224_s26 = smov (!%p192_p3), 119  }
   0x9   : > { %s2225_s27 = smov (!%p192_p3), 112   ;;  %s2226_s28 = smov (!%p192_p3), 118  }
   0xa   : > { %s2227_s29 = smov (!%p192_p3), 111   ;;  %s2228_s30 = smov (!%p192_p3), 110  }
   0xc   : > { %s3100_s15 = smov (!%p228_p4, %s2211_s15), 1  ;;  %v1871_v14 = vld [vmem:[%s3091_s1 + $0x120] sm:$0xf]  ;;  %v2066_v15 = vld [vmem:[%s3091_s1 + $0x140] sm:$0xf0]  ;;  %v2229_v35 = vmov 0  }
   0xd   : > { %s2273_s19 = sshll.u32 %s3100_s15, 6  ;;  %v1872_v16 = vor.u32 %v2066_v15, %v1871_v14  ;;  %v1799_v17 = vld [vmem:[%s3091_s1 + $0x90] sm:$0xf]  ;;  %v2048_v18 = vld [vmem:[%s3091_s1 + $0xb0] sm:$0xf0]  ;;  %2194 = vset.pattern.permute.xlu1 %v2229_v35  ;;  %2196 = vset.pattern.permute.xlu0 %v2229_v35  ;;  %v585_v57 = vld [vmem:[%s3092_s2] sm:$0xff] }
   0xe   : > { %s2279_s22 = scalar_lea.vmem %s3090_s0, %s2273_s19  ;;  %v1943_v19 = vld [vmem:[%s3091_s1 + $0x1b0] sm:$0xf]  ;;  %v1800_v20 = vor.u32 %v2048_v18, %v1799_v17  ;;  %v2084_v21 = vld [vmem:[%s3091_s1 + $0x1d0] sm:$0xf0]  ;;  %v1727_v26 = vld [vmem:[%s3091_s1] sm:$0xf]  ;;  %2195 = vset.pattern.permute.xlu2 %v2229_v35  ;;  %s3026_s5 = scalar_lea.vmem %s3094_s4, %s2273_s19 }
   0xf   : > { %v2282_v0 = vld [vmem:[%s2279_s22 + $0x38] sm:$0xff]  ;;  %v2285_v1 = vld [vmem:[%s2279_s22 + $0x30] sm:$0xff]  ;;  %v2301_v2 = vld [vmem:[%s2279_s22 + $0x28] sm:$0xff]  ;;  %v1944_v22 = vor.u32 %v2084_v21, %v1943_v19  ;;  %vm1570_vm0 = vcmask 125952  }
  0x10   : > { %327 = vrot.lane.b32.xlu1 %v2282_v0, %s2221_s23  ;;  %351 = vrot.lane.b32.xlu0 %v2282_v0, %s2222_s24  ;;  %v2314_v3 = vld [vmem:[%s2279_s22 + $0x20] sm:$0xff]  ;;  %v2321_v4 = vld [vmem:[%s2279_s22 + $0x18] sm:$0xff] }
  0x11   : > { %373 = vrot.lane.b32.xlu2 %v2285_v1, %s2223_s25  ;;  %2137 = vmatpush.bf16.msra.mxu1 %v2282_v0  ;;  %v2334_v5 = vld [vmem:[%s2279_s22 + $0x10] sm:$0xff]  ;;  %v2341_v6 = vld [vmem:[%s2279_s22 + $0x8] sm:$0xff]  ;;  %v2361_v7 = vld [vmem:[%s2279_s22] sm:$0xff] }
  0x12   : > { %2138 = vmatpush.bf16.msra.mxu2 %v2282_v0  ;;  %2139 = vmatpush.bf16.msra.mxu3 %v2282_v0  ;;  %v2030_v27 = vld [vmem:[%s3091_s1 + $0x20] sm:$0xf0]  ;;  %v1907_v32 = vld [vmem:[%s3091_s1 + $0x168] sm:$0xf]  ;;  %v2075_v33 = vld [vmem:[%s3091_s1 + $0x188] sm:$0xf0] }
  0x13   : > { %1049 = vmatpush.bf16.msra.mxu0 %v2282_v0  ;;  %v1728_v28 = vor.u32 %v2030_v27, %v1727_v26  ;;  %v1908_v34 = vor.u32 %v2075_v33, %v1907_v32  ;;  %v1835_v36 = vld [vmem:[%s3091_s1 + $0xd8] sm:$0xf]  ;;  %v2057_v37 = vld [vmem:[%s3091_s1 + $0xf8] sm:$0xf0]  ;;  %v1763_v45 = vld [vmem:[%s3091_s1 + $0x48] sm:$0xf] }
  0x14   : > { %v1836_v38 = vor.u32 %v2057_v37, %v1835_v36  ;;  %v1979_v39 = vld [vmem:[%s3091_s1 + $0x1f8] sm:$0xf]  ;;  %v2093_v40 = vld [vmem:[%s3091_s1 + $0x218] sm:$0xf0]  ;;  %v2039_v46 = vld [vmem:[%s3091_s1 + $0x68] sm:$0xf0] }
  0x15   : > { %2140 = vmatpush.bf16.msra.mxu1 %v2285_v1  ;;  %v1980_v41 = vor.u32 %v2093_v40, %v1979_v39  ;;  %v1764_v47 = vor.u32 %v2039_v46, %v1763_v45  ;;  %v586_v58 = vld [vmem:[%s3092_s2 + $0x8] sm:$0xff]  ;;  %v1737_v14 = vld [vmem:[%s3091_s1 + $0x2c] sm:$0xf0]  ;;  %v2040_v19 = vld [vmem:[%s3091_s1 + $0x70] sm:$0xf0] }
  0x16   : > { %2141 = vmatpush.bf16.msra.mxu2 %v2285_v1  ;;  %2142 = vmatpush.bf16.msra.mxu3 %v2285_v1  ;;  %v1735_v61 = vld [vmem:[%s3091_s1 + $0x8] sm:$0xf]  ;;  %v2031_v62 = vld [vmem:[%s3091_s1 + $0x28] sm:$0xf0]  ;;  %v1771_v18 = vld [vmem:[%s3091_s1 + $0x50] sm:$0xf] }
  0x17   : > { %1050 = vmatpush.bf16.msra.mxu0 %v2285_v1  ;;  %v595_v21 = vld [vmem:[%s3092_s2 + $0x50] sm:$0xff]  ;;  %v2035_v27 = vld [vmem:[%s3091_s1 + $0x4c] sm:$0xf]  ;;  %v596_v32 = vld [vmem:[%s3092_s2 + $0x58] sm:$0xff] }
  0x18   : > { %375 = vrot.lane.b32.xlu0 %v2282_v0, %s2223_s25  ;;  %349 = vrot.lane.b32.xlu1 %v2285_v1, %s2222_s24  ;;  %v597_v35 = vld [vmem:[%s3092_s2 + $0x60] sm:$0xff]  ;;  %v2036_v36 = vld [vmem:[%s3091_s1 + $0x54] sm:$0xf] }
  0x19   : > { %325 = vrot.lane.b32.xlu2 %v2285_v1, %s2221_s23  ;;  %2143 = vmatpush.bf16.msra.mxu1 %v2301_v2  ;;  %v1773_v37 = vld [vmem:[%s3091_s1 + $0x74] sm:$0xf0] }
  0x1a   : > { %2144 = vmatpush.bf16.msra.mxu2 %v2301_v2  ;;  %2145 = vmatpush.bf16.msra.mxu3 %v2301_v2  ;;  %v600_v46 = vld [vmem:[%s3092_s2 + $0x78] sm:$0xff] }
  0x1b   : > { %1051 = vmatpush.bf16.msra.mxu0 %v2301_v2 }
  0x1d   : > { %2146 = vmatpush.bf16.msra.mxu1 %v2314_v3 }
  0x1e   : > { %2147 = vmatpush.bf16.msra.mxu2 %v2314_v3  ;;  %2148 = vmatpush.bf16.msra.mxu3 %v2314_v3 }
  0x1f   : > { %1052 = vmatpush.bf16.msra.mxu0 %v2314_v3 }
  0x20   : > { %371 = vrot.lane.b32.xlu1 %v2301_v2, %s2223_s25  ;;  %347 = vrot.lane.b32.xlu0 %v2301_v2, %s2222_s24 }
  0x21   : > { %399 = vrot.lane.b32.xlu2 %v2282_v0, %s2224_s26  ;;  %2149 = vmatpush.bf16.msra.mxu1 %v2321_v4 }
  0x22   : > { %2150 = vmatpush.bf16.msra.mxu2 %v2321_v4  ;;  %2151 = vmatpush.bf16.msra.mxu3 %v2321_v4 }
  0x23   : > { %1053 = vmatpush.bf16.msra.mxu0 %v2321_v4 }
  0x25   : > { %2152 = vmatpush.bf16.msra.mxu1 %v2334_v5 }
  0x26   : > { %2153 = vmatpush.bf16.msra.mxu2 %v2334_v5  ;;  %2154 = vmatpush.bf16.msra.mxu3 %v2334_v5 }
  0x27   : > { %1054 = vmatpush.bf16.msra.mxu0 %v2334_v5 }
  0x28   : > { %323 = vrot.lane.b32.xlu0 %v2301_v2, %s2221_s23  ;;  %345 = vrot.lane.b32.xlu1 %v2314_v3, %s2222_s24 }
  0x29   : > { %369 = vrot.lane.b32.xlu2 %v2314_v3, %s2223_s25  ;;  %2155 = vmatpush.bf16.msra.mxu1 %v2341_v6 }
  0x2a   : > { %2156 = vmatpush.bf16.msra.mxu2 %v2341_v6  ;;  %2157 = vmatpush.bf16.msra.mxu3 %v2341_v6 }
  0x2b   : > { %1055 = vmatpush.bf16.msra.mxu0 %v2341_v6 }
  0x2d   : > { %2158 = vmatpush.bf16.msra.mxu1 %v2361_v7 }
  0x2e   : > { %2159 = vmatpush.bf16.msra.mxu2 %v2361_v7  ;;  %2160 = vmatpush.bf16.msra.mxu3 %v2361_v7 }
  0x2f   : > { %1056 = vmatpush.bf16.msra.mxu0 %v2361_v7 }
  0x30   : > { %397 = vrot.lane.b32.xlu0 %v2285_v1, %s2224_s26  ;;  %321 = vrot.lane.b32.xlu1 %v2314_v3, %s2221_s23 }
  0x31   : > { %343 = vrot.lane.b32.xlu2 %v2321_v4, %s2222_s24  ;;  %1077 = vmatmul.bf16.vlgmr.msra.gmra.mxu2 %v1872_v16 }
  0x32   : > { %1067 = vmatmul.bf16.vlgmr.msra.gmra.mxu1 %v1800_v20  ;;  %1087 = vmatmul.bf16.vlgmr.msra.gmra.mxu3 %v1944_v22  ;;  %v593_v22 = vld [vmem:[%s3092_s2 + $0x40] sm:$0xff] }
  0x33   : > { %1057 = vmatmul.bf16.vlgmr.msra.gmra.mxu0 %v1728_v28  ;;  %v1765_v28 = vld [vmem:[%s3091_s1 + $0x6c] sm:$0xf0] }
  0x34   : > { %v1768_v33 = vor.u32 %v2035_v27, %v1765_v28  ;;  %v2063_v27 = vld [vmem:[%s3091_s1 + $0x12c] sm:$0xf]  ;;  %v1881_v28 = vld [vmem:[%s3091_s1 + $0x14c] sm:$0xf0] }
  0x38   : > { %395 = vrot.lane.b32.xlu1 %v2301_v2, %s2224_s26  ;;  %367 = vrot.lane.b32.xlu0 %v2321_v4, %s2223_s25 }
  0x39   : > { %319 = vrot.lane.b32.xlu2 %v2321_v4, %s2221_s23 }
  0x40   : > { %365 = vrot.lane.b32.xlu1 %v2334_v5, %s2223_s25  ;;  %341 = vrot.lane.b32.xlu0 %v2334_v5, %s2222_s24 }
  0x41   : > { %393 = vrot.lane.b32.xlu2 %v2314_v3, %s2224_s26  ;;  %1082 = vmatmul.bf16.gmra.mxu2 %v1908_v34 }
  0x42   : > { %1072 = vmatmul.bf16.gmra.mxu1 %v1836_v38  ;;  %1092 = vmatmul.bf16.gmra.mxu3 %v1980_v41  ;;  %v1776_v41 = vor.u32 %v2036_v36, %v1773_v37 }
  0x43   : > { %1062 = vmatmul.bf16.gmra.mxu0 %v1764_v47 }
  0x48   : > { %317 = vrot.lane.b32.xlu0 %v2334_v5, %s2221_s23  ;;  %339 = vrot.lane.b32.xlu1 %v2341_v6, %s2222_s24 }
  0x49   : > { %363 = vrot.lane.b32.xlu2 %v2341_v6, %s2223_s25 }
  0x50   : > { %391 = vrot.lane.b32.xlu0 %v2321_v4, %s2224_s26  ;;  %315 = vrot.lane.b32.xlu1 %v2341_v6, %s2221_s23 }
  0x51   : > { %337 = vrot.lane.b32.xlu2 %v2361_v7, %s2222_s24 }
  0x58   : > { %389 = vrot.lane.b32.xlu1 %v2334_v5, %s2224_s26  ;;  %361 = vrot.lane.b32.xlu0 %v2361_v7, %s2223_s25 }
  0x59   : > { %313 = vrot.lane.b32.xlu2 %v2361_v7, %s2221_s23 }
  0x60   : > { %385 = vrot.lane.b32.xlu1 %v2361_v7, %s2224_s26  ;;  %387 = vrot.lane.b32.xlu0 %v2341_v6, %s2224_s26 }
  0x61   : > { %447 = vrot.lane.b32.xlu2 %v2282_v0, %s2225_s27 }
  0x68   : > { %423 = vrot.lane.b32.xlu1 %v2282_v0, %s2226_s28  ;;  %471 = vrot.lane.b32.xlu0 %v2282_v0, %s2227_s29 }
  0x69   : > { %445 = vrot.lane.b32.xlu2 %v2285_v1, %s2225_s27 }
  0x6b   : > { %v374_v8 = vpop.permute.xlu2 %373 }
  0x70   : > { %421 = vrot.lane.b32.xlu1 %v2285_v1, %s2226_s28  ;;  %469 = vrot.lane.b32.xlu0 %v2285_v1, %s2227_s29 }
  0x71   : > { %443 = vrot.lane.b32.xlu2 %v2301_v2, %s2225_s27 }
  0x73   : > { %v326_v9 = vpop.permute.xlu2 %325 }
  0x78   : > { %495 = vrot.lane.b32.xlu1 %v2282_v0, %s2228_s30  ;;  %467 = vrot.lane.b32.xlu0 %v2301_v2, %s2227_s29  ;;  %v587_v0 = vld [vmem:[%s3092_s2 + $0x10] sm:$0xff] }
  0x79   : > { %419 = vrot.lane.b32.xlu2 %v2301_v2, %s2226_s28 }
  0x7b   : > { %v400_v10 = vpop.permute.xlu2 %399 }
  0x7c   : > { %1245 = vmatpush.bf16.msrb.mxu0 %v400_v10  ;;  %v590_v10 = vld [vmem:[%s3092_s2 + $0x28] sm:$0xff] }
  0x80   : > { %441 = vrot.lane.b32.xlu0 %v2314_v3, %s2225_s27  ;;  %465 = vrot.lane.b32.xlu1 %v2314_v3, %s2227_s29 }
  0x81   : > { %493 = vrot.lane.b32.xlu2 %v2285_v1, %s2228_s30  ;;  %v588_v1 = vld [vmem:[%s3092_s2 + $0x18] sm:$0xff] }
  0x82   : > { %v328_v11 = vpop.permute.xlu1 %327  ;;  %v352_v12 = vpop.permute.xlu0 %351 }
  0x83   : > { %1098 = vmatpush.bf16.msrb.mxu1 %v328_v11  ;;  %1147 = vmatpush.bf16.msrb.mxu2 %v352_v12  ;;  %v370_v13 = vpop.permute.xlu2 %369  ;;  %v591_v12 = vld [vmem:[%s3092_s2 + $0x30] sm:$0xff] }
  0x87   : > { %1099 = vmatpush.bf16.msrb.mxu1 %v326_v9  ;;  %v592_v9 = vld [vmem:[%s3092_s2 + $0x38] sm:$0xff] }
  0x88   : > { %417 = vrot.lane.b32.xlu0 %v2314_v3, %s2226_s28  ;;  %439 = vrot.lane.b32.xlu1 %v2321_v4, %s2225_s27 }
  0x89   : > { %463 = vrot.lane.b32.xlu2 %v2321_v4, %s2227_s29 }
  0x8a   : > { %v376_v23 = vpop.permute.xlu0 %375  ;;  %v350_v24 = vpop.permute.xlu1 %349 }
  0x8b   : > { %1148 = vmatpush.bf16.msrb.mxu2 %v350_v24  ;;  %1196 = vmatpush.bf16.msrb.mxu3 %v376_v23  ;;  %v344_v25 = vpop.permute.xlu2 %343  ;;  %v1772_v23 = vor.u32 %v2040_v19, %v1771_v18  ;;  %v594_v24 = vld [vmem:[%s3092_s2 + $0x48] sm:$0xff] }
  0x8f   : > { %1197 = vmatpush.bf16.msrb.mxu3 %v374_v8 }
  0x90   : > { %491 = vrot.lane.b32.xlu0 %v2301_v2, %s2228_s30  ;;  %415 = vrot.lane.b32.xlu1 %v2321_v4, %s2226_s28  ;;  %v1736_v2 = vor.u32 %v2031_v62, %v1735_v61  ;;  %v1843_v61 = vld [vmem:[%s3091_s1 + $0xe0] sm:$0xf]  ;;  %v2058_v62 = vld [vmem:[%s3091_s1 + $0x100] sm:$0xf0] }
  0x91   : > { %437 = vrot.lane.b32.xlu2 %v2334_v5, %s2225_s27 }
  0x92   : > { %v372_v29 = vpop.permute.xlu1 %371  ;;  %v348_v30 = vpop.permute.xlu0 %347 }
  0x93   : > { %1198 = vmatpush.bf16.msrb.mxu3 %v372_v29  ;;  %1149 = vmatpush.bf16.msrb.mxu2 %v348_v30  ;;  %v320_v31 = vpop.permute.xlu2 %319  ;;  %v1743_v29 = vld [vmem:[%s3091_s1 + $0x10] sm:$0xf]  ;;  %v2032_v30 = vld [vmem:[%s3091_s1 + $0x30] sm:$0xf0] }
  0x94   : > { %v1744_v34 = vor.u32 %v2032_v30, %v1743_v29 }
  0x97   : > { %1199 = vmatpush.bf16.msrb.mxu3 %v370_v13  ;;  %v2027_v13 = vld [vmem:[%s3091_s1 + $0xc] sm:$0xf] }
  0x98   : > { %461 = vrot.lane.b32.xlu0 %v2334_v5, %s2227_s29  ;;  %489 = vrot.lane.b32.xlu1 %v2314_v3, %s2228_s30  ;;  %v589_v3 = vld [vmem:[%s3092_s2 + $0x20] sm:$0xff]  ;;  %v1740_v17 = vor.u32 %v2027_v13, %v1737_v14 }
  0x99   : > { %413 = vrot.lane.b32.xlu2 %v2334_v5, %s2226_s28 }
  0x9a   : > { %v324_v42 = vpop.permute.xlu0 %323  ;;  %v346_v43 = vpop.permute.xlu1 %345 }
  0x9b   : > { %1150 = vmatpush.bf16.msrb.mxu2 %v346_v43  ;;  %1100 = vmatpush.bf16.msrb.mxu1 %v324_v42  ;;  %v394_v44 = vpop.permute.xlu2 %393  ;;  %v1807_v42 = vld [vmem:[%s3091_s1 + $0x98] sm:$0xf]  ;;  %v2049_v43 = vld [vmem:[%s3091_s1 + $0xb8] sm:$0xf0] }
  0x9c   : > { %v1808_v45 = vor.u32 %v2049_v43, %v1807_v42 }
  0x9f   : > { %1151 = vmatpush.bf16.msrb.mxu2 %v344_v25 }
  0xa0   : > { %435 = vrot.lane.b32.xlu0 %v2341_v6, %s2225_s27  ;;  %459 = vrot.lane.b32.xlu1 %v2341_v6, %s2227_s29 }
  0xa1   : > { %487 = vrot.lane.b32.xlu2 %v2321_v4, %s2228_s30 }
  0xa2   : > { %v398_v48 = vpop.permute.xlu0 %397  ;;  %v322_v49 = vpop.permute.xlu1 %321 }
  0xa3   : > { %1101 = vmatpush.bf16.msrb.mxu1 %v322_v49  ;;  %1246 = vmatpush.bf16.msrb.mxu0 %v398_v48  ;;  %v364_v50 = vpop.permute.xlu2 %363  ;;  %v2044_v49 = vld [vmem:[%s3091_s1 + $0x94] sm:$0xf] }
  0xa7   : > { %1102 = vmatpush.bf16.msrb.mxu1 %v320_v31  ;;  %v598_v31 = vld [vmem:[%s3092_s2 + $0x68] sm:$0xff] }
  0xa8   : > { %411 = vrot.lane.b32.xlu0 %v2341_v6, %s2226_s28  ;;  %433 = vrot.lane.b32.xlu1 %v2361_v7, %s2225_s27 }
  0xa9   : > { %457 = vrot.lane.b32.xlu2 %v2361_v7, %s2227_s29 }
  0xaa   : > { %v396_v51 = vpop.permute.xlu1 %395  ;;  %v368_v52 = vpop.permute.xlu0 %367 }
  0xab   : > { %1247 = vmatpush.bf16.msrb.mxu0 %v396_v51  ;;  %1200 = vmatpush.bf16.msrb.mxu3 %v368_v52  ;;  %v338_v53 = vpop.permute.xlu2 %337  ;;  %v1779_v51 = vld [vmem:[%s3091_s1 + $0x58] sm:$0xf]  ;;  %v2041_v52 = vld [vmem:[%s3091_s1 + $0x78] sm:$0xf0] }
  0xaf   : > { %1248 = vmatpush.bf16.msrb.mxu0 %v394_v44  ;;  %v599_v44 = vld [vmem:[%s3092_s2 + $0x70] sm:$0xff] }
  0xb0   : > { %485 = vrot.lane.b32.xlu0 %v2334_v5, %s2228_s30  ;;  %409 = vrot.lane.b32.xlu1 %v2361_v7, %s2226_s28  ;;  %s3018_s28 = scalar_lea.vmem %s3093_s3, %s2273_s19 }
  0xb1   : > { %483 = vrot.lane.b32.xlu2 %v2341_v6, %s2228_s30  ;;  %v2026_v6 = vld [vmem:[%s3091_s1 + $0x4] sm:$0xf] }
  0xb2   : > { %v366_v54 = vpop.permute.xlu1 %365  ;;  %v342_v55 = vpop.permute.xlu0 %341 }
  0xb3   : > { %1201 = vmatpush.bf16.msrb.mxu3 %v366_v54  ;;  %1152 = vmatpush.bf16.msrb.mxu2 %v342_v55  ;;  %v314_v56 = vpop.permute.xlu2 %313  ;;  %v1780_v55 = vor.u32 %v2041_v52, %v1779_v51  ;;  %v2085_v51 = vld [vmem:[%s3091_s1 + $0x1d8] sm:$0xf0] }
  0xb4   : > { %v2705_v52 = vpop.f32.mrf.mxu2 }
  0xb7   : > { %1202 = vmatpush.bf16.msrb.mxu3 %v364_v50  ;;  %v1801_v50 = vld [vmem:[%s3091_s1 + $0xb4] sm:$0xf0] }
  0xb8   : > { %481 = vrot.lane.b32.xlu0 %v2361_v7, %s2228_s30  ;;  %603 = vperm.xlu1 %2194, %v585_v57   ;;  %v1729_v7 = vld [vmem:[%s3091_s1 + $0x24] sm:$0xf0]  ;;  %v1804_v54 = vor.u32 %v2044_v49, %v1801_v50  ;;  %v1809_v57 = vld [vmem:[%s3091_s1 + $0xbc] sm:$0xf0]  ;;  %v1951_v50 = vld [vmem:[%s3091_s1 + $0x1b8] sm:$0xf] }
  0xb9   : > { %608 = vperm.xlu2 %2195, %v586_v58   ;;  %v1732_v11 = vor.u32 %v2026_v6, %v1729_v7  ;;  %v2050_v6 = vld [vmem:[%s3091_s1 + $0xc0] sm:$0xf0] }
  0xba   : > { %v318_v59 = vpop.permute.xlu0 %317  ;;  %v340_v60 = vpop.permute.xlu1 %339 }
  0xbb   : > { %1153 = vmatpush.bf16.msrb.mxu2 %v340_v60  ;;  %1103 = vmatpush.bf16.msrb.mxu1 %v318_v59  ;;  %v448_v63 = vpop.permute.xlu2 %447 }
  0xbf   : > { %1154 = vmatpush.bf16.msrb.mxu2 %v338_v53 }
  0xc0   : > { %613 = vperm.xlu0 %2196, %v587_v0   ;;  %618 = vperm.xlu1 %2194, %v588_v1   ;;  %v1844_v0 = vor.u32 %v2058_v62, %v1843_v61 }
  0xc1   : > { %623 = vperm.xlu2 %2195, %v589_v3   ;;  %v2053_v3 = vld [vmem:[%s3091_s1 + $0xdc] sm:$0xf] }
  0xc2   : > { %v392_v4 = vpop.permute.xlu0 %391  ;;  %v316_v5 = vpop.permute.xlu1 %315  ;;  %1155 = vmatmul.bf16.vlgmr.msrb.gmra.mxu2 %v1736_v2 }
  0xc3   : > { %1343 = vmatpush.bf16.msra.mxu2 %v448_v63  ;;  %1104 = vmatpush.bf16.msrb.mxu1 %v316_v5  ;;  %v446_v8 = vpop.permute.xlu2 %445  ;;  %v1815_v5 = vld [vmem:[%s3091_s1 + $0xa0] sm:$0xf] }
  0xc4   : > { %1249 = vmatpush.bf16.msrb.mxu0 %v392_v4  ;;  %v1837_v4 = vld [vmem:[%s3091_s1 + $0xfc] sm:$0xf0] }
  0xc5   : > { %v1840_v7 = vor.u32 %v2053_v3, %v1837_v4 }
  0xc7   : > { %1344 = vmatpush.bf16.msra.mxu2 %v446_v8  ;;  %1105 = vmatpush.bf16.msrb.mxu1 %v314_v56  ;;  %v2045_v56 = vld [vmem:[%s3091_s1 + $0x9c] sm:$0xf]  ;;  %v1816_v8 = vor.u32 %v2050_v6, %v1815_v5  ;;  %v2731_v6 = vpop.f32.mrf.mxu3 }
  0xc8   : > { %638 = vperm.xlu0 %2196, %v592_v9   ;;  %628 = vperm.xlu1 %2194, %v590_v10   ;;  %v1812_v60 = vor.u32 %v2045_v56, %v1809_v57  ;;  %v2054_v10 = vld [vmem:[%s3091_s1 + $0xe4] sm:$0xf]  ;;  %v2080_v57 = vld [vmem:[%s3091_s1 + $0x1b4] sm:$0xf] }
  0xc9   : > { %633 = vperm.xlu2 %2195, %v591_v12  }
  0xca   : > { %v390_v15 = vpop.permute.xlu1 %389  ;;  %v362_v16 = vpop.permute.xlu0 %361  ;;  %1106 = vmatmul.bf16.vlgmr.msrb.gmra.mxu1 %v1732_v11  ;;  %v1845_v11 = vld [vmem:[%s3091_s1 + $0x104] sm:$0xf0] }
  0xcb   : > { %1203 = vmatpush.bf16.msrb.mxu3 %v362_v16  ;;  %1250 = vmatpush.bf16.msrb.mxu0 %v390_v15  ;;  %v444_v20 = vpop.permute.xlu2 %443  ;;  %v1848_v14 = vor.u32 %v2054_v10, %v1845_v11  ;;  %v1879_v15 = vld [vmem:[%s3091_s1 + $0x128] sm:$0xf]  ;;  %v2067_v16 = vld [vmem:[%s3091_s1 + $0x148] sm:$0xf0]  ;;  %v1058_v10 = vpop.f32.mrf.mxu0 }
  0xcc   : > { %1345 = vmatpush.bf16.msra.mxu2 %v444_v20 }
  0xce   : > { %1204 = vmatmul.bf16.vlgmr.msrb.gmra.mxu3 %v1740_v17  ;;  %v1880_v17 = vor.u32 %v2067_v16, %v1879_v15  ;;  %v1959_v15 = vld [vmem:[%s3091_s1 + $0x1c0] sm:$0xf]  ;;  %v2086_v16 = vld [vmem:[%s3091_s1 + $0x1e0] sm:$0xf0] }
  0xd0   : > { %653 = vperm.xlu0 %2196, %v595_v21   ;;  %643 = vperm.xlu1 %2194, %v593_v22   ;;  %v2062_v21 = vld [vmem:[%s3091_s1 + $0x124] sm:$0xf]  ;;  %v1873_v22 = vld [vmem:[%s3091_s1 + $0x144] sm:$0xf0] }
  0xd1   : > { %648 = vperm.xlu2 %2195, %v594_v24   ;;  %v2059_v24 = vld [vmem:[%s3091_s1 + $0x108] sm:$0xf0] }
  0xd2   : > { %v386_v25 = vpop.permute.xlu1 %385  ;;  %v388_v26 = vpop.permute.xlu0 %387  ;;  %1160 = vmatmul.bf16.gmra.mxu2 %v1772_v23  ;;  %v1851_v23 = vld [vmem:[%s3091_s1 + $0xe8] sm:$0xf] }
  0xd3   : > { %1251 = vmatpush.bf16.msrb.mxu0 %v388_v26  ;;  %v420_v38 = vpop.permute.xlu2 %419  ;;  %v1852_v26 = vor.u32 %v2059_v24, %v1851_v23  ;;  %v1060_v23 = vpop.f32.mrf.mxu0 }
  0xd7   : > { %1252 = vmatpush.bf16.msrb.mxu0 %v386_v25  ;;  %v1876_v25 = vor.u32 %v2062_v21, %v1873_v22  ;;  %v1989_v21 = vld [vmem:[%s3091_s1 + $0x224] sm:$0xf0] }
  0xd8   : > { %668 = vperm.xlu0 %2196, %v598_v31   ;;  %658 = vperm.xlu1 %2194, %v596_v32   ;;  %v1884_v31 = vor.u32 %v2063_v27, %v1881_v28  ;;  %v1915_v32 = vld [vmem:[%s3091_s1 + $0x170] sm:$0xf] }
  0xd9   : > { %663 = vperm.xlu2 %2195, %v597_v35  }
  0xda   : > { %v424_v39 = vpop.permute.xlu1 %423  ;;  %v472_v40 = vpop.permute.xlu0 %471  ;;  %1111 = vmatmul.bf16.gmra.mxu1 %v1768_v33  ;;  %1253 = vmatmul.bf16.vlgmr.msrb.gmra.mxu0 %v1744_v34  ;;  %v2076_v33 = vld [vmem:[%s3091_s1 + $0x190] sm:$0xf0] }
  0xdb   : > { %1294 = vmatpush.bf16.msra.mxu1 %v424_v39  ;;  %1392 = vmatpush.bf16.msra.mxu3 %v472_v40  ;;  %v494_v53 = vpop.permute.xlu2 %493  ;;  %v1916_v35 = vor.u32 %v2076_v33, %v1915_v32  ;;  %v1909_v39 = vld [vmem:[%s3091_s1 + $0x18c] sm:$0xf0]  ;;  %v2028_v32 = vld [vmem:[%s3091_s1 + $0x14] sm:$0xf]  ;;  %v1745_v33 = vld [vmem:[%s3091_s1 + $0x34] sm:$0xf0] }
  0xdc   : > { %v1887_v40 = vld [vmem:[%s3091_s1 + $0x130] sm:$0xf] }
  0xde   : > { %1209 = vmatmul.bf16.gmra.mxu3 %v1776_v41  ;;  %v2068_v41 = vld [vmem:[%s3091_s1 + $0x150] sm:$0xf0] }
  0xe0   : > { %673 = vperm.xlu1 %2194, %v599_v44   ;;  %v1888_v44 = vor.u32 %v2068_v41, %v1887_v40  ;;  %v2029_v41 = vld [vmem:[%s3091_s1 + $0x1c] sm:$0xf] }
  0xe1   : > { %678 = vperm.xlu2 %2195, %v600_v46   ;;  %v1917_v46 = vld [vmem:[%s3091_s1 + $0x194] sm:$0xf0] }
  0xe2   : > { %v422_v47 = vpop.permute.xlu1 %421  ;;  %v470_v48 = vpop.permute.xlu0 %469  ;;  %1165 = vmatmul.bf16.gmra.mxu2 %v1808_v45  ;;  %v2072_v45 = vld [vmem:[%s3091_s1 + $0x174] sm:$0xf] }
  0xe3   : > { %1295 = vmatpush.bf16.msra.mxu1 %v422_v47  ;;  %1393 = vmatpush.bf16.msra.mxu3 %v470_v48  ;;  %v464_v63 = vpop.permute.xlu2 %463  ;;  %v1920_v49 = vor.u32 %v2072_v45, %v1917_v46 }
  0xe7   : > { %1296 = vmatpush.bf16.msra.mxu1 %v420_v38  ;;  %v2071_v38 = vld [vmem:[%s3091_s1 + $0x16c] sm:$0xf] }
  0xe8   : > { %v1912_v43 = vor.u32 %v2071_v38, %v1909_v39  ;;  %v1748_v39 = vor.u32 %v2028_v32, %v1745_v33 }
  0xea   : > { %v496_v58 = vpop.permute.xlu1 %495  ;;  %v468_v59 = vpop.permute.xlu0 %467  ;;  %1116 = vmatmul.bf16.gmra.mxu1 %v1804_v54  ;;  %1258 = vmatmul.bf16.gmra.mxu0 %v1780_v55 }
  0xeb   : > { %1441 = vmatpush.bf16.msra.mxu0 %v496_v58  ;;  %1394 = vmatpush.bf16.msra.mxu3 %v468_v59  ;;  %v438_v9 = vpop.permute.xlu2 %437  ;;  %v2707_v54 = vpop.f32.mrf.mxu1  ;;  %v1945_v58 = vld [vmem:[%s3091_s1 + $0x1d4] sm:$0xf0] }
  0xec   : > { %v1923_v59 = vld [vmem:[%s3091_s1 + $0x178] sm:$0xf]  ;;  %v1948_v62 = vor.u32 %v2080_v57, %v1945_v58 }
  0xee   : > { %1214 = vmatmul.bf16.gmra.mxu3 %v1812_v60  ;;  %v2077_v60 = vld [vmem:[%s3091_s1 + $0x198] sm:$0xf0] }
  0xef   : > { %1442 = vmatpush.bf16.msra.mxu0 %v494_v53  ;;  %v1952_v53 = vor.u32 %v2085_v51, %v1951_v50 }
  0xf2   : > { %v442_v1 = vpop.permute.xlu0 %441  ;;  %v466_v2 = vpop.permute.xlu1 %465  ;;  %1170 = vmatmul.bf16.gmra.mxu2 %v1844_v0  ;;  %v2081_v0 = vld [vmem:[%s3091_s1 + $0x1bc] sm:$0xf] }
  0xf3   : > { %1346 = vmatpush.bf16.msra.mxu2 %v442_v1  ;;  %1395 = vmatpush.bf16.msra.mxu3 %v466_v2  ;;  %v414_v18 = vpop.permute.xlu2 %413  ;;  %v1953_v1 = vld [vmem:[%s3091_s1 + $0x1dc] sm:$0xf0]  ;;  %v2727_v2 = vpop.f32.mrf.mxu2 }
  0xf4   : > { %v2729_v3 = vpop.f32.mrf.mxu1  ;;  %v1956_v5 = vor.u32 %v2081_v0, %v1953_v1  ;;  %v2034_v0 = vld [vmem:[%s3091_s1 + $0x40] sm:$0xf0] }
  0xf7   : > { %1396 = vmatpush.bf16.msra.mxu3 %v464_v63  ;;  %v1924_v63 = vor.u32 %v2077_v60, %v1923_v59 }
  0xfa   : > { %v418_v12 = vpop.permute.xlu0 %417  ;;  %1121 = vmatmul.bf16.gmra.mxu1 %v1840_v7  ;;  %1263 = vmatmul.bf16.gmra.mxu0 %v1816_v8  ;;  %v440_v13 = vpop.permute.xlu1 %439  ;;  %v1987_v7 = vld [vmem:[%s3091_s1 + $0x200] sm:$0xf]  ;;  %v2094_v8 = vld [vmem:[%s3091_s1 + $0x220] sm:$0xf0] }
  0xfb   : > { %1297 = vmatpush.bf16.msra.mxu1 %v418_v12  ;;  %1347 = vmatpush.bf16.msra.mxu2 %v440_v13  ;;  %v488_v34 = vpop.permute.xlu2 %487  ;;  %v2739_v11 = vpop.f32.mrf.mxu2  ;;  %v2089_v12 = vld [vmem:[%s3091_s1 + $0x1fc] sm:$0xf] }
  0xfc   : > { %v2744_v13 = vpop.f32.mrf.mxu1 }
  0xfe   : > { %1219 = vmatmul.bf16.gmra.mxu3 %v1848_v14  ;;  %v1981_v14 = vld [vmem:[%s3091_s1 + $0x21c] sm:$0xf0] }
  0xff   : > { %1348 = vmatpush.bf16.msra.mxu2 %v438_v9  ;;  %v1988_v9 = vor.u32 %v2094_v8, %v1987_v7 }
 0x102   : > { %v492_v19 = vpop.permute.xlu0 %491  ;;  %v416_v20 = vpop.permute.xlu1 %415  ;;  %1175 = vmatmul.bf16.gmra.mxu2 %v1880_v17 }
 0x103   : > { %1443 = vmatpush.bf16.msra.mxu0 %v492_v19  ;;  %1298 = vmatpush.bf16.msra.mxu1 %v416_v20  ;;  %v458_v42 = vpop.permute.xlu2 %457  ;;  %v2755_v17 = vpop.f32.mrf.mxu3  ;;  %v1960_v19 = vor.u32 %v2086_v16, %v1959_v15  ;;  %v2090_v20 = vld [vmem:[%s3091_s1 + $0x204] sm:$0xf] }
 0x104   : > { %v1992_v22 = vor.u32 %v2090_v20, %v1989_v21  ;;  %v2763_v24 = vpop.f32.mrf.mxu2  ;;  %v2771_v27 = vpop.f32.mrf.mxu1 }
 0x107   : > { %1299 = vmatpush.bf16.msra.mxu1 %v414_v18  ;;  %v1984_v18 = vor.u32 %v2089_v12, %v1981_v14  ;;  %v2038_v12 = vld [vmem:[%s3091_s1 + $0x64] sm:$0xf]  ;;  %v1789_v14 = vld [vmem:[%s3091_s1 + $0x84] sm:$0xf0] }
 0x108   : > { %v1792_v21 = vor.u32 %v2038_v12, %v1789_v14  ;;  %v2055_v12 = vld [vmem:[%s3091_s1 + $0xec] sm:$0xf]  ;;  %v1853_v14 = vld [vmem:[%s3091_s1 + $0x10c] sm:$0xf0] }
 0x10a   : > { %v462_v29 = vpop.permute.xlu0 %461  ;;  %1126 = vmatmul.bf16.gmra.mxu1 %v1876_v25  ;;  %1268 = vmatmul.bf16.gmra.mxu0 %v1852_v26  ;;  %v490_v30 = vpop.permute.xlu1 %489  ;;  %v1751_v25 = vld [vmem:[%s3091_s1 + $0x18] sm:$0xf]  ;;  %v2033_v26 = vld [vmem:[%s3091_s1 + $0x38] sm:$0xf0] }
 0x10b   : > { %1444 = vmatpush.bf16.msra.mxu0 %v490_v30  ;;  %1397 = vmatpush.bf16.msra.mxu3 %v462_v29  ;;  %v484_v61 = vpop.permute.xlu2 %483  ;;  %v1752_v28 = vor.u32 %v2033_v26, %v1751_v25  ;;  %v2773_v29 = vpop.f32.mrf.mxu3  ;;  %v1995_v30 = vld [vmem:[%s3091_s1 + $0x208] sm:$0xf] }
 0x10e   : > { %1224 = vmatmul.bf16.gmra.mxu3 %v1884_v31  ;;  %v2095_v31 = vld [vmem:[%s3091_s1 + $0x228] sm:$0xf0] }
 0x10f   : > { %1445 = vmatpush.bf16.msra.mxu0 %v488_v34  ;;  %v1063_v34 = vpop.f32.mrf.mxu0  ;;  %v1996_v38 = vor.u32 %v2095_v31, %v1995_v30 }
 0x112   : > { %v436_v36 = vpop.permute.xlu0 %435  ;;  %v460_v37 = vpop.permute.xlu1 %459  ;;  %1180 = vmatmul.bf16.gmra.mxu2 %v1916_v35 }
 0x113   : > { %1349 = vmatpush.bf16.msra.mxu2 %v436_v36  ;;  %1398 = vmatpush.bf16.msra.mxu3 %v460_v37 }
 0x117   : > { %1399 = vmatpush.bf16.msra.mxu3 %v458_v42  ;;  %v1753_v42 = vld [vmem:[%s3091_s1 + $0x3c] sm:$0xf0] }
 0x118   : > { %v1756_v46 = vor.u32 %v2029_v41, %v1753_v42  ;;  %v2043_v41 = vld [vmem:[%s3091_s1 + $0x88] sm:$0xf0] }
 0x11a   : > { %v412_v47 = vpop.permute.xlu0 %411  ;;  %1131 = vmatmul.bf16.gmra.mxu1 %v1912_v43  ;;  %1273 = vmatmul.bf16.gmra.mxu0 %v1888_v44  ;;  %v434_v48 = vpop.permute.xlu1 %433 }
 0x11b   : > { %1300 = vmatpush.bf16.msra.mxu1 %v412_v47  ;;  %1350 = vmatpush.bf16.msra.mxu2 %v434_v48  ;;  %v2793_v44 = vpop.f32.mrf.mxu3  ;;  %v1787_v47 = vld [vmem:[%s3091_s1 + $0x60] sm:$0xf]  ;;  %v2042_v48 = vld [vmem:[%s3091_s1 + $0x80] sm:$0xf0] }
 0x11e   : > { %1229 = vmatmul.bf16.gmra.mxu3 %v1920_v49  ;;  %v609_v49 = vpop.permute.xlu2 %608 }
 0x11f   : > { %v1061_v51 = vadd.f32 %v1060_v23, %v609_v49  ;;  %v2051_v23 = vld [vmem:[%s3091_s1 + $0xc8] sm:$0xf0] }
 0x122   : > { %v486_v55 = vpop.permute.xlu0 %485  ;;  %v410_v56 = vpop.permute.xlu1 %409  ;;  %1185 = vmatmul.bf16.gmra.mxu2 %v1952_v53  ;;  %v1788_v53 = vor.u32 %v2042_v48, %v1787_v47 }
 0x123   : > { %1446 = vmatpush.bf16.msra.mxu0 %v486_v55  ;;  %1301 = vmatpush.bf16.msra.mxu1 %v410_v56  ;;  %v1065_v55 = vpop.f32.mrf.mxu0 }
 0x126   : > { %v624_v42 = vpop.permute.xlu2 %623 }
 0x127   : > { %1447 = vmatpush.bf16.msra.mxu0 %v484_v61  ;;  %v2037_v61 = vld [vmem:[%s3091_s1 + $0x5c] sm:$0xf] }
 0x12a   : > { %v482_v4 = vpop.permute.xlu0 %481  ;;  %1136 = vmatmul.bf16.gmra.mxu1 %v1948_v62  ;;  %1278 = vmatmul.bf16.gmra.mxu0 %v1924_v63  ;;  %v604_v35 = vpop.permute.xlu1 %603  ;;  %v1781_v62 = vld [vmem:[%s3091_s1 + $0x7c] sm:$0xf0] }
 0x12b   : > { %1448 = vmatpush.bf16.msra.mxu0 %v482_v4  ;;  %v1059_v37 = vadd.f32 %v1058_v10, %v604_v35  ;;  %v1759_v63 = vld [vmem:[%s3091_s1 + $0x20] sm:$0xf]  ;;  %v1784_v7 = vor.u32 %v2037_v61, %v1781_v62  ;;  %v2060_v61 = vld [vmem:[%s3091_s1 + $0x110] sm:$0xf0] }
 0x12c   : > { %v1760_v8 = vor.u32 %v2034_v0, %v1759_v63 }
 0x12e   : > { %1234 = vmatmul.bf16.gmra.mxu3 %v1956_v5 }
 0x132   : > { %1190 = vmatmul.bf16.gmra.mxu2 %v1988_v9  ;;  %v614_v1 = vpop.permute.xlu0 %613  ;;  %v619_v25 = vpop.permute.xlu1 %618 }
 0x133   : > { %v1064_v5 = vadd.f32 %v1063_v34, %v614_v1 }
 0x13a   : > { %1141 = vmatmul.bf16.gmra.mxu1 %v1984_v18  ;;  %1283 = vmatmul.bf16.gmra.mxu0 %v1960_v19 }
 0x13e   : > { %1239 = vmatmul.bf16.gmra.mxu3 %v1992_v22  ;;  %v1823_v22 = vld [vmem:[%s3091_s1 + $0xa8] sm:$0xf] }
 0x13f   : > { %v1824_v30 = vor.u32 %v2051_v23, %v1823_v22 }
 0x142   : > { %1351 = vmatmul.bf16.vlgmr.msra.gmra.mxu2 %v1752_v28  ;;  %v1066_v28 = vadd.f32 %v1065_v55, %v619_v25 }
 0x145   : > { %v1156_v36 = vpop.f32.mrf.mxu2 }
 0x147   : > { %v1107_v40 = vpop.f32.mrf.mxu1 }
 0x148   : > { %v1108_v43 = vadd.f32 %v1107_v40, %v1059_v37  ;;  %v1795_v40 = vld [vmem:[%s3091_s1 + $0x68] sm:$0xf] }
 0x149   : > { %v1796_v47 = vor.u32 %v2043_v41, %v1795_v40 }
 0x14a   : > { %v1157_v45 = vadd.f32 %v1156_v36, %v1108_v43  ;;  %1288 = vmatmul.bf16.gmra.mxu0 %v1996_v38  ;;  %1302 = vmatmul.bf16.vlgmr.msra.gmra.mxu1 %v1748_v39  ;;  %v2046_v38 = vld [vmem:[%s3091_s1 + $0xa4] sm:$0xf]  ;;  %v1817_v39 = vld [vmem:[%s3091_s1 + $0xc4] sm:$0xf0] }
 0x14d   : > { %v1158_v50 = vpop.f32.mrf.mxu2 }
 0x14e   : > { %1400 = vmatmul.bf16.vlgmr.msra.gmra.mxu3 %v1756_v46  ;;  %v1820_v46 = vor.u32 %v2046_v38, %v1817_v39  ;;  %v639_v38 = vpop.permute.xlu0 %638 }
 0x14f   : > { %v1109_v56 = vpop.f32.mrf.mxu1  ;;  %v1076_v40 = vadd.f32 %v2771_v27, %v639_v38  ;;  %v1889_v27 = vld [vmem:[%s3091_s1 + $0x154] sm:$0xf0] }
 0x150   : > { %v1110_v57 = vadd.f32 %v1109_v56, %v1061_v51  ;;  %v1825_v51 = vld [vmem:[%s3091_s1 + $0xcc] sm:$0xf0] }
 0x151   : > { %v1205_v58 = vpop.f32.mrf.mxu3 }
 0x152   : > { %v1159_v59 = vadd.f32 %v1158_v50, %v1110_v57  ;;  %v1206_v60 = vadd.f32 %v1205_v58, %v1157_v45  ;;  %1356 = vmatmul.bf16.gmra.mxu2 %v1788_v53  ;;  %v1069_v45 = vadd.f32 %v2707_v54, %v624_v42  ;;  %v2047_v50 = vld [vmem:[%s3091_s1 + $0xac] sm:$0xf] }
 0x153   : > { %v1828_v54 = vor.u32 %v2047_v50, %v1825_v51  ;;  %v2064_v50 = vld [vmem:[%s3091_s1 + $0x134] sm:$0xf] }
 0x155   : > { %v1161_v4 = vpop.f32.mrf.mxu2 }
 0x157   : > { %v1112_v9 = vpop.f32.mrf.mxu1  ;;  %v1254_v10 = vpop.f32.mrf.mxu0 }
 0x158   : > { %v1113_v15 = vadd.f32 %v1112_v9, %v1064_v5  ;;  %v2819_v16 = vadd.f32 %v1254_v10, %v1206_v60  ;;  %v1859_v60 = vld [vmem:[%s3091_s1 + $0xf0] sm:$0xf] }
 0x159   : > { %v1207_v18 = vpop.f32.mrf.mxu3  ;;  %v1860_v0 = vor.u32 %v2060_v61, %v1859_v60 }
 0x15a   : > { %v1162_v19 = vadd.f32 %v1161_v4, %v1113_v15  ;;  %v1208_v20 = vadd.f32 %v1207_v18, %v1159_v59  ;;  %1307 = vmatmul.bf16.gmra.mxu1 %v1784_v7  ;;  %1449 = vmatmul.bf16.vlgmr.msra.gmra.mxu0 %v1760_v8  ;;  %v629_v59 = vpop.permute.xlu1 %628  ;;  %v2052_v15 = vld [vmem:[%s3091_s1 + $0xd0] sm:$0xf0]  ;;  %v634_v18 = vpop.permute.xlu2 %633 }
 0x15b   : > { %v1071_v63 = vadd.f32 %v2729_v3, %v629_v59  ;;  %v1831_v3 = vld [vmem:[%s3091_s1 + $0xb0] sm:$0xf] }
 0x15c   : > { %v1832_v22 = vor.u32 %v2052_v15, %v1831_v3 }
 0x15d   : > { %v1163_v26 = vpop.f32.mrf.mxu2 }
 0x15e   : > { %1405 = vmatmul.bf16.gmra.mxu3 %v1792_v21  ;;  %v1856_v21 = vor.u32 %v2055_v12, %v1853_v14 }
 0x15f   : > { %v1114_v31 = vpop.f32.mrf.mxu1  ;;  %v1256_v32 = vpop.f32.mrf.mxu0 }
 0x160   : > { %v1115_v33 = vadd.f32 %v1114_v31, %v1066_v28  ;;  %v2827_v34 = vadd.f32 %v1256_v32, %v1208_v20  ;;  %v1074_v20 = vadd.f32 %v2744_v13, %v634_v18  ;;  %v1861_v28 = vld [vmem:[%s3091_s1 + $0x114] sm:$0xf0] }
 0x161   : > { %v1210_v35 = vpop.f32.mrf.mxu3 }
 0x162   : > { %v1164_v36 = vadd.f32 %v1163_v26, %v1115_v33  ;;  %v1211_v37 = vadd.f32 %v1210_v35, %v1162_v19  ;;  %1361 = vmatmul.bf16.gmra.mxu2 %v1824_v30  ;;  %v2056_v26 = vld [vmem:[%s3091_s1 + $0xf4] sm:$0xf]  ;;  %v644_v51 = vpop.permute.xlu1 %643  ;;  %v649_v12 = vpop.permute.xlu2 %648 }
 0x163   : > { %v1864_v13 = vor.u32 %v2056_v26, %v1861_v28  ;;  %v1081_v3 = vadd.f32 %v2727_v2, %v649_v12  ;;  %v2073_v26 = vld [vmem:[%s3091_s1 + $0x17c] sm:$0xf]  ;;  %v654_v28 = vpop.permute.xlu0 %653  ;;  %v1925_v2 = vld [vmem:[%s3091_s1 + $0x19c] sm:$0xf0] }
 0x165   : > { %v1166_v43 = vpop.f32.mrf.mxu2 }
 0x167   : > { %v1117_v48 = vpop.f32.mrf.mxu1  ;;  %v1259_v49 = vpop.f32.mrf.mxu0 }
 0x168   : > { %v1118_v53 = vadd.f32 %v1117_v48, %v1069_v45  ;;  %v2848_v55 = vadd.f32 %v1259_v49, %v1211_v37  ;;  %v2069_v37 = vld [vmem:[%s3091_s1 + $0x158] sm:$0xf0] }
 0x169   : > { %v1212_v56 = vpop.f32.mrf.mxu3 }
 0x16a   : > { %v1167_v57 = vadd.f32 %v1166_v43, %v1118_v53  ;;  %v1213_v58 = vadd.f32 %v1212_v56, %v1164_v36  ;;  %1312 = vmatmul.bf16.gmra.mxu1 %v1820_v46  ;;  %1454 = vmatmul.bf16.gmra.mxu0 %v1796_v47  ;;  %v1895_v36 = vld [vmem:[%s3091_s1 + $0x138] sm:$0xf]  ;;  %v2061_v56 = vld [vmem:[%s3091_s1 + $0x118] sm:$0xf0] }
 0x16b   : > { %v1896_v41 = vor.u32 %v2069_v37, %v1895_v36  ;;  %v1867_v53 = vld [vmem:[%s3091_s1 + $0xf8] sm:$0xf] }
 0x16c   : > { %v1868_v59 = vor.u32 %v2061_v56, %v1867_v53 }
 0x16d   : > { %v1168_v62 = vpop.f32.mrf.mxu2 }
 0x16e   : > { %1410 = vmatmul.bf16.gmra.mxu3 %v1828_v54  ;;  %v1892_v54 = vor.u32 %v2064_v50, %v1889_v27  ;;  %v2087_v50 = vld [vmem:[%s3091_s1 + $0x1e8] sm:$0xf0] }
 0x16f   : > { %v1119_v1 = vpop.f32.mrf.mxu1  ;;  %v1261_v4 = vpop.f32.mrf.mxu0 }
 0x170   : > { %v1120_v5 = vadd.f32 %v1119_v1, %v1071_v63  ;;  %v2857_v7 = vadd.f32 %v1261_v4, %v1213_v58  ;;  %v1079_v58 = vadd.f32 %v2705_v52, %v644_v51  ;;  %v1897_v63 = vld [vmem:[%s3091_s1 + $0x15c] sm:$0xf0] }
 0x171   : > { %v1215_v8 = vpop.f32.mrf.mxu3 }
 0x172   : > { %v1169_v9 = vadd.f32 %v1168_v62, %v1120_v5  ;;  %v1216_v10 = vadd.f32 %v1215_v8, %v1167_v57  ;;  %1366 = vmatmul.bf16.gmra.mxu2 %v1860_v0  ;;  %v2065_v62 = vld [vmem:[%s3091_s1 + $0x13c] sm:$0xf] }
 0x173   : > { %v1900_v52 = vor.u32 %v2065_v62, %v1897_v63  ;;  %v2082_v62 = vld [vmem:[%s3091_s1 + $0x1c4] sm:$0xf]  ;;  %v664_v63 = vpop.permute.xlu2 %663 }
 0x175   : > { %v1171_v19 = vpop.f32.mrf.mxu2 }
 0x177   : > { %v1122_v23 = vpop.f32.mrf.mxu1  ;;  %v1264_v25 = vpop.f32.mrf.mxu0 }
 0x178   : > { %v1123_v30 = vadd.f32 %v1122_v23, %v1074_v20  ;;  %v2878_v31 = vadd.f32 %v1264_v25, %v1216_v10  ;;  %v2078_v10 = vld [vmem:[%s3091_s1 + $0x1a0] sm:$0xf0] }
 0x179   : > { %v1217_v32 = vpop.f32.mrf.mxu3 }
 0x17a   : > { %v1172_v33 = vadd.f32 %v1171_v19, %v1123_v30  ;;  %v1218_v35 = vadd.f32 %v1217_v32, %v1169_v9  ;;  %1317 = vmatmul.bf16.gmra.mxu1 %v1856_v21  ;;  %1459 = vmatmul.bf16.gmra.mxu0 %v1832_v22  ;;  %v1931_v9 = vld [vmem:[%s3091_s1 + $0x180] sm:$0xf]  ;;  %v2070_v32 = vld [vmem:[%s3091_s1 + $0x160] sm:$0xf0] }
 0x17b   : > { %v1932_v15 = vor.u32 %v2078_v10, %v1931_v9  ;;  %v1903_v30 = vld [vmem:[%s3091_s1 + $0x140] sm:$0xf] }
 0x17c   : > { %v1904_v36 = vor.u32 %v2070_v32, %v1903_v30 }
 0x17d   : > { %v1173_v39 = vpop.f32.mrf.mxu2 }
 0x17e   : > { %1415 = vmatmul.bf16.gmra.mxu3 %v1864_v13  ;;  %v1928_v13 = vor.u32 %v2073_v26, %v1925_v2  ;;  %v2096_v26 = vld [vmem:[%s3091_s1 + $0x230] sm:$0xf0] }
 0x17f   : > { %v1124_v42 = vpop.f32.mrf.mxu1  ;;  %v1266_v43 = vpop.f32.mrf.mxu0 }
 0x180   : > { %v1125_v45 = vadd.f32 %v1124_v42, %v1076_v40  ;;  %v2887_v46 = vadd.f32 %v1266_v43, %v1218_v35  ;;  %v1084_v35 = vadd.f32 %v2739_v11, %v654_v28  ;;  %v1933_v40 = vld [vmem:[%s3091_s1 + $0x1a4] sm:$0xf0] }
 0x181   : > { %v1220_v47 = vpop.f32.mrf.mxu3 }
 0x182   : > { %v1174_v48 = vadd.f32 %v1173_v39, %v1125_v45  ;;  %v1221_v49 = vadd.f32 %v1220_v47, %v1172_v33  ;;  %1371 = vmatmul.bf16.gmra.mxu2 %v1896_v41  ;;  %v2074_v39 = vld [vmem:[%s3091_s1 + $0x184] sm:$0xf] }
 0x183   : > { %v1936_v11 = vor.u32 %v2074_v39, %v1933_v40  ;;  %v2091_v39 = vld [vmem:[%s3091_s1 + $0x20c] sm:$0xf] }
 0x185   : > { %v1176_v57 = vpop.f32.mrf.mxu2 }
 0x187   : > { %v1127_v60 = vpop.f32.mrf.mxu1  ;;  %v1269_v61 = vpop.f32.mrf.mxu0 }
 0x188   : > { %v1128_v0 = vadd.f32 %v1127_v60, %v1079_v58  ;;  %v2908_v1 = vadd.f32 %v1269_v61, %v1221_v49  ;;  %v1967_v49 = vld [vmem:[%s3091_s1 + $0x1c8] sm:$0xf] }
 0x189   : > { %v1222_v4 = vpop.f32.mrf.mxu3  ;;  %v1968_v53 = vor.u32 %v2087_v50, %v1967_v49 }
 0x18a   : > { %v1177_v5 = vadd.f32 %v1176_v57, %v1128_v0  ;;  %v1223_v8 = vadd.f32 %v1222_v4, %v1174_v48  ;;  %1322 = vmatmul.bf16.gmra.mxu1 %v1892_v54  ;;  %1464 = vmatmul.bf16.gmra.mxu0 %v1868_v59  ;;  %v659_v48 = vpop.permute.xlu1 %658  ;;  %v1939_v0 = vld [vmem:[%s3091_s1 + $0x188] sm:$0xf]  ;;  %v2079_v4 = vld [vmem:[%s3091_s1 + $0x1a8] sm:$0xf0] }
 0x18b   : > { %v1086_v27 = vadd.f32 %v2763_v24, %v659_v48  ;;  %v1961_v24 = vld [vmem:[%s3091_s1 + $0x1e4] sm:$0xf0]  ;;  %v1940_v9 = vor.u32 %v2079_v4, %v1939_v0 }
 0x18d   : > { %v1178_v14 = vpop.f32.mrf.mxu2 }
 0x18e   : > { %1420 = vmatmul.bf16.gmra.mxu3 %v1900_v52  ;;  %v1964_v52 = vor.u32 %v2082_v62, %v1961_v24 }
 0x18f   : > { %v1129_v18 = vpop.f32.mrf.mxu1  ;;  %v1271_v19 = vpop.f32.mrf.mxu0 }
 0x190   : > { %v1130_v20 = vadd.f32 %v1129_v18, %v1081_v3  ;;  %v2917_v21 = vadd.f32 %v1271_v19, %v1223_v8  ;;  %v1089_v8 = vadd.f32 %v2731_v6, %v664_v63  ;;  %v1969_v3 = vld [vmem:[%s3091_s1 + $0x1ec] sm:$0xf0] }
 0x191   : > { %v1225_v22 = vpop.f32.mrf.mxu3 }
 0x192   : > { %v1179_v23 = vadd.f32 %v1178_v14, %v1130_v20  ;;  %v1226_v25 = vadd.f32 %v1225_v22, %v1177_v5  ;;  %1376 = vmatmul.bf16.gmra.mxu2 %v1932_v15  ;;  %v2083_v14 = vld [vmem:[%s3091_s1 + $0x1cc] sm:$0xf]  ;;  %v674_v40 = vpop.permute.xlu1 %673 }
 0x193   : > { %v1972_v6 = vor.u32 %v2083_v14, %v1969_v3 }
 0x195   : > { %v1181_v33 = vpop.f32.mrf.mxu2 }
 0x197   : > { %v1132_v37 = vpop.f32.mrf.mxu1  ;;  %v1274_v38 = vpop.f32.mrf.mxu0 }
 0x198   : > { %v1133_v41 = vadd.f32 %v1132_v37, %v1084_v35  ;;  %v2938_v42 = vadd.f32 %v1274_v38, %v1226_v25  ;;  %v2003_v25 = vld [vmem:[%s3091_s1 + $0x210] sm:$0xf] }
 0x199   : > { %v1227_v43 = vpop.f32.mrf.mxu3  ;;  %v2004_v30 = vor.u32 %v2096_v26, %v2003_v25 }
 0x19a   : > { %v1182_v45 = vadd.f32 %v1181_v33, %v1133_v41  ;;  %v1228_v47 = vadd.f32 %v1227_v43, %v1179_v23  ;;  %1327 = vmatmul.bf16.gmra.mxu1 %v1928_v13  ;;  %1469 = vmatmul.bf16.gmra.mxu0 %v1904_v36  ;;  %v669_v23 = vpop.permute.xlu0 %668  ;;  %v1975_v41 = vld [vmem:[%s3091_s1 + $0x1d0] sm:$0xf]  ;;  %v2088_v43 = vld [vmem:[%s3091_s1 + $0x1f0] sm:$0xf0] }
 0x19b   : > { %v1091_v2 = vadd.f32 %v2755_v17, %v669_v23  ;;  %v1997_v17 = vld [vmem:[%s3091_s1 + $0x22c] sm:$0xf0]  ;;  %v1976_v48 = vor.u32 %v2088_v43, %v1975_v41 }
 0x19d   : > { %v1183_v51 = vpop.f32.mrf.mxu2 }
 0x19e   : > { %1425 = vmatmul.bf16.gmra.mxu3 %v1936_v11  ;;  %v2000_v11 = vor.u32 %v2091_v39, %v1997_v17 }
 0x19f   : > { %v1134_v56 = vpop.f32.mrf.mxu1  ;;  %v1276_v57 = vpop.f32.mrf.mxu0 }
 0x1a0   : > { %v1135_v58 = vadd.f32 %v1134_v56, %v1086_v27  ;;  %v2947_v54 = vadd.f32 %v1276_v57, %v1228_v47  ;;  %v1094_v47 = vadd.f32 %v2773_v29, %v674_v40  ;;  %v2005_v27 = vld [vmem:[%s3091_s1 + $0x234] sm:$0xf0] }
 0x1a1   : > { %v1230_v59 = vpop.f32.mrf.mxu3 }
 0x1a2   : > { %v1184_v60 = vadd.f32 %v1183_v51, %v1135_v58  ;;  %v1231_v61 = vadd.f32 %v1230_v59, %v1182_v45  ;;  %1381 = vmatmul.bf16.gmra.mxu2 %v1968_v53  ;;  %v2092_v51 = vld [vmem:[%s3091_s1 + $0x214] sm:$0xf] }
 0x1a3   : > { %v2008_v29 = vor.u32 %v2092_v51, %v2005_v27 }
 0x1a5   : > { %v1186_v5 = vpop.f32.mrf.mxu2 }
 0x1a7   : > { %v1137_v10 = vpop.f32.mrf.mxu1  ;;  %v1279_v12 = vpop.f32.mrf.mxu0 }
 0x1a8   : > { %v1138_v15 = vadd.f32 %v1137_v10, %v1089_v8  ;;  %v2968_v18 = vadd.f32 %v1279_v12, %v1231_v61  ;;  %v2097_v10 = vld [vmem:[%s3091_s1 + $0x238] sm:$0xf0] }
 0x1a9   : > { %v1232_v19 = vpop.f32.mrf.mxu3 }
 0x1aa   : > { %v1187_v20 = vadd.f32 %v1186_v5, %v1138_v15  ;;  %v1233_v22 = vadd.f32 %v1232_v19, %v1184_v60  ;;  %1332 = vmatmul.bf16.gmra.mxu1 %v1964_v52  ;;  %1474 = vmatmul.bf16.gmra.mxu0 %v1940_v9  ;;  %v679_v60 = vpop.permute.xlu2 %678  ;;  %v2011_v9 = vld [vmem:[%s3091_s1 + $0x218] sm:$0xf] }
 0x1ab   : > { %v1096_v62 = vadd.f32 %v2793_v44, %v679_v60  ;;  %v2012_v44 = vor.u32 %v2097_v10, %v2011_v9 }
 0x1ad   : > { %v1188_v28 = vpop.f32.mrf.mxu2 }
 0x1ae   : > { %1430 = vmatmul.bf16.gmra.mxu3 %v1972_v6 }
 0x1af   : > { %v1139_v32 = vpop.f32.mrf.mxu1  ;;  %v1281_v33 = vpop.f32.mrf.mxu0 }
 0x1b0   : > { %v1140_v35 = vadd.f32 %v1139_v32, %v1091_v2  ;;  %v2977_v13 = vadd.f32 %v1281_v33, %v1233_v22  ;;  %v2099_v2 = vld [vmem:[%s3018_s28] sm:$0xff]  }
 0x1b1   : > { %v1235_v36 = vpop.f32.mrf.mxu3 }
 0x1b2   : > { %v1189_v37 = vadd.f32 %v1188_v28, %v1140_v35  ;;  %v1236_v38 = vadd.f32 %v1235_v36, %v1187_v20  ;;  %1386 = vmatmul.bf16.gmra.mxu2 %v2004_v30  ;;  %v2100_v35 = vunpack.c.l.bf16 %v2099_v2 }
 0x1b5   : > { %v1191_v45 = vpop.f32.mrf.mxu2 }
 0x1b7   : > { %v1142_v49 = vpop.f32.mrf.mxu1  ;;  %v1284_v50 = vpop.f32.mrf.mxu0 }
 0x1b8   : > { %v1143_v53 = vadd.f32 %v1142_v49, %v1094_v47  ;;  %v2998_v56 = vadd.f32 %v1284_v50, %v1236_v38 }
 0x1b9   : > { %v1237_v57 = vpop.f32.mrf.mxu3 }
 0x1ba   : > { %v1192_v58 = vadd.f32 %v1191_v45, %v1143_v53  ;;  %v1238_v59 = vadd.f32 %v1237_v57, %v1189_v37  ;;  %1337 = vmatmul.bf16.gmra.mxu1 %v2000_v11  ;;  %1479 = vmatmul.bf16.gmra.mxu0 %v1976_v48  ;;  %v2101_v11 = vunpack.c.h.bf16 %v2099_v2  ;;  %v2130_v53 = vld [vmem:[%s3018_s28 + $0x8] sm:$0xff]  }
 0x1bd   : > { %v1193_v61 = vpop.f32.mrf.mxu2 }
 0x1be   : > { %1435 = vmatmul.bf16.gmra.mxu3 %v2008_v29 }
 0x1bf   : > { %v1144_v63 = vpop.f32.mrf.mxu1  ;;  %v1286_v24 = vpop.f32.mrf.mxu0 }
 0x1c0   : > { %v1145_v0 = vadd.f32 %v1144_v63, %v1096_v62  ;;  %v3001_v4 = vadd.f32 %v1286_v24, %v1238_v59 }
 0x1c1   : > { %v1240_v5 = vpop.f32.mrf.mxu3 }
 0x1c2   : > { %v1194_v8 = vadd.f32 %v1193_v61, %v1145_v0  ;;  %v1241_v52 = vadd.f32 %v1240_v5, %v1192_v58  ;;  %v2104_v61 = vunpack.c.l.bf16 %v2130_v53 }
 0x1c5   : > { %v1352_v12 = vpop.f32.mrf.mxu2 }
 0x1c7   : > { %v1289_v14 = vpop.f32.mrf.mxu0  ;;  %v1303_v3 = vpop.f32.mrf.mxu1 }
 0x1c8   : > { %v3009_v15 = vadd.f32 %v1289_v14, %v1241_v52  ;;  %v1304_v25 = vadd.f32 %v1303_v3, %v2819_v16 }
 0x1c9   : > { %v1242_v19 = vpop.f32.mrf.mxu3 }
 0x1ca   : > { %v1243_v20 = vadd.f32 %v1242_v19, %v1194_v8  ;;  %1484 = vmatmul.bf16.gmra.mxu0 %v2012_v44  ;;  %v1353_v30 = vadd.f32 %v1352_v12, %v1304_v25  ;;  %v2105_v44 = vunpack.c.h.bf16 %v2130_v53 }
 0x1cd   : > { %v1354_v22 = vpop.f32.mrf.mxu2 }
 0x1cf   : > { %v1291_v6 = vpop.f32.mrf.mxu0  ;;  %v1305_v23 = vpop.f32.mrf.mxu1 }
 0x1d0   : > { %v3012_v26 = vadd.f32 %v1291_v6, %v1243_v20  ;;  %v1306_v38 = vadd.f32 %v1305_v23, %v2827_v34  ;;  %v2131_v6 = vld [vmem:[%s3018_s28 + $0x10] sm:$0xff]  }
 0x1d1   : > { %v1401_v28 = vpop.f32.mrf.mxu3 }
 0x1d2   : > { %v1402_v33 = vadd.f32 %v1401_v28, %v1353_v30  ;;  %v1355_v17 = vadd.f32 %v1354_v22, %v1306_v38 }
 0x1d5   : > { %v1357_v32 = vpop.f32.mrf.mxu2 }
 0x1d7   : > { %v1308_v36 = vpop.f32.mrf.mxu1  ;;  %v1450_v37 = vpop.f32.mrf.mxu0 }
 0x1d8   : > { %v1451_v16 = vadd.f32 %v1450_v37, %v1402_v33  ;;  %v1309_v34 = vadd.f32 %v1308_v36, %v2848_v55 }
 0x1d9   : > { %v1403_v39 = vpop.f32.mrf.mxu3 }
 0x1da   : > { %v1522_v40 = vadd.f32 %v2100_v35, %v1451_v16  ;;  %v1404_v47 = vadd.f32 %v1403_v39, %v1355_v17  ;;  %v1358_v57 = vadd.f32 %v1357_v32, %v1309_v34  ;;  %v2108_v32 = vunpack.c.l.bf16 %v2131_v6  ;;  %v2132_v34 = vld [vmem:[%s3018_s28 + $0x18] sm:$0xff]  }
 0x1dc   : > { %v1538_v41 = vmax.f32 %v1522_v40, 0.0 }
 0x1dd   : > { %v1359_v43 = vpop.f32.mrf.mxu2 }
 0x1de   : > { %v1554_v45 = vpack.c.bf16 %v1538_v41, %v1538_v41 }
 0x1df   : > { %v1310_v48 = vpop.f32.mrf.mxu1  ;;  %v1452_v49 = vpop.f32.mrf.mxu0 }
 0x1e0   : > { %1571 = vst.msk [vmem:[%s3026_s5] sm:$0xf] %vm1570_vm0, %v1554_v45  ;;  %v1453_v50 = vadd.f32 %v1452_v49, %v1404_v47  ;;  %v1311_v24 = vadd.f32 %v1310_v48, %v2857_v7 }
 0x1e1   : > { %v1406_v51 = vpop.f32.mrf.mxu3 }
 0x1e2   : > { %v1523_v27 = vadd.f32 %v2101_v11, %v1453_v50  ;;  %v1407_v60 = vadd.f32 %v1406_v51, %v1358_v57  ;;  %v1360_v8 = vadd.f32 %v1359_v43, %v1311_v24  ;;  %v2109_v43 = vunpack.c.h.bf16 %v2131_v6 }
 0x1e4   : > { %v1539_v58 = vmax.f32 %v1523_v27, 0.0 }
 0x1e5   : > { %v1362_v59 = vpop.f32.mrf.mxu2 }
 0x1e6   : > { %v1555_v29 = vpack.c.bf16 %v1539_v58, %v1539_v58  ;;  %v2112_v58 = vunpack.c.l.bf16 %v2132_v34 }
 0x1e7   : > { %v1313_v62 = vpop.f32.mrf.mxu1  ;;  %v1455_v63 = vpop.f32.mrf.mxu0 }
 0x1e8   : > { %1572 = vst.msk [vmem:[%s3026_s5 + $0x4] sm:$0xf] %vm1570_vm0, %v1555_v29  ;;  %v1456_v55 = vadd.f32 %v1455_v63, %v1407_v60  ;;  %v1314_v19 = vadd.f32 %v1313_v62, %v2878_v31 }
 0x1e9   : > { %v1408_v0 = vpop.f32.mrf.mxu3 }
 0x1ea   : > { %v1524_v5 = vadd.f32 %v2104_v61, %v1456_v55  ;;  %v1409_v12 = vadd.f32 %v1408_v0, %v1360_v8  ;;  %v1363_v23 = vadd.f32 %v1362_v59, %v1314_v19  ;;  %v2113_v8 = vunpack.c.h.bf16 %v2132_v34 }
 0x1ec   : > { %v1540_v52 = vmax.f32 %v1524_v5, 0.0 }
 0x1ed   : > { %v1364_v9 = vpop.f32.mrf.mxu2 }
 0x1ee   : > { %v1556_v10 = vpack.c.bf16 %v1540_v52, %v1540_v52 }
 0x1ef   : > { %v1315_v14 = vpop.f32.mrf.mxu1  ;;  %v1457_v3 = vpop.f32.mrf.mxu0 }
 0x1f0   : > { %1573 = vst.msk [vmem:[%s3026_s5 + $0x8] sm:$0xf] %vm1570_vm0, %v1556_v10  ;;  %v1458_v7 = vadd.f32 %v1457_v3, %v1409_v12  ;;  %v1316_v36 = vadd.f32 %v1315_v14, %v2887_v46  ;;  %v2133_v14 = vld [vmem:[%s3018_s28 + $0x20] sm:$0xff]  }
 0x1f1   : > { %v1411_v20 = vpop.f32.mrf.mxu3 }
 0x1f2   : > { %v1525_v22 = vadd.f32 %v2105_v44, %v1458_v7  ;;  %v1412_v30 = vadd.f32 %v1411_v20, %v1363_v23  ;;  %v1365_v16 = vadd.f32 %v1364_v9, %v1316_v36 }
 0x1f4   : > { %v1541_v25 = vmax.f32 %v1525_v22, 0.0  ;;  %v2116_v22 = vunpack.c.l.bf16 %v2133_v14 }
 0x1f5   : > { %v1367_v28 = vpop.f32.mrf.mxu2 }
 0x1f6   : > { %v1557_v2 = vpack.c.bf16 %v1541_v25, %v1541_v25 }
 0x1f7   : > { %v1318_v33 = vpop.f32.mrf.mxu1  ;;  %v1460_v35 = vpop.f32.mrf.mxu0 }
 0x1f8   : > { %1574 = vst.msk [vmem:[%s3026_s5 + $0xc] sm:$0xf] %vm1570_vm0, %v1557_v2  ;;  %v1461_v31 = vadd.f32 %v1460_v35, %v1412_v30  ;;  %v1319_v11 = vadd.f32 %v1318_v33, %v2908_v1 }
 0x1f9   : > { %v1413_v37 = vpop.f32.mrf.mxu3 }
 0x1fa   : > { %v1526_v38 = vadd.f32 %v2108_v32, %v1461_v31  ;;  %v1414_v41 = vadd.f32 %v1413_v37, %v1365_v16  ;;  %v1368_v50 = vadd.f32 %v1367_v28, %v1319_v11  ;;  %v2117_v31 = vunpack.c.h.bf16 %v2133_v14 }
 0x1fc   : > { %v1542_v39 = vmax.f32 %v1526_v38, 0.0 }
 0x1fd   : > { %v1369_v40 = vpop.f32.mrf.mxu2 }
 0x1fe   : > { %v1558_v17 = vpack.c.bf16 %v1542_v39, %v1542_v39 }
 0x1ff   : > { %v1320_v45 = vpop.f32.mrf.mxu1  ;;  %v1462_v47 = vpop.f32.mrf.mxu0 }
 0x200   : > { %1575 = vst.msk [vmem:[%s3026_s5 + $0x10] sm:$0xf] %vm1570_vm0, %v1558_v17  ;;  %v1463_v46 = vadd.f32 %v1462_v47, %v1414_v41  ;;  %v1321_v60 = vadd.f32 %v1320_v45, %v2917_v21  ;;  %v2134_v41 = vld [vmem:[%s3018_s28 + $0x28] sm:$0xff]  }
 0x201   : > { %v1416_v48 = vpop.f32.mrf.mxu3 }
 0x202   : > { %v1527_v49 = vadd.f32 %v2109_v43, %v1463_v46  ;;  %v1417_v57 = vadd.f32 %v1416_v48, %v1368_v50  ;;  %v1370_v63 = vadd.f32 %v1369_v40, %v1321_v60  ;;  %v2120_v46 = vunpack.c.l.bf16 %v2134_v41 }
 0x204   : > { %v1543_v51 = vmax.f32 %v1527_v49, 0.0 }
 0x205   : > { %v1372_v27 = vpop.f32.mrf.mxu2 }
 0x206   : > { %v1559_v53 = vpack.c.bf16 %v1543_v51, %v1543_v51 }
 0x207   : > { %v1323_v59 = vpop.f32.mrf.mxu1  ;;  %v1465_v29 = vpop.f32.mrf.mxu0 }
 0x208   : > { %1576 = vst.msk [vmem:[%s3026_s5 + $0x14] sm:$0xf] %vm1570_vm0, %v1559_v53  ;;  %v1466_v1 = vadd.f32 %v1465_v29, %v1417_v57  ;;  %v1324_v10 = vadd.f32 %v1323_v59, %v2938_v42  ;;  %v2121_v29 = vunpack.c.h.bf16 %v2134_v41 }
 0x209   : > { %v1418_v61 = vpop.f32.mrf.mxu3 }
 0x20a   : > { %v1528_v62 = vadd.f32 %v2112_v58, %v1466_v1  ;;  %v1419_v5 = vadd.f32 %v1418_v61, %v1370_v63  ;;  %v1373_v3 = vadd.f32 %v1372_v27, %v1324_v10 }
 0x20c   : > { %v1544_v24 = vmax.f32 %v1528_v62, 0.0 }
 0x20d   : > { %v1374_v55 = vpop.f32.mrf.mxu2 }
 0x20e   : > { %v1560_v0 = vpack.c.bf16 %v1544_v24, %v1544_v24  ;;  %v2135_v24 = vld [vmem:[%s3018_s28 + $0x30] sm:$0xff]  }
 0x20f   : > { %v1325_v52 = vpop.f32.mrf.mxu1  ;;  %v1467_v9 = vpop.f32.mrf.mxu0 }
 0x210   : > { %1577 = vst.msk [vmem:[%s3026_s5 + $0x18] sm:$0xf] %vm1570_vm0, %v1560_v0  ;;  %v1468_v21 = vadd.f32 %v1467_v9, %v1419_v5  ;;  %v1326_v28 = vadd.f32 %v1325_v52, %v2947_v54  ;;  %v2124_v9 = vunpack.c.l.bf16 %v2135_v24 }
 0x211   : > { %v1421_v12 = vpop.f32.mrf.mxu3 }
 0x212   : > { %v1529_v44 = vadd.f32 %v2113_v8, %v1468_v21  ;;  %v1422_v20 = vadd.f32 %v1421_v12, %v1373_v3  ;;  %v1375_v32 = vadd.f32 %v1374_v55, %v1326_v28 }
 0x214   : > { %v1545_v19 = vmax.f32 %v1529_v44, 0.0 }
 0x215   : > { %v1377_v6 = vpop.f32.mrf.mxu2 }
 0x216   : > { %v1561_v7 = vpack.c.bf16 %v1545_v19, %v1545_v19 }
 0x217   : > { %v1328_v23 = vpop.f32.mrf.mxu1  ;;  %v1470_v25 = vpop.f32.mrf.mxu0 }
 0x218   : > { %1578 = vst.msk [vmem:[%s3026_s5 + $0x1c] sm:$0xf] %vm1570_vm0, %v1561_v7  ;;  %v1471_v42 = vadd.f32 %v1470_v25, %v1422_v20  ;;  %v1329_v16 = vadd.f32 %v1328_v23, %v2968_v18 }
 0x219   : > { %v1423_v2 = vpop.f32.mrf.mxu3 }
 0x21a   : > { %v1530_v30 = vadd.f32 %v2116_v22, %v1471_v42  ;;  %v1424_v36 = vadd.f32 %v1423_v2, %v1375_v32  ;;  %v1378_v43 = vadd.f32 %v1377_v6, %v1329_v16  ;;  %v2125_v22 = vunpack.c.h.bf16 %v2135_v24  ;;  %v2136_v2 = vld [vmem:[%s3018_s28 + $0x38] sm:$0xff]  }
 0x21c   : > { %v1546_v33 = vmax.f32 %v1530_v30, 0.0 }
 0x21d   : > { %v1379_v54 = vpop.f32.mrf.mxu2 }
 0x21e   : > { %v1562_v35 = vpack.c.bf16 %v1546_v33, %v1546_v33 }
 0x21f   : > { %v1330_v37 = vpop.f32.mrf.mxu1  ;;  %v1472_v38 = vpop.f32.mrf.mxu0 }
 0x220   : > { %1579 = vst.msk [vmem:[%s3026_s5 + $0x20] sm:$0xf] %vm1570_vm0, %v1562_v35  ;;  %v1473_v39 = vadd.f32 %v1472_v38, %v1424_v36  ;;  %v1331_v34 = vadd.f32 %v1330_v37, %v2977_v13 }
 0x221   : > { %v1426_v40 = vpop.f32.mrf.mxu3 }
 0x222   : > { %v1531_v17 = vadd.f32 %v2117_v31, %v1473_v39  ;;  %v1427_v11 = vadd.f32 %v1426_v40, %v1378_v43  ;;  %v1380_v53 = vadd.f32 %v1379_v54, %v1331_v34  ;;  %v2128_v31 = vunpack.c.l.bf16 %v2136_v2 }
 0x224   : > { %v1547_v45 = vmax.f32 %v1531_v17, 0.0 }
 0x225   : > { %v1382_v27 = vpop.f32.mrf.mxu2 }
 0x226   : > { %v1563_v47 = vpack.c.bf16 %v1547_v45, %v1547_v45  ;;  %v2129_v45 = vunpack.c.h.bf16 %v2136_v2 }
 0x227   : > { %v1333_v48 = vpop.f32.mrf.mxu1  ;;  %v1475_v49 = vpop.f32.mrf.mxu0 }
 0x228   : > { %1580 = vst.msk [vmem:[%s3026_s5 + $0x24] sm:$0xf] %vm1570_vm0, %v1563_v47  ;;  %v1476_v18 = vadd.f32 %v1475_v49, %v1427_v11  ;;  %v1334_v1 = vadd.f32 %v1333_v48, %v2998_v56 }
 0x229   : > { %v1428_v50 = vpop.f32.mrf.mxu3 }
 0x22a   : > { %v1532_v51 = vadd.f32 %v2120_v46, %v1476_v18  ;;  %v1429_v59 = vadd.f32 %v1428_v50, %v1380_v53  ;;  %v1383_v55 = vadd.f32 %v1382_v27, %v1334_v1 }
 0x22c   : > { %v1548_v57 = vmax.f32 %v1532_v51, 0.0 }
 0x22d   : > { %v1384_v5 = vpop.f32.mrf.mxu2 }
 0x22e   : > { %v1564_v58 = vpack.c.bf16 %v1548_v57, %v1548_v57 }
 0x22f   : > { %v1477_v60 = vpop.f32.mrf.mxu0  ;;  %v1335_v13 = vpop.f32.mrf.mxu1 }
 0x230   : > { %1581 = vst.msk [vmem:[%s3026_s5 + $0x28] sm:$0xf] %vm1570_vm0, %v1564_v58  ;;  %v1478_v61 = vadd.f32 %v1477_v60, %v1429_v59  ;;  %v1336_v21 = vadd.f32 %v1335_v13, %v3001_v4 }
 0x231   : > { %v1431_v62 = vpop.f32.mrf.mxu3 }
 0x232   : > { %v1533_v63 = vadd.f32 %v2121_v29, %v1478_v61  ;;  %v1432_v52 = vadd.f32 %v1431_v62, %v1383_v55  ;;  %v1385_v3 = vadd.f32 %v1384_v5, %v1336_v21 }
 0x234   : > { %v1549_v0 = vmax.f32 %v1533_v63, 0.0 }
 0x235   : > { %v1387_v6 = vpop.f32.mrf.mxu2 }
 0x236   : > { %v1565_v8 = vpack.c.bf16 %v1549_v0, %v1549_v0 }
 0x237   : > { %v1480_v10 = vpop.f32.mrf.mxu0  ;;  %v1338_v14 = vpop.f32.mrf.mxu1 }
 0x238   : > { %1582 = vst.msk [vmem:[%s3026_s5 + $0x2c] sm:$0xf] %vm1570_vm0, %v1565_v8  ;;  %v1481_v56 = vadd.f32 %v1480_v10, %v1432_v52  ;;  %v1339_v25 = vadd.f32 %v1338_v14, %v3009_v15 }
 0x239   : > { %v1433_v12 = vpop.f32.mrf.mxu3 }
 0x23a   : > { %v1534_v44 = vadd.f32 %v2124_v9, %v1481_v56  ;;  %v1434_v20 = vadd.f32 %v1433_v12, %v1385_v3  ;;  %v1388_v30 = vadd.f32 %v1387_v6, %v1339_v25 }
 0x23c   : > { %v1550_v19 = vmax.f32 %v1534_v44, 0.0 }
 0x23d   : > { %v1389_v16 = vpop.f32.mrf.mxu2 }
 0x23e   : > { %v1566_v7 = vpack.c.bf16 %v1550_v19, %v1550_v19 }
 0x23f   : > { %v1482_v23 = vpop.f32.mrf.mxu0  ;;  %v1340_v33 = vpop.f32.mrf.mxu1 }
 0x240   : > { %1583 = vst.msk [vmem:[%s3026_s5 + $0x30] sm:$0xf] %vm1570_vm0, %v1566_v7  ;;  %v1483_v4 = vadd.f32 %v1482_v23, %v1434_v20  ;;  %v1341_v38 = vadd.f32 %v1340_v33, %v3012_v26 }
 0x241   : > { %v1436_v28 = vpop.f32.mrf.mxu3 }
 0x242   : > { %v1535_v42 = vadd.f32 %v2125_v22, %v1483_v4  ;;  %v1437_v36 = vadd.f32 %v1436_v28, %v1388_v30  ;;  %v1390_v40 = vadd.f32 %v1389_v16, %v1341_v38 }
 0x244   : > { %v1551_v32 = vmax.f32 %v1535_v42, 0.0 }
 0x246   : > { %v1567_v35 = vpack.c.bf16 %v1551_v32, %v1551_v32 }
 0x247   : > { %v1485_v37 = vpop.f32.mrf.mxu0 }
 0x248   : > { %1584 = vst.msk [vmem:[%s3026_s5 + $0x34] sm:$0xf] %vm1570_vm0, %v1567_v35  ;;  %v1486_v15 = vadd.f32 %v1485_v37, %v1437_v36 }
 0x249   : > { %v1438_v54 = vpop.f32.mrf.mxu3 }
 0x24a   : > { %v1536_v39 = vadd.f32 %v2128_v31, %v1486_v15  ;;  %v1439_v43 = vadd.f32 %v1438_v54, %v1390_v40 }
 0x24c   : > { %v1552_v17 = vmax.f32 %v1536_v39, 0.0 }
 0x24e   : > { %v1568_v41 = vpack.c.bf16 %v1552_v17, %v1552_v17 }
 0x24f   : > { %v1487_v47 = vpop.f32.mrf.mxu0 }
 0x250   : > { %1585 = vst.msk [vmem:[%s3026_s5 + $0x38] sm:$0xf] %vm1570_vm0, %v1568_v41  ;;  %v1488_v11 = vadd.f32 %v1487_v47, %v1439_v43 }
 0x252   : > { %v1537_v46 = vadd.f32 %v2129_v45, %v1488_v11 }
 0x254   : > { %v1553_v48 = vmax.f32 %v1537_v46, 0.0 }
 0x256   : > { %v1569_v49 = vpack.c.bf16 %v1553_v48, %v1553_v48 }
 0x258   : > { %1586 = vst.msk [vmem:[%s3026_s5 + $0x3c] sm:$0xf] %vm1570_vm0, %v1569_v49 }
 0x259 PF: > { %s14_s17 = sadd.s32 1, %s2219_s17   ;;  %s3095_s15 = smov %s2215_s16 }
 0x25a   : > { %p11_p5 = scmp.ge.s32.totalorder %s14_s17, 4   ;;  %s3096_s16 = smov %s3098_s18 }
 0x25c   :  { %13 = sbr.rel (!%p11_p5) target bundleno = 2 (0x2), region = 69 }

</bundles_post_ra>
